<compile_context>
chip_gen: v6e
topology: v6e:2x2x1
jax: 0.10.0
libtpu: 0.0.40
codegen_flags: <defaults>
</compile_context>

<pallas_src>
from functools import partial

import jax
import jax.numpy as jnp
from jax import lax
from jax.experimental import pallas as pl
from jax.experimental.pallas import tpu as pltpu


def _round_up(x, m):
    return ((x + m - 1) // m) * m


# --------------------------------------------------------------------------------------
# Kernel 1: serial LSTM recurrence over time chunks (only h @ W_hh^T per step).
# --------------------------------------------------------------------------------------
def _lstm_recurrence_kernel(xp_ref, h0_ref, c0_ref, lens_ref, w_hh_ref,
                            ph_ref, hn_ref, cn_ref,
                            h_sc, c_sc, *, hidden_pad, chunk, pad_value):
    Hp = hidden_pad
    c_idx = pl.program_id(0)

    @pl.when(c_idx == 0)
    def _():
        h_sc[...] = h0_ref[...]
        c_sc[...] = c0_ref[...]

    lens = lens_ref[...]                              # [Bp, 1] int32

    # Static (unrolled) loop over the chunk's timesteps.
    for i in range(chunk):
        t = c_idx * chunk + i
        h_prev = h_sc[...]
        c_prev = c_sc[...]
        # gates = (x_t @ W_ih^T + b_ih + b_hh)  [precomputed]  +  h_{t-1} @ W_hh^T
        gates = xp_ref[i] + jnp.dot(h_prev.astype(w_hh_ref.dtype), w_hh_ref[...],
                                    preferred_element_type=jnp.float32)   # [Bp, 4Hp]
        i_g = jax.nn.sigmoid(gates[:, 0 * Hp:1 * Hp])   # gate slices are lane-aligned
        f_g = jax.nn.sigmoid(gates[:, 1 * Hp:2 * Hp])
        g_g = jnp.tanh(gates[:, 2 * Hp:3 * Hp])
        o_g = jax.nn.sigmoid(gates[:, 3 * Hp:4 * Hp])
        c_new = f_g * c_prev + i_g * g_g
        h_new = o_g * jnp.tanh(c_new)

        valid = t < lens                               # [Bp, 1] packed-sequence mask
        h_sc[...] = jnp.where(valid, h_new, h_prev)
        c_sc[...] = jnp.where(valid, c_new, c_prev)

        # pad_packed_sequence: padded steps filled with pad_index before the Linear.
        ph = jnp.where(valid, h_new, jnp.float32(pad_value))
        ph_ref[:, i:i + 1, :] = ph[:, None, :]         # batch-first [Bp, Tp, Hp] slab

    # Carries stop advancing once t >= len, so at the end they hold the state at the
    # last *valid* timestep of every row -> write h_n/c_n once, at the last chunk.
    @pl.when(c_idx == pl.num_programs(0) - 1)
    def _():
        hn_ref[...] = h_sc[...]
        cn_ref[...] = c_sc[...]


# --------------------------------------------------------------------------------------
# Kernel 2: parallel output projection + log-softmax over (batch-tile, time-tile) blocks.
# --------------------------------------------------------------------------------------
def _proj_logsoftmax_kernel(ph_ref, w_out_ref, b_out_ref, out_ref):
    Bc, Tc, Hp = ph_ref.shape
    Vp = out_ref.shape[-1]
    h2 = ph_ref[...].reshape(Bc * Tc, Hp)
    logits = (jnp.dot(h2.astype(w_out_ref.dtype), w_out_ref[...],
                      preferred_element_type=jnp.float32)
              + b_out_ref[...])                        # [Bc*Tc, Vp]
    m = jnp.max(logits, axis=-1, keepdims=True)
    lse = m + jnp.log(jnp.sum(jnp.exp(logits - m), axis=-1, keepdims=True))
    out_ref[...] = (logits - lse).reshape(Bc, Tc, Vp)  # LogSoftmax over dim=2


# --------------------------------------------------------------------------------------
# Wrapper
# --------------------------------------------------------------------------------------
def decoder_rnn_forward(params, hidden, input_data, seq_lengths, pad_index,
                        *, matmul_dtype=jnp.float32):
    h0, c0 = hidden                                    # each [1, B, H]
    B, T = input_data.shape
    H = params["w_hh"].shape[1]
    V = params["w_out"].shape[0]
    f32 = jnp.float32

    # Alignment padding: lanes (128) for H/V, sublanes (8) for batch; time chunked.
    Hp = _round_up(H, 128)
    Vp = _round_up(V, 128)
    Bp = _round_up(B, 8)
    Tc = 16 if T > 8 else 8                            # time chunk (amortizes grid cost)
    Tp = _round_up(T, Tc)
    Bc = 8                                             # batch tile for projection grid

    # ---- gate-blocked padding: each of i/f/g/o padded H -> Hp (zeros are exact) ----
    def pad_gate_cols(w):                              # [K, 4H] -> [K, 4Hp]
        K = w.shape[0]
        return jnp.pad(w.reshape(K, 4, H),
                       ((0, 0), (0, 0), (0, Hp - H))).reshape(K, 4 * Hp)

    w_ih_t = pad_gate_cols(params["w_ih"].T.astype(f32))                      # [H, 4Hp]
    w_hh_t = jnp.pad(pad_gate_cols(params["w_hh"].T.astype(f32)),
                     ((0, Hp - H), (0, 0)))                                   # [Hp, 4Hp]
    bias = pad_gate_cols((params["b_ih"] + params["b_hh"]).astype(f32)[None, :])  # [1,4Hp]
    w_out_t = jnp.pad(params["w_out"].T.astype(f32), ((0, Hp - H), (0, Vp - V)))  # [Hp,Vp]
    b_out = jnp.pad(params["b_out"].astype(f32), (0, Vp - V))
    # padded vocab columns must not pollute the softmax denominator
    b_out = jnp.where(jnp.arange(Vp) < V, b_out, f32(-1e30))[None, :]         # [1, Vp]

    # ---- embedding (+ eval-mode dropout = identity) and hoisted input GEMM ----
    ids_tm = input_data.T.astype(jnp.int32)                                   # [T, B]
    emb = jnp.take(params["embedding"].astype(f32), ids_tm, axis=0)           # [T, B, H]
    x_proj = jnp.dot(emb, w_ih_t, precision=lax.Precision.HIGHEST) + bias     # [T, B, 4Hp]
    x_proj = jnp.pad(x_proj, ((0, Tp - T), (0, Bp - B), (0, 0)))              # [Tp, Bp, 4Hp]

    h0p = jnp.pad(h0[0].astype(f32), ((0, Bp - B), (0, Hp - H)))              # [Bp, Hp]
    c0p = jnp.pad(c0[0].astype(f32), ((0, Bp - B), (0, Hp - H)))
    lens_p = jnp.pad(seq_lengths.astype(jnp.int32), (0, Bp - B)).reshape(Bp, 1)

    # ---- serial recurrence kernel: grid over time chunks ----
    padded_h, h_n, c_n = pl.pallas_call(
        partial(_lstm_recurrence_kernel, hidden_pad=Hp, chunk=Tc,
                pad_value=float(pad_index)),
        out_shape=(jax.ShapeDtypeStruct((Bp, Tp, Hp), f32),
                   jax.ShapeDtypeStruct((Bp, Hp), f32),
                   jax.ShapeDtypeStruct((Bp, Hp), f32)),
        grid_spec=pltpu.PrefetchScalarGridSpec(
            num_scalar_prefetch=0,
            grid=(Tp // Tc,),
            in_specs=[
                pl.BlockSpec((Tc, Bp, 4 * Hp), lambda c: (c, 0, 0)),          # x_proj chunk
                pl.BlockSpec((Bp, Hp), lambda c: (0, 0)),                     # h0
                pl.BlockSpec((Bp, Hp), lambda c: (0, 0)),                     # c0
                pl.BlockSpec((Bp, 1), lambda c: (0, 0)),                      # seq_lengths
                pl.BlockSpec((Hp, 4 * Hp), lambda c: (0, 0),
                             pipeline_mode=pl.Buffered(1)),                   # W_hh^T (const)
            ],
            out_specs=[
                pl.BlockSpec((Bp, Tc, Hp), lambda c: (0, c, 0)),              # padded h (B-first)
                pl.BlockSpec((Bp, Hp), lambda c: (0, 0)),                     # h_n
                pl.BlockSpec((Bp, Hp), lambda c: (0, 0)),                     # c_n
            ],
            scratch_shapes=[pltpu.VMEM((Bp, Hp), f32),                        # h carry
                            pltpu.VMEM((Bp, Hp), f32)],                       # c carry
        ),
        compiler_params=pltpu.CompilerParams(
            dimension_semantics=("arbitrary",),                               # time is serial
            vmem_limit_bytes=32 * 1024 * 1024),
    )(x_proj, h0p, c0p, lens_p, w_hh_t.astype(matmul_dtype))

    # ---- parallel output projection + log-softmax kernel ----
    logprobs = pl.pallas_call(
        _proj_logsoftmax_kernel,
        out_shape=jax.ShapeDtypeStruct((Bp, Tp, Vp), f32),
        grid_spec=pltpu.PrefetchScalarGridSpec(
            num_scalar_prefetch=0,
            grid=(Bp // Bc, Tp // Tc),
            in_specs=[
                pl.BlockSpec((Bc, Tc, Hp), lambda bi, ti: (bi, ti, 0)),
                pl.BlockSpec((Hp, Vp), lambda bi, ti: (0, 0),
                             pipeline_mode=pl.Buffered(1)),                   # W_out^T (const)
                pl.BlockSpec((1, Vp), lambda bi, ti: (0, 0),
                             pipeline_mode=pl.Buffered(1)),                   # b_out (const)
            ],
            out_specs=pl.BlockSpec((Bc, Tc, Vp), lambda bi, ti: (bi, ti, 0)),
        ),
        compiler_params=pltpu.CompilerParams(
            dimension_semantics=("parallel", "parallel"),
            vmem_limit_bytes=32 * 1024 * 1024),
    )(padded_h, w_out_t.astype(matmul_dtype), b_out)

    output = logprobs[:B, :T, :V]                       # already batch-first [B, T, V]
    return output, (h_n[:B, :H][None], c_n[:B, :H][None])


# --------------------------------------------------------------------------------------
# Pure-JAX reference with identical packed-LSTM semantics.
# --------------------------------------------------------------------------------------
def reference_forward(params, hidden, input_data, seq_lengths, pad_index):
    h0, c0 = hidden[0][0], hidden[1][0]
    x = jnp.take(params["embedding"], input_data, axis=0).astype(jnp.float32)
    B, T, H = x.shape
    hp = lax.Precision.HIGHEST
    w_ih_t, w_hh_t = params["w_ih"].T, params["w_hh"].T
    bias = params["b_ih"] + params["b_hh"]
    lens = seq_lengths.astype(jnp.int32)

    def step(carry, inp):
        h, c, hn, cn = carry
        t, xt = inp
        gates = (jnp.dot(xt, w_ih_t, precision=hp)
                 + jnp.dot(h, w_hh_t, precision=hp) + bias)
        i = jax.nn.sigmoid(gates[:, :H]); f = jax.nn.sigmoid(gates[:, H:2 * H])
        g = jnp.tanh(gates[:, 2 * H:3 * H]); o = jax.nn.sigmoid(gates[:, 3 * H:])
        c_new = f * c + i * g
        h_new = o * jnp.tanh(c_new)
        valid = (t < lens)[:, None]
        last = (lens == t + 1)[:, None]
        out_h = jnp.where(valid, h_new, float(pad_index))
        return (jnp.where(valid, h_new, h), jnp.where(valid, c_new, c),
                jnp.where(last, h_new, hn), jnp.where(last, c_new, cn)), out_h

    (_, _, hn, cn), hs = lax.scan(
        step, (h0, c0, h0, c0), (jnp.arange(T), jnp.transpose(x, (1, 0, 2))))
    hs = jnp.transpose(hs, (1, 0, 2))
    logits = jnp.dot(hs, params["w_out"].T, precision=hp) + params["b_out"]
    return jax.nn.log_softmax(logits, axis=2), (hn[None], cn[None])


if __name__ == "__main__":
    B, T, H, V = 12, 20, 32, 64          # batch, seq, hidden_size, output_size (vocab)
    pad_index = 0

    key = jax.random.PRNGKey(0)
    ks = jax.random.split(key, 10)
    params = {
        "embedding": 0.1 * jax.random.normal(ks[0], (V, H), jnp.float32),
        "w_ih":      0.1 * jax.random.normal(ks[1], (4 * H, H), jnp.float32),
        "w_hh":      0.1 * jax.random.normal(ks[2], (4 * H, H), jnp.float32),
        "b_ih":      0.1 * jax.random.normal(ks[3], (4 * H,), jnp.float32),
        "b_hh":      0.1 * jax.random.normal(ks[4], (4 * H,), jnp.float32),
        "w_out":     0.1 * jax.random.normal(ks[5], (V, H), jnp.float32),
        "b_out":     0.1 * jax.random.normal(ks[6], (V,), jnp.float32),
    }
    h0 = 0.1 * jax.random.normal(ks[7], (1, B, H), jnp.float32)
    c0 = 0.1 * jax.random.normal(ks[8], (1, B, H), jnp.float32)
    input_data = jax.random.randint(ks[9], (B, T), 0, V, dtype=jnp.int32)
    seq_lengths = jnp.array([20, 18, 17, 15, 12, 10, 8, 6, 5, 3, 2, 1], jnp.int32)

    ref_out, (ref_hn, ref_cn) = reference_forward(params, (h0, c0), input_data,
                                                  seq_lengths, pad_index)

    # f32 weights: tight tolerance against the f32 reference.
    out, (h_n, c_n) = decoder_rnn_forward(params, (h0, c0), input_data,
                                          seq_lengths, pad_index)
    out, h_n, c_n = jax.block_until_ready((out, h_n, c_n))
    assert out.shape == (B, T, V) and h_n.shape == (1, B, H) and c_n.shape == (1, B, H)
    assert jnp.allclose(out, ref_out, atol=2e-3, rtol=2e-3)
    assert jnp.allclose(h_n, ref_hn, atol=2e-3, rtol=2e-3)
    assert jnp.allclose(c_n, ref_cn, atol=2e-3, rtol=2e-3)

    # bf16 matmul weights (v6e/v7x MXU fast path; carries/nonlinearities stay f32).
    out_bf, (hn_bf, cn_bf) = decoder_rnn_forward(params, (h0, c0), input_data,
                                                 seq_lengths, pad_index,
                                                 matmul_dtype=jnp.bfloat16)
    out_bf, hn_bf, cn_bf = jax.block_until_ready((out_bf, hn_bf, cn_bf))
    assert jnp.allclose(out_bf, ref_out, atol=2e-2, rtol=2e-2)
    assert jnp.allclose(hn_bf, ref_hn, atol=2e-2, rtol=2e-2)
    assert jnp.allclose(cn_bf, ref_cn, atol=2e-2, rtol=2e-2)

    print("KERNEL_OK")
</pallas_src>

<mosaic_0001>
module attributes {stable_mosaic.version = 11 : i64} {
  func.func @_lstm_recurrence_kernel(%arg0: i32, %arg1: memref<16x16x512xf32, #tpu.memory_space<vmem>>, %arg2: memref<16x128xf32, #tpu.memory_space<vmem>>, %arg3: memref<16x128xf32, #tpu.memory_space<vmem>>, %arg4: memref<16x1xi32, #tpu.memory_space<vmem>>, %arg5: memref<128x512xf32, #tpu.memory_space<vmem>>, %arg6: memref<16x16x128xf32, #tpu.memory_space<vmem>>, %arg7: memref<16x128xf32, #tpu.memory_space<vmem>>, %arg8: memref<16x128xf32, #tpu.memory_space<vmem>>, %arg9: memref<16x128xf32, #tpu.memory_space<vmem>>, %arg10: memref<16x128xf32, #tpu.memory_space<vmem>>) attributes {dimension_semantics = [#tpu.dimension_semantics<arbitrary>], iteration_bounds = array<i64: 2>, scalar_prefetch = 0 : i64, scratch_operands = 2 : i64, tpu.core_type = #tpu.core_type<tc>, window_params = [{transform_indices = @transform_0, window_bounds = array<i64: 16, 16, 512>}, {pipeline_mode = #tpu.pipeline_mode<synchronous>, transform_indices = @transform_1, window_bounds = array<i64: 16, 128>}, {pipeline_mode = #tpu.pipeline_mode<synchronous>, transform_indices = @transform_2, window_bounds = array<i64: 16, 128>}, {pipeline_mode = #tpu.pipeline_mode<synchronous>, transform_indices = @transform_3, window_bounds = array<i64: 16, 1>}, {pipeline_mode = #tpu.pipeline_mode<synchronous>, transform_indices = @transform_4, window_bounds = array<i64: 128, 512>}, {transform_indices = @transform_5, window_bounds = array<i64: 16, 16, 128>}, {pipeline_mode = #tpu.pipeline_mode<synchronous>, transform_indices = @transform_6, window_bounds = array<i64: 16, 128>}, {pipeline_mode = #tpu.pipeline_mode<synchronous>, transform_indices = @transform_7, window_bounds = array<i64: 16, 128>}]} {
    %c0_i32 = arith.constant 0 : i32
    %0 = arith.cmpi eq, %arg0, %c0_i32 : i32
    %1 = arith.extui %0 : i1 to i32
    %c0_i32_0 = arith.constant 0 : i32
    %2 = arith.cmpi ne, %1, %c0_i32_0 : i32
    scf.if %2 {
      %c0_340 = arith.constant 0 : index
      %c0_341 = arith.constant 0 : index
      %807 = vector.load %arg2[%c0_340, %c0_341] : memref<16x128xf32, #tpu.memory_space<vmem>>, vector<16x128xf32>
      %c0_342 = arith.constant 0 : index
      %c0_343 = arith.constant 0 : index
      %808 = vector.load %arg9[%c0_342, %c0_343] : memref<16x128xf32, #tpu.memory_space<vmem>>, vector<16x128xf32>
      tpu.vector_store %arg9[%c0_342, %c0_343], %807 {strides = array<i32>} : memref<16x128xf32, #tpu.memory_space<vmem>>, vector<16x128xf32>,
      %c0_344 = arith.constant 0 : index
      %c0_345 = arith.constant 0 : index
      %809 = vector.load %arg3[%c0_344, %c0_345] : memref<16x128xf32, #tpu.memory_space<vmem>>, vector<16x128xf32>
      %c0_346 = arith.constant 0 : index
      %c0_347 = arith.constant 0 : index
      %810 = vector.load %arg10[%c0_346, %c0_347] : memref<16x128xf32, #tpu.memory_space<vmem>>, vector<16x128xf32>
      tpu.vector_store %arg10[%c0_346, %c0_347], %809 {strides = array<i32>} : memref<16x128xf32, #tpu.memory_space<vmem>>, vector<16x128xf32>,
    } else {
    }
    %c0 = arith.constant 0 : index
    %c0_1 = arith.constant 0 : index
    %3 = vector.load %arg4[%c0, %c0_1] : memref<16x1xi32, #tpu.memory_space<vmem>>, vector<16x1xi32>
    %c16_i32 = arith.constant 16 : i32
    %4 = arith.muli %arg0, %c16_i32 : i32
    %c0_i32_2 = arith.constant 0 : i32
    %5 = arith.addi %4, %c0_i32_2 : i32
    %c0_3 = arith.constant 0 : index
    %c0_4 = arith.constant 0 : index
    %6 = vector.load %arg9[%c0_3, %c0_4] : memref<16x128xf32, #tpu.memory_space<vmem>>, vector<16x128xf32>
    %c0_5 = arith.constant 0 : index
    %c0_6 = arith.constant 0 : index
    %7 = vector.load %arg10[%c0_5, %c0_6] : memref<16x128xf32, #tpu.memory_space<vmem>>, vector<16x128xf32>
    %c0_7 = arith.constant 0 : index
    %c0_8 = arith.constant 0 : index
    %c0_9 = arith.constant 0 : index
    %8 = vector.load %arg1[%c0_7, %c0_8, %c0_9] : memref<16x16x512xf32, #tpu.memory_space<vmem>>, vector<1x16x512xf32>
    %9 = vector.shape_cast %8 : vector<1x16x512xf32> to vector<16x512xf32>
    %c0_10 = arith.constant 0 : index
    %c0_11 = arith.constant 0 : index
    %10 = vector.load %arg5[%c0_10, %c0_11] : memref<128x512xf32, #tpu.memory_space<vmem>>, vector<128x512xf32>
    %cst = arith.constant dense<0.000000e+00> : vector<16x512xf32>
    %11 = tpu.matmul %6, %10, %cst {dimension_numbers = #tpu.dot_dimension_numbers<[1], [0], [0], [1], [0, 0, 1, 1], [], []>} : vector<16x128xf32>, vector<128x512xf32>, vector<16x512xf32> -> vector<16x512xf32>
    %12 = arith.addf %9, %11 : vector<16x512xf32>
    %13 = vector.extract_strided_slice %12 {offsets = [0, 0], sizes = [16, 128], strides = [1, 1]} : vector<16x512xf32> to vector<16x128xf32>
    %14 = arith.negf %13 : vector<16x128xf32>
    %15 = math.exp %14 : vector<16x128xf32>
    %cst_12 = arith.constant 1.000000e+00 : f32
    %16 = vector.broadcast %cst_12 : f32 to vector<16x128xf32>
    %17 = arith.addf %16, %15 : vector<16x128xf32>
    %18 = arith.divf %16, %17 : vector<16x128xf32>
    %19 = vector.extract_strided_slice %12 {offsets = [0, 128], sizes = [16, 128], strides = [1, 1]} : vector<16x512xf32> to vector<16x128xf32>
    %20 = arith.negf %19 : vector<16x128xf32>
    %21 = math.exp %20 : vector<16x128xf32>
    %cst_13 = arith.constant 1.000000e+00 : f32
    %22 = vector.broadcast %cst_13 : f32 to vector<16x128xf32>
    %23 = arith.addf %22, %21 : vector<16x128xf32>
    %24 = arith.divf %22, %23 : vector<16x128xf32>
    %25 = vector.extract_strided_slice %12 {offsets = [0, 256], sizes = [16, 128], strides = [1, 1]} : vector<16x512xf32> to vector<16x128xf32>
    %26 = math.tanh %25 : vector<16x128xf32>
    %27 = vector.extract_strided_slice %12 {offsets = [0, 384], sizes = [16, 128], strides = [1, 1]} : vector<16x512xf32> to vector<16x128xf32>
    %28 = arith.negf %27 : vector<16x128xf32>
    %29 = math.exp %28 : vector<16x128xf32>
    %cst_14 = arith.constant 1.000000e+00 : f32
    %30 = vector.broadcast %cst_14 : f32 to vector<16x128xf32>
    %31 = arith.addf %30, %29 : vector<16x128xf32>
    %32 = arith.divf %30, %31 : vector<16x128xf32>
    %33 = arith.mulf %24, %7 : vector<16x128xf32>
    %34 = arith.mulf %18, %26 : vector<16x128xf32>
    %35 = arith.addf %33, %34 : vector<16x128xf32>
    %36 = math.tanh %35 : vector<16x128xf32>
    %37 = arith.mulf %32, %36 : vector<16x128xf32>
    %38 = vector.broadcast %5 : i32 to vector<16x1xi32>
    %39 = arith.cmpi slt, %38, %3 : vector<16x1xi32>
    %40 = vector.shape_cast %39 : vector<16x1xi1> to vector<16x1xi1>
    %41 = vector.broadcast %40 : vector<16x1xi1> to vector<16x128xi1>
    %42 = arith.select %41, %37, %6 : vector<16x128xi1>, vector<16x128xf32>
    %c0_15 = arith.constant 0 : index
    %c0_16 = arith.constant 0 : index
    %43 = vector.load %arg9[%c0_15, %c0_16] : memref<16x128xf32, #tpu.memory_space<vmem>>, vector<16x128xf32>
    tpu.vector_store %arg9[%c0_15, %c0_16], %42 {strides = array<i32>} : memref<16x128xf32, #tpu.memory_space<vmem>>, vector<16x128xf32>,
    %44 = vector.shape_cast %39 : vector<16x1xi1> to vector<16x1xi1>
    %45 = vector.broadcast %44 : vector<16x1xi1> to vector<16x128xi1>
    %46 = arith.select %45, %35, %7 : vector<16x128xi1>, vector<16x128xf32>
    %c0_17 = arith.constant 0 : index
    %c0_18 = arith.constant 0 : index
    %47 = vector.load %arg10[%c0_17, %c0_18] : memref<16x128xf32, #tpu.memory_space<vmem>>, vector<16x128xf32>
    tpu.vector_store %arg10[%c0_17, %c0_18], %46 {strides = array<i32>} : memref<16x128xf32, #tpu.memory_space<vmem>>, vector<16x128xf32>,
    %cst_19 = arith.constant 0.000000e+00 : f32
    %48 = vector.shape_cast %39 : vector<16x1xi1> to vector<16x1xi1>
    %49 = vector.broadcast %48 : vector<16x1xi1> to vector<16x128xi1>
    %50 = vector.broadcast %cst_19 : f32 to vector<16x128xf32>
    %51 = arith.select %49, %37, %50 : vector<16x128xi1>, vector<16x128xf32>
    %52 = vector.shape_cast %51 : vector<16x128xf32> to vector<16x1x128xf32>
    %c0_20 = arith.constant 0 : index
    %c0_21 = arith.constant 0 : index
    %c0_22 = arith.constant 0 : index
    %53 = vector.load %arg6[%c0_20, %c0_21, %c0_22] : memref<16x16x128xf32, #tpu.memory_space<vmem>>, vector<16x1x128xf32>
    tpu.vector_store %arg6[%c0_20, %c0_21, %c0_22], %52 {strides = array<i32>} : memref<16x16x128xf32, #tpu.memory_space<vmem>>, vector<16x1x128xf32>,
    %c16_i32_23 = arith.constant 16 : i32
    %54 = arith.muli %arg0, %c16_i32_23 : i32
    %c1_i32 = arith.constant 1 : i32
    %55 = arith.addi %54, %c1_i32 : i32
    %c0_24 = arith.constant 0 : index
    %c0_25 = arith.constant 0 : index
    %56 = vector.load %arg9[%c0_24, %c0_25] : memref<16x128xf32, #tpu.memory_space<vmem>>, vector<16x128xf32>
    %c0_26 = arith.constant 0 : index
    %c0_27 = arith.constant 0 : index
    %57 = vector.load %arg10[%c0_26, %c0_27] : memref<16x128xf32, #tpu.memory_space<vmem>>, vector<16x128xf32>
    %c1 = arith.constant 1 : index
    %c0_28 = arith.constant 0 : index
    %c0_29 = arith.constant 0 : index
    %58 = vector.load %arg1[%c1, %c0_28, %c0_29] : memref<16x16x512xf32, #tpu.memory_space<vmem>>, vector<1x16x512xf32>
    %59 = vector.shape_cast %58 : vector<1x16x512xf32> to vector<16x512xf32>
    %c0_30 = arith.constant 0 : index
    %c0_31 = arith.constant 0 : index
    %60 = vector.load %arg5[%c0_30, %c0_31] : memref<128x512xf32, #tpu.memory_space<vmem>>, vector<128x512xf32>
    %cst_32 = arith.constant dense<0.000000e+00> : vector<16x512xf32>
    %61 = tpu.matmul %56, %60, %cst_32 {dimension_numbers = #tpu.dot_dimension_numbers<[1], [0], [0], [1], [0, 0, 1, 1], [], []>} : vector<16x128xf32>, vector<128x512xf32>, vector<16x512xf32> -> vector<16x512xf32>
    %62 = arith.addf %59, %61 : vector<16x512xf32>
    %63 = vector.extract_strided_slice %62 {offsets = [0, 0], sizes = [16, 128], strides = [1, 1]} : vector<16x512xf32> to vector<16x128xf32>
    %64 = arith.negf %63 : vector<16x128xf32>
    %65 = math.exp %64 : vector<16x128xf32>
    %cst_33 = arith.constant 1.000000e+00 : f32
    %66 = vector.broadcast %cst_33 : f32 to vector<16x128xf32>
    %67 = arith.addf %66, %65 : vector<16x128xf32>
    %68 = arith.divf %66, %67 : vector<16x128xf32>
    %69 = vector.extract_strided_slice %62 {offsets = [0, 128], sizes = [16, 128], strides = [1, 1]} : vector<16x512xf32> to vector<16x128xf32>
    %70 = arith.negf %69 : vector<16x128xf32>
    %71 = math.exp %70 : vector<16x128xf32>
    %cst_34 = arith.constant 1.000000e+00 : f32
    %72 = vector.broadcast %cst_34 : f32 to vector<16x128xf32>
    %73 = arith.addf %72, %71 : vector<16x128xf32>
    %74 = arith.divf %72, %73 : vector<16x128xf32>
    %75 = vector.extract_strided_slice %62 {offsets = [0, 256], sizes = [16, 128], strides = [1, 1]} : vector<16x512xf32> to vector<16x128xf32>
    %76 = math.tanh %75 : vector<16x128xf32>
    %77 = vector.extract_strided_slice %62 {offsets = [0, 384], sizes = [16, 128], strides = [1, 1]} : vector<16x512xf32> to vector<16x128xf32>
    %78 = arith.negf %77 : vector<16x128xf32>
    %79 = math.exp %78 : vector<16x128xf32>
    %cst_35 = arith.constant 1.000000e+00 : f32
    %80 = vector.broadcast %cst_35 : f32 to vector<16x128xf32>
    %81 = arith.addf %80, %79 : vector<16x128xf32>
    %82 = arith.divf %80, %81 : vector<16x128xf32>
    %83 = arith.mulf %74, %57 : vector<16x128xf32>
    %84 = arith.mulf %68, %76 : vector<16x128xf32>
    %85 = arith.addf %83, %84 : vector<16x128xf32>
    %86 = math.tanh %85 : vector<16x128xf32>
    %87 = arith.mulf %82, %86 : vector<16x128xf32>
    %88 = vector.broadcast %55 : i32 to vector<16x1xi32>
    %89 = arith.cmpi slt, %88, %3 : vector<16x1xi32>
    %90 = vector.shape_cast %89 : vector<16x1xi1> to vector<16x1xi1>
    %91 = vector.broadcast %90 : vector<16x1xi1> to vector<16x128xi1>
    %92 = arith.select %91, %87, %56 : vector<16x128xi1>, vector<16x128xf32>
    %c0_36 = arith.constant 0 : index
    %c0_37 = arith.constant 0 : index
    %93 = vector.load %arg9[%c0_36, %c0_37] : memref<16x128xf32, #tpu.memory_space<vmem>>, vector<16x128xf32>
    tpu.vector_store %arg9[%c0_36, %c0_37], %92 {strides = array<i32>} : memref<16x128xf32, #tpu.memory_space<vmem>>, vector<16x128xf32>,
    %94 = vector.shape_cast %89 : vector<16x1xi1> to vector<16x1xi1>
    %95 = vector.broadcast %94 : vector<16x1xi1> to vector<16x128xi1>
    %96 = arith.select %95, %85, %57 : vector<16x128xi1>, vector<16x128xf32>
    %c0_38 = arith.constant 0 : index
    %c0_39 = arith.constant 0 : index
    %97 = vector.load %arg10[%c0_38, %c0_39] : memref<16x128xf32, #tpu.memory_space<vmem>>, vector<16x128xf32>
    tpu.vector_store %arg10[%c0_38, %c0_39], %96 {strides = array<i32>} : memref<16x128xf32, #tpu.memory_space<vmem>>, vector<16x128xf32>,
    %cst_40 = arith.constant 0.000000e+00 : f32
    %98 = vector.shape_cast %89 : vector<16x1xi1> to vector<16x1xi1>
    %99 = vector.broadcast %98 : vector<16x1xi1> to vector<16x128xi1>
    %100 = vector.broadcast %cst_40 : f32 to vector<16x128xf32>
    %101 = arith.select %99, %87, %100 : vector<16x128xi1>, vector<16x128xf32>
    %102 = vector.shape_cast %101 : vector<16x128xf32> to vector<16x1x128xf32>
    %c0_41 = arith.constant 0 : index
    %c1_42 = arith.constant 1 : index
    %c0_43 = arith.constant 0 : index
    %103 = vector.load %arg6[%c0_41, %c1_42, %c0_43] : memref<16x16x128xf32, #tpu.memory_space<vmem>>, vector<16x1x128xf32>
    tpu.vector_store %arg6[%c0_41, %c1_42, %c0_43], %102 {strides = array<i32>} : memref<16x16x128xf32, #tpu.memory_space<vmem>>, vector<16x1x128xf32>,
    %c16_i32_44 = arith.constant 16 : i32
    %104 = arith.muli %arg0, %c16_i32_44 : i32
    %c2_i32 = arith.constant 2 : i32
    %105 = arith.addi %104, %c2_i32 : i32
    %c0_45 = arith.constant 0 : index
    %c0_46 = arith.constant 0 : index
    %106 = vector.load %arg9[%c0_45, %c0_46] : memref<16x128xf32, #tpu.memory_space<vmem>>, vector<16x128xf32>
    %c0_47 = arith.constant 0 : index
    %c0_48 = arith.constant 0 : index
    %107 = vector.load %arg10[%c0_47, %c0_48] : memref<16x128xf32, #tpu.memory_space<vmem>>, vector<16x128xf32>
    %c2 = arith.constant 2 : index
    %c0_49 = arith.constant 0 : index
    %c0_50 = arith.constant 0 : index
    %108 = vector.load %arg1[%c2, %c0_49, %c0_50] : memref<16x16x512xf32, #tpu.memory_space<vmem>>, vector<1x16x512xf32>
    %109 = vector.shape_cast %108 : vector<1x16x512xf32> to vector<16x512xf32>
    %c0_51 = arith.constant 0 : index
    %c0_52 = arith.constant 0 : index
    %110 = vector.load %arg5[%c0_51, %c0_52] : memref<128x512xf32, #tpu.memory_space<vmem>>, vector<128x512xf32>
    %cst_53 = arith.constant dense<0.000000e+00> : vector<16x512xf32>
    %111 = tpu.matmul %106, %110, %cst_53 {dimension_numbers = #tpu.dot_dimension_numbers<[1], [0], [0], [1], [0, 0, 1, 1], [], []>} : vector<16x128xf32>, vector<128x512xf32>, vector<16x512xf32> -> vector<16x512xf32>
    %112 = arith.addf %109, %111 : vector<16x512xf32>
    %113 = vector.extract_strided_slice %112 {offsets = [0, 0], sizes = [16, 128], strides = [1, 1]} : vector<16x512xf32> to vector<16x128xf32>
    %114 = arith.negf %113 : vector<16x128xf32>
    %115 = math.exp %114 : vector<16x128xf32>
    %cst_54 = arith.constant 1.000000e+00 : f32
    %116 = vector.broadcast %cst_54 : f32 to vector<16x128xf32>
    %117 = arith.addf %116, %115 : vector<16x128xf32>
    %118 = arith.divf %116, %117 : vector<16x128xf32>
    %119 = vector.extract_strided_slice %112 {offsets = [0, 128], sizes = [16, 128], strides = [1, 1]} : vector<16x512xf32> to vector<16x128xf32>
    %120 = arith.negf %119 : vector<16x128xf32>
    %121 = math.exp %120 : vector<16x128xf32>
    %cst_55 = arith.constant 1.000000e+00 : f32
    %122 = vector.broadcast %cst_55 : f32 to vector<16x128xf32>
    %123 = arith.addf %122, %121 : vector<16x128xf32>
    %124 = arith.divf %122, %123 : vector<16x128xf32>
    %125 = vector.extract_strided_slice %112 {offsets = [0, 256], sizes = [16, 128], strides = [1, 1]} : vector<16x512xf32> to vector<16x128xf32>
    %126 = math.tanh %125 : vector<16x128xf32>
    %127 = vector.extract_strided_slice %112 {offsets = [0, 384], sizes = [16, 128], strides = [1, 1]} : vector<16x512xf32> to vector<16x128xf32>
    %128 = arith.negf %127 : vector<16x128xf32>
    %129 = math.exp %128 : vector<16x128xf32>
    %cst_56 = arith.constant 1.000000e+00 : f32
    %130 = vector.broadcast %cst_56 : f32 to vector<16x128xf32>
    %131 = arith.addf %130, %129 : vector<16x128xf32>
    %132 = arith.divf %130, %131 : vector<16x128xf32>
    %133 = arith.mulf %124, %107 : vector<16x128xf32>
    %134 = arith.mulf %118, %126 : vector<16x128xf32>
    %135 = arith.addf %133, %134 : vector<16x128xf32>
    %136 = math.tanh %135 : vector<16x128xf32>
    %137 = arith.mulf %132, %136 : vector<16x128xf32>
    %138 = vector.broadcast %105 : i32 to vector<16x1xi32>
    %139 = arith.cmpi slt, %138, %3 : vector<16x1xi32>
    %140 = vector.shape_cast %139 : vector<16x1xi1> to vector<16x1xi1>
    %141 = vector.broadcast %140 : vector<16x1xi1> to vector<16x128xi1>
    %142 = arith.select %141, %137, %106 : vector<16x128xi1>, vector<16x128xf32>
    %c0_57 = arith.constant 0 : index
    %c0_58 = arith.constant 0 : index
    %143 = vector.load %arg9[%c0_57, %c0_58] : memref<16x128xf32, #tpu.memory_space<vmem>>, vector<16x128xf32>
    tpu.vector_store %arg9[%c0_57, %c0_58], %142 {strides = array<i32>} : memref<16x128xf32, #tpu.memory_space<vmem>>, vector<16x128xf32>,
    %144 = vector.shape_cast %139 : vector<16x1xi1> to vector<16x1xi1>
    %145 = vector.broadcast %144 : vector<16x1xi1> to vector<16x128xi1>
    %146 = arith.select %145, %135, %107 : vector<16x128xi1>, vector<16x128xf32>
    %c0_59 = arith.constant 0 : index
    %c0_60 = arith.constant 0 : index
    %147 = vector.load %arg10[%c0_59, %c0_60] : memref<16x128xf32, #tpu.memory_space<vmem>>, vector<16x128xf32>
    tpu.vector_store %arg10[%c0_59, %c0_60], %146 {strides = array<i32>} : memref<16x128xf32, #tpu.memory_space<vmem>>, vector<16x128xf32>,
    %cst_61 = arith.constant 0.000000e+00 : f32
    %148 = vector.shape_cast %139 : vector<16x1xi1> to vector<16x1xi1>
    %149 = vector.broadcast %148 : vector<16x1xi1> to vector<16x128xi1>
    %150 = vector.broadcast %cst_61 : f32 to vector<16x128xf32>
    %151 = arith.select %149, %137, %150 : vector<16x128xi1>, vector<16x128xf32>
    %152 = vector.shape_cast %151 : vector<16x128xf32> to vector<16x1x128xf32>
    %c0_62 = arith.constant 0 : index
    %c2_63 = arith.constant 2 : index
    %c0_64 = arith.constant 0 : index
    %153 = vector.load %arg6[%c0_62, %c2_63, %c0_64] : memref<16x16x128xf32, #tpu.memory_space<vmem>>, vector<16x1x128xf32>
    tpu.vector_store %arg6[%c0_62, %c2_63, %c0_64], %152 {strides = array<i32>} : memref<16x16x128xf32, #tpu.memory_space<vmem>>, vector<16x1x128xf32>,
    %c16_i32_65 = arith.constant 16 : i32
    %154 = arith.muli %arg0, %c16_i32_65 : i32
    %c3_i32 = arith.constant 3 : i32
    %155 = arith.addi %154, %c3_i32 : i32
    %c0_66 = arith.constant 0 : index
    %c0_67 = arith.constant 0 : index
    %156 = vector.load %arg9[%c0_66, %c0_67] : memref<16x128xf32, #tpu.memory_space<vmem>>, vector<16x128xf32>
    %c0_68 = arith.constant 0 : index
    %c0_69 = arith.constant 0 : index
    %157 = vector.load %arg10[%c0_68, %c0_69] : memref<16x128xf32, #tpu.memory_space<vmem>>, vector<16x128xf32>
    %c3 = arith.constant 3 : index
    %c0_70 = arith.constant 0 : index
    %c0_71 = arith.constant 0 : index
    %158 = vector.load %arg1[%c3, %c0_70, %c0_71] : memref<16x16x512xf32, #tpu.memory_space<vmem>>, vector<1x16x512xf32>
    %159 = vector.shape_cast %158 : vector<1x16x512xf32> to vector<16x512xf32>
    %c0_72 = arith.constant 0 : index
    %c0_73 = arith.constant 0 : index
    %160 = vector.load %arg5[%c0_72, %c0_73] : memref<128x512xf32, #tpu.memory_space<vmem>>, vector<128x512xf32>
    %cst_74 = arith.constant dense<0.000000e+00> : vector<16x512xf32>
    %161 = tpu.matmul %156, %160, %cst_74 {dimension_numbers = #tpu.dot_dimension_numbers<[1], [0], [0], [1], [0, 0, 1, 1], [], []>} : vector<16x128xf32>, vector<128x512xf32>, vector<16x512xf32> -> vector<16x512xf32>
    %162 = arith.addf %159, %161 : vector<16x512xf32>
    %163 = vector.extract_strided_slice %162 {offsets = [0, 0], sizes = [16, 128], strides = [1, 1]} : vector<16x512xf32> to vector<16x128xf32>
    %164 = arith.negf %163 : vector<16x128xf32>
    %165 = math.exp %164 : vector<16x128xf32>
    %cst_75 = arith.constant 1.000000e+00 : f32
    %166 = vector.broadcast %cst_75 : f32 to vector<16x128xf32>
    %167 = arith.addf %166, %165 : vector<16x128xf32>
    %168 = arith.divf %166, %167 : vector<16x128xf32>
    %169 = vector.extract_strided_slice %162 {offsets = [0, 128], sizes = [16, 128], strides = [1, 1]} : vector<16x512xf32> to vector<16x128xf32>
    %170 = arith.negf %169 : vector<16x128xf32>
    %171 = math.exp %170 : vector<16x128xf32>
    %cst_76 = arith.constant 1.000000e+00 : f32
    %172 = vector.broadcast %cst_76 : f32 to vector<16x128xf32>
    %173 = arith.addf %172, %171 : vector<16x128xf32>
    %174 = arith.divf %172, %173 : vector<16x128xf32>
    %175 = vector.extract_strided_slice %162 {offsets = [0, 256], sizes = [16, 128], strides = [1, 1]} : vector<16x512xf32> to vector<16x128xf32>
    %176 = math.tanh %175 : vector<16x128xf32>
    %177 = vector.extract_strided_slice %162 {offsets = [0, 384], sizes = [16, 128], strides = [1, 1]} : vector<16x512xf32> to vector<16x128xf32>
    %178 = arith.negf %177 : vector<16x128xf32>
    %179 = math.exp %178 : vector<16x128xf32>
    %cst_77 = arith.constant 1.000000e+00 : f32
    %180 = vector.broadcast %cst_77 : f32 to vector<16x128xf32>
    %181 = arith.addf %180, %179 : vector<16x128xf32>
    %182 = arith.divf %180, %181 : vector<16x128xf32>
    %183 = arith.mulf %174, %157 : vector<16x128xf32>
    %184 = arith.mulf %168, %176 : vector<16x128xf32>
    %185 = arith.addf %183, %184 : vector<16x128xf32>
    %186 = math.tanh %185 : vector<16x128xf32>
    %187 = arith.mulf %182, %186 : vector<16x128xf32>
    %188 = vector.broadcast %155 : i32 to vector<16x1xi32>
    %189 = arith.cmpi slt, %188, %3 : vector<16x1xi32>
    %190 = vector.shape_cast %189 : vector<16x1xi1> to vector<16x1xi1>
    %191 = vector.broadcast %190 : vector<16x1xi1> to vector<16x128xi1>
    %192 = arith.select %191, %187, %156 : vector<16x128xi1>, vector<16x128xf32>
    %c0_78 = arith.constant 0 : index
    %c0_79 = arith.constant 0 : index
    %193 = vector.load %arg9[%c0_78, %c0_79] : memref<16x128xf32, #tpu.memory_space<vmem>>, vector<16x128xf32>
    tpu.vector_store %arg9[%c0_78, %c0_79], %192 {strides = array<i32>} : memref<16x128xf32, #tpu.memory_space<vmem>>, vector<16x128xf32>,
    %194 = vector.shape_cast %189 : vector<16x1xi1> to vector<16x1xi1>
    %195 = vector.broadcast %194 : vector<16x1xi1> to vector<16x128xi1>
    %196 = arith.select %195, %185, %157 : vector<16x128xi1>, vector<16x128xf32>
    %c0_80 = arith.constant 0 : index
    %c0_81 = arith.constant 0 : index
    %197 = vector.load %arg10[%c0_80, %c0_81] : memref<16x128xf32, #tpu.memory_space<vmem>>, vector<16x128xf32>
    tpu.vector_store %arg10[%c0_80, %c0_81], %196 {strides = array<i32>} : memref<16x128xf32, #tpu.memory_space<vmem>>, vector<16x128xf32>,
    %cst_82 = arith.constant 0.000000e+00 : f32
    %198 = vector.shape_cast %189 : vector<16x1xi1> to vector<16x1xi1>
    %199 = vector.broadcast %198 : vector<16x1xi1> to vector<16x128xi1>
    %200 = vector.broadcast %cst_82 : f32 to vector<16x128xf32>
    %201 = arith.select %199, %187, %200 : vector<16x128xi1>, vector<16x128xf32>
    %202 = vector.shape_cast %201 : vector<16x128xf32> to vector<16x1x128xf32>
    %c0_83 = arith.constant 0 : index
    %c3_84 = arith.constant 3 : index
    %c0_85 = arith.constant 0 : index
    %203 = vector.load %arg6[%c0_83, %c3_84, %c0_85] : memref<16x16x128xf32, #tpu.memory_space<vmem>>, vector<16x1x128xf32>
    tpu.vector_store %arg6[%c0_83, %c3_84, %c0_85], %202 {strides = array<i32>} : memref<16x16x128xf32, #tpu.memory_space<vmem>>, vector<16x1x128xf32>,
    %c16_i32_86 = arith.constant 16 : i32
    %204 = arith.muli %arg0, %c16_i32_86 : i32
    %c4_i32 = arith.constant 4 : i32
    %205 = arith.addi %204, %c4_i32 : i32
    %c0_87 = arith.constant 0 : index
    %c0_88 = arith.constant 0 : index
    %206 = vector.load %arg9[%c0_87, %c0_88] : memref<16x128xf32, #tpu.memory_space<vmem>>, vector<16x128xf32>
    %c0_89 = arith.constant 0 : index
    %c0_90 = arith.constant 0 : index
    %207 = vector.load %arg10[%c0_89, %c0_90] : memref<16x128xf32, #tpu.memory_space<vmem>>, vector<16x128xf32>
    %c4 = arith.constant 4 : index
    %c0_91 = arith.constant 0 : index
    %c0_92 = arith.constant 0 : index
    %208 = vector.load %arg1[%c4, %c0_91, %c0_92] : memref<16x16x512xf32, #tpu.memory_space<vmem>>, vector<1x16x512xf32>
    %209 = vector.shape_cast %208 : vector<1x16x512xf32> to vector<16x512xf32>
    %c0_93 = arith.constant 0 : index
    %c0_94 = arith.constant 0 : index
    %210 = vector.load %arg5[%c0_93, %c0_94] : memref<128x512xf32, #tpu.memory_space<vmem>>, vector<128x512xf32>
    %cst_95 = arith.constant dense<0.000000e+00> : vector<16x512xf32>
    %211 = tpu.matmul %206, %210, %cst_95 {dimension_numbers = #tpu.dot_dimension_numbers<[1], [0], [0], [1], [0, 0, 1, 1], [], []>} : vector<16x128xf32>, vector<128x512xf32>, vector<16x512xf32> -> vector<16x512xf32>
    %212 = arith.addf %209, %211 : vector<16x512xf32>
    %213 = vector.extract_strided_slice %212 {offsets = [0, 0], sizes = [16, 128], strides = [1, 1]} : vector<16x512xf32> to vector<16x128xf32>
    %214 = arith.negf %213 : vector<16x128xf32>
    %215 = math.exp %214 : vector<16x128xf32>
    %cst_96 = arith.constant 1.000000e+00 : f32
    %216 = vector.broadcast %cst_96 : f32 to vector<16x128xf32>
    %217 = arith.addf %216, %215 : vector<16x128xf32>
    %218 = arith.divf %216, %217 : vector<16x128xf32>
    %219 = vector.extract_strided_slice %212 {offsets = [0, 128], sizes = [16, 128], strides = [1, 1]} : vector<16x512xf32> to vector<16x128xf32>
    %220 = arith.negf %219 : vector<16x128xf32>
    %221 = math.exp %220 : vector<16x128xf32>
    %cst_97 = arith.constant 1.000000e+00 : f32
    %222 = vector.broadcast %cst_97 : f32 to vector<16x128xf32>
    %223 = arith.addf %222, %221 : vector<16x128xf32>
    %224 = arith.divf %222, %223 : vector<16x128xf32>
    %225 = vector.extract_strided_slice %212 {offsets = [0, 256], sizes = [16, 128], strides = [1, 1]} : vector<16x512xf32> to vector<16x128xf32>
    %226 = math.tanh %225 : vector<16x128xf32>
    %227 = vector.extract_strided_slice %212 {offsets = [0, 384], sizes = [16, 128], strides = [1, 1]} : vector<16x512xf32> to vector<16x128xf32>
    %228 = arith.negf %227 : vector<16x128xf32>
    %229 = math.exp %228 : vector<16x128xf32>
    %cst_98 = arith.constant 1.000000e+00 : f32
    %230 = vector.broadcast %cst_98 : f32 to vector<16x128xf32>
    %231 = arith.addf %230, %229 : vector<16x128xf32>
    %232 = arith.divf %230, %231 : vector<16x128xf32>
    %233 = arith.mulf %224, %207 : vector<16x128xf32>
    %234 = arith.mulf %218, %226 : vector<16x128xf32>
    %235 = arith.addf %233, %234 : vector<16x128xf32>
    %236 = math.tanh %235 : vector<16x128xf32>
    %237 = arith.mulf %232, %236 : vector<16x128xf32>
    %238 = vector.broadcast %205 : i32 to vector<16x1xi32>
    %239 = arith.cmpi slt, %238, %3 : vector<16x1xi32>
    %240 = vector.shape_cast %239 : vector<16x1xi1> to vector<16x1xi1>
    %241 = vector.broadcast %240 : vector<16x1xi1> to vector<16x128xi1>
    %242 = arith.select %241, %237, %206 : vector<16x128xi1>, vector<16x128xf32>
    %c0_99 = arith.constant 0 : index
    %c0_100 = arith.constant 0 : index
    %243 = vector.load %arg9[%c0_99, %c0_100] : memref<16x128xf32, #tpu.memory_space<vmem>>, vector<16x128xf32>
    tpu.vector_store %arg9[%c0_99, %c0_100], %242 {strides = array<i32>} : memref<16x128xf32, #tpu.memory_space<vmem>>, vector<16x128xf32>,
    %244 = vector.shape_cast %239 : vector<16x1xi1> to vector<16x1xi1>
    %245 = vector.broadcast %244 : vector<16x1xi1> to vector<16x128xi1>
    %246 = arith.select %245, %235, %207 : vector<16x128xi1>, vector<16x128xf32>
    %c0_101 = arith.constant 0 : index
    %c0_102 = arith.constant 0 : index
    %247 = vector.load %arg10[%c0_101, %c0_102] : memref<16x128xf32, #tpu.memory_space<vmem>>, vector<16x128xf32>
    tpu.vector_store %arg10[%c0_101, %c0_102], %246 {strides = array<i32>} : memref<16x128xf32, #tpu.memory_space<vmem>>, vector<16x128xf32>,
    %cst_103 = arith.constant 0.000000e+00 : f32
    %248 = vector.shape_cast %239 : vector<16x1xi1> to vector<16x1xi1>
    %249 = vector.broadcast %248 : vector<16x1xi1> to vector<16x128xi1>
    %250 = vector.broadcast %cst_103 : f32 to vector<16x128xf32>
    %251 = arith.select %249, %237, %250 : vector<16x128xi1>, vector<16x128xf32>
    %252 = vector.shape_cast %251 : vector<16x128xf32> to vector<16x1x128xf32>
    %c0_104 = arith.constant 0 : index
    %c4_105 = arith.constant 4 : index
    %c0_106 = arith.constant 0 : index
    %253 = vector.load %arg6[%c0_104, %c4_105, %c0_106] : memref<16x16x128xf32, #tpu.memory_space<vmem>>, vector<16x1x128xf32>
    tpu.vector_store %arg6[%c0_104, %c4_105, %c0_106], %252 {strides = array<i32>} : memref<16x16x128xf32, #tpu.memory_space<vmem>>, vector<16x1x128xf32>,
    %c16_i32_107 = arith.constant 16 : i32
    %254 = arith.muli %arg0, %c16_i32_107 : i32
    %c5_i32 = arith.constant 5 : i32
    %255 = arith.addi %254, %c5_i32 : i32
    %c0_108 = arith.constant 0 : index
    %c0_109 = arith.constant 0 : index
    %256 = vector.load %arg9[%c0_108, %c0_109] : memref<16x128xf32, #tpu.memory_space<vmem>>, vector<16x128xf32>
    %c0_110 = arith.constant 0 : index
    %c0_111 = arith.constant 0 : index
    %257 = vector.load %arg10[%c0_110, %c0_111] : memref<16x128xf32, #tpu.memory_space<vmem>>, vector<16x128xf32>
    %c5 = arith.constant 5 : index
    %c0_112 = arith.constant 0 : index
    %c0_113 = arith.constant 0 : index
    %258 = vector.load %arg1[%c5, %c0_112, %c0_113] : memref<16x16x512xf32, #tpu.memory_space<vmem>>, vector<1x16x512xf32>
    %259 = vector.shape_cast %258 : vector<1x16x512xf32> to vector<16x512xf32>
    %c0_114 = arith.constant 0 : index
    %c0_115 = arith.constant 0 : index
    %260 = vector.load %arg5[%c0_114, %c0_115] : memref<128x512xf32, #tpu.memory_space<vmem>>, vector<128x512xf32>
    %cst_116 = arith.constant dense<0.000000e+00> : vector<16x512xf32>
    %261 = tpu.matmul %256, %260, %cst_116 {dimension_numbers = #tpu.dot_dimension_numbers<[1], [0], [0], [1], [0, 0, 1, 1], [], []>} : vector<16x128xf32>, vector<128x512xf32>, vector<16x512xf32> -> vector<16x512xf32>
    %262 = arith.addf %259, %261 : vector<16x512xf32>
    %263 = vector.extract_strided_slice %262 {offsets = [0, 0], sizes = [16, 128], strides = [1, 1]} : vector<16x512xf32> to vector<16x128xf32>
    %264 = arith.negf %263 : vector<16x128xf32>
    %265 = math.exp %264 : vector<16x128xf32>
    %cst_117 = arith.constant 1.000000e+00 : f32
    %266 = vector.broadcast %cst_117 : f32 to vector<16x128xf32>
    %267 = arith.addf %266, %265 : vector<16x128xf32>
    %268 = arith.divf %266, %267 : vector<16x128xf32>
    %269 = vector.extract_strided_slice %262 {offsets = [0, 128], sizes = [16, 128], strides = [1, 1]} : vector<16x512xf32> to vector<16x128xf32>
    %270 = arith.negf %269 : vector<16x128xf32>
    %271 = math.exp %270 : vector<16x128xf32>
    %cst_118 = arith.constant 1.000000e+00 : f32
    %272 = vector.broadcast %cst_118 : f32 to vector<16x128xf32>
    %273 = arith.addf %272, %271 : vector<16x128xf32>
    %274 = arith.divf %272, %273 : vector<16x128xf32>
    %275 = vector.extract_strided_slice %262 {offsets = [0, 256], sizes = [16, 128], strides = [1, 1]} : vector<16x512xf32> to vector<16x128xf32>
    %276 = math.tanh %275 : vector<16x128xf32>
    %277 = vector.extract_strided_slice %262 {offsets = [0, 384], sizes = [16, 128], strides = [1, 1]} : vector<16x512xf32> to vector<16x128xf32>
    %278 = arith.negf %277 : vector<16x128xf32>
    %279 = math.exp %278 : vector<16x128xf32>
    %cst_119 = arith.constant 1.000000e+00 : f32
    %280 = vector.broadcast %cst_119 : f32 to vector<16x128xf32>
    %281 = arith.addf %280, %279 : vector<16x128xf32>
    %282 = arith.divf %280, %281 : vector<16x128xf32>
    %283 = arith.mulf %274, %257 : vector<16x128xf32>
    %284 = arith.mulf %268, %276 : vector<16x128xf32>
    %285 = arith.addf %283, %284 : vector<16x128xf32>
    %286 = math.tanh %285 : vector<16x128xf32>
    %287 = arith.mulf %282, %286 : vector<16x128xf32>
    %288 = vector.broadcast %255 : i32 to vector<16x1xi32>
    %289 = arith.cmpi slt, %288, %3 : vector<16x1xi32>
    %290 = vector.shape_cast %289 : vector<16x1xi1> to vector<16x1xi1>
    %291 = vector.broadcast %290 : vector<16x1xi1> to vector<16x128xi1>
    %292 = arith.select %291, %287, %256 : vector<16x128xi1>, vector<16x128xf32>
    %c0_120 = arith.constant 0 : index
    %c0_121 = arith.constant 0 : index
    %293 = vector.load %arg9[%c0_120, %c0_121] : memref<16x128xf32, #tpu.memory_space<vmem>>, vector<16x128xf32>
    tpu.vector_store %arg9[%c0_120, %c0_121], %292 {strides = array<i32>} : memref<16x128xf32, #tpu.memory_space<vmem>>, vector<16x128xf32>,
    %294 = vector.shape_cast %289 : vector<16x1xi1> to vector<16x1xi1>
    %295 = vector.broadcast %294 : vector<16x1xi1> to vector<16x128xi1>
    %296 = arith.select %295, %285, %257 : vector<16x128xi1>, vector<16x128xf32>
    %c0_122 = arith.constant 0 : index
    %c0_123 = arith.constant 0 : index
    %297 = vector.load %arg10[%c0_122, %c0_123] : memref<16x128xf32, #tpu.memory_space<vmem>>, vector<16x128xf32>
    tpu.vector_store %arg10[%c0_122, %c0_123], %296 {strides = array<i32>} : memref<16x128xf32, #tpu.memory_space<vmem>>, vector<16x128xf32>,
    %cst_124 = arith.constant 0.000000e+00 : f32
    %298 = vector.shape_cast %289 : vector<16x1xi1> to vector<16x1xi1>
    %299 = vector.broadcast %298 : vector<16x1xi1> to vector<16x128xi1>
    %300 = vector.broadcast %cst_124 : f32 to vector<16x128xf32>
    %301 = arith.select %299, %287, %300 : vector<16x128xi1>, vector<16x128xf32>
    %302 = vector.shape_cast %301 : vector<16x128xf32> to vector<16x1x128xf32>
    %c0_125 = arith.constant 0 : index
    %c5_126 = arith.constant 5 : index
    %c0_127 = arith.constant 0 : index
    %303 = vector.load %arg6[%c0_125, %c5_126, %c0_127] : memref<16x16x128xf32, #tpu.memory_space<vmem>>, vector<16x1x128xf32>
    tpu.vector_store %arg6[%c0_125, %c5_126, %c0_127], %302 {strides = array<i32>} : memref<16x16x128xf32, #tpu.memory_space<vmem>>, vector<16x1x128xf32>,
    %c16_i32_128 = arith.constant 16 : i32
    %304 = arith.muli %arg0, %c16_i32_128 : i32
    %c6_i32 = arith.constant 6 : i32
    %305 = arith.addi %304, %c6_i32 : i32
    %c0_129 = arith.constant 0 : index
    %c0_130 = arith.constant 0 : index
    %306 = vector.load %arg9[%c0_129, %c0_130] : memref<16x128xf32, #tpu.memory_space<vmem>>, vector<16x128xf32>
    %c0_131 = arith.constant 0 : index
    %c0_132 = arith.constant 0 : index
    %307 = vector.load %arg10[%c0_131, %c0_132] : memref<16x128xf32, #tpu.memory_space<vmem>>, vector<16x128xf32>
    %c6 = arith.constant 6 : index
    %c0_133 = arith.constant 0 : index
    %c0_134 = arith.constant 0 : index
    %308 = vector.load %arg1[%c6, %c0_133, %c0_134] : memref<16x16x512xf32, #tpu.memory_space<vmem>>, vector<1x16x512xf32>
    %309 = vector.shape_cast %308 : vector<1x16x512xf32> to vector<16x512xf32>
    %c0_135 = arith.constant 0 : index
    %c0_136 = arith.constant 0 : index
    %310 = vector.load %arg5[%c0_135, %c0_136] : memref<128x512xf32, #tpu.memory_space<vmem>>, vector<128x512xf32>
    %cst_137 = arith.constant dense<0.000000e+00> : vector<16x512xf32>
    %311 = tpu.matmul %306, %310, %cst_137 {dimension_numbers = #tpu.dot_dimension_numbers<[1], [0], [0], [1], [0, 0, 1, 1], [], []>} : vector<16x128xf32>, vector<128x512xf32>, vector<16x512xf32> -> vector<16x512xf32>
    %312 = arith.addf %309, %311 : vector<16x512xf32>
    %313 = vector.extract_strided_slice %312 {offsets = [0, 0], sizes = [16, 128], strides = [1, 1]} : vector<16x512xf32> to vector<16x128xf32>
    %314 = arith.negf %313 : vector<16x128xf32>
    %315 = math.exp %314 : vector<16x128xf32>
    %cst_138 = arith.constant 1.000000e+00 : f32
    %316 = vector.broadcast %cst_138 : f32 to vector<16x128xf32>
    %317 = arith.addf %316, %315 : vector<16x128xf32>
    %318 = arith.divf %316, %317 : vector<16x128xf32>
    %319 = vector.extract_strided_slice %312 {offsets = [0, 128], sizes = [16, 128], strides = [1, 1]} : vector<16x512xf32> to vector<16x128xf32>
    %320 = arith.negf %319 : vector<16x128xf32>
    %321 = math.exp %320 : vector<16x128xf32>
    %cst_139 = arith.constant 1.000000e+00 : f32
    %322 = vector.broadcast %cst_139 : f32 to vector<16x128xf32>
    %323 = arith.addf %322, %321 : vector<16x128xf32>
    %324 = arith.divf %322, %323 : vector<16x128xf32>
    %325 = vector.extract_strided_slice %312 {offsets = [0, 256], sizes = [16, 128], strides = [1, 1]} : vector<16x512xf32> to vector<16x128xf32>
    %326 = math.tanh %325 : vector<16x128xf32>
    %327 = vector.extract_strided_slice %312 {offsets = [0, 384], sizes = [16, 128], strides = [1, 1]} : vector<16x512xf32> to vector<16x128xf32>
    %328 = arith.negf %327 : vector<16x128xf32>
    %329 = math.exp %328 : vector<16x128xf32>
    %cst_140 = arith.constant 1.000000e+00 : f32
    %330 = vector.broadcast %cst_140 : f32 to vector<16x128xf32>
    %331 = arith.addf %330, %329 : vector<16x128xf32>
    %332 = arith.divf %330, %331 : vector<16x128xf32>
    %333 = arith.mulf %324, %307 : vector<16x128xf32>
    %334 = arith.mulf %318, %326 : vector<16x128xf32>
    %335 = arith.addf %333, %334 : vector<16x128xf32>
    %336 = math.tanh %335 : vector<16x128xf32>
    %337 = arith.mulf %332, %336 : vector<16x128xf32>
    %338 = vector.broadcast %305 : i32 to vector<16x1xi32>
    %339 = arith.cmpi slt, %338, %3 : vector<16x1xi32>
    %340 = vector.shape_cast %339 : vector<16x1xi1> to vector<16x1xi1>
    %341 = vector.broadcast %340 : vector<16x1xi1> to vector<16x128xi1>
    %342 = arith.select %341, %337, %306 : vector<16x128xi1>, vector<16x128xf32>
    %c0_141 = arith.constant 0 : index
    %c0_142 = arith.constant 0 : index
    %343 = vector.load %arg9[%c0_141, %c0_142] : memref<16x128xf32, #tpu.memory_space<vmem>>, vector<16x128xf32>
    tpu.vector_store %arg9[%c0_141, %c0_142], %342 {strides = array<i32>} : memref<16x128xf32, #tpu.memory_space<vmem>>, vector<16x128xf32>,
    %344 = vector.shape_cast %339 : vector<16x1xi1> to vector<16x1xi1>
    %345 = vector.broadcast %344 : vector<16x1xi1> to vector<16x128xi1>
    %346 = arith.select %345, %335, %307 : vector<16x128xi1>, vector<16x128xf32>
    %c0_143 = arith.constant 0 : index
    %c0_144 = arith.constant 0 : index
    %347 = vector.load %arg10[%c0_143, %c0_144] : memref<16x128xf32, #tpu.memory_space<vmem>>, vector<16x128xf32>
    tpu.vector_store %arg10[%c0_143, %c0_144], %346 {strides = array<i32>} : memref<16x128xf32, #tpu.memory_space<vmem>>, vector<16x128xf32>,
    %cst_145 = arith.constant 0.000000e+00 : f32
    %348 = vector.shape_cast %339 : vector<16x1xi1> to vector<16x1xi1>
    %349 = vector.broadcast %348 : vector<16x1xi1> to vector<16x128xi1>
    %350 = vector.broadcast %cst_145 : f32 to vector<16x128xf32>
    %351 = arith.select %349, %337, %350 : vector<16x128xi1>, vector<16x128xf32>
    %352 = vector.shape_cast %351 : vector<16x128xf32> to vector<16x1x128xf32>
    %c0_146 = arith.constant 0 : index
    %c6_147 = arith.constant 6 : index
    %c0_148 = arith.constant 0 : index
    %353 = vector.load %arg6[%c0_146, %c6_147, %c0_148] : memref<16x16x128xf32, #tpu.memory_space<vmem>>, vector<16x1x128xf32>
    tpu.vector_store %arg6[%c0_146, %c6_147, %c0_148], %352 {strides = array<i32>} : memref<16x16x128xf32, #tpu.memory_space<vmem>>, vector<16x1x128xf32>,
    %c16_i32_149 = arith.constant 16 : i32
    %354 = arith.muli %arg0, %c16_i32_149 : i32
    %c7_i32 = arith.constant 7 : i32
    %355 = arith.addi %354, %c7_i32 : i32
    %c0_150 = arith.constant 0 : index
    %c0_151 = arith.constant 0 : index
    %356 = vector.load %arg9[%c0_150, %c0_151] : memref<16x128xf32, #tpu.memory_space<vmem>>, vector<16x128xf32>
    %c0_152 = arith.constant 0 : index
    %c0_153 = arith.constant 0 : index
    %357 = vector.load %arg10[%c0_152, %c0_153] : memref<16x128xf32, #tpu.memory_space<vmem>>, vector<16x128xf32>
    %c7 = arith.constant 7 : index
    %c0_154 = arith.constant 0 : index
    %c0_155 = arith.constant 0 : index
    %358 = vector.load %arg1[%c7, %c0_154, %c0_155] : memref<16x16x512xf32, #tpu.memory_space<vmem>>, vector<1x16x512xf32>
    %359 = vector.shape_cast %358 : vector<1x16x512xf32> to vector<16x512xf32>
    %c0_156 = arith.constant 0 : index
    %c0_157 = arith.constant 0 : index
    %360 = vector.load %arg5[%c0_156, %c0_157] : memref<128x512xf32, #tpu.memory_space<vmem>>, vector<128x512xf32>
    %cst_158 = arith.constant dense<0.000000e+00> : vector<16x512xf32>
    %361 = tpu.matmul %356, %360, %cst_158 {dimension_numbers = #tpu.dot_dimension_numbers<[1], [0], [0], [1], [0, 0, 1, 1], [], []>} : vector<16x128xf32>, vector<128x512xf32>, vector<16x512xf32> -> vector<16x512xf32>
    %362 = arith.addf %359, %361 : vector<16x512xf32>
    %363 = vector.extract_strided_slice %362 {offsets = [0, 0], sizes = [16, 128], strides = [1, 1]} : vector<16x512xf32> to vector<16x128xf32>
    %364 = arith.negf %363 : vector<16x128xf32>
    %365 = math.exp %364 : vector<16x128xf32>
    %cst_159 = arith.constant 1.000000e+00 : f32
    %366 = vector.broadcast %cst_159 : f32 to vector<16x128xf32>
    %367 = arith.addf %366, %365 : vector<16x128xf32>
    %368 = arith.divf %366, %367 : vector<16x128xf32>
    %369 = vector.extract_strided_slice %362 {offsets = [0, 128], sizes = [16, 128], strides = [1, 1]} : vector<16x512xf32> to vector<16x128xf32>
    %370 = arith.negf %369 : vector<16x128xf32>
    %371 = math.exp %370 : vector<16x128xf32>
    %cst_160 = arith.constant 1.000000e+00 : f32
    %372 = vector.broadcast %cst_160 : f32 to vector<16x128xf32>
    %373 = arith.addf %372, %371 : vector<16x128xf32>
    %374 = arith.divf %372, %373 : vector<16x128xf32>
    %375 = vector.extract_strided_slice %362 {offsets = [0, 256], sizes = [16, 128], strides = [1, 1]} : vector<16x512xf32> to vector<16x128xf32>
    %376 = math.tanh %375 : vector<16x128xf32>
    %377 = vector.extract_strided_slice %362 {offsets = [0, 384], sizes = [16, 128], strides = [1, 1]} : vector<16x512xf32> to vector<16x128xf32>
    %378 = arith.negf %377 : vector<16x128xf32>
    %379 = math.exp %378 : vector<16x128xf32>
    %cst_161 = arith.constant 1.000000e+00 : f32
    %380 = vector.broadcast %cst_161 : f32 to vector<16x128xf32>
    %381 = arith.addf %380, %379 : vector<16x128xf32>
    %382 = arith.divf %380, %381 : vector<16x128xf32>
    %383 = arith.mulf %374, %357 : vector<16x128xf32>
    %384 = arith.mulf %368, %376 : vector<16x128xf32>
    %385 = arith.addf %383, %384 : vector<16x128xf32>
    %386 = math.tanh %385 : vector<16x128xf32>
    %387 = arith.mulf %382, %386 : vector<16x128xf32>
    %388 = vector.broadcast %355 : i32 to vector<16x1xi32>
    %389 = arith.cmpi slt, %388, %3 : vector<16x1xi32>
    %390 = vector.shape_cast %389 : vector<16x1xi1> to vector<16x1xi1>
    %391 = vector.broadcast %390 : vector<16x1xi1> to vector<16x128xi1>
    %392 = arith.select %391, %387, %356 : vector<16x128xi1>, vector<16x128xf32>
    %c0_162 = arith.constant 0 : index
    %c0_163 = arith.constant 0 : index
    %393 = vector.load %arg9[%c0_162, %c0_163] : memref<16x128xf32, #tpu.memory_space<vmem>>, vector<16x128xf32>
    tpu.vector_store %arg9[%c0_162, %c0_163], %392 {strides = array<i32>} : memref<16x128xf32, #tpu.memory_space<vmem>>, vector<16x128xf32>,
    %394 = vector.shape_cast %389 : vector<16x1xi1> to vector<16x1xi1>
    %395 = vector.broadcast %394 : vector<16x1xi1> to vector<16x128xi1>
    %396 = arith.select %395, %385, %357 : vector<16x128xi1>, vector<16x128xf32>
    %c0_164 = arith.constant 0 : index
    %c0_165 = arith.constant 0 : index
    %397 = vector.load %arg10[%c0_164, %c0_165] : memref<16x128xf32, #tpu.memory_space<vmem>>, vector<16x128xf32>
    tpu.vector_store %arg10[%c0_164, %c0_165], %396 {strides = array<i32>} : memref<16x128xf32, #tpu.memory_space<vmem>>, vector<16x128xf32>,
    %cst_166 = arith.constant 0.000000e+00 : f32
    %398 = vector.shape_cast %389 : vector<16x1xi1> to vector<16x1xi1>
    %399 = vector.broadcast %398 : vector<16x1xi1> to vector<16x128xi1>
    %400 = vector.broadcast %cst_166 : f32 to vector<16x128xf32>
    %401 = arith.select %399, %387, %400 : vector<16x128xi1>, vector<16x128xf32>
    %402 = vector.shape_cast %401 : vector<16x128xf32> to vector<16x1x128xf32>
    %c0_167 = arith.constant 0 : index
    %c7_168 = arith.constant 7 : index
    %c0_169 = arith.constant 0 : index
    %403 = vector.load %arg6[%c0_167, %c7_168, %c0_169] : memref<16x16x128xf32, #tpu.memory_space<vmem>>, vector<16x1x128xf32>
    tpu.vector_store %arg6[%c0_167, %c7_168, %c0_169], %402 {strides = array<i32>} : memref<16x16x128xf32, #tpu.memory_space<vmem>>, vector<16x1x128xf32>,
    %c16_i32_170 = arith.constant 16 : i32
    %404 = arith.muli %arg0, %c16_i32_170 : i32
    %c8_i32 = arith.constant 8 : i32
    %405 = arith.addi %404, %c8_i32 : i32
    %c0_171 = arith.constant 0 : index
    %c0_172 = arith.constant 0 : index
    %406 = vector.load %arg9[%c0_171, %c0_172] : memref<16x128xf32, #tpu.memory_space<vmem>>, vector<16x128xf32>
    %c0_173 = arith.constant 0 : index
    %c0_174 = arith.constant 0 : index
    %407 = vector.load %arg10[%c0_173, %c0_174] : memref<16x128xf32, #tpu.memory_space<vmem>>, vector<16x128xf32>
    %c8 = arith.constant 8 : index
    %c0_175 = arith.constant 0 : index
    %c0_176 = arith.constant 0 : index
    %408 = vector.load %arg1[%c8, %c0_175, %c0_176] : memref<16x16x512xf32, #tpu.memory_space<vmem>>, vector<1x16x512xf32>
    %409 = vector.shape_cast %408 : vector<1x16x512xf32> to vector<16x512xf32>
    %c0_177 = arith.constant 0 : index
    %c0_178 = arith.constant 0 : index
    %410 = vector.load %arg5[%c0_177, %c0_178] : memref<128x512xf32, #tpu.memory_space<vmem>>, vector<128x512xf32>
    %cst_179 = arith.constant dense<0.000000e+00> : vector<16x512xf32>
    %411 = tpu.matmul %406, %410, %cst_179 {dimension_numbers = #tpu.dot_dimension_numbers<[1], [0], [0], [1], [0, 0, 1, 1], [], []>} : vector<16x128xf32>, vector<128x512xf32>, vector<16x512xf32> -> vector<16x512xf32>
    %412 = arith.addf %409, %411 : vector<16x512xf32>
    %413 = vector.extract_strided_slice %412 {offsets = [0, 0], sizes = [16, 128], strides = [1, 1]} : vector<16x512xf32> to vector<16x128xf32>
    %414 = arith.negf %413 : vector<16x128xf32>
    %415 = math.exp %414 : vector<16x128xf32>
    %cst_180 = arith.constant 1.000000e+00 : f32
    %416 = vector.broadcast %cst_180 : f32 to vector<16x128xf32>
    %417 = arith.addf %416, %415 : vector<16x128xf32>
    %418 = arith.divf %416, %417 : vector<16x128xf32>
    %419 = vector.extract_strided_slice %412 {offsets = [0, 128], sizes = [16, 128], strides = [1, 1]} : vector<16x512xf32> to vector<16x128xf32>
    %420 = arith.negf %419 : vector<16x128xf32>
    %421 = math.exp %420 : vector<16x128xf32>
    %cst_181 = arith.constant 1.000000e+00 : f32
    %422 = vector.broadcast %cst_181 : f32 to vector<16x128xf32>
    %423 = arith.addf %422, %421 : vector<16x128xf32>
    %424 = arith.divf %422, %423 : vector<16x128xf32>
    %425 = vector.extract_strided_slice %412 {offsets = [0, 256], sizes = [16, 128], strides = [1, 1]} : vector<16x512xf32> to vector<16x128xf32>
    %426 = math.tanh %425 : vector<16x128xf32>
    %427 = vector.extract_strided_slice %412 {offsets = [0, 384], sizes = [16, 128], strides = [1, 1]} : vector<16x512xf32> to vector<16x128xf32>
    %428 = arith.negf %427 : vector<16x128xf32>
    %429 = math.exp %428 : vector<16x128xf32>
    %cst_182 = arith.constant 1.000000e+00 : f32
    %430 = vector.broadcast %cst_182 : f32 to vector<16x128xf32>
    %431 = arith.addf %430, %429 : vector<16x128xf32>
    %432 = arith.divf %430, %431 : vector<16x128xf32>
    %433 = arith.mulf %424, %407 : vector<16x128xf32>
    %434 = arith.mulf %418, %426 : vector<16x128xf32>
    %435 = arith.addf %433, %434 : vector<16x128xf32>
    %436 = math.tanh %435 : vector<16x128xf32>
    %437 = arith.mulf %432, %436 : vector<16x128xf32>
    %438 = vector.broadcast %405 : i32 to vector<16x1xi32>
    %439 = arith.cmpi slt, %438, %3 : vector<16x1xi32>
    %440 = vector.shape_cast %439 : vector<16x1xi1> to vector<16x1xi1>
    %441 = vector.broadcast %440 : vector<16x1xi1> to vector<16x128xi1>
    %442 = arith.select %441, %437, %406 : vector<16x128xi1>, vector<16x128xf32>
    %c0_183 = arith.constant 0 : index
    %c0_184 = arith.constant 0 : index
    %443 = vector.load %arg9[%c0_183, %c0_184] : memref<16x128xf32, #tpu.memory_space<vmem>>, vector<16x128xf32>
    tpu.vector_store %arg9[%c0_183, %c0_184], %442 {strides = array<i32>} : memref<16x128xf32, #tpu.memory_space<vmem>>, vector<16x128xf32>,
    %444 = vector.shape_cast %439 : vector<16x1xi1> to vector<16x1xi1>
    %445 = vector.broadcast %444 : vector<16x1xi1> to vector<16x128xi1>
    %446 = arith.select %445, %435, %407 : vector<16x128xi1>, vector<16x128xf32>
    %c0_185 = arith.constant 0 : index
    %c0_186 = arith.constant 0 : index
    %447 = vector.load %arg10[%c0_185, %c0_186] : memref<16x128xf32, #tpu.memory_space<vmem>>, vector<16x128xf32>
    tpu.vector_store %arg10[%c0_185, %c0_186], %446 {strides = array<i32>} : memref<16x128xf32, #tpu.memory_space<vmem>>, vector<16x128xf32>,
    %cst_187 = arith.constant 0.000000e+00 : f32
    %448 = vector.shape_cast %439 : vector<16x1xi1> to vector<16x1xi1>
    %449 = vector.broadcast %448 : vector<16x1xi1> to vector<16x128xi1>
    %450 = vector.broadcast %cst_187 : f32 to vector<16x128xf32>
    %451 = arith.select %449, %437, %450 : vector<16x128xi1>, vector<16x128xf32>
    %452 = vector.shape_cast %451 : vector<16x128xf32> to vector<16x1x128xf32>
    %c0_188 = arith.constant 0 : index
    %c8_189 = arith.constant 8 : index
    %c0_190 = arith.constant 0 : index
    %453 = vector.load %arg6[%c0_188, %c8_189, %c0_190] : memref<16x16x128xf32, #tpu.memory_space<vmem>>, vector<16x1x128xf32>
    tpu.vector_store %arg6[%c0_188, %c8_189, %c0_190], %452 {strides = array<i32>} : memref<16x16x128xf32, #tpu.memory_space<vmem>>, vector<16x1x128xf32>,
    %c16_i32_191 = arith.constant 16 : i32
    %454 = arith.muli %arg0, %c16_i32_191 : i32
    %c9_i32 = arith.constant 9 : i32
    %455 = arith.addi %454, %c9_i32 : i32
    %c0_192 = arith.constant 0 : index
    %c0_193 = arith.constant 0 : index
    %456 = vector.load %arg9[%c0_192, %c0_193] : memref<16x128xf32, #tpu.memory_space<vmem>>, vector<16x128xf32>
    %c0_194 = arith.constant 0 : index
    %c0_195 = arith.constant 0 : index
    %457 = vector.load %arg10[%c0_194, %c0_195] : memref<16x128xf32, #tpu.memory_space<vmem>>, vector<16x128xf32>
    %c9 = arith.constant 9 : index
    %c0_196 = arith.constant 0 : index
    %c0_197 = arith.constant 0 : index
    %458 = vector.load %arg1[%c9, %c0_196, %c0_197] : memref<16x16x512xf32, #tpu.memory_space<vmem>>, vector<1x16x512xf32>
    %459 = vector.shape_cast %458 : vector<1x16x512xf32> to vector<16x512xf32>
    %c0_198 = arith.constant 0 : index
    %c0_199 = arith.constant 0 : index
    %460 = vector.load %arg5[%c0_198, %c0_199] : memref<128x512xf32, #tpu.memory_space<vmem>>, vector<128x512xf32>
    %cst_200 = arith.constant dense<0.000000e+00> : vector<16x512xf32>
    %461 = tpu.matmul %456, %460, %cst_200 {dimension_numbers = #tpu.dot_dimension_numbers<[1], [0], [0], [1], [0, 0, 1, 1], [], []>} : vector<16x128xf32>, vector<128x512xf32>, vector<16x512xf32> -> vector<16x512xf32>
    %462 = arith.addf %459, %461 : vector<16x512xf32>
    %463 = vector.extract_strided_slice %462 {offsets = [0, 0], sizes = [16, 128], strides = [1, 1]} : vector<16x512xf32> to vector<16x128xf32>
    %464 = arith.negf %463 : vector<16x128xf32>
    %465 = math.exp %464 : vector<16x128xf32>
    %cst_201 = arith.constant 1.000000e+00 : f32
    %466 = vector.broadcast %cst_201 : f32 to vector<16x128xf32>
    %467 = arith.addf %466, %465 : vector<16x128xf32>
    %468 = arith.divf %466, %467 : vector<16x128xf32>
    %469 = vector.extract_strided_slice %462 {offsets = [0, 128], sizes = [16, 128], strides = [1, 1]} : vector<16x512xf32> to vector<16x128xf32>
    %470 = arith.negf %469 : vector<16x128xf32>
    %471 = math.exp %470 : vector<16x128xf32>
    %cst_202 = arith.constant 1.000000e+00 : f32
    %472 = vector.broadcast %cst_202 : f32 to vector<16x128xf32>
    %473 = arith.addf %472, %471 : vector<16x128xf32>
    %474 = arith.divf %472, %473 : vector<16x128xf32>
    %475 = vector.extract_strided_slice %462 {offsets = [0, 256], sizes = [16, 128], strides = [1, 1]} : vector<16x512xf32> to vector<16x128xf32>
    %476 = math.tanh %475 : vector<16x128xf32>
    %477 = vector.extract_strided_slice %462 {offsets = [0, 384], sizes = [16, 128], strides = [1, 1]} : vector<16x512xf32> to vector<16x128xf32>
    %478 = arith.negf %477 : vector<16x128xf32>
    %479 = math.exp %478 : vector<16x128xf32>
    %cst_203 = arith.constant 1.000000e+00 : f32
    %480 = vector.broadcast %cst_203 : f32 to vector<16x128xf32>
    %481 = arith.addf %480, %479 : vector<16x128xf32>
    %482 = arith.divf %480, %481 : vector<16x128xf32>
    %483 = arith.mulf %474, %457 : vector<16x128xf32>
    %484 = arith.mulf %468, %476 : vector<16x128xf32>
    %485 = arith.addf %483, %484 : vector<16x128xf32>
    %486 = math.tanh %485 : vector<16x128xf32>
    %487 = arith.mulf %482, %486 : vector<16x128xf32>
    %488 = vector.broadcast %455 : i32 to vector<16x1xi32>
    %489 = arith.cmpi slt, %488, %3 : vector<16x1xi32>
    %490 = vector.shape_cast %489 : vector<16x1xi1> to vector<16x1xi1>
    %491 = vector.broadcast %490 : vector<16x1xi1> to vector<16x128xi1>
    %492 = arith.select %491, %487, %456 : vector<16x128xi1>, vector<16x128xf32>
    %c0_204 = arith.constant 0 : index
    %c0_205 = arith.constant 0 : index
    %493 = vector.load %arg9[%c0_204, %c0_205] : memref<16x128xf32, #tpu.memory_space<vmem>>, vector<16x128xf32>
    tpu.vector_store %arg9[%c0_204, %c0_205], %492 {strides = array<i32>} : memref<16x128xf32, #tpu.memory_space<vmem>>, vector<16x128xf32>,
    %494 = vector.shape_cast %489 : vector<16x1xi1> to vector<16x1xi1>
    %495 = vector.broadcast %494 : vector<16x1xi1> to vector<16x128xi1>
    %496 = arith.select %495, %485, %457 : vector<16x128xi1>, vector<16x128xf32>
    %c0_206 = arith.constant 0 : index
    %c0_207 = arith.constant 0 : index
    %497 = vector.load %arg10[%c0_206, %c0_207] : memref<16x128xf32, #tpu.memory_space<vmem>>, vector<16x128xf32>
    tpu.vector_store %arg10[%c0_206, %c0_207], %496 {strides = array<i32>} : memref<16x128xf32, #tpu.memory_space<vmem>>, vector<16x128xf32>,
    %cst_208 = arith.constant 0.000000e+00 : f32
    %498 = vector.shape_cast %489 : vector<16x1xi1> to vector<16x1xi1>
    %499 = vector.broadcast %498 : vector<16x1xi1> to vector<16x128xi1>
    %500 = vector.broadcast %cst_208 : f32 to vector<16x128xf32>
    %501 = arith.select %499, %487, %500 : vector<16x128xi1>, vector<16x128xf32>
    %502 = vector.shape_cast %501 : vector<16x128xf32> to vector<16x1x128xf32>
    %c0_209 = arith.constant 0 : index
    %c9_210 = arith.constant 9 : index
    %c0_211 = arith.constant 0 : index
    %503 = vector.load %arg6[%c0_209, %c9_210, %c0_211] : memref<16x16x128xf32, #tpu.memory_space<vmem>>, vector<16x1x128xf32>
    tpu.vector_store %arg6[%c0_209, %c9_210, %c0_211], %502 {strides = array<i32>} : memref<16x16x128xf32, #tpu.memory_space<vmem>>, vector<16x1x128xf32>,
    %c16_i32_212 = arith.constant 16 : i32
    %504 = arith.muli %arg0, %c16_i32_212 : i32
    %c10_i32 = arith.constant 10 : i32
    %505 = arith.addi %504, %c10_i32 : i32
    %c0_213 = arith.constant 0 : index
    %c0_214 = arith.constant 0 : index
    %506 = vector.load %arg9[%c0_213, %c0_214] : memref<16x128xf32, #tpu.memory_space<vmem>>, vector<16x128xf32>
    %c0_215 = arith.constant 0 : index
    %c0_216 = arith.constant 0 : index
    %507 = vector.load %arg10[%c0_215, %c0_216] : memref<16x128xf32, #tpu.memory_space<vmem>>, vector<16x128xf32>
    %c10 = arith.constant 10 : index
    %c0_217 = arith.constant 0 : index
    %c0_218 = arith.constant 0 : index
    %508 = vector.load %arg1[%c10, %c0_217, %c0_218] : memref<16x16x512xf32, #tpu.memory_space<vmem>>, vector<1x16x512xf32>
    %509 = vector.shape_cast %508 : vector<1x16x512xf32> to vector<16x512xf32>
    %c0_219 = arith.constant 0 : index
    %c0_220 = arith.constant 0 : index
    %510 = vector.load %arg5[%c0_219, %c0_220] : memref<128x512xf32, #tpu.memory_space<vmem>>, vector<128x512xf32>
    %cst_221 = arith.constant dense<0.000000e+00> : vector<16x512xf32>
    %511 = tpu.matmul %506, %510, %cst_221 {dimension_numbers = #tpu.dot_dimension_numbers<[1], [0], [0], [1], [0, 0, 1, 1], [], []>} : vector<16x128xf32>, vector<128x512xf32>, vector<16x512xf32> -> vector<16x512xf32>
    %512 = arith.addf %509, %511 : vector<16x512xf32>
    %513 = vector.extract_strided_slice %512 {offsets = [0, 0], sizes = [16, 128], strides = [1, 1]} : vector<16x512xf32> to vector<16x128xf32>
    %514 = arith.negf %513 : vector<16x128xf32>
    %515 = math.exp %514 : vector<16x128xf32>
    %cst_222 = arith.constant 1.000000e+00 : f32
    %516 = vector.broadcast %cst_222 : f32 to vector<16x128xf32>
    %517 = arith.addf %516, %515 : vector<16x128xf32>
    %518 = arith.divf %516, %517 : vector<16x128xf32>
    %519 = vector.extract_strided_slice %512 {offsets = [0, 128], sizes = [16, 128], strides = [1, 1]} : vector<16x512xf32> to vector<16x128xf32>
    %520 = arith.negf %519 : vector<16x128xf32>
    %521 = math.exp %520 : vector<16x128xf32>
    %cst_223 = arith.constant 1.000000e+00 : f32
    %522 = vector.broadcast %cst_223 : f32 to vector<16x128xf32>
    %523 = arith.addf %522, %521 : vector<16x128xf32>
    %524 = arith.divf %522, %523 : vector<16x128xf32>
    %525 = vector.extract_strided_slice %512 {offsets = [0, 256], sizes = [16, 128], strides = [1, 1]} : vector<16x512xf32> to vector<16x128xf32>
    %526 = math.tanh %525 : vector<16x128xf32>
    %527 = vector.extract_strided_slice %512 {offsets = [0, 384], sizes = [16, 128], strides = [1, 1]} : vector<16x512xf32> to vector<16x128xf32>
    %528 = arith.negf %527 : vector<16x128xf32>
    %529 = math.exp %528 : vector<16x128xf32>
    %cst_224 = arith.constant 1.000000e+00 : f32
    %530 = vector.broadcast %cst_224 : f32 to vector<16x128xf32>
    %531 = arith.addf %530, %529 : vector<16x128xf32>
    %532 = arith.divf %530, %531 : vector<16x128xf32>
    %533 = arith.mulf %524, %507 : vector<16x128xf32>
    %534 = arith.mulf %518, %526 : vector<16x128xf32>
    %535 = arith.addf %533, %534 : vector<16x128xf32>
    %536 = math.tanh %535 : vector<16x128xf32>
    %537 = arith.mulf %532, %536 : vector<16x128xf32>
    %538 = vector.broadcast %505 : i32 to vector<16x1xi32>
    %539 = arith.cmpi slt, %538, %3 : vector<16x1xi32>
    %540 = vector.shape_cast %539 : vector<16x1xi1> to vector<16x1xi1>
    %541 = vector.broadcast %540 : vector<16x1xi1> to vector<16x128xi1>
    %542 = arith.select %541, %537, %506 : vector<16x128xi1>, vector<16x128xf32>
    %c0_225 = arith.constant 0 : index
    %c0_226 = arith.constant 0 : index
    %543 = vector.load %arg9[%c0_225, %c0_226] : memref<16x128xf32, #tpu.memory_space<vmem>>, vector<16x128xf32>
    tpu.vector_store %arg9[%c0_225, %c0_226], %542 {strides = array<i32>} : memref<16x128xf32, #tpu.memory_space<vmem>>, vector<16x128xf32>,
    %544 = vector.shape_cast %539 : vector<16x1xi1> to vector<16x1xi1>
    %545 = vector.broadcast %544 : vector<16x1xi1> to vector<16x128xi1>
    %546 = arith.select %545, %535, %507 : vector<16x128xi1>, vector<16x128xf32>
    %c0_227 = arith.constant 0 : index
    %c0_228 = arith.constant 0 : index
    %547 = vector.load %arg10[%c0_227, %c0_228] : memref<16x128xf32, #tpu.memory_space<vmem>>, vector<16x128xf32>
    tpu.vector_store %arg10[%c0_227, %c0_228], %546 {strides = array<i32>} : memref<16x128xf32, #tpu.memory_space<vmem>>, vector<16x128xf32>,
    %cst_229 = arith.constant 0.000000e+00 : f32
    %548 = vector.shape_cast %539 : vector<16x1xi1> to vector<16x1xi1>
    %549 = vector.broadcast %548 : vector<16x1xi1> to vector<16x128xi1>
    %550 = vector.broadcast %cst_229 : f32 to vector<16x128xf32>
    %551 = arith.select %549, %537, %550 : vector<16x128xi1>, vector<16x128xf32>
    %552 = vector.shape_cast %551 : vector<16x128xf32> to vector<16x1x128xf32>
    %c0_230 = arith.constant 0 : index
    %c10_231 = arith.constant 10 : index
    %c0_232 = arith.constant 0 : index
    %553 = vector.load %arg6[%c0_230, %c10_231, %c0_232] : memref<16x16x128xf32, #tpu.memory_space<vmem>>, vector<16x1x128xf32>
    tpu.vector_store %arg6[%c0_230, %c10_231, %c0_232], %552 {strides = array<i32>} : memref<16x16x128xf32, #tpu.memory_space<vmem>>, vector<16x1x128xf32>,
    %c16_i32_233 = arith.constant 16 : i32
    %554 = arith.muli %arg0, %c16_i32_233 : i32
    %c11_i32 = arith.constant 11 : i32
    %555 = arith.addi %554, %c11_i32 : i32
    %c0_234 = arith.constant 0 : index
    %c0_235 = arith.constant 0 : index
    %556 = vector.load %arg9[%c0_234, %c0_235] : memref<16x128xf32, #tpu.memory_space<vmem>>, vector<16x128xf32>
    %c0_236 = arith.constant 0 : index
    %c0_237 = arith.constant 0 : index
    %557 = vector.load %arg10[%c0_236, %c0_237] : memref<16x128xf32, #tpu.memory_space<vmem>>, vector<16x128xf32>
    %c11 = arith.constant 11 : index
    %c0_238 = arith.constant 0 : index
    %c0_239 = arith.constant 0 : index
    %558 = vector.load %arg1[%c11, %c0_238, %c0_239] : memref<16x16x512xf32, #tpu.memory_space<vmem>>, vector<1x16x512xf32>
    %559 = vector.shape_cast %558 : vector<1x16x512xf32> to vector<16x512xf32>
    %c0_240 = arith.constant 0 : index
    %c0_241 = arith.constant 0 : index
    %560 = vector.load %arg5[%c0_240, %c0_241] : memref<128x512xf32, #tpu.memory_space<vmem>>, vector<128x512xf32>
    %cst_242 = arith.constant dense<0.000000e+00> : vector<16x512xf32>
    %561 = tpu.matmul %556, %560, %cst_242 {dimension_numbers = #tpu.dot_dimension_numbers<[1], [0], [0], [1], [0, 0, 1, 1], [], []>} : vector<16x128xf32>, vector<128x512xf32>, vector<16x512xf32> -> vector<16x512xf32>
    %562 = arith.addf %559, %561 : vector<16x512xf32>
    %563 = vector.extract_strided_slice %562 {offsets = [0, 0], sizes = [16, 128], strides = [1, 1]} : vector<16x512xf32> to vector<16x128xf32>
    %564 = arith.negf %563 : vector<16x128xf32>
    %565 = math.exp %564 : vector<16x128xf32>
    %cst_243 = arith.constant 1.000000e+00 : f32
    %566 = vector.broadcast %cst_243 : f32 to vector<16x128xf32>
    %567 = arith.addf %566, %565 : vector<16x128xf32>
    %568 = arith.divf %566, %567 : vector<16x128xf32>
    %569 = vector.extract_strided_slice %562 {offsets = [0, 128], sizes = [16, 128], strides = [1, 1]} : vector<16x512xf32> to vector<16x128xf32>
    %570 = arith.negf %569 : vector<16x128xf32>
    %571 = math.exp %570 : vector<16x128xf32>
    %cst_244 = arith.constant 1.000000e+00 : f32
    %572 = vector.broadcast %cst_244 : f32 to vector<16x128xf32>
    %573 = arith.addf %572, %571 : vector<16x128xf32>
    %574 = arith.divf %572, %573 : vector<16x128xf32>
    %575 = vector.extract_strided_slice %562 {offsets = [0, 256], sizes = [16, 128], strides = [1, 1]} : vector<16x512xf32> to vector<16x128xf32>
    %576 = math.tanh %575 : vector<16x128xf32>
    %577 = vector.extract_strided_slice %562 {offsets = [0, 384], sizes = [16, 128], strides = [1, 1]} : vector<16x512xf32> to vector<16x128xf32>
    %578 = arith.negf %577 : vector<16x128xf32>
    %579 = math.exp %578 : vector<16x128xf32>
    %cst_245 = arith.constant 1.000000e+00 : f32
    %580 = vector.broadcast %cst_245 : f32 to vector<16x128xf32>
    %581 = arith.addf %580, %579 : vector<16x128xf32>
    %582 = arith.divf %580, %581 : vector<16x128xf32>
    %583 = arith.mulf %574, %557 : vector<16x128xf32>
    %584 = arith.mulf %568, %576 : vector<16x128xf32>
    %585 = arith.addf %583, %584 : vector<16x128xf32>
    %586 = math.tanh %585 : vector<16x128xf32>
    %587 = arith.mulf %582, %586 : vector<16x128xf32>
    %588 = vector.broadcast %555 : i32 to vector<16x1xi32>
    %589 = arith.cmpi slt, %588, %3 : vector<16x1xi32>
    %590 = vector.shape_cast %589 : vector<16x1xi1> to vector<16x1xi1>
    %591 = vector.broadcast %590 : vector<16x1xi1> to vector<16x128xi1>
    %592 = arith.select %591, %587, %556 : vector<16x128xi1>, vector<16x128xf32>
    %c0_246 = arith.constant 0 : index
    %c0_247 = arith.constant 0 : index
    %593 = vector.load %arg9[%c0_246, %c0_247] : memref<16x128xf32, #tpu.memory_space<vmem>>, vector<16x128xf32>
    tpu.vector_store %arg9[%c0_246, %c0_247], %592 {strides = array<i32>} : memref<16x128xf32, #tpu.memory_space<vmem>>, vector<16x128xf32>,
    %594 = vector.shape_cast %589 : vector<16x1xi1> to vector<16x1xi1>
    %595 = vector.broadcast %594 : vector<16x1xi1> to vector<16x128xi1>
    %596 = arith.select %595, %585, %557 : vector<16x128xi1>, vector<16x128xf32>
    %c0_248 = arith.constant 0 : index
    %c0_249 = arith.constant 0 : index
    %597 = vector.load %arg10[%c0_248, %c0_249] : memref<16x128xf32, #tpu.memory_space<vmem>>, vector<16x128xf32>
    tpu.vector_store %arg10[%c0_248, %c0_249], %596 {strides = array<i32>} : memref<16x128xf32, #tpu.memory_space<vmem>>, vector<16x128xf32>,
    %cst_250 = arith.constant 0.000000e+00 : f32
    %598 = vector.shape_cast %589 : vector<16x1xi1> to vector<16x1xi1>
    %599 = vector.broadcast %598 : vector<16x1xi1> to vector<16x128xi1>
    %600 = vector.broadcast %cst_250 : f32 to vector<16x128xf32>
    %601 = arith.select %599, %587, %600 : vector<16x128xi1>, vector<16x128xf32>
    %602 = vector.shape_cast %601 : vector<16x128xf32> to vector<16x1x128xf32>
    %c0_251 = arith.constant 0 : index
    %c11_252 = arith.constant 11 : index
    %c0_253 = arith.constant 0 : index
    %603 = vector.load %arg6[%c0_251, %c11_252, %c0_253] : memref<16x16x128xf32, #tpu.memory_space<vmem>>, vector<16x1x128xf32>
    tpu.vector_store %arg6[%c0_251, %c11_252, %c0_253], %602 {strides = array<i32>} : memref<16x16x128xf32, #tpu.memory_space<vmem>>, vector<16x1x128xf32>,
    %c16_i32_254 = arith.constant 16 : i32
    %604 = arith.muli %arg0, %c16_i32_254 : i32
    %c12_i32 = arith.constant 12 : i32
    %605 = arith.addi %604, %c12_i32 : i32
    %c0_255 = arith.constant 0 : index
    %c0_256 = arith.constant 0 : index
    %606 = vector.load %arg9[%c0_255, %c0_256] : memref<16x128xf32, #tpu.memory_space<vmem>>, vector<16x128xf32>
    %c0_257 = arith.constant 0 : index
    %c0_258 = arith.constant 0 : index
    %607 = vector.load %arg10[%c0_257, %c0_258] : memref<16x128xf32, #tpu.memory_space<vmem>>, vector<16x128xf32>
    %c12 = arith.constant 12 : index
    %c0_259 = arith.constant 0 : index
    %c0_260 = arith.constant 0 : index
    %608 = vector.load %arg1[%c12, %c0_259, %c0_260] : memref<16x16x512xf32, #tpu.memory_space<vmem>>, vector<1x16x512xf32>
    %609 = vector.shape_cast %608 : vector<1x16x512xf32> to vector<16x512xf32>
    %c0_261 = arith.constant 0 : index
    %c0_262 = arith.constant 0 : index
    %610 = vector.load %arg5[%c0_261, %c0_262] : memref<128x512xf32, #tpu.memory_space<vmem>>, vector<128x512xf32>
    %cst_263 = arith.constant dense<0.000000e+00> : vector<16x512xf32>
    %611 = tpu.matmul %606, %610, %cst_263 {dimension_numbers = #tpu.dot_dimension_numbers<[1], [0], [0], [1], [0, 0, 1, 1], [], []>} : vector<16x128xf32>, vector<128x512xf32>, vector<16x512xf32> -> vector<16x512xf32>
    %612 = arith.addf %609, %611 : vector<16x512xf32>
    %613 = vector.extract_strided_slice %612 {offsets = [0, 0], sizes = [16, 128], strides = [1, 1]} : vector<16x512xf32> to vector<16x128xf32>
    %614 = arith.negf %613 : vector<16x128xf32>
    %615 = math.exp %614 : vector<16x128xf32>
    %cst_264 = arith.constant 1.000000e+00 : f32
    %616 = vector.broadcast %cst_264 : f32 to vector<16x128xf32>
    %617 = arith.addf %616, %615 : vector<16x128xf32>
    %618 = arith.divf %616, %617 : vector<16x128xf32>
    %619 = vector.extract_strided_slice %612 {offsets = [0, 128], sizes = [16, 128], strides = [1, 1]} : vector<16x512xf32> to vector<16x128xf32>
    %620 = arith.negf %619 : vector<16x128xf32>
    %621 = math.exp %620 : vector<16x128xf32>
    %cst_265 = arith.constant 1.000000e+00 : f32
    %622 = vector.broadcast %cst_265 : f32 to vector<16x128xf32>
    %623 = arith.addf %622, %621 : vector<16x128xf32>
    %624 = arith.divf %622, %623 : vector<16x128xf32>
    %625 = vector.extract_strided_slice %612 {offsets = [0, 256], sizes = [16, 128], strides = [1, 1]} : vector<16x512xf32> to vector<16x128xf32>
    %626 = math.tanh %625 : vector<16x128xf32>
    %627 = vector.extract_strided_slice %612 {offsets = [0, 384], sizes = [16, 128], strides = [1, 1]} : vector<16x512xf32> to vector<16x128xf32>
    %628 = arith.negf %627 : vector<16x128xf32>
    %629 = math.exp %628 : vector<16x128xf32>
    %cst_266 = arith.constant 1.000000e+00 : f32
    %630 = vector.broadcast %cst_266 : f32 to vector<16x128xf32>
    %631 = arith.addf %630, %629 : vector<16x128xf32>
    %632 = arith.divf %630, %631 : vector<16x128xf32>
    %633 = arith.mulf %624, %607 : vector<16x128xf32>
    %634 = arith.mulf %618, %626 : vector<16x128xf32>
    %635 = arith.addf %633, %634 : vector<16x128xf32>
    %636 = math.tanh %635 : vector<16x128xf32>
    %637 = arith.mulf %632, %636 : vector<16x128xf32>
    %638 = vector.broadcast %605 : i32 to vector<16x1xi32>
    %639 = arith.cmpi slt, %638, %3 : vector<16x1xi32>
    %640 = vector.shape_cast %639 : vector<16x1xi1> to vector<16x1xi1>
    %641 = vector.broadcast %640 : vector<16x1xi1> to vector<16x128xi1>
    %642 = arith.select %641, %637, %606 : vector<16x128xi1>, vector<16x128xf32>
    %c0_267 = arith.constant 0 : index
    %c0_268 = arith.constant 0 : index
    %643 = vector.load %arg9[%c0_267, %c0_268] : memref<16x128xf32, #tpu.memory_space<vmem>>, vector<16x128xf32>
    tpu.vector_store %arg9[%c0_267, %c0_268], %642 {strides = array<i32>} : memref<16x128xf32, #tpu.memory_space<vmem>>, vector<16x128xf32>,
    %644 = vector.shape_cast %639 : vector<16x1xi1> to vector<16x1xi1>
    %645 = vector.broadcast %644 : vector<16x1xi1> to vector<16x128xi1>
    %646 = arith.select %645, %635, %607 : vector<16x128xi1>, vector<16x128xf32>
    %c0_269 = arith.constant 0 : index
    %c0_270 = arith.constant 0 : index
    %647 = vector.load %arg10[%c0_269, %c0_270] : memref<16x128xf32, #tpu.memory_space<vmem>>, vector<16x128xf32>
    tpu.vector_store %arg10[%c0_269, %c0_270], %646 {strides = array<i32>} : memref<16x128xf32, #tpu.memory_space<vmem>>, vector<16x128xf32>,
    %cst_271 = arith.constant 0.000000e+00 : f32
    %648 = vector.shape_cast %639 : vector<16x1xi1> to vector<16x1xi1>
    %649 = vector.broadcast %648 : vector<16x1xi1> to vector<16x128xi1>
    %650 = vector.broadcast %cst_271 : f32 to vector<16x128xf32>
    %651 = arith.select %649, %637, %650 : vector<16x128xi1>, vector<16x128xf32>
    %652 = vector.shape_cast %651 : vector<16x128xf32> to vector<16x1x128xf32>
    %c0_272 = arith.constant 0 : index
    %c12_273 = arith.constant 12 : index
    %c0_274 = arith.constant 0 : index
    %653 = vector.load %arg6[%c0_272, %c12_273, %c0_274] : memref<16x16x128xf32, #tpu.memory_space<vmem>>, vector<16x1x128xf32>
    tpu.vector_store %arg6[%c0_272, %c12_273, %c0_274], %652 {strides = array<i32>} : memref<16x16x128xf32, #tpu.memory_space<vmem>>, vector<16x1x128xf32>,
    %c16_i32_275 = arith.constant 16 : i32
    %654 = arith.muli %arg0, %c16_i32_275 : i32
    %c13_i32 = arith.constant 13 : i32
    %655 = arith.addi %654, %c13_i32 : i32
    %c0_276 = arith.constant 0 : index
    %c0_277 = arith.constant 0 : index
    %656 = vector.load %arg9[%c0_276, %c0_277] : memref<16x128xf32, #tpu.memory_space<vmem>>, vector<16x128xf32>
    %c0_278 = arith.constant 0 : index
    %c0_279 = arith.constant 0 : index
    %657 = vector.load %arg10[%c0_278, %c0_279] : memref<16x128xf32, #tpu.memory_space<vmem>>, vector<16x128xf32>
    %c13 = arith.constant 13 : index
    %c0_280 = arith.constant 0 : index
    %c0_281 = arith.constant 0 : index
    %658 = vector.load %arg1[%c13, %c0_280, %c0_281] : memref<16x16x512xf32, #tpu.memory_space<vmem>>, vector<1x16x512xf32>
    %659 = vector.shape_cast %658 : vector<1x16x512xf32> to vector<16x512xf32>
    %c0_282 = arith.constant 0 : index
    %c0_283 = arith.constant 0 : index
    %660 = vector.load %arg5[%c0_282, %c0_283] : memref<128x512xf32, #tpu.memory_space<vmem>>, vector<128x512xf32>
    %cst_284 = arith.constant dense<0.000000e+00> : vector<16x512xf32>
    %661 = tpu.matmul %656, %660, %cst_284 {dimension_numbers = #tpu.dot_dimension_numbers<[1], [0], [0], [1], [0, 0, 1, 1], [], []>} : vector<16x128xf32>, vector<128x512xf32>, vector<16x512xf32> -> vector<16x512xf32>
    %662 = arith.addf %659, %661 : vector<16x512xf32>
    %663 = vector.extract_strided_slice %662 {offsets = [0, 0], sizes = [16, 128], strides = [1, 1]} : vector<16x512xf32> to vector<16x128xf32>
    %664 = arith.negf %663 : vector<16x128xf32>
    %665 = math.exp %664 : vector<16x128xf32>
    %cst_285 = arith.constant 1.000000e+00 : f32
    %666 = vector.broadcast %cst_285 : f32 to vector<16x128xf32>
    %667 = arith.addf %666, %665 : vector<16x128xf32>
    %668 = arith.divf %666, %667 : vector<16x128xf32>
    %669 = vector.extract_strided_slice %662 {offsets = [0, 128], sizes = [16, 128], strides = [1, 1]} : vector<16x512xf32> to vector<16x128xf32>
    %670 = arith.negf %669 : vector<16x128xf32>
    %671 = math.exp %670 : vector<16x128xf32>
    %cst_286 = arith.constant 1.000000e+00 : f32
    %672 = vector.broadcast %cst_286 : f32 to vector<16x128xf32>
    %673 = arith.addf %672, %671 : vector<16x128xf32>
    %674 = arith.divf %672, %673 : vector<16x128xf32>
    %675 = vector.extract_strided_slice %662 {offsets = [0, 256], sizes = [16, 128], strides = [1, 1]} : vector<16x512xf32> to vector<16x128xf32>
    %676 = math.tanh %675 : vector<16x128xf32>
    %677 = vector.extract_strided_slice %662 {offsets = [0, 384], sizes = [16, 128], strides = [1, 1]} : vector<16x512xf32> to vector<16x128xf32>
    %678 = arith.negf %677 : vector<16x128xf32>
    %679 = math.exp %678 : vector<16x128xf32>
    %cst_287 = arith.constant 1.000000e+00 : f32
    %680 = vector.broadcast %cst_287 : f32 to vector<16x128xf32>
    %681 = arith.addf %680, %679 : vector<16x128xf32>
    %682 = arith.divf %680, %681 : vector<16x128xf32>
    %683 = arith.mulf %674, %657 : vector<16x128xf32>
    %684 = arith.mulf %668, %676 : vector<16x128xf32>
    %685 = arith.addf %683, %684 : vector<16x128xf32>
    %686 = math.tanh %685 : vector<16x128xf32>
    %687 = arith.mulf %682, %686 : vector<16x128xf32>
    %688 = vector.broadcast %655 : i32 to vector<16x1xi32>
    %689 = arith.cmpi slt, %688, %3 : vector<16x1xi32>
    %690 = vector.shape_cast %689 : vector<16x1xi1> to vector<16x1xi1>
    %691 = vector.broadcast %690 : vector<16x1xi1> to vector<16x128xi1>
    %692 = arith.select %691, %687, %656 : vector<16x128xi1>, vector<16x128xf32>
    %c0_288 = arith.constant 0 : index
    %c0_289 = arith.constant 0 : index
    %693 = vector.load %arg9[%c0_288, %c0_289] : memref<16x128xf32, #tpu.memory_space<vmem>>, vector<16x128xf32>
    tpu.vector_store %arg9[%c0_288, %c0_289], %692 {strides = array<i32>} : memref<16x128xf32, #tpu.memory_space<vmem>>, vector<16x128xf32>,
    %694 = vector.shape_cast %689 : vector<16x1xi1> to vector<16x1xi1>
    %695 = vector.broadcast %694 : vector<16x1xi1> to vector<16x128xi1>
    %696 = arith.select %695, %685, %657 : vector<16x128xi1>, vector<16x128xf32>
    %c0_290 = arith.constant 0 : index
    %c0_291 = arith.constant 0 : index
    %697 = vector.load %arg10[%c0_290, %c0_291] : memref<16x128xf32, #tpu.memory_space<vmem>>, vector<16x128xf32>
    tpu.vector_store %arg10[%c0_290, %c0_291], %696 {strides = array<i32>} : memref<16x128xf32, #tpu.memory_space<vmem>>, vector<16x128xf32>,
    %cst_292 = arith.constant 0.000000e+00 : f32
    %698 = vector.shape_cast %689 : vector<16x1xi1> to vector<16x1xi1>
    %699 = vector.broadcast %698 : vector<16x1xi1> to vector<16x128xi1>
    %700 = vector.broadcast %cst_292 : f32 to vector<16x128xf32>
    %701 = arith.select %699, %687, %700 : vector<16x128xi1>, vector<16x128xf32>
    %702 = vector.shape_cast %701 : vector<16x128xf32> to vector<16x1x128xf32>
    %c0_293 = arith.constant 0 : index
    %c13_294 = arith.constant 13 : index
    %c0_295 = arith.constant 0 : index
    %703 = vector.load %arg6[%c0_293, %c13_294, %c0_295] : memref<16x16x128xf32, #tpu.memory_space<vmem>>, vector<16x1x128xf32>
    tpu.vector_store %arg6[%c0_293, %c13_294, %c0_295], %702 {strides = array<i32>} : memref<16x16x128xf32, #tpu.memory_space<vmem>>, vector<16x1x128xf32>,
    %c16_i32_296 = arith.constant 16 : i32
    %704 = arith.muli %arg0, %c16_i32_296 : i32
    %c14_i32 = arith.constant 14 : i32
    %705 = arith.addi %704, %c14_i32 : i32
    %c0_297 = arith.constant 0 : index
    %c0_298 = arith.constant 0 : index
    %706 = vector.load %arg9[%c0_297, %c0_298] : memref<16x128xf32, #tpu.memory_space<vmem>>, vector<16x128xf32>
    %c0_299 = arith.constant 0 : index
    %c0_300 = arith.constant 0 : index
    %707 = vector.load %arg10[%c0_299, %c0_300] : memref<16x128xf32, #tpu.memory_space<vmem>>, vector<16x128xf32>
    %c14 = arith.constant 14 : index
    %c0_301 = arith.constant 0 : index
    %c0_302 = arith.constant 0 : index
    %708 = vector.load %arg1[%c14, %c0_301, %c0_302] : memref<16x16x512xf32, #tpu.memory_space<vmem>>, vector<1x16x512xf32>
    %709 = vector.shape_cast %708 : vector<1x16x512xf32> to vector<16x512xf32>
    %c0_303 = arith.constant 0 : index
    %c0_304 = arith.constant 0 : index
    %710 = vector.load %arg5[%c0_303, %c0_304] : memref<128x512xf32, #tpu.memory_space<vmem>>, vector<128x512xf32>
    %cst_305 = arith.constant dense<0.000000e+00> : vector<16x512xf32>
    %711 = tpu.matmul %706, %710, %cst_305 {dimension_numbers = #tpu.dot_dimension_numbers<[1], [0], [0], [1], [0, 0, 1, 1], [], []>} : vector<16x128xf32>, vector<128x512xf32>, vector<16x512xf32> -> vector<16x512xf32>
    %712 = arith.addf %709, %711 : vector<16x512xf32>
    %713 = vector.extract_strided_slice %712 {offsets = [0, 0], sizes = [16, 128], strides = [1, 1]} : vector<16x512xf32> to vector<16x128xf32>
    %714 = arith.negf %713 : vector<16x128xf32>
    %715 = math.exp %714 : vector<16x128xf32>
    %cst_306 = arith.constant 1.000000e+00 : f32
    %716 = vector.broadcast %cst_306 : f32 to vector<16x128xf32>
    %717 = arith.addf %716, %715 : vector<16x128xf32>
    %718 = arith.divf %716, %717 : vector<16x128xf32>
    %719 = vector.extract_strided_slice %712 {offsets = [0, 128], sizes = [16, 128], strides = [1, 1]} : vector<16x512xf32> to vector<16x128xf32>
    %720 = arith.negf %719 : vector<16x128xf32>
    %721 = math.exp %720 : vector<16x128xf32>
    %cst_307 = arith.constant 1.000000e+00 : f32
    %722 = vector.broadcast %cst_307 : f32 to vector<16x128xf32>
    %723 = arith.addf %722, %721 : vector<16x128xf32>
    %724 = arith.divf %722, %723 : vector<16x128xf32>
    %725 = vector.extract_strided_slice %712 {offsets = [0, 256], sizes = [16, 128], strides = [1, 1]} : vector<16x512xf32> to vector<16x128xf32>
    %726 = math.tanh %725 : vector<16x128xf32>
    %727 = vector.extract_strided_slice %712 {offsets = [0, 384], sizes = [16, 128], strides = [1, 1]} : vector<16x512xf32> to vector<16x128xf32>
    %728 = arith.negf %727 : vector<16x128xf32>
    %729 = math.exp %728 : vector<16x128xf32>
    %cst_308 = arith.constant 1.000000e+00 : f32
    %730 = vector.broadcast %cst_308 : f32 to vector<16x128xf32>
    %731 = arith.addf %730, %729 : vector<16x128xf32>
    %732 = arith.divf %730, %731 : vector<16x128xf32>
    %733 = arith.mulf %724, %707 : vector<16x128xf32>
    %734 = arith.mulf %718, %726 : vector<16x128xf32>
    %735 = arith.addf %733, %734 : vector<16x128xf32>
    %736 = math.tanh %735 : vector<16x128xf32>
    %737 = arith.mulf %732, %736 : vector<16x128xf32>
    %738 = vector.broadcast %705 : i32 to vector<16x1xi32>
    %739 = arith.cmpi slt, %738, %3 : vector<16x1xi32>
    %740 = vector.shape_cast %739 : vector<16x1xi1> to vector<16x1xi1>
    %741 = vector.broadcast %740 : vector<16x1xi1> to vector<16x128xi1>
    %742 = arith.select %741, %737, %706 : vector<16x128xi1>, vector<16x128xf32>
    %c0_309 = arith.constant 0 : index
    %c0_310 = arith.constant 0 : index
    %743 = vector.load %arg9[%c0_309, %c0_310] : memref<16x128xf32, #tpu.memory_space<vmem>>, vector<16x128xf32>
    tpu.vector_store %arg9[%c0_309, %c0_310], %742 {strides = array<i32>} : memref<16x128xf32, #tpu.memory_space<vmem>>, vector<16x128xf32>,
    %744 = vector.shape_cast %739 : vector<16x1xi1> to vector<16x1xi1>
    %745 = vector.broadcast %744 : vector<16x1xi1> to vector<16x128xi1>
    %746 = arith.select %745, %735, %707 : vector<16x128xi1>, vector<16x128xf32>
    %c0_311 = arith.constant 0 : index
    %c0_312 = arith.constant 0 : index
    %747 = vector.load %arg10[%c0_311, %c0_312] : memref<16x128xf32, #tpu.memory_space<vmem>>, vector<16x128xf32>
    tpu.vector_store %arg10[%c0_311, %c0_312], %746 {strides = array<i32>} : memref<16x128xf32, #tpu.memory_space<vmem>>, vector<16x128xf32>,
    %cst_313 = arith.constant 0.000000e+00 : f32
    %748 = vector.shape_cast %739 : vector<16x1xi1> to vector<16x1xi1>
    %749 = vector.broadcast %748 : vector<16x1xi1> to vector<16x128xi1>
    %750 = vector.broadcast %cst_313 : f32 to vector<16x128xf32>
    %751 = arith.select %749, %737, %750 : vector<16x128xi1>, vector<16x128xf32>
    %752 = vector.shape_cast %751 : vector<16x128xf32> to vector<16x1x128xf32>
    %c0_314 = arith.constant 0 : index
    %c14_315 = arith.constant 14 : index
    %c0_316 = arith.constant 0 : index
    %753 = vector.load %arg6[%c0_314, %c14_315, %c0_316] : memref<16x16x128xf32, #tpu.memory_space<vmem>>, vector<16x1x128xf32>
    tpu.vector_store %arg6[%c0_314, %c14_315, %c0_316], %752 {strides = array<i32>} : memref<16x16x128xf32, #tpu.memory_space<vmem>>, vector<16x1x128xf32>,
    %c16_i32_317 = arith.constant 16 : i32
    %754 = arith.muli %arg0, %c16_i32_317 : i32
    %c15_i32 = arith.constant 15 : i32
    %755 = arith.addi %754, %c15_i32 : i32
    %c0_318 = arith.constant 0 : index
    %c0_319 = arith.constant 0 : index
    %756 = vector.load %arg9[%c0_318, %c0_319] : memref<16x128xf32, #tpu.memory_space<vmem>>, vector<16x128xf32>
    %c0_320 = arith.constant 0 : index
    %c0_321 = arith.constant 0 : index
    %757 = vector.load %arg10[%c0_320, %c0_321] : memref<16x128xf32, #tpu.memory_space<vmem>>, vector<16x128xf32>
    %c15 = arith.constant 15 : index
    %c0_322 = arith.constant 0 : index
    %c0_323 = arith.constant 0 : index
    %758 = vector.load %arg1[%c15, %c0_322, %c0_323] : memref<16x16x512xf32, #tpu.memory_space<vmem>>, vector<1x16x512xf32>
    %759 = vector.shape_cast %758 : vector<1x16x512xf32> to vector<16x512xf32>
    %c0_324 = arith.constant 0 : index
    %c0_325 = arith.constant 0 : index
    %760 = vector.load %arg5[%c0_324, %c0_325] : memref<128x512xf32, #tpu.memory_space<vmem>>, vector<128x512xf32>
    %cst_326 = arith.constant dense<0.000000e+00> : vector<16x512xf32>
    %761 = tpu.matmul %756, %760, %cst_326 {dimension_numbers = #tpu.dot_dimension_numbers<[1], [0], [0], [1], [0, 0, 1, 1], [], []>} : vector<16x128xf32>, vector<128x512xf32>, vector<16x512xf32> -> vector<16x512xf32>
    %762 = arith.addf %759, %761 : vector<16x512xf32>
    %763 = vector.extract_strided_slice %762 {offsets = [0, 0], sizes = [16, 128], strides = [1, 1]} : vector<16x512xf32> to vector<16x128xf32>
    %764 = arith.negf %763 : vector<16x128xf32>
    %765 = math.exp %764 : vector<16x128xf32>
    %cst_327 = arith.constant 1.000000e+00 : f32
    %766 = vector.broadcast %cst_327 : f32 to vector<16x128xf32>
    %767 = arith.addf %766, %765 : vector<16x128xf32>
    %768 = arith.divf %766, %767 : vector<16x128xf32>
    %769 = vector.extract_strided_slice %762 {offsets = [0, 128], sizes = [16, 128], strides = [1, 1]} : vector<16x512xf32> to vector<16x128xf32>
    %770 = arith.negf %769 : vector<16x128xf32>
    %771 = math.exp %770 : vector<16x128xf32>
    %cst_328 = arith.constant 1.000000e+00 : f32
    %772 = vector.broadcast %cst_328 : f32 to vector<16x128xf32>
    %773 = arith.addf %772, %771 : vector<16x128xf32>
    %774 = arith.divf %772, %773 : vector<16x128xf32>
    %775 = vector.extract_strided_slice %762 {offsets = [0, 256], sizes = [16, 128], strides = [1, 1]} : vector<16x512xf32> to vector<16x128xf32>
    %776 = math.tanh %775 : vector<16x128xf32>
    %777 = vector.extract_strided_slice %762 {offsets = [0, 384], sizes = [16, 128], strides = [1, 1]} : vector<16x512xf32> to vector<16x128xf32>
    %778 = arith.negf %777 : vector<16x128xf32>
    %779 = math.exp %778 : vector<16x128xf32>
    %cst_329 = arith.constant 1.000000e+00 : f32
    %780 = vector.broadcast %cst_329 : f32 to vector<16x128xf32>
    %781 = arith.addf %780, %779 : vector<16x128xf32>
    %782 = arith.divf %780, %781 : vector<16x128xf32>
    %783 = arith.mulf %774, %757 : vector<16x128xf32>
    %784 = arith.mulf %768, %776 : vector<16x128xf32>
    %785 = arith.addf %783, %784 : vector<16x128xf32>
    %786 = math.tanh %785 : vector<16x128xf32>
    %787 = arith.mulf %782, %786 : vector<16x128xf32>
    %788 = vector.broadcast %755 : i32 to vector<16x1xi32>
    %789 = arith.cmpi slt, %788, %3 : vector<16x1xi32>
    %790 = vector.shape_cast %789 : vector<16x1xi1> to vector<16x1xi1>
    %791 = vector.broadcast %790 : vector<16x1xi1> to vector<16x128xi1>
    %792 = arith.select %791, %787, %756 : vector<16x128xi1>, vector<16x128xf32>
    %c0_330 = arith.constant 0 : index
    %c0_331 = arith.constant 0 : index
    %793 = vector.load %arg9[%c0_330, %c0_331] : memref<16x128xf32, #tpu.memory_space<vmem>>, vector<16x128xf32>
    tpu.vector_store %arg9[%c0_330, %c0_331], %792 {strides = array<i32>} : memref<16x128xf32, #tpu.memory_space<vmem>>, vector<16x128xf32>,
    %794 = vector.shape_cast %789 : vector<16x1xi1> to vector<16x1xi1>
    %795 = vector.broadcast %794 : vector<16x1xi1> to vector<16x128xi1>
    %796 = arith.select %795, %785, %757 : vector<16x128xi1>, vector<16x128xf32>
    %c0_332 = arith.constant 0 : index
    %c0_333 = arith.constant 0 : index
    %797 = vector.load %arg10[%c0_332, %c0_333] : memref<16x128xf32, #tpu.memory_space<vmem>>, vector<16x128xf32>
    tpu.vector_store %arg10[%c0_332, %c0_333], %796 {strides = array<i32>} : memref<16x128xf32, #tpu.memory_space<vmem>>, vector<16x128xf32>,
    %cst_334 = arith.constant 0.000000e+00 : f32
    %798 = vector.shape_cast %789 : vector<16x1xi1> to vector<16x1xi1>
    %799 = vector.broadcast %798 : vector<16x1xi1> to vector<16x128xi1>
    %800 = vector.broadcast %cst_334 : f32 to vector<16x128xf32>
    %801 = arith.select %799, %787, %800 : vector<16x128xi1>, vector<16x128xf32>
    %802 = vector.shape_cast %801 : vector<16x128xf32> to vector<16x1x128xf32>
    %c0_335 = arith.constant 0 : index
    %c15_336 = arith.constant 15 : index
    %c0_337 = arith.constant 0 : index
    %803 = vector.load %arg6[%c0_335, %c15_336, %c0_337] : memref<16x16x128xf32, #tpu.memory_space<vmem>>, vector<16x1x128xf32>
    tpu.vector_store %arg6[%c0_335, %c15_336, %c0_337], %802 {strides = array<i32>} : memref<16x16x128xf32, #tpu.memory_space<vmem>>, vector<16x1x128xf32>,
    %c1_i32_338 = arith.constant 1 : i32
    %804 = arith.cmpi eq, %arg0, %c1_i32_338 : i32
    %805 = arith.extui %804 : i1 to i32
    %c0_i32_339 = arith.constant 0 : i32
    %806 = arith.cmpi ne, %805, %c0_i32_339 : i32
    scf.if %806 {
      %c0_340 = arith.constant 0 : index
      %c0_341 = arith.constant 0 : index
      %807 = vector.load %arg9[%c0_340, %c0_341] : memref<16x128xf32, #tpu.memory_space<vmem>>, vector<16x128xf32>
      %c0_342 = arith.constant 0 : index
      %c0_343 = arith.constant 0 : index
      %808 = vector.load %arg7[%c0_342, %c0_343] : memref<16x128xf32, #tpu.memory_space<vmem>>, vector<16x128xf32>
      tpu.vector_store %arg7[%c0_342, %c0_343], %807 {strides = array<i32>} : memref<16x128xf32, #tpu.memory_space<vmem>>, vector<16x128xf32>,
      %c0_344 = arith.constant 0 : index
      %c0_345 = arith.constant 0 : index
      %809 = vector.load %arg10[%c0_344, %c0_345] : memref<16x128xf32, #tpu.memory_space<vmem>>, vector<16x128xf32>
      %c0_346 = arith.constant 0 : index
      %c0_347 = arith.constant 0 : index
      %810 = vector.load %arg8[%c0_346, %c0_347] : memref<16x128xf32, #tpu.memory_space<vmem>>, vector<16x128xf32>
      tpu.vector_store %arg8[%c0_346, %c0_347], %809 {strides = array<i32>} : memref<16x128xf32, #tpu.memory_space<vmem>>, vector<16x128xf32>,
    } else {
    }
    return
  }
  func.func @transform_0(%arg0: i32) -> (i32, i32, i32) {
    %c0_i32 = arith.constant 0 : i32
    %c0_i32_0 = arith.constant 0 : i32
    %c0_i32_1 = arith.constant 0 : i32
    return %arg0, %c0_i32, %c0_i32_0 : i32, i32, i32
  }
  func.func @transform_1(%arg0: i32) -> (i32, i32) {
    %c0_i32 = arith.constant 0 : i32
    %c0_i32_0 = arith.constant 0 : i32
    %c0_i32_1 = arith.constant 0 : i32
    return %c0_i32, %c0_i32_0 : i32, i32
  }
  func.func @transform_2(%arg0: i32) -> (i32, i32) {
    %c0_i32 = arith.constant 0 : i32
    %c0_i32_0 = arith.constant 0 : i32
    %c0_i32_1 = arith.constant 0 : i32
    return %c0_i32, %c0_i32_0 : i32, i32
  }
  func.func @transform_3(%arg0: i32) -> (i32, i32) {
    %c0_i32 = arith.constant 0 : i32
    %c0_i32_0 = arith.constant 0 : i32
    %c0_i32_1 = arith.constant 0 : i32
    return %c0_i32, %c0_i32_0 : i32, i32
  }
  func.func @transform_4(%arg0: i32) -> (i32, i32) {
    %c0_i32 = arith.constant 0 : i32
    %c0_i32_0 = arith.constant 0 : i32
    %c0_i32_1 = arith.constant 0 : i32
    return %c0_i32, %c0_i32_0 : i32, i32
  }
  func.func @transform_5(%arg0: i32) -> (i32, i32, i32) {
    %c0_i32 = arith.constant 0 : i32
    %c0_i32_0 = arith.constant 0 : i32
    %c0_i32_1 = arith.constant 0 : i32
    return %c0_i32, %arg0, %c0_i32_0 : i32, i32, i32
  }
  func.func @transform_6(%arg0: i32) -> (i32, i32) {
    %c0_i32 = arith.constant 0 : i32
    %c0_i32_0 = arith.constant 0 : i32
    %c0_i32_1 = arith.constant 0 : i32
    return %c0_i32, %c0_i32_0 : i32, i32
  }
  func.func @transform_7(%arg0: i32) -> (i32, i32) {
    %c0_i32 = arith.constant 0 : i32
    %c0_i32_0 = arith.constant 0 : i32
    %c0_i32_1 = arith.constant 0 : i32
    return %c0_i32, %c0_i32_0 : i32, i32
  }
}

</mosaic_0001>

<bundles_post_ra>
// kernel: tpu_custom_call.1
= control target key start
LH: loop header
LB: loop body
LE: loop exit
PB: predicated region body
PF: predicated region fallthrough
CT: control target
= control target key end

     0   :  { %s12014_s0 = inlined_call_operand.hbm [shape: f32[32,16,512], index: 0, kind: input, shape index: {}]   ;;  %s12015_s1 = inlined_call_operand.vmem [shape: f32[16,128], index: 1, kind: input, shape index: {}]   ;;  %s12016_s2 = inlined_call_operand.hbm [shape: f32[16,128], index: 2, kind: input, shape index: {}]   ;;  %s12017_s3 = inlined_call_operand.vmem [shape: s32[16,1], index: 3, kind: input, shape index: {}]   ;;  %s12018_s4 = inlined_call_operand.hbm [shape: f32[128,512], index: 4, kind: input, shape index: {}]   ;;  %s12019_s5 = inlined_call_operand.hbm [shape: f32[16,32,128], index: 5, kind: output, shape index: {0}]   ;;  %s12020_s6 = inlined_call_operand.hbm [shape: f32[16,128], index: 6, kind: output, shape index: {1}]   ;;  %s12021_s7 = inlined_call_operand.hbm [shape: f32[16,128], index: 7, kind: output, shape index: {2}]  }
   0x1   :  { %12276 = sst [smem:[#allocation46_spill]] %s12016_s2 }
   0x2   :  { %13 = vsyncpa [#allocation5], 0 }
   0x3   :  { %15 = vsyncpa [#allocation5 + $0x1], 0 }
   0x4   :  { %16 = vsyncpa [#allocation8], 0 }
   0x5   :  { %17 = vsyncpa [#allocation6], 0 }
   0x6   :  { %19 = vsyncpa [#allocation6 + $0x1], 0 }
   0x7   :  { %20 = vsyncpa [#allocation12], 0  ;;  %s8841_s24 = smov 0   ;;  %s8843_s25 = smov 0  }
   0x8   :  { %s8845_s26 = smov 0   ;;  %s8847_s27 = smov 0  }
   0x9 LB: > { %s8862_s28 = sadd.s32 4294967295, %s8778_s27   ;;  %s7614_s29 = sadd.s32 4294967294, %s8778_s27   ;;  %s8778_s27 = sphi %s8847_s27, %s12658_s27   ;;  %s8774_s26 = sphi %s8845_s26, %s12657_s26   ;;  %s8770_s25 = sphi %s8843_s25, %s12656_s25   ;;  %s8766_s24 = sphi %s8841_s24, %s12655_s24  }
   0xa   : > { %p46_p0 = scmp.ne.s32.totalorder %s8770_s25, %s8766_s24  ;;  %p12022_p1 = scmp.eq.s32.totalorder %s8862_s28, 0 }
   0xb   : > { %p160_p3 = scmp.eq.s32.totalorder %s7614_s29, 1  ;;  %p7615_p5 = scmp.ge.s32.totalorder %s8778_s27, 1 }
   0xc   : > { %p8871_p4 = por %p12022_p1, %p46_p0  ;;  %p209_p7 = scmp.lt.s32.totalorder %s8778_s27, 3 }
   0xd   : > { %p8876_p6 = por %p160_p3, %p46_p0  ;;  %s8780_s10 = smov [#allocation7]  }
   0xe   : > { %s12277_s30 = scalar_select %p8871_p4, 1, 0 }
   0xf   : > { %s12278_s8 = scalar_select %p8876_p6, 1, 0 }
  0x10   : > { %p8882_p9 = pnand %p7615_p5, %p209_p7  ;;  %s224_s11 = sshll.u32 %s8780_s10, 4  ;;  %s225_s11 = int_to_ptr.vmem [resolvable:$true] %s224_s11 }
  0x11   : > { %s8781_s13 = smov [#allocation9]   ;;  %s8615_s15 = scalar_lea.vmem %s225_s11, 256 }
  0x12   : > { %s12279_s9 = scalar_select %p8882_p9, 1, 0 }
  0x13   : > { %p8013_p10 = pneg %p8882_p9  ;;  %s240_s14 = sshll.u32 %s8781_s13, 4  ;;  %s241_s14 = int_to_ptr.vmem [resolvable:$true] %s240_s14 }
  0x14   : > { %p8616_p0 = scmp.ne.s32.totalorder %s225_s11, %s8615_s15  ;;  %p8623_p7 = scmp.lt.s32.totalorder %s225_s11, %s225_s11 }
  0x15   : > { %p8891_p12 = pnand %p8013_p10, %p12022_p1  ;;  %p8624_p11 = scmp.lt.s32.totalorder %s8615_s15, %s8615_s15 }
  0x17   : > { %p8606_p13 = pneg %p8891_p12  ;;  %p8625_p8 = por %p8624_p11, %p8623_p7 }
  0x19   : > { %p8618_p3 = pnand %p8616_p0, %p8606_p13 }
  0x1b   : > { %p8619_p5 = pneg %p8618_p3 }
  0x1d   : > { %p8626_p10 = pnand %p8625_p8, %p8619_p5 }
  0x1f   : > { %8629 = shalt.err (!%p8626_p10)
}
  0x20   : > { %s8782_s16 = smov 128   ;;  %s8783_s17 = smov 8  }
  0x21   : > { %s12281_s2 = sld [smem:[#allocation46_spill]]  ;;  %s8641_s20 = scalar_lea.vmem %s241_s14, 8192 }
  0x22   : > { %p8642_p1 = scmp.ne.s32.totalorder %s241_s14, %s8641_s20  ;;  %p8649_p2 = scmp.lt.s32.totalorder %s241_s14, %s241_s14 }
  0x23   : > { %p8650_p6 = scmp.lt.s32.totalorder %s8641_s20, %s8641_s20 }
  0x24   : > { %p8644_p0 = pnand %p8642_p1, %p8606_p13 }
  0x25   : > { %p8651_p11 = por %p8650_p6, %p8649_p2 }
  0x26   : > { %p8645_p3 = pneg %p8644_p0 }
  0x27   : > { %8016 = dma.hbm_to_vmem [thread:$0]  (!%p8891_p12), %s12281_s2, 256, %s225_s11, [#allocation8], %s8782_s16, %s8782_s16, %s8783_s17  }
  0x28   : > { %p8652_p8 = pnand %p8651_p11, %p8645_p3 }
  0x2a   : > { %8655 = shalt.err (!%p8652_p8)
}
  0x2b   : > { %s12023_s21 = smov 512   ;;  %s12024_s22 = smov 32  }
  0x2c   : > { %8019 = dma.hbm_to_vmem [thread:$0]  (!%p8891_p12), %s12018_s4, 8192, %s241_s14, [#allocation8], %s12023_s21, %s12023_s21, %s12024_s22  }
  0x2d   : > { %s8917_s10 = sadd.s32 1, %s8778_s27   ;;  %s33_s13 = sadd.s32 1, %s8774_s26 }
  0x2e   : > { %s30_s11 = ssub.s32 %s8778_s27, %s8917_s10  ;;  %p40_p2 = scmp.ne.s32.totalorder %s8774_s26, %s8770_s25 }
  0x2f   : > { %p31_p1 = scmp.eq.s32.totalorder %s30_s11, 0  ;;  %p41_p6 = scmp.eq.s32.totalorder %s8778_s27, 0 }
  0x30   : > { %p12282_p5 = scmp.eq.s32.totalorder %s8862_s28, 1  ;;  %p8030_p10 = scmp.lt.s32.totalorder %s8778_s27, 2 }
  0x31   : > { %s8926_s15 = scalar_select %p31_p1, %s8774_s26, %s33_s13  }
  0x32   : > { %p42_p13 = por %p41_p6, %p40_p2  ;;  %p8930_p7 = por %p12282_p5, %p40_p2 }
  0x33   : > { %s254_s16 = sand.u32 1, %s8774_s26   ;;  %s7985_s14 = sshll.u32 %s8778_s27, 14 }
  0x34   : > { %s12283_s12 = scalar_select %p8930_p7, 1, 0 }
  0x35   : > { %s7619_s17 = sshll.u32 %s254_s16, 10  ;;  %s8940_s20 = scalar_lea.hbm %s12014_s0, %s7985_s14 }
  0x36   : > { %s258_s23 = scalar_lea.vmem [#allocation4], %s7619_s17  ;;  %p8944_p12 = pnand %p8030_p10, %p42_p13 }
  0x37   : > { %s266_s29 = sshll.u32 %s258_s23, 4  ;;  %s8948_s13 = scalar_lea.sflag [#allocation5], %s254_s16  ;;  %s8942_s29 = int_to_ptr.vmem [resolvable:$true] %s266_s29 }
  0x38   : > { %s8656_s21 = scalar_lea.hbm %s8940_s20, 16384  ;;  %p8658_p3 = pneg %p8944_p12 }
  0x39   : > { %p8657_p0 = scmp.ne.s32.totalorder %s8940_s20, %s8656_s21  ;;  %s8661_s17 = scalar_lea.hbm %s12014_s0, 32768 }
  0x3a   : > { %p8662_p1 = scmp.lt.s32.totalorder %s8940_s20, %s12014_s0  ;;  %p8663_p2 = scmp.lt.s32.totalorder %s8661_s17, %s8656_s21 }
  0x3b   : > { %p8659_p11 = pnand %p8658_p3, %p8657_p0 }
  0x3c   : > { %p8664_p6 = por %p8663_p2, %p8662_p1 }
  0x3d   : > { %p8660_p8 = pneg %p8659_p11 }
  0x3f   : > { %p8665_p13 = pnand %p8664_p6, %p8660_p8 }
  0x41   : > { %8668 = shalt.err (!%p8665_p13)
}
  0x42   : > { %s8669_s16 = scalar_lea.vmem %s8942_s29, 16384  ;;  %s8786_s22 = smov [#allocation4]  }
  0x43   : > { %p8670_p5 = scmp.ne.s32.totalorder %s8942_s29, %s8669_s16  ;;  %s8674_s2 = sshll.u32 %s8786_s22, 4  ;;  %s8675_s2 = int_to_ptr.vmem [resolvable:$false] %s8674_s2 }
  0x44   : > { %s8676_s14 = scalar_lea.vmem %s8675_s2, 32768  ;;  %p8677_p11 = scmp.lt.s32.totalorder %s8942_s29, %s8675_s2 }
  0x45   : > { %p8672_p10 = pnand %p8670_p5, %p8658_p3  ;;  %p8678_p7 = scmp.lt.s32.totalorder %s8676_s14, %s8669_s16 }
  0x47   : > { %p8673_p0 = pneg %p8672_p10  ;;  %p8679_p4 = por %p8678_p7, %p8677_p11 }
  0x49   : > { %p8680_p9 = pnand %p8679_p4, %p8673_p0 }
  0x4b   : > { %8683 = shalt.err (!%p8680_p9)
}
  0x4c   : > { %s12285_s21 = smov 32   ;;  %s12286_s18 = smov 512  }
  0x4d   : > { %8023 = dma.hbm_to_vmem [thread:$0]  (!%p8944_p12), %s8940_s20, 16384, %s8942_s29, %s8948_s13, %s12286_s18, %s12286_s18, %s12285_s21  }
  0x4e   : > { %p12287_p3 = scmp.ne.s32.totalorder %s12279_s9, 0 }
  0x50   : > { %278 = sbr.rel (%p12287_p3) target bundleno = 4195 (0x1063), region = 40 }
  0x55   : > { %s8975_s22 = sand.u32 1, %s8770_s25   ;;  %p12288_p4 = scmp.ne.s32.totalorder %s12277_s30, 0 }
  0x56   : > { %s7624_s2 = sshll.u32 %s8975_s22, 10  ;;  %s281_s17 = scalar_lea.sflag [#allocation5], %s8975_s22 }
  0x57   : > { %s8979_s19 = scalar_lea.vmem [#allocation4], %s7624_s2 }
  0x58   : > { %8749 = dma.done.wait (%p12288_p4), %s281_s17, 16384  }
  0x59   : > { %8751 = vsyncadd (%p12288_p4), %s281_s17, 4294950912  ;;  %p12289_p9 = scmp.eq.s32.totalorder %s8862_s28, 0 }
  0x5b   : > { %8753 = dma.done.wait (%p12289_p9), [#allocation8], 8448   ;;  %p12290_p7 = pmov %p12289_p9 }
  0x5c   : > { %s7627_s9 = sshll.u32 %s8975_s22, 8  ;;  %p12291_p12 = scmp.ne.s32.totalorder %s8862_s28, 0 }
  0x5d   : > { %8755 = vsyncadd (%p12290_p7), [#allocation8], 4294958848  ;;  %s8990_s20 = scalar_lea.vmem [#allocation10], %s7627_s9 }
  0x5e   : > { %328 = sbr.rel (%p12291_p12) target bundleno = 102 (0x66), region = 56 }
  0x63   : > { %v329_v0 = vld [vmem:[%s12015_s1] sm:$0xff]  ;;  %v330_v1 = vld [vmem:[%s12015_s1 + $0x8] sm:$0xff] }
  0x64   : > { %v333_v2 = vld [vmem:[#allocation7] sm:$0xff]  ;;  %331 = vst [vmem:[#allocation2] sm:$0xff] %v329_v0  ;;  %332 = vst [vmem:[#allocation2 + $0x8] sm:$0xff] %v330_v1  ;;  %v334_v3 = vld [vmem:[#allocation7 + $0x8] sm:$0xff] }
  0x65   : > { %335 = vst [vmem:[#allocation3 + $0x8] sm:$0xff] %v333_v2  ;;  %336 = vst [vmem:[#allocation3] sm:$0xff] %v334_v3 }
  0x66 PF: > { %v9000_v4 = vld [vmem:[#allocation9 + $0x1e8] sm:$0xff]  ;;  %v9002_v5 = vld [vmem:[#allocation9 + $0x1e0] sm:$0xff]  ;;  %v12028_v8 = vmov 0.0   ;;  %v12030_v11 = vmov 0   ;;  %v9025_v14 = vld [vmem:[#allocation9 + $0x1f8] sm:$0xff]  ;;  %s9140_s23 = sshll.u32 %s8862_s28, 4 }
  0x67   : > { %v9004_v6 = vld [vmem:[#allocation9 + $0x1c8] sm:$0xff]  ;;  %416 = vmatprep.subr.mxu0 %v9000_v4  ;;  %v9007_v7 = vld [vmem:[#allocation9 + $0x1c0] sm:$0xff]  ;;  %480 = vmatprep.mubr.f32.mxu0 %v12028_v8  ;;  %v9031_v16 = vld [vmem:[#allocation9 + $0x1f0] sm:$0xff]  ;;  %v626_v60 = vstv %s9140_s23  ;;  %s1224_s2 = sadd.s32 2, %s9140_s23  ;;  %s1667_s17 = sadd.s32 3, %s9140_s23 }
  0x68   : > { %417 = vmatpush1.msra.mxu0 %v9002_v5  ;;  %v9011_v9 = vld [vmem:[#allocation9 + $0x1a8] sm:$0xff]  ;;  %557 = vmatprep.mubr.f32.mxu1 %v12028_v8  ;;  %v9015_v10 = vld [vmem:[#allocation9 + $0x1a0] sm:$0xff]  ;;  %v9037_v18 = vld [vmem:[#allocation9 + $0x1d8] sm:$0xff]  ;;  %s2110_s9 = sadd.s32 4, %s9140_s23  ;;  %s2553_s29 = sadd.s32 5, %s9140_s23 }
  0x69   : > { %418 = vmatprep.subr.mxu0 %v9004_v6  ;;  %8090 = vset.pattern.permute.xlu0 %v12030_v11  ;;  %v9019_v12 = vld [vmem:[#allocation9 + $0x188] sm:$0xff]  ;;  %v9023_v13 = vld [vmem:[#allocation9 + $0x180] sm:$0xff]  ;;  %v9039_v19 = vld [vmem:[#allocation9 + $0x1d0] sm:$0xff]  ;;  %s2996_s11 = sadd.s32 6, %s9140_s23  ;;  %s3439_s13 = sadd.s32 7, %s9140_s23 }
  0x6a   : > { %419 = vmatpush1.msra.mxu0 %v9007_v7  ;;  %8091 = vset.pattern.permute.xlu1 %v12030_v11  ;;  %v9028_v15 = vld [vmem:[#allocation9 + $0x168] sm:$0xff]  ;;  %v9034_v17 = vld [vmem:[#allocation9 + $0x160] sm:$0xff]  ;;  %v9045_v21 = vld [vmem:[#allocation9 + $0x1b8] sm:$0xff]  ;;  %s3882_s30 = sadd.s32 8, %s9140_s23  ;;  %s4325_s16 = sadd.s32 9, %s9140_s23 }
  0x6b   : > { %420 = vmatprep.subr.mxu0 %v9011_v9  ;;  %493 = vmatprep.subr.mxu1 %v9025_v14  ;;  %v9042_v20 = vld [vmem:[#allocation9 + $0x148] sm:$0xff]  ;;  %v9048_v22 = vld [vmem:[#allocation9 + $0x140] sm:$0xff]  ;;  %v9051_v23 = vld [vmem:[#allocation9 + $0x1b0] sm:$0xff]  ;;  %s4768_s14 = sadd.s32 10, %s9140_s23  ;;  %s5211_s21 = sadd.s32 11, %s9140_s23 }
  0x6c   : > { %421 = vmatpush1.msra.mxu0 %v9015_v10  ;;  %494 = vmatpush1.msra.mxu1 %v9031_v16  ;;  %v9053_v24 = vld [vmem:[#allocation9 + $0x198] sm:$0xff]  ;;  %v9056_v25 = vld [vmem:[#allocation9 + $0x128] sm:$0xff]  ;;  %v9059_v26 = vld [vmem:[#allocation9 + $0x190] sm:$0xff]  ;;  %s5654_s18 = sadd.s32 12, %s9140_s23  ;;  %p7974_p8 = scmp.ne.s32.totalorder %s8862_s28, 1 }
  0x6d   : > { %422 = vmatprep.subr.mxu0 %v9019_v12  ;;  %495 = vmatprep.subr.mxu1 %v9037_v18  ;;  %v9062_v27 = vld [vmem:[#allocation9 + $0x120] sm:$0xff]  ;;  %v9065_v28 = vld [vmem:[#allocation9 + $0x178] sm:$0xff]  ;;  %v9068_v29 = vld [vmem:[#allocation9 + $0x108] sm:$0xff] }
  0x6e   : > { %423 = vmatpush1.msra.mxu0 %v9023_v13  ;;  %496 = vmatpush1.msra.mxu1 %v9039_v19  ;;  %v9071_v30 = vld [vmem:[#allocation9 + $0x170] sm:$0xff]  ;;  %v9074_v31 = vld [vmem:[#allocation9 + $0x100] sm:$0xff]  ;;  %v9077_v32 = vld [vmem:[#allocation9 + $0x158] sm:$0xff] }
  0x6f   : > { %424 = vmatprep.subr.mxu0 %v9028_v15  ;;  %497 = vmatprep.subr.mxu1 %v9045_v21  ;;  %v9080_v33 = vld [vmem:[#allocation9 + $0xe8] sm:$0xff]  ;;  %v9083_v34 = vld [vmem:[#allocation9 + $0x150] sm:$0xff]  ;;  %v9086_v35 = vld [vmem:[#allocation9 + $0xe0] sm:$0xff] }
  0x70   : > { %425 = vmatpush1.msra.mxu0 %v9034_v17  ;;  %498 = vmatpush1.msra.mxu1 %v9051_v23  ;;  %v9089_v36 = vld [vmem:[#allocation9 + $0x138] sm:$0xff]  ;;  %v9092_v37 = vld [vmem:[#allocation9 + $0xc8] sm:$0xff]  ;;  %v9095_v38 = vld [vmem:[#allocation9 + $0x130] sm:$0xff] }
  0x71   : > { %426 = vmatprep.subr.mxu0 %v9042_v20  ;;  %499 = vmatprep.subr.mxu1 %v9053_v24  ;;  %v9098_v39 = vld [vmem:[#allocation9 + $0xc0] sm:$0xff]  ;;  %v9101_v40 = vld [vmem:[#allocation9 + $0x118] sm:$0xff]  ;;  %v9104_v41 = vld [vmem:[#allocation9 + $0xa8] sm:$0xff] }
  0x72   : > { %427 = vmatpush1.msra.mxu0 %v9048_v22  ;;  %500 = vmatpush1.msra.mxu1 %v9059_v26  ;;  %v9107_v42 = vld [vmem:[#allocation9 + $0x110] sm:$0xff]  ;;  %v9110_v43 = vld [vmem:[#allocation9 + $0xa0] sm:$0xff]  ;;  %v9113_v44 = vld [vmem:[#allocation9 + $0xf8] sm:$0xff] }
  0x73   : > { %428 = vmatprep.subr.mxu0 %v9056_v25  ;;  %501 = vmatprep.subr.mxu1 %v9065_v28  ;;  %v9116_v45 = vld [vmem:[#allocation9 + $0x88] sm:$0xff]  ;;  %v9119_v46 = vld [vmem:[#allocation9 + $0xf0] sm:$0xff]  ;;  %v9122_v47 = vld [vmem:[#allocation9 + $0x80] sm:$0xff] }
  0x74   : > { %429 = vmatpush1.msra.mxu0 %v9062_v27  ;;  %502 = vmatpush1.msra.mxu1 %v9071_v30  ;;  %v9125_v48 = vld [vmem:[#allocation9 + $0xd8] sm:$0xff]  ;;  %v9128_v49 = vld [vmem:[#allocation9 + $0x68] sm:$0xff]  ;;  %v9131_v50 = vld [vmem:[#allocation9 + $0xd0] sm:$0xff] }
  0x75   : > { %430 = vmatprep.subr.mxu0 %v9068_v29  ;;  %503 = vmatprep.subr.mxu1 %v9077_v32  ;;  %v9134_v51 = vld [vmem:[#allocation9 + $0x60] sm:$0xff]  ;;  %v9137_v52 = vld [vmem:[#allocation9 + $0xb8] sm:$0xff]  ;;  %v9143_v53 = vld [vmem:[#allocation9 + $0x48] sm:$0xff] }
  0x76   : > { %431 = vmatpush1.msra.mxu0 %v9074_v31  ;;  %504 = vmatpush1.msra.mxu1 %v9083_v34  ;;  %12292 = vst [vmem:[#allocation20_spill] sm:$0xff] %v9134_v51  ;;  %12293 = vst [vmem:[#allocation21_spill] sm:$0xff] %v9143_v53  ;;  %v9146_v54 = vld [vmem:[#allocation9 + $0xb0] sm:$0xff]  ;;  %v9149_v55 = vld [vmem:[#allocation9 + $0x40] sm:$0xff] }
  0x77   : > { %432 = vmatprep.subr.mxu0 %v9080_v33  ;;  %505 = vmatprep.subr.mxu1 %v9089_v36  ;;  %12294 = vst [vmem:[#allocation22_spill] sm:$0xff] %v9149_v55  ;;  %v9152_v56 = vld [vmem:[#allocation9 + $0x98] sm:$0xff]  ;;  %v9155_v57 = vld [vmem:[#allocation9 + $0x28] sm:$0xff]  ;;  %v9158_v58 = vld [vmem:[#allocation9 + $0x90] sm:$0xff] }
  0x78   : > { %433 = vmatpush1.msra.mxu0 %v9086_v35  ;;  %506 = vmatpush1.msra.mxu1 %v9095_v38  ;;  %12295 = vst [vmem:[#allocation23_spill] sm:$0xff] %v9155_v57  ;;  %v9163_v59 = vld [vmem:[%s12017_s3] sm:$0xff]  ;;  %v9167_v61 = vld [vmem:[#allocation9 + $0x20] sm:$0xff]  ;;  %v9170_v62 = vld [vmem:[#allocation9 + $0x78] sm:$0xff] }
  0x79   : > { %434 = vmatprep.subr.mxu0 %v9092_v37  ;;  %507 = vmatprep.subr.mxu1 %v9101_v40  ;;  %12296 = vst [vmem:[#allocation24_spill] sm:$0xff] %v9167_v61  ;;  %v9173_v63 = vld [vmem:[#allocation9 + $0x8] sm:$0xff]  ;;  %v9176_v0 = vld [vmem:[#allocation9 + $0x70] sm:$0xff]  ;;  %v9179_v1 = vld [vmem:[#allocation9] sm:$0xff]  ;;  %vm627_vm0 = vcmp.lt.s32.totalorder %v626_v60, %v9163_v59 }
  0x7a   : > { %435 = vmatpush1.msra.mxu0 %v9098_v39  ;;  %508 = vmatpush1.msra.mxu1 %v9107_v42  ;;  %12297 = vst [vmem:[#allocation25_spill] sm:$0xff] %v9173_v63  ;;  %12298 = vst [vmem:[#allocation26_spill] sm:$0xff] %v9176_v0  ;;  %v9182_v2 = vld [vmem:[#allocation9 + $0x58] sm:$0xff]  ;;  %v9186_v3 = vld [vmem:[#allocation2] sm:$0xff] }
  0x7b   : > { %436 = vmatprep.subr.mxu0 %v9104_v41  ;;  %509 = vmatprep.subr.mxu1 %v9113_v44  ;;  %12299 = vst [vmem:[#allocation27_spill] sm:$0xff] %v9179_v1  ;;  %12300 = vst [vmem:[#allocation28_spill] sm:$0xff] %v9182_v2  ;;  %v9189_v8 = vld [vmem:[#allocation9 + $0x50] sm:$0xff]  ;;  %v9194_v11 = vld [vmem:[%s12017_s3 + $0x8] sm:$0xff] }
  0x7c   : > { %437 = vmatpush1.msra.mxu0 %v9110_v43  ;;  %510 = vmatpush1.msra.mxu1 %v9119_v46  ;;  %12301 = vst [vmem:[#allocation29_spill] sm:$0xff] %v9189_v8  ;;  %vm628_vm1 = vcmp.lt.s32.totalorder %v626_v60, %v9194_v11  ;;  %v9229_v60 = vstv %s1667_s17  ;;  %s6540_s17 = sadd.s32 14, %s9140_s23 }
  0x7d   : > { %438 = vmatprep.subr.mxu0 %v9116_v45  ;;  %511 = vmatprep.subr.mxu1 %v9125_v48  ;;  %vm1956_vm3 = vcmp.lt.s32.totalorder %v9229_v60, %v9163_v59 }
  0x7e   : > { %439 = vmatpush1.msra.mxu0 %v9122_v47  ;;  %512 = vmatpush1.msra.mxu1 %v9131_v50 }
  0x7f   : > { %440 = vmatprep.subr.mxu0 %v9128_v49  ;;  %513 = vmatprep.subr.mxu1 %v9137_v52 }
  0x80   : > { %441 = vmatpush1.msra.mxu0 %v9134_v51  ;;  %514 = vmatpush1.msra.mxu1 %v9146_v54  ;;  %v9208_v51 = vld [vmem:[#allocation9 + $0x18] sm:$0xff] }
  0x81   : > { %442 = vmatprep.subr.mxu0 %v9143_v53  ;;  %515 = vmatprep.subr.mxu1 %v9152_v56 }
  0x82   : > { %443 = vmatpush1.msra.mxu0 %v9149_v55  ;;  %516 = vmatpush1.msra.mxu1 %v9158_v58  ;;  %v12302_v55 = vmov 0  }
  0x83   : > { %444 = vmatprep.subr.mxu0 %v9155_v57  ;;  %517 = vmatprep.subr.mxu1 %v9170_v62  ;;  %v9198_v57 = vld [vmem:[#allocation9 + $0x38] sm:$0xff]  ;;  %v629_v53 = vsel %vm627_vm0, 1, %v12302_v55 }
  0x84   : > { %445 = vmatpush1.msra.mxu0 %v9167_v61  ;;  %518 = vmatpush1.msra.mxu1 %v9176_v0  ;;  %v9203_v61 = vld [vmem:[#allocation9 + $0x30] sm:$0xff]  ;;  %v9212_v0 = vld [vmem:[#allocation2 + $0x8] sm:$0xff] }
  0x85   : > { %446 = vmatprep.subr.mxu0 %v9173_v63  ;;  %519 = vmatprep.subr.mxu1 %v9182_v2  ;;  %v12303_v63 = vmov 0.0   ;;  %v9217_v2 = vstv %s1224_s2  ;;  %s6097_s2 = sadd.s32 13, %s9140_s23 }
  0x86   : > { %447 = vmatpush1.msra.mxu0 %v9179_v1  ;;  %520 = vmatpush1.msra.mxu1 %v9189_v8  ;;  %v9215_v1 = vld [vmem:[#allocation9 + $0x10] sm:$0xff]  ;;  %v630_v8 = vsel %vm628_vm1, 1, %v12302_v55  ;;  %vm1513_vm2 = vcmp.lt.s32.totalorder %v9217_v2, %v9163_v59 }
  0x87   : > { %481 = vmatmul.mubr.f32.vlgmr.msra.gmra.mxu0 %v9186_v3  ;;  %521 = vmatprep.subr.mxu1 %v9198_v57 }
  0x88   : > { %486 = vmatprep.mubr.f32.mxu0 %v12303_v63  ;;  %522 = vmatpush1.msra.mxu1 %v9203_v61 }
  0x89   : > { %632 = vperm.xlu0 %8090, %v629_v53   ;;  %523 = vmatprep.subr.mxu1 %v9208_v51 }
  0x8a   : > { %859 = vmatprep.subr.mxu0 %v9000_v4  ;;  %524 = vmatpush1.msra.mxu1 %v9215_v1  ;;  %v1515_v4 = vsel %vm1513_vm2, 1, %v12302_v55  ;;  %vm1514_vm2 = vcmp.lt.s32.totalorder %v9217_v2, %v9194_v11 }
  0x8b   : > { %487 = vmatmul.mubr.f32.gmra.mxu0 %v9212_v0  ;;  %558 = vmatmul.mubr.f32.vlgmr.msra.gmra.mxu1 %v9186_v3 }
  0x8c   : > { %936 = vmatprep.subr.mxu1 %v9025_v14  ;;  %563 = vmatprep.mubr.f32.mxu1 %v12303_v63  ;;  %v9242_v14 = vstv %s2110_s9  ;;  %s6983_s9 = sadd.s32 15, %s9140_s23 }
  0x8d   : > { %635 = vperm.xlu0 %8090, %v630_v8   ;;  %860 = vmatpush1.msra.mxu0 %v9002_v5  ;;  %v1958_v5 = vsel %vm1956_vm3, 1, %v12302_v55  ;;  %vm2399_vm4 = vcmp.lt.s32.totalorder %v9242_v14, %v9163_v59  ;;  %v9267_v8 = vstv %s2996_s11  ;;  %vm1957_vm3 = vcmp.lt.s32.totalorder %v9229_v60, %v9194_v11 }
  0x8e   : > { %937 = vmatpush1.msra.mxu1 %v9031_v16  ;;  %861 = vmatprep.subr.mxu0 %v9004_v6  ;;  %v9254_v6 = vstv %s2553_s29  ;;  %vm3285_vm6 = vcmp.lt.s32.totalorder %v9267_v8, %v9163_v59  ;;  %v9306_v16 = vstv %s4325_s16  ;;  %s781_s29 = sadd.s32 1, %s9140_s23 }
  0x8f   : > { %938 = vmatprep.subr.mxu1 %v9037_v18  ;;  %564 = vmatmul.mubr.f32.gmra.mxu1 %v9212_v0  ;;  %vm2842_vm5 = vcmp.lt.s32.totalorder %v9254_v6, %v9163_v59  ;;  %vm4614_vm9 = vcmp.lt.s32.totalorder %v9306_v16, %v9163_v59  ;;  %v9319_v18 = vstv %s4768_s14 }
  0x90   : > { %862 = vmatpush1.msra.mxu0 %v9007_v7  ;;  %939 = vmatpush1.msra.mxu1 %v9039_v19  ;;  %v2401_v7 = vsel %vm2399_vm4, 1, %v12302_v55  ;;  %v4616_v19 = vsel %vm4614_vm9, 1, %v12302_v55  ;;  %vm5057_vm10 = vcmp.lt.s32.totalorder %v9319_v18, %v9163_v59  ;;  %vm2400_vm4 = vcmp.lt.s32.totalorder %v9242_v14, %v9194_v11 }
  0x91   : > { %1518 = vperm.xlu0 %8090, %v1515_v4   ;;  %863 = vmatprep.subr.mxu0 %v9011_v9  ;;  %v2844_v9 = vsel %vm2842_vm5, 1, %v12302_v55  ;;  %vm2843_vm5 = vcmp.lt.s32.totalorder %v9254_v6, %v9194_v11  ;;  %vm4615_vm9 = vcmp.lt.s32.totalorder %v9306_v16, %v9194_v11  ;;  %v347_v16 = vld [vmem:[%s8979_s19 + $0x18] sm:$0xff] }
  0x92   : > { %940 = vmatprep.subr.mxu1 %v9045_v21  ;;  %864 = vmatpush1.msra.mxu0 %v9015_v10  ;;  %v9280_v10 = vstv %s3439_s13  ;;  %v12305_v21 = vld [vmem:[#allocation26_spill] sm:$0xff] }
  0x93   : > { %941 = vmatpush1.msra.mxu1 %v9051_v23  ;;  %865 = vmatprep.subr.mxu0 %v9019_v12  ;;  %v3287_v12 = vsel %vm3285_vm6, 1, %v12302_v55  ;;  %vm3728_vm7 = vcmp.lt.s32.totalorder %v9280_v10, %v9163_v59  ;;  %v12307_v23 = vld [vmem:[#allocation28_spill] sm:$0xff]  ;;  %vm3286_vm6 = vcmp.lt.s32.totalorder %v9267_v8, %v9194_v11 }
  0x94   : > { %942 = vmatprep.subr.mxu1 %v9053_v24  ;;  %866 = vmatpush1.msra.mxu0 %v9023_v13  ;;  %v9293_v13 = vstv %s3882_s30  ;;  %v9332_v24 = vstv %s5211_s21 }
  0x95   : > { %1961 = vperm.xlu0 %8090, %v1958_v5   ;;  %943 = vmatpush1.msra.mxu1 %v9059_v26  ;;  %vm4171_vm8 = vcmp.lt.s32.totalorder %v9293_v13, %v9163_v59  ;;  %v12309_v26 = vld [vmem:[#allocation29_spill] sm:$0xff]  ;;  %vm5500_vm11 = vcmp.lt.s32.totalorder %v9332_v24, %v9163_v59  ;;  %v349_v5 = vld [vmem:[%s8979_s19 + $0x28] sm:$0xff] }
  0x96   : > { %867 = vmatprep.subr.mxu0 %v9028_v15  ;;  %944 = vmatprep.subr.mxu1 %v9065_v28  ;;  %v3730_v15 = vsel %vm3728_vm7, 1, %v12302_v55  ;;  %v5059_v28 = vsel %vm5057_vm10, 1, %v12302_v55  ;;  %vm3729_vm7 = vcmp.lt.s32.totalorder %v9280_v10, %v9194_v11  ;;  %vm5058_vm10 = vcmp.lt.s32.totalorder %v9319_v18, %v9194_v11  ;;  %v346_v18 = vld [vmem:[%s8979_s19 + $0x10] sm:$0xff] }
  0x97   : > { %868 = vmatpush1.msra.mxu0 %v9034_v17  ;;  %945 = vmatpush1.msra.mxu1 %v9071_v30  ;;  %v4173_v17 = vsel %vm4171_vm8, 1, %v12302_v55  ;;  %v12312_v30 = vld [vmem:[#allocation25_spill] sm:$0xff]  ;;  %vm4172_vm8 = vcmp.lt.s32.totalorder %v9293_v13, %v9194_v11 }
  0x98   : > { %869 = vmatprep.subr.mxu0 %v9042_v20  ;;  %946 = vmatprep.subr.mxu1 %v9077_v32  ;;  %v12304_v20 = vld [vmem:[#allocation20_spill] sm:$0xff]  ;;  %v12313_v32 = vld [vmem:[#allocation27_spill] sm:$0xff] }
  0x99   : > { %2404 = vperm.xlu0 %8090, %v2401_v7   ;;  %870 = vmatpush1.msra.mxu0 %v9048_v22  ;;  %v12306_v22 = vld [vmem:[#allocation21_spill] sm:$0xff] }
  0x9a   : > { %947 = vmatpush1.msra.mxu1 %v9083_v34  ;;  %871 = vmatprep.subr.mxu0 %v9056_v25  ;;  %v12308_v25 = vld [vmem:[#allocation22_spill] sm:$0xff]  ;;  %v6385_v34 = vstv %s6097_s2 }
  0x9b   : > { %948 = vmatprep.subr.mxu1 %v9089_v36  ;;  %872 = vmatpush1.msra.mxu0 %v9062_v27  ;;  %v12310_v27 = vld [vmem:[#allocation23_spill] sm:$0xff]  ;;  %vm6386_vm13 = vcmp.lt.s32.totalorder %v6385_v34, %v9163_v59  ;;  %v9359_v36 = vstv %s6540_s17 }
  0x9c   : > { %949 = vmatpush1.msra.mxu1 %v9095_v38  ;;  %873 = vmatprep.subr.mxu0 %v9068_v29  ;;  %v12311_v29 = vld [vmem:[#allocation24_spill] sm:$0xff]  ;;  %vm6829_vm14 = vcmp.lt.s32.totalorder %v9359_v36, %v9163_v59  ;;  %v9365_v38 = vstv %s6983_s9 }
  0x9d   : > { %2847 = vperm.xlu0 %8090, %v2844_v9   ;;  %950 = vmatprep.subr.mxu1 %v9101_v40  ;;  %vm7272_vm15 = vcmp.lt.s32.totalorder %v9365_v38, %v9163_v59 }
  0x9e   : > { %874 = vmatpush1.msra.mxu0 %v9074_v31  ;;  %951 = vmatpush1.msra.mxu1 %v9107_v42  ;;  %v9345_v31 = vstv %s5654_s18  ;;  %v7274_v40 = vsel %vm7272_vm15, 1, %v12302_v55  ;;  %vm7273_vm15 = vcmp.lt.s32.totalorder %v9365_v38, %v9194_v11  ;;  %v342_v38 = vld [vmem:[#allocation3 + $0x8] sm:$0xff] }
  0x9f   : > { %875 = vmatprep.subr.mxu0 %v9080_v33  ;;  %952 = vmatprep.subr.mxu1 %v9113_v44  ;;  %v5502_v33 = vsel %vm5500_vm11, 1, %v12302_v55  ;;  %vm5943_vm12 = vcmp.lt.s32.totalorder %v9345_v31, %v9163_v59  ;;  %v1516_v44 = vsel %vm1514_vm2, 1, %v12302_v55  ;;  %vm5501_vm11 = vcmp.lt.s32.totalorder %v9332_v24, %v9194_v11 }
  0xa0   : > { %876 = vmatpush1.msra.mxu0 %v9086_v35  ;;  %953 = vmatpush1.msra.mxu1 %v9119_v46  ;;  %v5945_v35 = vsel %vm5943_vm12, 1, %v12302_v55  ;;  %v2402_v46 = vsel %vm2400_vm4, 1, %v12302_v55  ;;  %v5503_v53 = vsel %vm5501_vm11, 1, %v12302_v55  ;;  %vm5944_vm12 = vcmp.lt.s32.totalorder %v9345_v31, %v9194_v11 }
  0xa1   : > { %3290 = vperm.xlu0 %8090, %v3287_v12   ;;  %877 = vmatprep.subr.mxu0 %v9092_v37  ;;  %v6388_v37 = vsel %vm6386_vm13, 1, %v12302_v55  ;;  %vm6387_vm13 = vcmp.lt.s32.totalorder %v6385_v34, %v9194_v11  ;;  %v7275_v10 = vsel %vm7273_vm15, 1, %v12302_v55 }
  0xa2   : > { %954 = vmatprep.subr.mxu1 %v9125_v48  ;;  %878 = vmatpush1.msra.mxu0 %v9098_v39  ;;  %v6831_v39 = vsel %vm6829_vm14, 1, %v12302_v55  ;;  %v3288_v48 = vsel %vm3286_vm6, 1, %v12302_v55  ;;  %vm6830_vm14 = vcmp.lt.s32.totalorder %v9359_v36, %v9194_v11 }
  0xa3   : > { %955 = vmatpush1.msra.mxu1 %v9131_v50  ;;  %879 = vmatprep.subr.mxu0 %v9104_v41  ;;  %v1069_v41 = vstv %s781_s29  ;;  %v4174_v50 = vsel %vm4172_vm8, 1, %v12302_v55  ;;  %v6832_v2 = vsel %vm6830_vm14, 1, %v12302_v55 }
  0xa4   : > { %956 = vmatprep.subr.mxu1 %v9137_v52  ;;  %880 = vmatpush1.msra.mxu0 %v9110_v43  ;;  %vm1070_vm0 = vcmp.lt.s32.totalorder %v1069_v41, %v9163_v59  ;;  %vm1071_vm1 = vcmp.lt.s32.totalorder %v1069_v41, %v9194_v11  ;;  %v5060_v52 = vsel %vm5058_vm10, 1, %v12302_v55  ;;  %v345_v59 = vld [vmem:[%s8979_s19 + $0x8] sm:$0xff] }
  0xa5   : > { %3733 = vperm.xlu0 %8090, %v3730_v15   ;;  %957 = vmatpush1.msra.mxu1 %v9146_v54  ;;  %v1072_v42 = vsel %vm1070_vm0, 1, %v12302_v55  ;;  %v1073_v43 = vsel %vm1071_vm1, 1, %v12302_v55  ;;  %v5946_v54 = vsel %vm5944_vm12, 1, %v12302_v55 }
  0xa6   : > { %881 = vmatprep.subr.mxu0 %v9116_v45  ;;  %958 = vmatprep.subr.mxu1 %v9152_v56  ;;  %v1959_v45 = vsel %vm1957_vm3, 1, %v12302_v55  ;;  %v344_v56 = vld [vmem:[%s8979_s19] sm:$0xff] }
  0xa7   : > { %882 = vmatpush1.msra.mxu0 %v9122_v47  ;;  %959 = vmatpush1.msra.mxu1 %v9158_v58  ;;  %v2845_v47 = vsel %vm2843_vm5, 1, %v12302_v55 }
  0xa8   : > { %883 = vmatprep.subr.mxu0 %v9128_v49  ;;  %960 = vmatprep.subr.mxu1 %v9170_v62  ;;  %v3731_v49 = vsel %vm3729_vm7, 1, %v12302_v55 }
  0xa9   : > { %4176 = vperm.xlu0 %8090, %v4173_v17   ;;  %884 = vmatpush1.msra.mxu0 %v12304_v20  ;;  %v351_v20 = vld [vmem:[%s8979_s19 + $0x38] sm:$0xff] }
  0xaa   : > { %961 = vmatpush1.msra.mxu1 %v12305_v21  ;;  %885 = vmatprep.subr.mxu0 %v12306_v22 }
  0xab   : > { %962 = vmatprep.subr.mxu1 %v12307_v23  ;;  %886 = vmatpush1.msra.mxu0 %v12308_v25  ;;  %v350_v23 = vld [vmem:[%s8979_s19 + $0x30] sm:$0xff] }
  0xac   : > { %963 = vmatpush1.msra.mxu1 %v12309_v26  ;;  %887 = vmatprep.subr.mxu0 %v12310_v27 }
  0xad   : > { %4619 = vperm.xlu0 %8090, %v4616_v19   ;;  %964 = vmatprep.subr.mxu1 %v9198_v57  ;;  %v6389_v57 = vsel %vm6387_vm13, 1, %v12302_v55 }
  0xae   : > { %888 = vmatpush1.msra.mxu0 %v12311_v29  ;;  %965 = vmatpush1.msra.mxu1 %v9203_v61 }
  0xaf   : > { %889 = vmatprep.subr.mxu0 %v12312_v30  ;;  %966 = vmatprep.subr.mxu1 %v9208_v51  ;;  %v4617_v51 = vsel %vm4615_vm9, 1, %v12302_v55 }
  0xb0   : > { %890 = vmatpush1.msra.mxu0 %v12313_v32  ;;  %923 = vmatprep.mubr.f32.mxu0 %v12303_v63 }
  0xb1   : > { %5062 = vperm.xlu0 %8090, %v5059_v28   ;;  %967 = vmatpush1.msra.mxu1 %v9215_v1  ;;  %v348_v1 = vld [vmem:[%s8979_s19 + $0x20] sm:$0xff] }
  0xb2   : > { %1000 = vmatprep.mubr.f32.mxu1 %v12303_v63  ;;  %1075 = vperm.xlu1 %8091, %v1072_v42  }
  0xb5   : > { %5505 = vperm.xlu0 %8090, %v5502_v33  }
  0xb6   : > { %1078 = vperm.xlu1 %8091, %v1073_v43  }
  0xb9   : > { %5948 = vperm.xlu0 %8090, %v5945_v35  }
  0xba   : > { %1521 = vperm.xlu1 %8091, %v1516_v44  }
  0xbd   : > { %6391 = vperm.xlu0 %8090, %v6388_v37  }
  0xbe   : > { %1964 = vperm.xlu1 %8091, %v1959_v45  }
  0xc1   : > { %6834 = vperm.xlu0 %8090, %v6831_v39  }
  0xc2   : > { %2407 = vperm.xlu1 %8091, %v2402_v46  }
  0xc5   : > { %7277 = vperm.xlu0 %8090, %v7274_v40  }
  0xc6   : > { %2850 = vperm.xlu1 %8091, %v2845_v47   ;;  %v343_v47 = vld [vmem:[#allocation3] sm:$0xff] }
  0xca   : > { %3293 = vperm.xlu1 %8091, %v3288_v48  }
  0xce   : > { %3736 = vperm.xlu1 %8091, %v3731_v49  }
  0xd2   : > { %4179 = vperm.xlu1 %8091, %v4174_v50  }
  0xd6   : > { %4622 = vperm.xlu1 %8091, %v4617_v51  }
  0xda   : > { %5065 = vperm.xlu1 %8091, %v5060_v52  }
  0xde   : > { %5508 = vperm.xlu1 %8091, %v5503_v53  }
  0xe2   : > { %5951 = vperm.xlu1 %8091, %v5946_v54  }
  0xe6   : > { %6394 = vperm.xlu1 %8091, %v6389_v57  }
  0xea   : > { %6837 = vperm.xlu1 %8091, %v6832_v2  }
  0xee   : > { %7280 = vperm.xlu1 %8091, %v7275_v10  }
 0x104   : > { %v633_v40 = vpop.permute.xlu0 %632 }
 0x105   : > { %vm637_vm0 = vcmp.eq.s32.totalorder %v633_v40, 1  ;;  %v9491_v40 = vld [vmem:[#allocation9 + $0x1c8] sm:$0xff] }
 0x108   : > { %v636_v51 = vpop.permute.xlu0 %635 }
 0x109   : > { %vm638_vm1 = vcmp.eq.s32.totalorder %v636_v51, 1  ;;  %v9523_v51 = vld [vmem:[#allocation9 + $0x190] sm:$0xff] }
 0x147   : > { %v482_v58 = vpop.f32.mrf.mxu0 }
 0x148   : > { %v570_v61 = vadd.f32 %v482_v58, %v344_v56  ;;  %v8789_v58 = vmov 1966171168  }
 0x149   : > { %v484_v62 = vpop.f32.mrf.mxu0 }
 0x14a   : > { %v7630_v60 = vmul.f32 -1.442695, %v570_v61  ;;  %v571_v4 = vadd.f32 %v484_v62, %v345_v59  ;;  %v653_v59 = vunpack.c.l.s4 %v8789_v58  ;;  %v655_v61 = vlaneseq  ;;  %v9535_v58 = vld [vmem:[#allocation9 + $0x170] sm:$0xff] }
 0x14b   : > { %v488_v14 = vpop.f32.mrf.mxu0  ;;  %v559_v8 = vpop.f32.mrf.mxu1 }
 0x14c   : > { %8092 = vpow2.f32 %v7630_v60  ;;  %v7632_v6 = vmul.f32 -1.442695, %v571_v4  ;;  %v574_v7 = vadd.f32 %v488_v14, %v348_v1  ;;  %v572_v22 = vadd.f32 %v559_v8, %v346_v18 }
 0x14d   : > { %v490_v9 = vpop.f32.mrf.mxu0  ;;  %v561_v15 = vpop.f32.mrf.mxu1  ;;  %v654_v62 = vunpack.c.0.s8 %v653_v59  ;;  %v656_v1 = vshrl.u32 %v655_v61, 7  ;;  %v9539_v59 = vld [vmem:[#allocation9 + $0x148] sm:$0xff]  ;;  %v9541_v61 = vld [vmem:[#allocation9 + $0x158] sm:$0xff] }
 0x14e   : > { %8094 = vpow2.f32 %v7632_v6  ;;  %v7631_v12 = vmul.f32 -1.442695, %v574_v7  ;;  %v575_v13 = vadd.f32 %v490_v9, %v349_v5  ;;  %v573_v19 = vadd.f32 %v561_v15, %v347_v16 }
 0x14f   : > { %v565_v17 = vpop.f32.mrf.mxu1  ;;  %v9431_v4 = vsub.s32 %v654_v62, %v656_v1  ;;  %v9545_v62 = vld [vmem:[#allocation9 + $0x140] sm:$0xff]  ;;  %v9547_v1 = vld [vmem:[#allocation9 + $0x150] sm:$0xff] }
 0x150   : > { %8096 = vpow2.f32 %v7631_v12  ;;  %v7633_v11 = vmul.f32 -1.442695, %v575_v13  ;;  %v7634_v24 = vmul.f32 -1.442695, %v573_v19  ;;  %v576_v26 = vadd.f32 %v565_v17, %v350_v23 }
 0x151   : > { %v567_v21 = vpop.f32.mrf.mxu1 }
 0x152   : > { %8098 = vpow2.f32 %v7633_v11  ;;  %v577_v25 = vadd.f32 %v567_v21, %v351_v20 }
 0x153   : > { %8100 = vtanh.f32 %v572_v22 }
 0x154   : > { %8102 = vpow2.f32 %v7634_v24  ;;  %v7635_v29 = vmul.f32 -1.442695, %v577_v25 }
 0x159   : > { %v8093_v55 = vpop.eup %8092 }
 0x15a   : > { %v584_v27 = vadd.f32 1.0, %v8093_v55 }
 0x15b   : > { %v8095_v28 = vpop.eup %8094 }
 0x15c   : > { %8104 = vrcp.f32 %v584_v27  ;;  %v596_v30 = vadd.f32 1.0, %v8095_v28 }
 0x15d   : > { %v8097_v31 = vpop.eup %8096  ;;  %8106 = vtanh.f32 %v576_v26 }
 0x15e   : > { %8108 = vrcp.f32 %v596_v30  ;;  %v585_v32 = vadd.f32 1.0, %v8097_v31 }
 0x15f   : > { %v8099_v33 = vpop.eup %8098  ;;  %8110 = vpow2.f32 %v7635_v29 }
 0x160   : > { %8112 = vrcp.f32 %v585_v32  ;;  %v597_v34 = vadd.f32 1.0, %v8099_v33  ;;  %v8101_v35 = vpop.eup %8100 }
 0x161   : > { %v8103_v36 = vpop.eup %8102 }
 0x162   : > { %8114 = vrcp.f32 %v597_v34  ;;  %v610_v42 = vadd.f32 1.0, %v8103_v36  ;;  %v9479_v36 = vld [vmem:[#allocation9 + $0x1e8] sm:$0xff] }
 0x163   : > { %1302 = vmatprep.subr.mxu0 %v9479_v36 }
 0x164   : > { %8116 = vrcp.f32 %v610_v42  ;;  %v9497_v42 = vld [vmem:[#allocation9 + $0x1c0] sm:$0xff] }
 0x169   : > { %v8105_v37 = vpop.eup %8104 }
 0x16a   : > { %v8107_v39 = vpop.eup %8106  ;;  %v618_v45 = vmul.f32 %v8105_v37, %v8101_v35  ;;  %v9481_v37 = vld [vmem:[#allocation9 + $0x1f8] sm:$0xff] }
 0x16b   : > { %v8109_v41 = vpop.eup %8108  ;;  %1379 = vmatprep.subr.mxu1 %v9481_v37 }
 0x16c   : > { %v8111_v43 = vpop.eup %8110  ;;  %v616_v44 = vmul.f32 %v8109_v41, %v342_v38  ;;  %v9493_v41 = vld [vmem:[#allocation9 + $0x1d8] sm:$0xff] }
 0x16d   : > { %v8113_v46 = vpop.eup %8112  ;;  %v611_v50 = vadd.f32 1.0, %v8111_v43  ;;  %v9499_v43 = vld [vmem:[#allocation9 + $0x1d0] sm:$0xff] }
 0x16e   : > { %v620_v48 = vadd.f32 %v618_v45, %v616_v44  ;;  %v619_v54 = vmul.f32 %v8113_v46, %v8107_v39  ;;  %v9487_v39 = vld [vmem:[#allocation9 + $0x1f0] sm:$0xff]  ;;  %v9503_v44 = vld [vmem:[#allocation9 + $0x1a8] sm:$0xff]  ;;  %v9505_v45 = vld [vmem:[#allocation9 + $0x1b8] sm:$0xff] }
 0x16f   : > { %v8115_v49 = vpop.eup %8114  ;;  %v9509_v46 = vld [vmem:[#allocation9 + $0x1a0] sm:$0xff] }
 0x170   : > { %8118 = vtanh.f32 %v620_v48  ;;  %v9426_v52 = vsel %vm637_vm0, %v620_v48, %v342_v38  ;;  %v617_v53 = vmul.f32 %v8115_v49, %v343_v47  ;;  %v9485_v38 = vld [vmem:[#allocation9 + $0x1e0] sm:$0xff]  ;;  %v9515_v48 = vld [vmem:[#allocation9 + $0x188] sm:$0xff]  ;;  %v9517_v49 = vld [vmem:[#allocation9 + $0x198] sm:$0xff] }
 0x171   : > { %8120 = vrcp.f32 %v611_v50  ;;  %v8117_v2 = vpop.eup %8116  ;;  %v9521_v50 = vld [vmem:[#allocation9 + $0x180] sm:$0xff] }
 0x172   : > { %v621_v56 = vadd.f32 %v619_v54, %v617_v53  ;;  %v9527_v53 = vld [vmem:[#allocation9 + $0x168] sm:$0xff]  ;;  %v9529_v54 = vld [vmem:[#allocation9 + $0x178] sm:$0xff] }
 0x174   : > { %8122 = vtanh.f32 %v621_v56  ;;  %v9429_v57 = vsel %vm638_vm1, %v621_v56, %v343_v47  ;;  %v9511_v47 = vld [vmem:[#allocation9 + $0x1b0] sm:$0xff]  ;;  %v9533_v56 = vld [vmem:[#allocation9 + $0x160] sm:$0xff] }
 0x17d   : > { %v8119_v60 = vpop.eup %8118 }
 0x17e   : > { %v624_v14 = vmul.f32 %v8119_v60, %v8117_v2  ;;  %v8121_v5 = vpop.eup %8120  ;;  %v9551_v2 = vld [vmem:[#allocation9 + $0x128] sm:$0xff]  ;;  %v9553_v60 = vld [vmem:[#allocation9 + $0x138] sm:$0xff] }
 0x180   : > { %v9435_v6 = vsel %vm637_vm0, %v624_v14, %v9186_v3  ;;  %v647_v7 = vsel %vm637_vm0, %v624_v14, 0.0  ;;  %v9557_v14 = vld [vmem:[#allocation9 + $0x120] sm:$0xff] }
 0x181   : > { %v8123_v8 = vpop.eup %8122  ;;  %v651_v9 = vcombine.high %v647_v7, %v647_v7  ;;  %v658_v10 = vrot.slane %v647_v7, %v9431_v4  ;;  %924 = vmatmul.mubr.f32.vlgmr.msra.gmra.mxu0 %v9435_v6  ;;  %1001 = vmatmul.mubr.f32.vlgmr.msra.gmra.mxu1 %v9435_v6  ;;  %v9563_v7 = vld [vmem:[#allocation9 + $0x108] sm:$0xff] }
 0x182   : > { %v625_v12 = vmul.f32 %v8123_v8, %v8121_v5  ;;  %929 = vmatprep.mubr.f32.mxu0 %v12303_v63  ;;  %1006 = vmatprep.mubr.f32.mxu1 %v12303_v63  ;;  %v9559_v5 = vld [vmem:[#allocation9 + $0x130] sm:$0xff]  ;;  %v9565_v8 = vld [vmem:[#allocation9 + $0x118] sm:$0xff] }
 0x183   : > { %v665_v3 = vrot.slane %v651_v9, %v9431_v4  ;;  %v666_v13 = vcombine.high %v658_v10, %v658_v10  ;;  %v674_v15 = vrot.slane %v658_v10, %v9431_v4  ;;  %7636 = vst.sshfl [vmem:[%s8990_s20] sm:$0x1 pattern:$0x73625140] %v658_v10  ;;  %1303 = vmatpush1.msra.mxu0 %v9485_v38  ;;  %v9569_v9 = vld [vmem:[#allocation9 + $0x100] sm:$0xff]  ;;  %v9571_v10 = vld [vmem:[#allocation9 + $0x110] sm:$0xff] }
 0x184   : > { %v9448_v11 = vsel %vm638_vm1, %v625_v12, %v9212_v0  ;;  %v648_v16 = vsel %vm638_vm1, %v625_v12, 0.0  ;;  %1380 = vmatpush1.msra.mxu1 %v9487_v39  ;;  %1304 = vmatprep.subr.mxu0 %v9491_v40  ;;  %v9575_v12 = vld [vmem:[#allocation9 + $0xe8] sm:$0xff] }
 0x185   : > { %v667_v17 = vcombine.high %v665_v3, %v665_v3  ;;  %v681_v18 = vrot.slane %v665_v3, %v9431_v4  ;;  %v688_v19 = vrot.slane %v666_v13, %v9431_v4  ;;  %v696_v20 = vcombine.high %v674_v15, %v674_v15  ;;  %7637 = vst.sshfl [vmem:[%s8990_s20 + $0x10] sm:$0x1 pattern:$0x73625140] %v666_v13  ;;  %v9581_v13 = vld [vmem:[#allocation9 + $0xe0] sm:$0xff]  ;;  %v9583_v15 = vld [vmem:[#allocation9 + $0xf0] sm:$0xff] }
 0x186   : > { %7638 = vst.sshfl [vmem:[%s8990_s20 + $0x40] sm:$0x1 pattern:$0x73625140] %v665_v3  ;;  %930 = vmatmul.mubr.f32.gmra.mxu0 %v9448_v11  ;;  %v700_v21 = vcombine.high %v648_v16, %v648_v16  ;;  %v707_v0 = vrot.slane %v648_v16, %v9431_v4  ;;  %1007 = vmatmul.mubr.f32.gmra.mxu1 %v9448_v11  ;;  %v9577_v3 = vld [vmem:[#allocation9 + $0xf8] sm:$0xff]  ;;  %v9587_v16 = vld [vmem:[#allocation9 + $0xc8] sm:$0xff] }
 0x187   : > { %1366 = vmatprep.mubr.f32.mxu0 %v12303_v63  ;;  %v695_v22 = vrot.slane %v667_v17, %v9431_v4  ;;  %v697_v23 = vcombine.high %v681_v18, %v681_v18  ;;  %v698_v24 = vcombine.high %v688_v19, %v688_v19  ;;  %767 = vst [vmem:[%s8990_s20 + $0x20] sm:$0x1] %v696_v20  ;;  %7639 = vst.sshfl [vmem:[%s8990_s20 + $0x50] sm:$0x1 pattern:$0x73625140] %v667_v17 }
 0x188   : > { %1443 = vmatprep.mubr.f32.mxu1 %v12303_v63  ;;  %v714_v25 = vrot.slane %v700_v21, %v9431_v4  ;;  %v715_v55 = vcombine.high %v707_v0, %v707_v0  ;;  %v723_v26 = vrot.slane %v707_v0, %v9431_v4  ;;  %7640 = vst.sshfl [vmem:[%s8990_s20 + $0x80] sm:$0x1 pattern:$0x73625140] %v707_v0  ;;  %v9589_v17 = vld [vmem:[#allocation9 + $0xd8] sm:$0xff]  ;;  %v9593_v18 = vld [vmem:[#allocation9 + $0xc0] sm:$0xff] }
 0x189   : > { %v699_v27 = vcombine.high %v695_v22, %v695_v22  ;;  %768 = vst [vmem:[%s8990_s20 + $0x30] sm:$0x1] %v698_v24  ;;  %771 = vst [vmem:[%s8990_s20 + $0x60] sm:$0x1] %v697_v23  ;;  %1381 = vmatprep.subr.mxu1 %v9493_v41  ;;  %1305 = vmatpush1.msra.mxu0 %v9497_v42  ;;  %v9595_v19 = vld [vmem:[#allocation9 + $0xd0] sm:$0xff]  ;;  %v9599_v20 = vld [vmem:[#allocation9 + $0xa8] sm:$0xff] }
 0x18a   : > { %v716_v28 = vcombine.high %v714_v25, %v714_v25  ;;  %v730_v29 = vrot.slane %v714_v25, %v9431_v4  ;;  %v737_v30 = vrot.slane %v715_v55, %v9431_v4  ;;  %v745_v31 = vcombine.high %v723_v26, %v723_v26  ;;  %7641 = vst.sshfl [vmem:[%s8990_s20 + $0x90] sm:$0x1 pattern:$0x73625140] %v715_v55  ;;  %v9601_v21 = vld [vmem:[#allocation9 + $0xb8] sm:$0xff]  ;;  %v9605_v0 = vld [vmem:[#allocation9 + $0xa0] sm:$0xff] }
 0x18b   : > { %7642 = vst.sshfl [vmem:[%s8990_s20 + $0xc0] sm:$0x1 pattern:$0x73625140] %v714_v25  ;;  %772 = vst [vmem:[%s8990_s20 + $0x70] sm:$0x1] %v699_v27  ;;  %1382 = vmatpush1.msra.mxu1 %v9499_v43  ;;  %1306 = vmatprep.subr.mxu0 %v9503_v44 }
 0x18c   : > { %v744_v32 = vrot.slane %v716_v28, %v9431_v4  ;;  %v746_v33 = vcombine.high %v730_v29, %v730_v29  ;;  %v747_v34 = vcombine.high %v737_v30, %v737_v30  ;;  %775 = vst [vmem:[%s8990_s20 + $0xa0] sm:$0x1] %v745_v31  ;;  %7643 = vst.sshfl [vmem:[%s8990_s20 + $0xd0] sm:$0x1 pattern:$0x73625140] %v716_v28  ;;  %1383 = vmatprep.subr.mxu1 %v9505_v45 }
 0x18d   : > { %1307 = vmatpush1.msra.mxu0 %v9509_v46  ;;  %1384 = vmatpush1.msra.mxu1 %v9511_v47  ;;  %12314 = vst [vmem:[#allocation20_spill] sm:$0xff] %v9593_v18  ;;  %12315 = vst [vmem:[#allocation26_spill] sm:$0xff] %v9595_v19  ;;  %v9607_v22 = vld [vmem:[#allocation9 + $0xb0] sm:$0xff]  ;;  %v9611_v23 = vld [vmem:[#allocation9 + $0x88] sm:$0xff] }
 0x18e   : > { %v748_v35 = vcombine.high %v744_v32, %v744_v32  ;;  %776 = vst [vmem:[%s8990_s20 + $0xb0] sm:$0x1] %v747_v34  ;;  %779 = vst [vmem:[%s8990_s20 + $0xe0] sm:$0x1] %v746_v33  ;;  %1308 = vmatprep.subr.mxu0 %v9515_v48  ;;  %1385 = vmatprep.subr.mxu1 %v9517_v49  ;;  %v9613_v24 = vld [vmem:[#allocation9 + $0x98] sm:$0xff]  ;;  %v9617_v25 = vld [vmem:[#allocation9 + $0x80] sm:$0xff] }
 0x18f   : > { %1309 = vmatpush1.msra.mxu0 %v9521_v50  ;;  %1386 = vmatpush1.msra.mxu1 %v9523_v51  ;;  %12316 = vst [vmem:[#allocation21_spill] sm:$0xff] %v9599_v20  ;;  %12317 = vst [vmem:[#allocation28_spill] sm:$0xff] %v9601_v21  ;;  %v9619_v55 = vld [vmem:[#allocation9 + $0x90] sm:$0xff]  ;;  %v9623_v26 = vld [vmem:[#allocation9 + $0x68] sm:$0xff] }
 0x190   : > { %780 = vst [vmem:[%s8990_s20 + $0xf0] sm:$0x1] %v748_v35  ;;  %1310 = vmatprep.subr.mxu0 %v9527_v53  ;;  %1387 = vmatprep.subr.mxu1 %v9529_v54  ;;  %12318 = vst [vmem:[#allocation22_spill] sm:$0xff] %v9605_v0  ;;  %v9625_v27 = vld [vmem:[#allocation9 + $0x78] sm:$0xff]  ;;  %v9629_v28 = vld [vmem:[#allocation9 + $0x60] sm:$0xff] }
 0x191   : > { %1311 = vmatpush1.msra.mxu0 %v9533_v56  ;;  %1388 = vmatpush1.msra.mxu1 %v9535_v58  ;;  %12319 = vst [vmem:[#allocation29_spill] sm:$0xff] %v9607_v22  ;;  %12320 = vst [vmem:[#allocation23_spill] sm:$0xff] %v9611_v23  ;;  %v9631_v29 = vld [vmem:[#allocation9 + $0x70] sm:$0xff]  ;;  %v9635_v30 = vld [vmem:[#allocation9 + $0x48] sm:$0xff] }
 0x192   : > { %1312 = vmatprep.subr.mxu0 %v9539_v59  ;;  %1389 = vmatprep.subr.mxu1 %v9541_v61  ;;  %12321 = vst [vmem:[#allocation24_spill] sm:$0xff] %v9613_v24  ;;  %12322 = vst [vmem:[#allocation25_spill] sm:$0xff] %v9617_v25  ;;  %v9637_v31 = vld [vmem:[#allocation9 + $0x58] sm:$0xff]  ;;  %v9641_v32 = vld [vmem:[#allocation9 + $0x40] sm:$0xff] }
 0x193   : > { %1313 = vmatpush1.msra.mxu0 %v9545_v62  ;;  %1390 = vmatpush1.msra.mxu1 %v9547_v1  ;;  %12323 = vst [vmem:[#allocation27_spill] sm:$0xff] %v9619_v55  ;;  %12324 = vst [vmem:[#allocation30_spill] sm:$0xff] %v9623_v26  ;;  %v9643_v33 = vld [vmem:[#allocation9 + $0x50] sm:$0xff]  ;;  %v9647_v34 = vld [vmem:[#allocation9 + $0x28] sm:$0xff] }
 0x194   : > { %1314 = vmatprep.subr.mxu0 %v9551_v2  ;;  %1391 = vmatprep.subr.mxu1 %v9553_v60  ;;  %12325 = vst [vmem:[#allocation31_spill] sm:$0xff] %v9625_v27  ;;  %12326 = vst [vmem:[#allocation32_spill] sm:$0xff] %v9629_v28  ;;  %v9649_v35 = vld [vmem:[#allocation9 + $0x38] sm:$0xff] }
 0x195   : > { %1315 = vmatpush1.msra.mxu0 %v9557_v14  ;;  %1392 = vmatpush1.msra.mxu1 %v9559_v5  ;;  %12327 = vst [vmem:[#allocation33_spill] sm:$0xff] %v9631_v29  ;;  %12328 = vst [vmem:[#allocation34_spill] sm:$0xff] %v9635_v30 }
 0x196   : > { %1316 = vmatprep.subr.mxu0 %v9563_v7  ;;  %1393 = vmatprep.subr.mxu1 %v9565_v8  ;;  %12329 = vst [vmem:[#allocation35_spill] sm:$0xff] %v9637_v31  ;;  %12330 = vst [vmem:[#allocation36_spill] sm:$0xff] %v9641_v32 }
 0x197   : > { %1317 = vmatpush1.msra.mxu0 %v9569_v9  ;;  %1394 = vmatpush1.msra.mxu1 %v9571_v10  ;;  %12331 = vst [vmem:[#allocation37_spill] sm:$0xff] %v9643_v33  ;;  %12332 = vst [vmem:[#allocation38_spill] sm:$0xff] %v9647_v34 }
 0x198   : > { %1318 = vmatprep.subr.mxu0 %v9575_v12  ;;  %1395 = vmatprep.subr.mxu1 %v9577_v3  ;;  %12333 = vst [vmem:[#allocation39_spill] sm:$0xff] %v9649_v35 }
 0x199   : > { %1319 = vmatpush1.msra.mxu0 %v9581_v13  ;;  %1396 = vmatpush1.msra.mxu1 %v9583_v15 }
 0x19a   : > { %1320 = vmatprep.subr.mxu0 %v9587_v16  ;;  %1397 = vmatprep.subr.mxu1 %v9589_v17 }
 0x19b   : > { %1321 = vmatpush1.msra.mxu0 %v9593_v18  ;;  %1398 = vmatpush1.msra.mxu1 %v9595_v19 }
 0x19c   : > { %1322 = vmatprep.subr.mxu0 %v9599_v20  ;;  %1399 = vmatprep.subr.mxu1 %v9601_v21  ;;  %v7646_v21 = vld [vmem:[%s8979_s19 + $0x50] sm:$0xff] }
 0x19d   : > { %1323 = vmatpush1.msra.mxu0 %v9605_v0  ;;  %1400 = vmatpush1.msra.mxu1 %v9607_v22 }
 0x19e   : > { %1324 = vmatprep.subr.mxu0 %v9611_v23  ;;  %1401 = vmatprep.subr.mxu1 %v9613_v24  ;;  %v7649_v24 = vld [vmem:[%s8979_s19 + $0x68] sm:$0xff] }
 0x19f   : > { %1325 = vmatpush1.msra.mxu0 %v9617_v25  ;;  %1402 = vmatpush1.msra.mxu1 %v9619_v55 }
 0x1a0   : > { %1326 = vmatprep.subr.mxu0 %v9623_v26  ;;  %1403 = vmatprep.subr.mxu1 %v9625_v27  ;;  %v7648_v27 = vld [vmem:[%s8979_s19 + $0x60] sm:$0xff] }
 0x1a1   : > { %1327 = vmatpush1.msra.mxu0 %v9629_v28  ;;  %1404 = vmatpush1.msra.mxu1 %v9631_v29  ;;  %v7645_v29 = vld [vmem:[%s8979_s19 + $0x48] sm:$0xff] }
 0x1a2   : > { %1328 = vmatprep.subr.mxu0 %v9635_v30  ;;  %1405 = vmatprep.subr.mxu1 %v9637_v31  ;;  %v9653_v30 = vld [vmem:[#allocation9 + $0x20] sm:$0xff]  ;;  %v9655_v31 = vld [vmem:[#allocation9 + $0x30] sm:$0xff] }
 0x1a3   : > { %1329 = vmatpush1.msra.mxu0 %v9641_v32  ;;  %1406 = vmatpush1.msra.mxu1 %v9643_v33  ;;  %12334 = vst [vmem:[#allocation40_spill] sm:$0xff] %v9653_v30  ;;  %12335 = vst [vmem:[#allocation41_spill] sm:$0xff] %v9655_v31  ;;  %v9659_v32 = vld [vmem:[#allocation9 + $0x8] sm:$0xff]  ;;  %v9661_v33 = vld [vmem:[#allocation9 + $0x18] sm:$0xff] }
 0x1a4   : > { %1330 = vmatprep.subr.mxu0 %v9647_v34  ;;  %1407 = vmatprep.subr.mxu1 %v9649_v35  ;;  %12336 = vst [vmem:[#allocation42_spill] sm:$0xff] %v9659_v32  ;;  %12337 = vst [vmem:[#allocation43_spill] sm:$0xff] %v9661_v33  ;;  %v9665_v34 = vld [vmem:[#allocation9] sm:$0xff]  ;;  %v9667_v35 = vld [vmem:[#allocation9 + $0x10] sm:$0xff] }
 0x1a5   : > { %1331 = vmatpush1.msra.mxu0 %v9653_v30  ;;  %1408 = vmatpush1.msra.mxu1 %v9655_v31  ;;  %12338 = vst [vmem:[#allocation44_spill] sm:$0xff] %v9665_v34  ;;  %12339 = vst [vmem:[#allocation45_spill] sm:$0xff] %v9667_v35  ;;  %v7644_v31 = vld [vmem:[%s8979_s19 + $0x40] sm:$0xff] }
 0x1a6   : > { %1332 = vmatprep.subr.mxu0 %v9659_v32  ;;  %1409 = vmatprep.subr.mxu1 %v9661_v33 }
 0x1a7   : > { %1333 = vmatpush1.msra.mxu0 %v9665_v34  ;;  %1410 = vmatpush1.msra.mxu1 %v9667_v35 }
 0x1a8   : > { %1745 = vmatprep.subr.mxu0 %v9479_v36  ;;  %1822 = vmatprep.subr.mxu1 %v9481_v37 }
 0x241   : > { %v925_v30 = vpop.f32.mrf.mxu0  ;;  %v1002_v32 = vpop.f32.mrf.mxu1 }
 0x242   : > { %v1013_v28 = vadd.f32 %v7644_v31, %v925_v30  ;;  %v7647_v30 = vld [vmem:[%s8979_s19 + $0x58] sm:$0xff] }
 0x243   : > { %v927_v33 = vpop.f32.mrf.mxu0  ;;  %v1004_v34 = vpop.f32.mrf.mxu1 }
 0x244   : > { %v7652_v26 = vmul.f32 -1.442695, %v1013_v28  ;;  %v1014_v55 = vadd.f32 %v7645_v29, %v927_v33  ;;  %v1016_v28 = vadd.f32 %v7647_v30, %v1004_v34  ;;  %v7651_v29 = vld [vmem:[%s8979_s19 + $0x78] sm:$0xff] }
 0x246   : > { %v931_v25 = vpop.f32.mrf.mxu0  ;;  %8124 = vpow2.f32 %v7652_v26  ;;  %v7654_v35 = vmul.f32 -1.442695, %v1014_v55  ;;  %v1008_v31 = vpop.f32.mrf.mxu1  ;;  %v7656_v20 = vmul.f32 -1.442695, %v1016_v28  ;;  %v1015_v55 = vadd.f32 %v7646_v21, %v1002_v32 }
 0x247   : > { %v1017_v36 = vadd.f32 %v7648_v27, %v931_v25  ;;  %v7650_v25 = vld [vmem:[%s8979_s19 + $0x70] sm:$0xff]  ;;  %v1076_v32 = vpop.permute.xlu1 %1075 }
 0x248   : > { %v933_v23 = vpop.f32.mrf.mxu0  ;;  %8126 = vpow2.f32 %v7654_v35  ;;  %v1010_v33 = vpop.f32.mrf.mxu1  ;;  %vm1080_vm2 = vcmp.eq.s32.totalorder %v1076_v32, 1 }
 0x249   : > { %v7653_v37 = vmul.f32 -1.442695, %v1017_v36  ;;  %v1018_v22 = vadd.f32 %v7649_v24, %v933_v23  ;;  %v1020_v26 = vadd.f32 %v7651_v29, %v1010_v33  ;;  %v1019_v36 = vadd.f32 %v7650_v25, %v1008_v31 }
 0x24b   : > { %8128 = vpow2.f32 %v7653_v37  ;;  %v7655_v0 = vmul.f32 -1.442695, %v1018_v22  ;;  %v7657_v35 = vmul.f32 -1.442695, %v1020_v26 }
 0x24d   : > { %8130 = vpow2.f32 %v7655_v0 }
 0x24e   : > { %8132 = vpow2.f32 %v7656_v20 }
 0x253   : > { %v8125_v19 = vpop.eup %8124 }
 0x254   : > { %v1027_v18 = vadd.f32 1.0, %v8125_v19 }
 0x255   : > { %v8127_v27 = vpop.eup %8126 }
 0x256   : > { %8134 = vrcp.f32 %v1027_v18  ;;  %v1039_v23 = vadd.f32 1.0, %v8127_v27  ;;  %v1079_v27 = vpop.permute.xlu1 %1078 }
 0x257   : > { %8136 = vtanh.f32 %v1015_v55  ;;  %vm1081_vm3 = vcmp.eq.s32.totalorder %v1079_v27, 1 }
 0x258   : > { %v8129_v24 = vpop.eup %8128  ;;  %8138 = vrcp.f32 %v1039_v23 }
 0x259   : > { %v1028_v0 = vadd.f32 1.0, %v8129_v24  ;;  %8140 = vpow2.f32 %v7657_v35 }
 0x25a   : > { %v8131_v22 = vpop.eup %8130 }
 0x25b   : > { %8142 = vrcp.f32 %v1028_v0  ;;  %v1040_v34 = vadd.f32 1.0, %v8131_v22  ;;  %v8133_v37 = vpop.eup %8132 }
 0x25c   : > { %8144 = vtanh.f32 %v1019_v36  ;;  %v1053_v20 = vadd.f32 1.0, %v8133_v37 }
 0x25d   : > { %8146 = vrcp.f32 %v1040_v34 }
 0x25e   : > { %8148 = vrcp.f32 %v1053_v20 }
 0x263   : > { %v8135_v21 = vpop.eup %8134 }
 0x264   : > { %v8137_v19 = vpop.eup %8136 }
 0x265   : > { %v8139_v30 = vpop.eup %8138  ;;  %v1061_v18 = vmul.f32 %v8137_v19, %v8135_v21 }
 0x266   : > { %v8141_v28 = vpop.eup %8140  ;;  %v1059_v29 = vmul.f32 %v8139_v30, %v9426_v52 }
 0x267   : > { %v1054_v25 = vadd.f32 1.0, %v8141_v28 }
 0x268   : > { %v8143_v33 = vpop.eup %8142  ;;  %v1063_v26 = vadd.f32 %v1061_v18, %v1059_v29 }
 0x269   : > { %v8145_v31 = vpop.eup %8144 }
 0x26a   : > { %v8147_v55 = vpop.eup %8146  ;;  %8150 = vtanh.f32 %v1063_v26  ;;  %v9684_v35 = vsel %vm1080_vm2, %v1063_v26, %v9426_v52  ;;  %v1062_v23 = vmul.f32 %v8145_v31, %v8143_v33 }
 0x26b   : > { %v1060_v24 = vmul.f32 %v8147_v55, %v9429_v57  ;;  %8152 = vrcp.f32 %v1054_v25  ;;  %v8149_v22 = vpop.eup %8148 }
 0x26d   : > { %v1064_v36 = vadd.f32 %v1062_v23, %v1060_v24 }
 0x26f   : > { %8154 = vtanh.f32 %v1064_v36  ;;  %v9689_v0 = vsel %vm1081_vm3, %v1064_v36, %v9429_v57 }
 0x277   : > { %v8151_v34 = vpop.eup %8150 }
 0x278   : > { %v1067_v37 = vmul.f32 %v8151_v34, %v8149_v22  ;;  %v8153_v21 = vpop.eup %8152 }
 0x27a   : > { %v9693_v52 = vsel %vm1080_vm2, %v1067_v37, %v9435_v6  ;;  %v1090_v19 = vsel %vm1080_vm2, %v1067_v37, 0.0 }
 0x27b   : > { %v1094_v20 = vcombine.high %v1090_v19, %v1090_v19  ;;  %v1101_v28 = vrot.slane %v1090_v19, %v9431_v4  ;;  %1367 = vmatmul.mubr.f32.vlgmr.msra.gmra.mxu0 %v9693_v52  ;;  %1444 = vmatmul.mubr.f32.vlgmr.msra.gmra.mxu1 %v9693_v52  ;;  %v12340_v19 = vld [vmem:[#allocation20_spill] sm:$0xff] }
 0x27c   : > { %v8155_v30 = vpop.eup %8154  ;;  %1372 = vmatprep.mubr.f32.mxu0 %v12303_v63  ;;  %1449 = vmatprep.mubr.f32.mxu1 %v12303_v63 }
 0x27d   : > { %v1068_v57 = vmul.f32 %v8155_v30, %v8153_v21  ;;  %v1108_v6 = vrot.slane %v1094_v20, %v9431_v4  ;;  %v1109_v18 = vcombine.high %v1101_v28, %v1101_v28  ;;  %v1117_v32 = vrot.slane %v1101_v28, %v9431_v4  ;;  %7658 = vst.sshfl [vmem:[%s8990_s20 + $0x1] sm:$0x1 pattern:$0x73625140] %v1101_v28  ;;  %v12341_v30 = vld [vmem:[#allocation26_spill] sm:$0xff]  ;;  %v12342_v20 = vld [vmem:[#allocation21_spill] sm:$0xff] }
 0x27e   : > { %1746 = vmatpush1.msra.mxu0 %v9485_v38  ;;  %1823 = vmatpush1.msra.mxu1 %v9487_v39  ;;  %v12343_v28 = vld [vmem:[#allocation28_spill] sm:$0xff] }
 0x27f   : > { %v9708_v29 = vsel %vm1081_vm3, %v1068_v57, %v9448_v11  ;;  %v1091_v33 = vsel %vm1081_vm3, %v1068_v57, 0.0  ;;  %1747 = vmatprep.subr.mxu0 %v9491_v40  ;;  %1824 = vmatprep.subr.mxu1 %v9493_v41  ;;  %v1110_v31 = vcombine.high %v1108_v6, %v1108_v6  ;;  %v1124_v26 = vrot.slane %v1108_v6, %v9431_v4  ;;  %v12344_v57 = vld [vmem:[#allocation22_spill] sm:$0xff] }
 0x280   : > { %v1131_v55 = vrot.slane %v1109_v18, %v9431_v4  ;;  %v1139_v38 = vcombine.high %v1117_v32, %v1117_v32  ;;  %7659 = vst.sshfl [vmem:[%s8990_s20 + $0x11] sm:$0x1 pattern:$0x73625140] %v1109_v18  ;;  %1373 = vmatmul.mubr.f32.gmra.mxu0 %v9708_v29  ;;  %v1143_v11 = vcombine.high %v1091_v33, %v1091_v33  ;;  %v12346_v18 = vld [vmem:[#allocation23_spill] sm:$0xff]  ;;  %v12347_v32 = vld [vmem:[#allocation24_spill] sm:$0xff] }
 0x281   : > { %7660 = vst.sshfl [vmem:[%s8990_s20 + $0x41] sm:$0x1 pattern:$0x73625140] %v1108_v6  ;;  %v1150_v39 = vrot.slane %v1091_v33, %v9431_v4  ;;  %1450 = vmatmul.mubr.f32.gmra.mxu1 %v9708_v29  ;;  %1748 = vmatpush1.msra.mxu0 %v9497_v42  ;;  %v1138_v40 = vrot.slane %v1110_v31, %v9431_v4  ;;  %v12345_v6 = vld [vmem:[#allocation29_spill] sm:$0xff] }
 0x282   : > { %v1140_v41 = vcombine.high %v1124_v26, %v1124_v26  ;;  %v1141_v25 = vcombine.high %v1131_v55, %v1131_v55  ;;  %1210 = vst [vmem:[%s8990_s20 + $0x21] sm:$0x1] %v1139_v38  ;;  %7661 = vst.sshfl [vmem:[%s8990_s20 + $0x51] sm:$0x1 pattern:$0x73625140] %v1110_v31  ;;  %1825 = vmatpush1.msra.mxu1 %v9499_v43  ;;  %1749 = vmatprep.subr.mxu0 %v9503_v44 }
 0x283   : > { %v1157_v27 = vrot.slane %v1143_v11, %v9431_v4  ;;  %v1158_v23 = vcombine.high %v1150_v39, %v1150_v39  ;;  %v1166_v24 = vrot.slane %v1150_v39, %v9431_v4  ;;  %7662 = vst.sshfl [vmem:[%s8990_s20 + $0x81] sm:$0x1 pattern:$0x73625140] %v1150_v39  ;;  %1826 = vmatprep.subr.mxu1 %v9505_v45  ;;  %v12348_v33 = vld [vmem:[#allocation25_spill] sm:$0xff]  ;;  %v12349_v31 = vld [vmem:[#allocation27_spill] sm:$0xff] }
 0x284   : > { %1750 = vmatpush1.msra.mxu0 %v9509_v46  ;;  %v1142_v42 = vcombine.high %v1138_v40, %v1138_v40  ;;  %1211 = vst [vmem:[%s8990_s20 + $0x31] sm:$0x1] %v1141_v25  ;;  %1214 = vst [vmem:[%s8990_s20 + $0x61] sm:$0x1] %v1140_v41  ;;  %1827 = vmatpush1.msra.mxu1 %v9511_v47  ;;  %v12350_v26 = vld [vmem:[#allocation30_spill] sm:$0xff]  ;;  %v12351_v55 = vld [vmem:[#allocation31_spill] sm:$0xff] }
 0x285   : > { %1751 = vmatprep.subr.mxu0 %v9515_v48  ;;  %v1159_v43 = vcombine.high %v1157_v27, %v1157_v27  ;;  %v1173_v44 = vrot.slane %v1157_v27, %v9431_v4  ;;  %v1180_v36 = vrot.slane %v1158_v23, %v9431_v4  ;;  %v1188_v22 = vcombine.high %v1166_v24, %v1166_v24  ;;  %v12352_v38 = vld [vmem:[#allocation32_spill] sm:$0xff]  ;;  %v12353_v11 = vld [vmem:[#allocation33_spill] sm:$0xff]  ;;  %v12354_v39 = vld [vmem:[#allocation34_spill] sm:$0xff] }
 0x286   : > { %7663 = vst.sshfl [vmem:[%s8990_s20 + $0x91] sm:$0x1 pattern:$0x73625140] %v1158_v23  ;;  %1828 = vmatprep.subr.mxu1 %v9517_v49  ;;  %1215 = vst [vmem:[%s8990_s20 + $0x71] sm:$0x1] %v1142_v42  ;;  %1752 = vmatpush1.msra.mxu0 %v9521_v50 }
 0x287   : > { %7664 = vst.sshfl [vmem:[%s8990_s20 + $0xc1] sm:$0x1 pattern:$0x73625140] %v1157_v27  ;;  %1829 = vmatpush1.msra.mxu1 %v9523_v51  ;;  %v1187_v45 = vrot.slane %v1159_v43, %v9431_v4  ;;  %v1189_v34 = vcombine.high %v1173_v44, %v1173_v44  ;;  %v1190_v37 = vcombine.high %v1180_v36, %v1180_v36  ;;  %1218 = vst [vmem:[%s8990_s20 + $0xa1] sm:$0x1] %v1188_v22 }
 0x288   : > { %7665 = vst.sshfl [vmem:[%s8990_s20 + $0xd1] sm:$0x1 pattern:$0x73625140] %v1159_v43  ;;  %1753 = vmatprep.subr.mxu0 %v9527_v53  ;;  %1830 = vmatprep.subr.mxu1 %v9529_v54  ;;  %v12355_v40 = vld [vmem:[#allocation35_spill] sm:$0xff]  ;;  %v12356_v41 = vld [vmem:[#allocation36_spill] sm:$0xff] }
 0x289   : > { %1754 = vmatpush1.msra.mxu0 %v9533_v56  ;;  %1831 = vmatpush1.msra.mxu1 %v9535_v58  ;;  %v1191_v21 = vcombine.high %v1187_v45, %v1187_v45  ;;  %1219 = vst [vmem:[%s8990_s20 + $0xb1] sm:$0x1] %v1190_v37  ;;  %1222 = vst [vmem:[%s8990_s20 + $0xe1] sm:$0x1] %v1189_v34  ;;  %v12357_v25 = vld [vmem:[#allocation37_spill] sm:$0xff]  ;;  %v12358_v27 = vld [vmem:[#allocation38_spill] sm:$0xff] }
 0x28a   : > { %1755 = vmatprep.subr.mxu0 %v9539_v59  ;;  %1832 = vmatprep.subr.mxu1 %v9541_v61  ;;  %v12359_v23 = vld [vmem:[#allocation39_spill] sm:$0xff]  ;;  %v12360_v24 = vld [vmem:[#allocation40_spill] sm:$0xff]  ;;  %v12361_v42 = vld [vmem:[#allocation41_spill] sm:$0xff] }
 0x28b   : > { %1756 = vmatpush1.msra.mxu0 %v9545_v62  ;;  %1833 = vmatpush1.msra.mxu1 %v9547_v1  ;;  %1223 = vst [vmem:[%s8990_s20 + $0xf1] sm:$0x1] %v1191_v21  ;;  %v12362_v43 = vld [vmem:[#allocation42_spill] sm:$0xff]  ;;  %v12363_v44 = vld [vmem:[#allocation43_spill] sm:$0xff]  ;;  %v12364_v36 = vld [vmem:[#allocation44_spill] sm:$0xff] }
 0x28c   : > { %1757 = vmatprep.subr.mxu0 %v9551_v2  ;;  %1834 = vmatprep.subr.mxu1 %v9553_v60  ;;  %v12365_v22 = vld [vmem:[#allocation45_spill] sm:$0xff]  ;;  %v7666_v45 = vld [vmem:[%s8979_s19 + $0x80] sm:$0xff]  ;;  %v7667_v37 = vld [vmem:[%s8979_s19 + $0x88] sm:$0xff] }
 0x28d   : > { %1758 = vmatpush1.msra.mxu0 %v9557_v14  ;;  %1835 = vmatpush1.msra.mxu1 %v9559_v5 }
 0x28e   : > { %1759 = vmatprep.subr.mxu0 %v9563_v7  ;;  %1836 = vmatprep.subr.mxu1 %v9565_v8 }
 0x28f   : > { %1760 = vmatpush1.msra.mxu0 %v9569_v9  ;;  %1837 = vmatpush1.msra.mxu1 %v9571_v10 }
 0x290   : > { %1761 = vmatprep.subr.mxu0 %v9575_v12  ;;  %1838 = vmatprep.subr.mxu1 %v9577_v3 }
 0x291   : > { %1762 = vmatpush1.msra.mxu0 %v9581_v13  ;;  %1839 = vmatpush1.msra.mxu1 %v9583_v15 }
 0x292   : > { %1763 = vmatprep.subr.mxu0 %v9587_v16  ;;  %1840 = vmatprep.subr.mxu1 %v9589_v17 }
 0x293   : > { %1764 = vmatpush1.msra.mxu0 %v12340_v19  ;;  %1841 = vmatpush1.msra.mxu1 %v12341_v30 }
 0x294   : > { %1765 = vmatprep.subr.mxu0 %v12342_v20  ;;  %1842 = vmatprep.subr.mxu1 %v12343_v28 }
 0x295   : > { %1766 = vmatpush1.msra.mxu0 %v12344_v57  ;;  %1843 = vmatpush1.msra.mxu1 %v12345_v6 }
 0x296   : > { %1767 = vmatprep.subr.mxu0 %v12346_v18  ;;  %1844 = vmatprep.subr.mxu1 %v12347_v32 }
 0x297   : > { %1768 = vmatpush1.msra.mxu0 %v12348_v33  ;;  %1845 = vmatpush1.msra.mxu1 %v12349_v31 }
 0x298   : > { %1769 = vmatprep.subr.mxu0 %v12350_v26  ;;  %1846 = vmatprep.subr.mxu1 %v12351_v55  ;;  %v7668_v55 = vld [vmem:[%s8979_s19 + $0x90] sm:$0xff] }
 0x299   : > { %1770 = vmatpush1.msra.mxu0 %v12352_v38  ;;  %1847 = vmatpush1.msra.mxu1 %v12353_v11 }
 0x29a   : > { %1771 = vmatprep.subr.mxu0 %v12354_v39  ;;  %1848 = vmatprep.subr.mxu1 %v12355_v40 }
 0x29b   : > { %1772 = vmatpush1.msra.mxu0 %v12356_v41  ;;  %1849 = vmatpush1.msra.mxu1 %v12357_v25 }
 0x29c   : > { %1773 = vmatprep.subr.mxu0 %v12358_v27  ;;  %1850 = vmatprep.subr.mxu1 %v12359_v23  ;;  %v7670_v23 = vld [vmem:[%s8979_s19 + $0xa0] sm:$0xff] }
 0x29d   : > { %1774 = vmatpush1.msra.mxu0 %v12360_v24  ;;  %1851 = vmatpush1.msra.mxu1 %v12361_v42 }
 0x29e   : > { %1775 = vmatprep.subr.mxu0 %v12362_v43  ;;  %1852 = vmatprep.subr.mxu1 %v12363_v44  ;;  %v7671_v44 = vld [vmem:[%s8979_s19 + $0xa8] sm:$0xff] }
 0x29f   : > { %1776 = vmatpush1.msra.mxu0 %v12364_v36  ;;  %1809 = vmatprep.mubr.f32.mxu0 %v12303_v63 }
 0x2a0   : > { %1853 = vmatpush1.msra.mxu1 %v12365_v22  ;;  %1886 = vmatprep.mubr.f32.mxu1 %v12303_v63 }
 0x33b   : > { %v1368_v34 = vpop.f32.mrf.mxu0  ;;  %v1445_v24 = vpop.f32.mrf.mxu1 }
 0x33c   : > { %v1456_v21 = vadd.f32 %v7666_v45, %v1368_v34  ;;  %v7669_v45 = vld [vmem:[%s8979_s19 + $0x98] sm:$0xff] }
 0x33d   : > { %v1370_v42 = vpop.f32.mrf.mxu0  ;;  %v1447_v41 = vpop.f32.mrf.mxu1 }
 0x33e   : > { %v7674_v43 = vmul.f32 -1.442695, %v1456_v21  ;;  %v1457_v27 = vadd.f32 %v7667_v37, %v1370_v42  ;;  %v1459_v21 = vadd.f32 %v7669_v45, %v1447_v41  ;;  %v7673_v42 = vld [vmem:[%s8979_s19 + $0xb8] sm:$0xff] }
 0x340   : > { %v1374_v25 = vpop.f32.mrf.mxu0  ;;  %8156 = vpow2.f32 %v7674_v43  ;;  %v7676_v36 = vmul.f32 -1.442695, %v1457_v27  ;;  %v7678_v26 = vmul.f32 -1.442695, %v1459_v21  ;;  %v1458_v27 = vadd.f32 %v7668_v55, %v1445_v24 }
 0x341   : > { %v1460_v22 = vadd.f32 %v7670_v23, %v1374_v25  ;;  %v1451_v34 = vpop.f32.mrf.mxu1  ;;  %v7672_v25 = vld [vmem:[%s8979_s19 + $0xb0] sm:$0xff] }
 0x342   : > { %v1376_v40 = vpop.f32.mrf.mxu0  ;;  %8158 = vpow2.f32 %v7676_v36 }
 0x343   : > { %v7675_v39 = vmul.f32 -1.442695, %v1460_v22  ;;  %v1461_v11 = vadd.f32 %v7671_v44, %v1376_v40  ;;  %v1453_v37 = vpop.f32.mrf.mxu1 }
 0x344   : > { %v1463_v43 = vadd.f32 %v7673_v42, %v1453_v37 }
 0x345   : > { %8160 = vpow2.f32 %v7675_v39  ;;  %v7677_v38 = vmul.f32 -1.442695, %v1461_v11  ;;  %v1462_v39 = vadd.f32 %v7672_v25, %v1451_v34  ;;  %v1519_v34 = vpop.permute.xlu0 %1518 }
 0x346   : > { %v7679_v36 = vmul.f32 -1.442695, %v1463_v43  ;;  %vm1523_vm4 = vcmp.eq.s32.totalorder %v1519_v34, 1 }
 0x347   : > { %8162 = vpow2.f32 %v7677_v38 }
 0x348   : > { %8164 = vpow2.f32 %v7678_v26 }
 0x34d   : > { %v8157_v31 = vpop.eup %8156 }
 0x34e   : > { %v1470_v33 = vadd.f32 1.0, %v8157_v31 }
 0x34f   : > { %v8159_v23 = vpop.eup %8158 }
 0x350   : > { %8166 = vrcp.f32 %v1470_v33  ;;  %v1482_v40 = vadd.f32 1.0, %v8159_v23 }
 0x351   : > { %8168 = vtanh.f32 %v1458_v27 }
 0x352   : > { %v8161_v44 = vpop.eup %8160  ;;  %8170 = vrcp.f32 %v1482_v40 }
 0x353   : > { %v1471_v38 = vadd.f32 1.0, %v8161_v44  ;;  %8172 = vpow2.f32 %v7679_v36  ;;  %v1522_v44 = vpop.permute.xlu1 %1521 }
 0x354   : > { %v8163_v11 = vpop.eup %8162  ;;  %vm1524_vm5 = vcmp.eq.s32.totalorder %v1522_v44, 1 }
 0x355   : > { %8174 = vrcp.f32 %v1471_v38  ;;  %v1483_v41 = vadd.f32 1.0, %v8163_v11  ;;  %v8165_v22 = vpop.eup %8164 }
 0x356   : > { %8176 = vtanh.f32 %v1462_v39  ;;  %v1496_v45 = vadd.f32 1.0, %v8165_v22 }
 0x357   : > { %8178 = vrcp.f32 %v1483_v41 }
 0x358   : > { %8180 = vrcp.f32 %v1496_v45 }
 0x35d   : > { %v8167_v55 = vpop.eup %8166 }
 0x35e   : > { %v8169_v31 = vpop.eup %8168 }
 0x35f   : > { %v8171_v24 = vpop.eup %8170  ;;  %v1504_v21 = vmul.f32 %v8169_v31, %v8167_v55 }
 0x360   : > { %v8173_v26 = vpop.eup %8172  ;;  %v1502_v33 = vmul.f32 %v8171_v24, %v9684_v35 }
 0x361   : > { %v1497_v25 = vadd.f32 1.0, %v8173_v26 }
 0x362   : > { %v8175_v42 = vpop.eup %8174  ;;  %v1506_v43 = vadd.f32 %v1504_v21, %v1502_v33 }
 0x363   : > { %v8177_v37 = vpop.eup %8176 }
 0x364   : > { %v8179_v27 = vpop.eup %8178  ;;  %8182 = vtanh.f32 %v1506_v43  ;;  %v9810_v23 = vsel %vm1523_vm4, %v1506_v43, %v9684_v35  ;;  %v1505_v36 = vmul.f32 %v8177_v37, %v8175_v42 }
 0x365   : > { %v1503_v40 = vmul.f32 %v8179_v27, %v9689_v0  ;;  %8184 = vrcp.f32 %v1497_v25  ;;  %v8181_v11 = vpop.eup %8180 }
 0x367   : > { %v1507_v39 = vadd.f32 %v1505_v36, %v1503_v40 }
 0x369   : > { %8186 = vtanh.f32 %v1507_v39  ;;  %v9815_v38 = vsel %vm1524_vm5, %v1507_v39, %v9689_v0 }
 0x371   : > { %v8183_v41 = vpop.eup %8182 }
 0x372   : > { %v1510_v22 = vmul.f32 %v8183_v41, %v8181_v11  ;;  %v8185_v55 = vpop.eup %8184 }
 0x374   : > { %v9819_v35 = vsel %vm1523_vm4, %v1510_v22, %v9693_v52  ;;  %v1533_v31 = vsel %vm1523_vm4, %v1510_v22, 0.0 }
 0x375   : > { %v1537_v45 = vcombine.high %v1533_v31, %v1533_v31  ;;  %v1544_v26 = vrot.slane %v1533_v31, %v9431_v4  ;;  %1810 = vmatmul.mubr.f32.vlgmr.msra.gmra.mxu0 %v9819_v35  ;;  %1887 = vmatmul.mubr.f32.vlgmr.msra.gmra.mxu1 %v9819_v35 }
 0x376   : > { %v8187_v24 = vpop.eup %8186  ;;  %1815 = vmatprep.mubr.f32.mxu0 %v12303_v63  ;;  %1892 = vmatprep.mubr.f32.mxu1 %v12303_v63 }
 0x377   : > { %v1511_v0 = vmul.f32 %v8187_v24, %v8185_v55  ;;  %v1551_v52 = vrot.slane %v1537_v45, %v9431_v4  ;;  %v1552_v21 = vcombine.high %v1544_v26, %v1544_v26  ;;  %v1560_v33 = vrot.slane %v1544_v26, %v9431_v4  ;;  %7680 = vst.sshfl [vmem:[%s8990_s20 + $0x2] sm:$0x1 pattern:$0x73625140] %v1544_v26 }
 0x379   : > { %v9832_v42 = vsel %vm1524_vm5, %v1511_v0, %v9708_v29  ;;  %v1534_v37 = vsel %vm1524_vm5, %v1511_v0, 0.0  ;;  %v1553_v34 = vcombine.high %v1551_v52, %v1551_v52  ;;  %v1567_v43 = vrot.slane %v1551_v52, %v9431_v4  ;;  %7681 = vst.sshfl [vmem:[%s8990_s20 + $0x12] sm:$0x1 pattern:$0x73625140] %v1552_v21 }
 0x37a   : > { %v1574_v27 = vrot.slane %v1552_v21, %v9431_v4  ;;  %v1582_v25 = vcombine.high %v1560_v33, %v1560_v33  ;;  %7682 = vst.sshfl [vmem:[%s8990_s20 + $0x42] sm:$0x1 pattern:$0x73625140] %v1551_v52  ;;  %1816 = vmatmul.mubr.f32.gmra.mxu0 %v9832_v42  ;;  %v1586_v36 = vcombine.high %v1534_v37, %v1534_v37 }
 0x37b   : > { %v1593_v29 = vrot.slane %v1534_v37, %v9431_v4  ;;  %1893 = vmatmul.mubr.f32.gmra.mxu1 %v9832_v42  ;;  %2252 = vmatprep.mubr.f32.mxu0 %v12303_v63  ;;  %v1581_v40 = vrot.slane %v1553_v34, %v9431_v4  ;;  %v1583_v44 = vcombine.high %v1567_v43, %v1567_v43  ;;  %v9863_v37 = vld [vmem:[#allocation9 + $0x1e8] sm:$0xff]  ;;  %v9869_v43 = vld [vmem:[#allocation9 + $0x1e0] sm:$0xff] }
 0x37c   : > { %v1584_v39 = vcombine.high %v1574_v27, %v1574_v27  ;;  %1653 = vst [vmem:[%s8990_s20 + $0x22] sm:$0x1] %v1582_v25  ;;  %7683 = vst.sshfl [vmem:[%s8990_s20 + $0x52] sm:$0x1 pattern:$0x73625140] %v1553_v34  ;;  %2329 = vmatprep.mubr.f32.mxu1 %v12303_v63  ;;  %v1600_v11 = vrot.slane %v1586_v36, %v9431_v4  ;;  %2188 = vmatprep.subr.mxu0 %v9863_v37 }
 0x37d   : > { %v1601_v41 = vcombine.high %v1593_v29, %v1593_v29  ;;  %v1609_v22 = vrot.slane %v1593_v29, %v9431_v4  ;;  %7684 = vst.sshfl [vmem:[%s8990_s20 + $0x82] sm:$0x1 pattern:$0x73625140] %v1593_v29  ;;  %v1585_v55 = vcombine.high %v1581_v40, %v1581_v40  ;;  %1657 = vst [vmem:[%s8990_s20 + $0x62] sm:$0x1] %v1583_v44  ;;  %2189 = vmatpush1.msra.mxu0 %v9869_v43 }
 0x37e   : > { %1654 = vst [vmem:[%s8990_s20 + $0x32] sm:$0x1] %v1584_v39  ;;  %v1602_v31 = vcombine.high %v1600_v11, %v1600_v11  ;;  %v1616_v24 = vrot.slane %v1600_v11, %v9431_v4  ;;  %7686 = vst.sshfl [vmem:[%s8990_s20 + $0xc2] sm:$0x1 pattern:$0x73625140] %v1600_v11 }
 0x37f   : > { %v1623_v45 = vrot.slane %v1601_v41, %v9431_v4  ;;  %v1631_v26 = vcombine.high %v1609_v22, %v1609_v22  ;;  %7685 = vst.sshfl [vmem:[%s8990_s20 + $0x92] sm:$0x1 pattern:$0x73625140] %v1601_v41  ;;  %1658 = vst [vmem:[%s8990_s20 + $0x72] sm:$0x1] %v1585_v55 }
 0x380   : > { %v1630_v0 = vrot.slane %v1602_v31, %v9431_v4  ;;  %v1632_v52 = vcombine.high %v1616_v24, %v1616_v24  ;;  %7687 = vst.sshfl [vmem:[%s8990_s20 + $0xd2] sm:$0x1 pattern:$0x73625140] %v1602_v31  ;;  %v9865_v34 = vld [vmem:[#allocation9 + $0x1f8] sm:$0xff]  ;;  %v9871_v27 = vld [vmem:[#allocation9 + $0x1f0] sm:$0xff] }
 0x381   : > { %v1633_v21 = vcombine.high %v1623_v45, %v1623_v45  ;;  %1661 = vst [vmem:[%s8990_s20 + $0xa2] sm:$0x1] %v1631_v26  ;;  %2265 = vmatprep.subr.mxu1 %v9865_v34  ;;  %v9875_v25 = vld [vmem:[#allocation9 + $0x1c8] sm:$0xff]  ;;  %v9877_v36 = vld [vmem:[#allocation9 + $0x1d8] sm:$0xff]  ;;  %v9881_v29 = vld [vmem:[#allocation9 + $0x1c0] sm:$0xff] }
 0x382   : > { %v1634_v33 = vcombine.high %v1630_v0, %v1630_v0  ;;  %1665 = vst [vmem:[%s8990_s20 + $0xe2] sm:$0x1] %v1632_v52  ;;  %2266 = vmatpush1.msra.mxu1 %v9871_v27  ;;  %2190 = vmatprep.subr.mxu0 %v9875_v25  ;;  %v9883_v40 = vld [vmem:[#allocation9 + $0x1d0] sm:$0xff]  ;;  %v9887_v44 = vld [vmem:[#allocation9 + $0x1a8] sm:$0xff]  ;;  %v9889_v39 = vld [vmem:[#allocation9 + $0x1b8] sm:$0xff] }
 0x383   : > { %1662 = vst [vmem:[%s8990_s20 + $0xb2] sm:$0x1] %v1633_v21  ;;  %2267 = vmatprep.subr.mxu1 %v9877_v36  ;;  %2191 = vmatpush1.msra.mxu0 %v9881_v29  ;;  %v7695_v55 = vld [vmem:[%s8979_s19 + $0xf8] sm:$0xff]  ;;  %v7690_v24 = vld [vmem:[%s8979_s19 + $0xd0] sm:$0xff] }
 0x384   : > { %1666 = vst [vmem:[%s8990_s20 + $0xf2] sm:$0x1] %v1634_v33  ;;  %2268 = vmatpush1.msra.mxu1 %v9883_v40  ;;  %2192 = vmatprep.subr.mxu0 %v9887_v44  ;;  %v7694_v33 = vld [vmem:[%s8979_s19 + $0xf0] sm:$0xff] }
 0x385   : > { %2269 = vmatprep.subr.mxu1 %v9889_v39  ;;  %2193 = vmatpush1.msra.mxu0 %v9509_v46  ;;  %v12366_v46 = vld [vmem:[#allocation25_spill] sm:$0xff] }
 0x386   : > { %2270 = vmatpush1.msra.mxu1 %v9511_v47  ;;  %2194 = vmatprep.subr.mxu0 %v9515_v48  ;;  %v12367_v47 = vld [vmem:[#allocation27_spill] sm:$0xff]  ;;  %v12368_v48 = vld [vmem:[#allocation30_spill] sm:$0xff] }
 0x387   : > { %2271 = vmatprep.subr.mxu1 %v9517_v49  ;;  %2195 = vmatpush1.msra.mxu0 %v9521_v50  ;;  %v12369_v49 = vld [vmem:[#allocation31_spill] sm:$0xff]  ;;  %v12370_v50 = vld [vmem:[#allocation32_spill] sm:$0xff] }
 0x388   : > { %2272 = vmatpush1.msra.mxu1 %v9523_v51  ;;  %2196 = vmatprep.subr.mxu0 %v9527_v53  ;;  %v12371_v51 = vld [vmem:[#allocation33_spill] sm:$0xff]  ;;  %v12372_v53 = vld [vmem:[#allocation34_spill] sm:$0xff] }
 0x389   : > { %2273 = vmatprep.subr.mxu1 %v9529_v54  ;;  %2197 = vmatpush1.msra.mxu0 %v9533_v56  ;;  %v12373_v54 = vld [vmem:[#allocation35_spill] sm:$0xff]  ;;  %v12374_v56 = vld [vmem:[#allocation36_spill] sm:$0xff] }
 0x38a   : > { %2274 = vmatpush1.msra.mxu1 %v9535_v58  ;;  %2198 = vmatprep.subr.mxu0 %v9539_v59  ;;  %v12375_v58 = vld [vmem:[#allocation37_spill] sm:$0xff]  ;;  %v12376_v59 = vld [vmem:[#allocation38_spill] sm:$0xff] }
 0x38b   : > { %2275 = vmatprep.subr.mxu1 %v9541_v61  ;;  %2199 = vmatpush1.msra.mxu0 %v9545_v62  ;;  %v12377_v61 = vld [vmem:[#allocation39_spill] sm:$0xff]  ;;  %v12378_v62 = vld [vmem:[#allocation40_spill] sm:$0xff] }
 0x38c   : > { %2276 = vmatpush1.msra.mxu1 %v9547_v1  ;;  %2200 = vmatprep.subr.mxu0 %v9551_v2  ;;  %v12379_v1 = vld [vmem:[#allocation41_spill] sm:$0xff]  ;;  %v12380_v2 = vld [vmem:[#allocation42_spill] sm:$0xff] }
 0x38d   : > { %2277 = vmatprep.subr.mxu1 %v9553_v60  ;;  %2201 = vmatpush1.msra.mxu0 %v9557_v14  ;;  %v12381_v60 = vld [vmem:[#allocation43_spill] sm:$0xff]  ;;  %v12382_v14 = vld [vmem:[#allocation44_spill] sm:$0xff] }
 0x38e   : > { %2278 = vmatpush1.msra.mxu1 %v9559_v5  ;;  %2202 = vmatprep.subr.mxu0 %v9563_v7  ;;  %v12383_v5 = vld [vmem:[#allocation45_spill] sm:$0xff]  ;;  %v7688_v7 = vld [vmem:[%s8979_s19 + $0xc0] sm:$0xff] }
 0x38f   : > { %2279 = vmatprep.subr.mxu1 %v9565_v8  ;;  %2203 = vmatpush1.msra.mxu0 %v9569_v9  ;;  %v7689_v9 = vld [vmem:[%s8979_s19 + $0xc8] sm:$0xff] }
 0x390   : > { %2280 = vmatpush1.msra.mxu1 %v9571_v10  ;;  %2204 = vmatprep.subr.mxu0 %v9575_v12 }
 0x391   : > { %2281 = vmatprep.subr.mxu1 %v9577_v3  ;;  %2205 = vmatpush1.msra.mxu0 %v9581_v13  ;;  %v7692_v13 = vld [vmem:[%s8979_s19 + $0xe0] sm:$0xff] }
 0x392   : > { %2282 = vmatpush1.msra.mxu1 %v9583_v15  ;;  %2206 = vmatprep.subr.mxu0 %v9587_v16 }
 0x393   : > { %2283 = vmatprep.subr.mxu1 %v9589_v17  ;;  %2207 = vmatpush1.msra.mxu0 %v12340_v19  ;;  %v7693_v19 = vld [vmem:[%s8979_s19 + $0xe8] sm:$0xff] }
 0x394   : > { %2284 = vmatpush1.msra.mxu1 %v12341_v30  ;;  %2208 = vmatprep.subr.mxu0 %v12342_v20 }
 0x395   : > { %2285 = vmatprep.subr.mxu1 %v12343_v28  ;;  %2209 = vmatpush1.msra.mxu0 %v12344_v57 }
 0x396   : > { %2286 = vmatpush1.msra.mxu1 %v12345_v6  ;;  %2210 = vmatprep.subr.mxu0 %v12346_v18 }
 0x397   : > { %2287 = vmatprep.subr.mxu1 %v12347_v32  ;;  %2211 = vmatpush1.msra.mxu0 %v12366_v46  ;;  %v7691_v32 = vld [vmem:[%s8979_s19 + $0xd8] sm:$0xff] }
 0x398   : > { %2288 = vmatpush1.msra.mxu1 %v12367_v47  ;;  %2212 = vmatprep.subr.mxu0 %v12368_v48 }
 0x399   : > { %2289 = vmatprep.subr.mxu1 %v12369_v49  ;;  %2213 = vmatpush1.msra.mxu0 %v12370_v50 }
 0x39a   : > { %2290 = vmatpush1.msra.mxu1 %v12371_v51  ;;  %2214 = vmatprep.subr.mxu0 %v12372_v53 }
 0x39b   : > { %2291 = vmatprep.subr.mxu1 %v12373_v54  ;;  %2215 = vmatpush1.msra.mxu0 %v12374_v56 }
 0x39c   : > { %2292 = vmatpush1.msra.mxu1 %v12375_v58  ;;  %2216 = vmatprep.subr.mxu0 %v12376_v59 }
 0x39d   : > { %2293 = vmatprep.subr.mxu1 %v12377_v61  ;;  %2217 = vmatpush1.msra.mxu0 %v12378_v62 }
 0x39e   : > { %2294 = vmatpush1.msra.mxu1 %v12379_v1  ;;  %2218 = vmatprep.subr.mxu0 %v12380_v2 }
 0x39f   : > { %2295 = vmatprep.subr.mxu1 %v12381_v60  ;;  %2219 = vmatpush1.msra.mxu0 %v12382_v14 }
 0x3a0   : > { %2296 = vmatpush1.msra.mxu1 %v12383_v5  ;;  %2631 = vmatprep.subr.mxu0 %v9863_v37 }
 0x3a1   : > { %2708 = vmatprep.subr.mxu1 %v9865_v34 }
 0x435   : > { %v1811_v8 = vpop.f32.mrf.mxu0  ;;  %v1888_v12 = vpop.f32.mrf.mxu1 }
 0x436   : > { %v1899_v10 = vadd.f32 %v7688_v7, %v1811_v8  ;;  %v1901_v52 = vadd.f32 %v7690_v24, %v1888_v12  ;;  %v1962_v7 = vpop.permute.xlu0 %1961 }
 0x437   : > { %v1813_v3 = vpop.f32.mrf.mxu0  ;;  %v1890_v20 = vpop.f32.mrf.mxu1  ;;  %vm1966_vm6 = vcmp.eq.s32.totalorder %v1962_v7, 1  ;;  %v10039_v7 = vld [vmem:[#allocation9 + $0x168] sm:$0xff] }
 0x438   : > { %v7696_v15 = vmul.f32 -1.442695, %v1899_v10  ;;  %v1900_v16 = vadd.f32 %v7689_v9, %v1813_v3  ;;  %v1902_v22 = vadd.f32 %v7691_v32, %v1890_v20 }
 0x43a   : > { %v1817_v17 = vpop.f32.mrf.mxu0  ;;  %8188 = vpow2.f32 %v7696_v15  ;;  %v7698_v30 = vmul.f32 -1.442695, %v1900_v16  ;;  %v7700_v45 = vmul.f32 -1.442695, %v1902_v22  ;;  %v1965_v15 = vpop.permute.xlu1 %1964 }
 0x43b   : > { %v1903_v28 = vadd.f32 %v7692_v13, %v1817_v17  ;;  %v1894_v11 = vpop.f32.mrf.mxu1  ;;  %vm1967_vm7 = vcmp.eq.s32.totalorder %v1965_v15, 1  ;;  %v10057_v15 = vld [vmem:[#allocation9 + $0x140] sm:$0xff] }
 0x43c   : > { %v1819_v57 = vpop.f32.mrf.mxu0  ;;  %8190 = vpow2.f32 %v7698_v30  ;;  %v1905_v50 = vadd.f32 %v7694_v33, %v1894_v11 }
 0x43d   : > { %v7697_v6 = vmul.f32 -1.442695, %v1903_v28  ;;  %v1904_v18 = vadd.f32 %v7693_v19, %v1819_v57  ;;  %v1896_v31 = vpop.f32.mrf.mxu1 }
 0x43e   : > { %v1906_v26 = vadd.f32 %v7695_v55, %v1896_v31 }
 0x43f   : > { %8192 = vpow2.f32 %v7697_v6  ;;  %v7699_v41 = vmul.f32 -1.442695, %v1904_v18 }
 0x440   : > { %v7701_v47 = vmul.f32 -1.442695, %v1906_v26 }
 0x441   : > { %8194 = vpow2.f32 %v7699_v41 }
 0x442   : > { %8196 = vpow2.f32 %v7700_v45 }
 0x447   : > { %v8189_v0 = vpop.eup %8188 }
 0x448   : > { %v1913_v21 = vadd.f32 1.0, %v8189_v0 }
 0x449   : > { %v8191_v46 = vpop.eup %8190 }
 0x44a   : > { %8198 = vrcp.f32 %v1913_v21  ;;  %v1925_v48 = vadd.f32 1.0, %v8191_v46 }
 0x44b   : > { %8200 = vtanh.f32 %v1901_v52 }
 0x44c   : > { %v8193_v49 = vpop.eup %8192  ;;  %8202 = vrcp.f32 %v1925_v48 }
 0x44d   : > { %v1914_v51 = vadd.f32 1.0, %v8193_v49  ;;  %8204 = vpow2.f32 %v7701_v47 }
 0x44e   : > { %v8195_v53 = vpop.eup %8194 }
 0x44f   : > { %8206 = vrcp.f32 %v1914_v51  ;;  %v1926_v54 = vadd.f32 1.0, %v8195_v53  ;;  %v8197_v56 = vpop.eup %8196 }
 0x450   : > { %8208 = vtanh.f32 %v1905_v50  ;;  %v1939_v62 = vadd.f32 1.0, %v8197_v56 }
 0x451   : > { %8210 = vrcp.f32 %v1926_v54 }
 0x452   : > { %8212 = vrcp.f32 %v1939_v62  ;;  %v10021_v62 = vld [vmem:[#allocation9 + $0x1a0] sm:$0xff] }
 0x457   : > { %v8199_v58 = vpop.eup %8198 }
 0x458   : > { %v8201_v59 = vpop.eup %8200 }
 0x459   : > { %v8203_v61 = vpop.eup %8202  ;;  %v1947_v2 = vmul.f32 %v8201_v59, %v8199_v58 }
 0x45a   : > { %v8205_v1 = vpop.eup %8204  ;;  %v1945_v60 = vmul.f32 %v8203_v61, %v9810_v23 }
 0x45b   : > { %v1940_v10 = vadd.f32 1.0, %v8205_v1  ;;  %v10023_v1 = vld [vmem:[#allocation9 + $0x1b0] sm:$0xff] }
 0x45c   : > { %v8207_v14 = vpop.eup %8206  ;;  %v1949_v8 = vadd.f32 %v1947_v2, %v1945_v60  ;;  %v10027_v2 = vld [vmem:[#allocation9 + $0x188] sm:$0xff]  ;;  %v10029_v60 = vld [vmem:[#allocation9 + $0x198] sm:$0xff] }
 0x45d   : > { %v8209_v5 = vpop.eup %8208 }
 0x45e   : > { %v8211_v9 = vpop.eup %8210  ;;  %8214 = vtanh.f32 %v1949_v8  ;;  %v9960_v12 = vsel %vm1966_vm6, %v1949_v8, %v9810_v23  ;;  %v1948_v3 = vmul.f32 %v8209_v5, %v8207_v14  ;;  %v10033_v14 = vld [vmem:[#allocation9 + $0x180] sm:$0xff]  ;;  %v10035_v5 = vld [vmem:[#allocation9 + $0x190] sm:$0xff]  ;;  %v10041_v8 = vld [vmem:[#allocation9 + $0x178] sm:$0xff] }
 0x45f   : > { %v1946_v13 = vmul.f32 %v8211_v9, %v9815_v38  ;;  %8216 = vrcp.f32 %v1940_v10  ;;  %v8213_v19 = vpop.eup %8212  ;;  %v10045_v9 = vld [vmem:[#allocation9 + $0x160] sm:$0xff]  ;;  %v10047_v10 = vld [vmem:[#allocation9 + $0x170] sm:$0xff] }
 0x461   : > { %v1950_v16 = vadd.f32 %v1948_v3, %v1946_v13  ;;  %v10051_v3 = vld [vmem:[#allocation9 + $0x148] sm:$0xff]  ;;  %v10053_v13 = vld [vmem:[#allocation9 + $0x158] sm:$0xff] }
 0x463   : > { %8218 = vtanh.f32 %v1950_v16  ;;  %v9965_v17 = vsel %vm1967_vm7, %v1950_v16, %v9815_v38  ;;  %v10059_v16 = vld [vmem:[#allocation9 + $0x150] sm:$0xff] }
 0x46b   : > { %v8215_v30 = vpop.eup %8214 }
 0x46c   : > { %v1953_v20 = vmul.f32 %v8215_v30, %v8213_v19  ;;  %v8217_v28 = vpop.eup %8216  ;;  %v10063_v19 = vld [vmem:[#allocation9 + $0x128] sm:$0xff]  ;;  %v10065_v30 = vld [vmem:[#allocation9 + $0x138] sm:$0xff] }
 0x46e   : > { %v9969_v23 = vsel %vm1966_vm6, %v1953_v20, %v9819_v35  ;;  %v1976_v57 = vsel %vm1966_vm6, %v1953_v20, 0.0  ;;  %v10069_v20 = vld [vmem:[#allocation9 + $0x120] sm:$0xff] }
 0x46f   : > { %v1980_v18 = vcombine.high %v1976_v57, %v1976_v57  ;;  %v1987_v32 = vrot.slane %v1976_v57, %v9431_v4  ;;  %2253 = vmatmul.mubr.f32.vlgmr.msra.gmra.mxu0 %v9969_v23  ;;  %2330 = vmatmul.mubr.f32.vlgmr.msra.gmra.mxu1 %v9969_v23  ;;  %v10075_v57 = vld [vmem:[#allocation9 + $0x108] sm:$0xff] }
 0x470   : > { %v8219_v6 = vpop.eup %8218  ;;  %2258 = vmatprep.mubr.f32.mxu0 %v12303_v63  ;;  %2335 = vmatprep.mubr.f32.mxu1 %v12303_v63 }
 0x471   : > { %v1954_v38 = vmul.f32 %v8219_v6, %v8217_v28  ;;  %v1994_v35 = vrot.slane %v1980_v18, %v9431_v4  ;;  %v1995_v11 = vcombine.high %v1987_v32, %v1987_v32  ;;  %v2003_v41 = vrot.slane %v1987_v32, %v9431_v4  ;;  %7702 = vst.sshfl [vmem:[%s8990_s20 + $0x3] sm:$0x1 pattern:$0x73625140] %v1987_v32  ;;  %v10071_v28 = vld [vmem:[#allocation9 + $0x130] sm:$0xff]  ;;  %v10077_v6 = vld [vmem:[#allocation9 + $0x118] sm:$0xff] }
 0x472   : > { %2632 = vmatpush1.msra.mxu0 %v9869_v43  ;;  %2709 = vmatpush1.msra.mxu1 %v9871_v27  ;;  %v10081_v18 = vld [vmem:[#allocation9 + $0x100] sm:$0xff]  ;;  %v10083_v32 = vld [vmem:[#allocation9 + $0x110] sm:$0xff] }
 0x473   : > { %v9984_v22 = vsel %vm1967_vm7, %v1954_v38, %v9832_v42  ;;  %v1977_v55 = vsel %vm1967_vm7, %v1954_v38, 0.0  ;;  %2633 = vmatprep.subr.mxu0 %v9875_v25  ;;  %2710 = vmatprep.subr.mxu1 %v9877_v36  ;;  %v1996_v31 = vcombine.high %v1994_v35, %v1994_v35  ;;  %v2010_v24 = vrot.slane %v1994_v35, %v9431_v4  ;;  %v10087_v38 = vld [vmem:[#allocation9 + $0xe8] sm:$0xff] }
 0x474   : > { %v2017_v45 = vrot.slane %v1995_v11, %v9431_v4  ;;  %v2025_v26 = vcombine.high %v2003_v41, %v2003_v41  ;;  %7703 = vst.sshfl [vmem:[%s8990_s20 + $0x13] sm:$0x1 pattern:$0x73625140] %v1995_v11  ;;  %2259 = vmatmul.mubr.f32.gmra.mxu0 %v9984_v22  ;;  %v2029_v42 = vcombine.high %v1977_v55, %v1977_v55  ;;  %v10093_v11 = vld [vmem:[#allocation9 + $0xe0] sm:$0xff]  ;;  %v10095_v41 = vld [vmem:[#allocation9 + $0xf0] sm:$0xff] }
 0x475   : > { %7704 = vst.sshfl [vmem:[%s8990_s20 + $0x43] sm:$0x1 pattern:$0x73625140] %v1994_v35  ;;  %v2036_v0 = vrot.slane %v1977_v55, %v9431_v4  ;;  %2336 = vmatmul.mubr.f32.gmra.mxu1 %v9984_v22  ;;  %2634 = vmatpush1.msra.mxu0 %v9881_v29  ;;  %v2024_v52 = vrot.slane %v1996_v31, %v9431_v4  ;;  %v10089_v35 = vld [vmem:[#allocation9 + $0xf8] sm:$0xff]  ;;  %v10099_v55 = vld [vmem:[#allocation9 + $0xc8] sm:$0xff] }
 0x476   : > { %v2026_v21 = vcombine.high %v2010_v24, %v2010_v24  ;;  %v2027_v33 = vcombine.high %v2017_v45, %v2017_v45  ;;  %2096 = vst [vmem:[%s8990_s20 + $0x23] sm:$0x1] %v2025_v26  ;;  %7705 = vst.sshfl [vmem:[%s8990_s20 + $0x53] sm:$0x1 pattern:$0x73625140] %v1996_v31  ;;  %2711 = vmatpush1.msra.mxu1 %v9883_v40  ;;  %2635 = vmatprep.subr.mxu0 %v9887_v44 }
 0x477   : > { %v2043_v46 = vrot.slane %v2029_v42, %v9431_v4  ;;  %v2044_v47 = vcombine.high %v2036_v0, %v2036_v0  ;;  %v2052_v48 = vrot.slane %v2036_v0, %v9431_v4  ;;  %7706 = vst.sshfl [vmem:[%s8990_s20 + $0x83] sm:$0x1 pattern:$0x73625140] %v2036_v0  ;;  %2712 = vmatprep.subr.mxu1 %v9889_v39  ;;  %v10101_v31 = vld [vmem:[#allocation9 + $0xd8] sm:$0xff]  ;;  %v10105_v24 = vld [vmem:[#allocation9 + $0xc0] sm:$0xff] }
 0x478   : > { %2695 = vmatprep.mubr.f32.mxu0 %v12303_v63  ;;  %v2028_v49 = vcombine.high %v2024_v52, %v2024_v52  ;;  %2097 = vst [vmem:[%s8990_s20 + $0x33] sm:$0x1] %v2027_v33  ;;  %2100 = vst [vmem:[%s8990_s20 + $0x63] sm:$0x1] %v2026_v21  ;;  %2772 = vmatprep.mubr.f32.mxu1 %v12303_v63  ;;  %v10107_v45 = vld [vmem:[#allocation9 + $0xd0] sm:$0xff]  ;;  %v10111_v26 = vld [vmem:[#allocation9 + $0xa8] sm:$0xff] }
 0x479   : > { %v2045_v50 = vcombine.high %v2043_v46, %v2043_v46  ;;  %v2059_v51 = vrot.slane %v2043_v46, %v9431_v4  ;;  %v2066_v53 = vrot.slane %v2044_v47, %v9431_v4  ;;  %v2074_v54 = vcombine.high %v2052_v48, %v2052_v48  ;;  %7707 = vst.sshfl [vmem:[%s8990_s20 + $0x93] sm:$0x1 pattern:$0x73625140] %v2044_v47  ;;  %v10113_v42 = vld [vmem:[#allocation9 + $0xb8] sm:$0xff]  ;;  %v10117_v0 = vld [vmem:[#allocation9 + $0xa0] sm:$0xff] }
 0x47a   : > { %7708 = vst.sshfl [vmem:[%s8990_s20 + $0xc3] sm:$0x1 pattern:$0x73625140] %v2043_v46  ;;  %2101 = vst [vmem:[%s8990_s20 + $0x73] sm:$0x1] %v2028_v49  ;;  %2636 = vmatpush1.msra.mxu0 %v10021_v62  ;;  %2713 = vmatpush1.msra.mxu1 %v10023_v1 }
 0x47b   : > { %v2073_v56 = vrot.slane %v2045_v50, %v9431_v4  ;;  %v2075_v58 = vcombine.high %v2059_v51, %v2059_v51  ;;  %v2076_v59 = vcombine.high %v2066_v53, %v2066_v53  ;;  %2104 = vst [vmem:[%s8990_s20 + $0xa3] sm:$0x1] %v2074_v54  ;;  %7709 = vst.sshfl [vmem:[%s8990_s20 + $0xd3] sm:$0x1 pattern:$0x73625140] %v2045_v50  ;;  %2637 = vmatprep.subr.mxu0 %v10027_v2 }
 0x47c   : > { %2714 = vmatprep.subr.mxu1 %v10029_v60  ;;  %2638 = vmatpush1.msra.mxu0 %v10033_v14  ;;  %12384 = vst [vmem:[#allocation20_spill] sm:$0xff] %v10105_v24  ;;  %12385 = vst [vmem:[#allocation26_spill] sm:$0xff] %v10107_v45  ;;  %v10119_v52 = vld [vmem:[#allocation9 + $0xb0] sm:$0xff]  ;;  %v10123_v21 = vld [vmem:[#allocation9 + $0x88] sm:$0xff] }
 0x47d   : > { %v2077_v61 = vcombine.high %v2073_v56, %v2073_v56  ;;  %2105 = vst [vmem:[%s8990_s20 + $0xb3] sm:$0x1] %v2076_v59  ;;  %2108 = vst [vmem:[%s8990_s20 + $0xe3] sm:$0x1] %v2075_v58  ;;  %2715 = vmatpush1.msra.mxu1 %v10035_v5  ;;  %2639 = vmatprep.subr.mxu0 %v10039_v7  ;;  %v10125_v33 = vld [vmem:[#allocation9 + $0x98] sm:$0xff]  ;;  %v10129_v46 = vld [vmem:[#allocation9 + $0x80] sm:$0xff] }
 0x47e   : > { %2716 = vmatprep.subr.mxu1 %v10041_v8  ;;  %2640 = vmatpush1.msra.mxu0 %v10045_v9  ;;  %12386 = vst [vmem:[#allocation21_spill] sm:$0xff] %v10111_v26  ;;  %12387 = vst [vmem:[#allocation28_spill] sm:$0xff] %v10113_v42  ;;  %v10131_v47 = vld [vmem:[#allocation9 + $0x90] sm:$0xff]  ;;  %v10135_v48 = vld [vmem:[#allocation9 + $0x68] sm:$0xff] }
 0x47f   : > { %2109 = vst [vmem:[%s8990_s20 + $0xf3] sm:$0x1] %v2077_v61  ;;  %2717 = vmatpush1.msra.mxu1 %v10047_v10  ;;  %2641 = vmatprep.subr.mxu0 %v10051_v3  ;;  %12388 = vst [vmem:[#allocation22_spill] sm:$0xff] %v10117_v0  ;;  %v10137_v49 = vld [vmem:[#allocation9 + $0x78] sm:$0xff]  ;;  %v10141_v50 = vld [vmem:[#allocation9 + $0x60] sm:$0xff] }
 0x480   : > { %2718 = vmatprep.subr.mxu1 %v10053_v13  ;;  %2642 = vmatpush1.msra.mxu0 %v10057_v15  ;;  %12389 = vst [vmem:[#allocation29_spill] sm:$0xff] %v10119_v52  ;;  %12390 = vst [vmem:[#allocation23_spill] sm:$0xff] %v10123_v21  ;;  %v10143_v51 = vld [vmem:[#allocation9 + $0x70] sm:$0xff]  ;;  %v10147_v53 = vld [vmem:[#allocation9 + $0x48] sm:$0xff] }
 0x481   : > { %2719 = vmatpush1.msra.mxu1 %v10059_v16  ;;  %2643 = vmatprep.subr.mxu0 %v10063_v19  ;;  %12391 = vst [vmem:[#allocation24_spill] sm:$0xff] %v10125_v33  ;;  %12392 = vst [vmem:[#allocation25_spill] sm:$0xff] %v10129_v46  ;;  %v10149_v54 = vld [vmem:[#allocation9 + $0x58] sm:$0xff]  ;;  %v10153_v56 = vld [vmem:[#allocation9 + $0x40] sm:$0xff] }
 0x482   : > { %2720 = vmatprep.subr.mxu1 %v10065_v30  ;;  %2644 = vmatpush1.msra.mxu0 %v10069_v20  ;;  %12393 = vst [vmem:[#allocation27_spill] sm:$0xff] %v10131_v47  ;;  %12394 = vst [vmem:[#allocation30_spill] sm:$0xff] %v10135_v48  ;;  %v10155_v58 = vld [vmem:[#allocation9 + $0x50] sm:$0xff]  ;;  %v10159_v59 = vld [vmem:[#allocation9 + $0x28] sm:$0xff] }
 0x483   : > { %2721 = vmatpush1.msra.mxu1 %v10071_v28  ;;  %2645 = vmatprep.subr.mxu0 %v10075_v57  ;;  %12395 = vst [vmem:[#allocation31_spill] sm:$0xff] %v10137_v49  ;;  %12396 = vst [vmem:[#allocation32_spill] sm:$0xff] %v10141_v50  ;;  %v10161_v61 = vld [vmem:[#allocation9 + $0x38] sm:$0xff] }
 0x484   : > { %2722 = vmatprep.subr.mxu1 %v10077_v6  ;;  %2646 = vmatpush1.msra.mxu0 %v10081_v18  ;;  %12397 = vst [vmem:[#allocation33_spill] sm:$0xff] %v10143_v51  ;;  %12398 = vst [vmem:[#allocation34_spill] sm:$0xff] %v10147_v53 }
 0x485   : > { %2723 = vmatpush1.msra.mxu1 %v10083_v32  ;;  %2647 = vmatprep.subr.mxu0 %v10087_v38  ;;  %12399 = vst [vmem:[#allocation35_spill] sm:$0xff] %v10149_v54  ;;  %12400 = vst [vmem:[#allocation36_spill] sm:$0xff] %v10153_v56 }
 0x486   : > { %2724 = vmatprep.subr.mxu1 %v10089_v35  ;;  %2648 = vmatpush1.msra.mxu0 %v10093_v11  ;;  %12401 = vst [vmem:[#allocation37_spill] sm:$0xff] %v10155_v58  ;;  %12402 = vst [vmem:[#allocation38_spill] sm:$0xff] %v10159_v59 }
 0x487   : > { %2725 = vmatpush1.msra.mxu1 %v10095_v41  ;;  %2649 = vmatprep.subr.mxu0 %v10099_v55  ;;  %12403 = vst [vmem:[#allocation39_spill] sm:$0xff] %v10161_v61 }
 0x488   : > { %2726 = vmatprep.subr.mxu1 %v10101_v31  ;;  %2650 = vmatpush1.msra.mxu0 %v10105_v24 }
 0x489   : > { %2727 = vmatpush1.msra.mxu1 %v10107_v45  ;;  %2651 = vmatprep.subr.mxu0 %v10111_v26 }
 0x48a   : > { %2728 = vmatprep.subr.mxu1 %v10113_v42  ;;  %2652 = vmatpush1.msra.mxu0 %v10117_v0  ;;  %v7712_v42 = vld [vmem:[%s8979_s19 + $0x110] sm:$0xff] }
 0x48b   : > { %2729 = vmatpush1.msra.mxu1 %v10119_v52  ;;  %2653 = vmatprep.subr.mxu0 %v10123_v21 }
 0x48c   : > { %2730 = vmatprep.subr.mxu1 %v10125_v33  ;;  %2654 = vmatpush1.msra.mxu0 %v10129_v46  ;;  %v7715_v33 = vld [vmem:[%s8979_s19 + $0x128] sm:$0xff] }
 0x48d   : > { %2731 = vmatpush1.msra.mxu1 %v10131_v47  ;;  %2655 = vmatprep.subr.mxu0 %v10135_v48 }
 0x48e   : > { %2732 = vmatprep.subr.mxu1 %v10137_v49  ;;  %2656 = vmatpush1.msra.mxu0 %v10141_v50  ;;  %v7714_v49 = vld [vmem:[%s8979_s19 + $0x120] sm:$0xff] }
 0x48f   : > { %2733 = vmatpush1.msra.mxu1 %v10143_v51  ;;  %2657 = vmatprep.subr.mxu0 %v10147_v53  ;;  %v10165_v53 = vld [vmem:[#allocation9 + $0x20] sm:$0xff]  ;;  %v7711_v51 = vld [vmem:[%s8979_s19 + $0x108] sm:$0xff] }
 0x490   : > { %2734 = vmatprep.subr.mxu1 %v10149_v54  ;;  %2658 = vmatpush1.msra.mxu0 %v10153_v56  ;;  %12404 = vst [vmem:[#allocation40_spill] sm:$0xff] %v10165_v53  ;;  %v10167_v54 = vld [vmem:[#allocation9 + $0x30] sm:$0xff]  ;;  %v10171_v56 = vld [vmem:[#allocation9 + $0x8] sm:$0xff] }
 0x491   : > { %2735 = vmatpush1.msra.mxu1 %v10155_v58  ;;  %2659 = vmatprep.subr.mxu0 %v10159_v59  ;;  %12405 = vst [vmem:[#allocation41_spill] sm:$0xff] %v10167_v54  ;;  %12406 = vst [vmem:[#allocation42_spill] sm:$0xff] %v10171_v56  ;;  %v10173_v58 = vld [vmem:[#allocation9 + $0x18] sm:$0xff]  ;;  %v10177_v59 = vld [vmem:[#allocation9] sm:$0xff] }
 0x492   : > { %2736 = vmatprep.subr.mxu1 %v10161_v61  ;;  %2660 = vmatpush1.msra.mxu0 %v10165_v53  ;;  %12407 = vst [vmem:[#allocation43_spill] sm:$0xff] %v10173_v58  ;;  %12408 = vst [vmem:[#allocation44_spill] sm:$0xff] %v10177_v59  ;;  %v10179_v61 = vld [vmem:[#allocation9 + $0x10] sm:$0xff] }
 0x493   : > { %2737 = vmatpush1.msra.mxu1 %v10167_v54  ;;  %2661 = vmatprep.subr.mxu0 %v10171_v56  ;;  %12409 = vst [vmem:[#allocation45_spill] sm:$0xff] %v10179_v61  ;;  %v7710_v54 = vld [vmem:[%s8979_s19 + $0x100] sm:$0xff] }
 0x494   : > { %2738 = vmatprep.subr.mxu1 %v10173_v58  ;;  %2662 = vmatpush1.msra.mxu0 %v10177_v59 }
 0x495   : > { %2739 = vmatpush1.msra.mxu1 %v10179_v61  ;;  %3074 = vmatprep.subr.mxu0 %v9863_v37 }
 0x496   : > { %3151 = vmatprep.subr.mxu1 %v9865_v34 }
 0x52f   : > { %v2254_v53 = vpop.f32.mrf.mxu0  ;;  %v2331_v56 = vpop.f32.mrf.mxu1 }
 0x530   : > { %v2342_v50 = vadd.f32 %v7710_v54, %v2254_v53  ;;  %v7713_v53 = vld [vmem:[%s8979_s19 + $0x118] sm:$0xff] }
 0x531   : > { %v2256_v58 = vpop.f32.mrf.mxu0  ;;  %v2333_v59 = vpop.f32.mrf.mxu1 }
 0x532   : > { %v7718_v48 = vmul.f32 -1.442695, %v2342_v50  ;;  %v2343_v47 = vadd.f32 %v7711_v51, %v2256_v58  ;;  %v2345_v50 = vadd.f32 %v7713_v53, %v2333_v59  ;;  %v7717_v51 = vld [vmem:[%s8979_s19 + $0x138] sm:$0xff] }
 0x534   : > { %v2260_v46 = vpop.f32.mrf.mxu0  ;;  %8220 = vpow2.f32 %v7718_v48  ;;  %v7720_v61 = vmul.f32 -1.442695, %v2343_v47  ;;  %v7722_v26 = vmul.f32 -1.442695, %v2345_v50  ;;  %v2344_v47 = vadd.f32 %v7712_v42, %v2331_v56 }
 0x535   : > { %v2346_v37 = vadd.f32 %v7714_v49, %v2260_v46  ;;  %v2337_v54 = vpop.f32.mrf.mxu1  ;;  %v7716_v46 = vld [vmem:[%s8979_s19 + $0x130] sm:$0xff] }
 0x536   : > { %v2262_v21 = vpop.f32.mrf.mxu0  ;;  %8222 = vpow2.f32 %v7720_v61 }
 0x537   : > { %v7719_v34 = vmul.f32 -1.442695, %v2346_v37  ;;  %v2347_v52 = vadd.f32 %v7715_v33, %v2262_v21  ;;  %v2339_v58 = vpop.f32.mrf.mxu1  ;;  %v2348_v37 = vadd.f32 %v7716_v46, %v2337_v54  ;;  %v2405_v54 = vpop.permute.xlu0 %2404 }
 0x538   : > { %v2349_v48 = vadd.f32 %v7717_v51, %v2339_v58  ;;  %vm2409_vm8 = vcmp.eq.s32.totalorder %v2405_v54, 1 }
 0x539   : > { %8224 = vpow2.f32 %v7719_v34  ;;  %v7721_v0 = vmul.f32 -1.442695, %v2347_v52 }
 0x53a   : > { %v7723_v61 = vmul.f32 -1.442695, %v2349_v48 }
 0x53b   : > { %8226 = vpow2.f32 %v7721_v0 }
 0x53c   : > { %8228 = vpow2.f32 %v7722_v26 }
 0x541   : > { %v8221_v45 = vpop.eup %8220 }
 0x542   : > { %v2356_v24 = vadd.f32 1.0, %v8221_v45 }
 0x543   : > { %v8223_v49 = vpop.eup %8222 }
 0x544   : > { %8230 = vrcp.f32 %v2356_v24  ;;  %v2368_v21 = vadd.f32 1.0, %v8223_v49 }
 0x545   : > { %8232 = vtanh.f32 %v2344_v47 }
 0x546   : > { %v8225_v33 = vpop.eup %8224  ;;  %8234 = vrcp.f32 %v2368_v21 }
 0x547   : > { %v2357_v0 = vadd.f32 1.0, %v8225_v33  ;;  %8236 = vpow2.f32 %v7723_v61  ;;  %v2408_v33 = vpop.permute.xlu1 %2407 }
 0x548   : > { %v8227_v52 = vpop.eup %8226  ;;  %vm2410_vm9 = vcmp.eq.s32.totalorder %v2408_v33, 1 }
 0x549   : > { %8238 = vrcp.f32 %v2357_v0  ;;  %v2369_v59 = vadd.f32 1.0, %v8227_v52  ;;  %v8229_v34 = vpop.eup %8228 }
 0x54a   : > { %8240 = vtanh.f32 %v2348_v37  ;;  %v2382_v53 = vadd.f32 1.0, %v8229_v34 }
 0x54b   : > { %8242 = vrcp.f32 %v2369_v59 }
 0x54c   : > { %8244 = vrcp.f32 %v2382_v53 }
 0x551   : > { %v8231_v42 = vpop.eup %8230 }
 0x552   : > { %v8233_v45 = vpop.eup %8232 }
 0x553   : > { %v8235_v56 = vpop.eup %8234  ;;  %v2390_v50 = vmul.f32 %v8233_v45, %v8231_v42 }
 0x554   : > { %v8237_v26 = vpop.eup %8236  ;;  %v2388_v24 = vmul.f32 %v8235_v56, %v9960_v12 }
 0x555   : > { %v2383_v46 = vadd.f32 1.0, %v8237_v26 }
 0x556   : > { %v8239_v51 = vpop.eup %8238  ;;  %v2392_v48 = vadd.f32 %v2390_v50, %v2388_v24 }
 0x557   : > { %v8241_v58 = vpop.eup %8240 }
 0x558   : > { %v8243_v47 = vpop.eup %8242  ;;  %8246 = vtanh.f32 %v2392_v48  ;;  %v10196_v49 = vsel %vm2409_vm8, %v2392_v48, %v9960_v12  ;;  %v2391_v61 = vmul.f32 %v8241_v58, %v8239_v51 }
 0x559   : > { %v2389_v21 = vmul.f32 %v8243_v47, %v9965_v17  ;;  %8248 = vrcp.f32 %v2383_v46  ;;  %v8245_v52 = vpop.eup %8244 }
 0x55b   : > { %v2393_v37 = vadd.f32 %v2391_v61, %v2389_v21 }
 0x55d   : > { %8250 = vtanh.f32 %v2393_v37  ;;  %v10201_v0 = vsel %vm2410_vm9, %v2393_v37, %v9965_v17 }
 0x565   : > { %v8247_v59 = vpop.eup %8246 }
 0x566   : > { %v2396_v34 = vmul.f32 %v8247_v59, %v8245_v52  ;;  %v8249_v42 = vpop.eup %8248 }
 0x568   : > { %v10205_v12 = vsel %vm2409_vm8, %v2396_v34, %v9969_v23  ;;  %v2419_v45 = vsel %vm2409_vm8, %v2396_v34, 0.0 }
 0x569   : > { %v2423_v53 = vcombine.high %v2419_v45, %v2419_v45  ;;  %v2430_v26 = vrot.slane %v2419_v45, %v9431_v4  ;;  %2696 = vmatmul.mubr.f32.vlgmr.msra.gmra.mxu0 %v10205_v12  ;;  %2773 = vmatmul.mubr.f32.vlgmr.msra.gmra.mxu1 %v10205_v12  ;;  %v12410_v45 = vld [vmem:[#allocation20_spill] sm:$0xff] }
 0x56a   : > { %v8251_v56 = vpop.eup %8250  ;;  %2701 = vmatprep.mubr.f32.mxu0 %v12303_v63  ;;  %2778 = vmatprep.mubr.f32.mxu1 %v12303_v63 }
 0x56b   : > { %v2397_v17 = vmul.f32 %v8251_v56, %v8249_v42  ;;  %v2437_v23 = vrot.slane %v2423_v53, %v9431_v4  ;;  %v2438_v50 = vcombine.high %v2430_v26, %v2430_v26  ;;  %v2446_v24 = vrot.slane %v2430_v26, %v9431_v4  ;;  %7724 = vst.sshfl [vmem:[%s8990_s20 + $0x4] sm:$0x1 pattern:$0x73625140] %v2430_v26  ;;  %v12411_v56 = vld [vmem:[#allocation26_spill] sm:$0xff]  ;;  %v12412_v53 = vld [vmem:[#allocation21_spill] sm:$0xff] }
 0x56c   : > { %3075 = vmatpush1.msra.mxu0 %v9869_v43  ;;  %3152 = vmatpush1.msra.mxu1 %v9871_v27  ;;  %v12413_v26 = vld [vmem:[#allocation28_spill] sm:$0xff] }
 0x56d   : > { %v10220_v51 = vsel %vm2410_vm9, %v2397_v17, %v9984_v22  ;;  %v2420_v58 = vsel %vm2410_vm9, %v2397_v17, 0.0  ;;  %3076 = vmatprep.subr.mxu0 %v9875_v25  ;;  %3153 = vmatprep.subr.mxu1 %v9877_v36  ;;  %v2439_v54 = vcombine.high %v2437_v23, %v2437_v23  ;;  %v2453_v48 = vrot.slane %v2437_v23, %v9431_v4  ;;  %v12414_v17 = vld [vmem:[#allocation22_spill] sm:$0xff] }
 0x56e   : > { %v2460_v47 = vrot.slane %v2438_v50, %v9431_v4  ;;  %v2468_v43 = vcombine.high %v2446_v24, %v2446_v24  ;;  %7725 = vst.sshfl [vmem:[%s8990_s20 + $0x14] sm:$0x1 pattern:$0x73625140] %v2438_v50  ;;  %2702 = vmatmul.mubr.f32.gmra.mxu0 %v10220_v51  ;;  %v2472_v27 = vcombine.high %v2420_v58, %v2420_v58  ;;  %v12416_v50 = vld [vmem:[#allocation23_spill] sm:$0xff]  ;;  %v12417_v24 = vld [vmem:[#allocation24_spill] sm:$0xff] }
 0x56f   : > { %7726 = vst.sshfl [vmem:[%s8990_s20 + $0x44] sm:$0x1 pattern:$0x73625140] %v2437_v23  ;;  %v2479_v22 = vrot.slane %v2420_v58, %v9431_v4  ;;  %2779 = vmatmul.mubr.f32.gmra.mxu1 %v10220_v51  ;;  %3077 = vmatpush1.msra.mxu0 %v9881_v29  ;;  %v2467_v25 = vrot.slane %v2439_v54, %v9431_v4  ;;  %v12415_v23 = vld [vmem:[#allocation29_spill] sm:$0xff] }
 0x570   : > { %v2469_v36 = vcombine.high %v2453_v48, %v2453_v48  ;;  %v2470_v46 = vcombine.high %v2460_v47, %v2460_v47  ;;  %2539 = vst [vmem:[%s8990_s20 + $0x24] sm:$0x1] %v2468_v43  ;;  %7727 = vst.sshfl [vmem:[%s8990_s20 + $0x54] sm:$0x1 pattern:$0x73625140] %v2439_v54  ;;  %3154 = vmatpush1.msra.mxu1 %v9883_v40  ;;  %3078 = vmatprep.subr.mxu0 %v9887_v44 }
 0x571   : > { %v2486_v61 = vrot.slane %v2472_v27, %v9431_v4  ;;  %v2487_v21 = vcombine.high %v2479_v22, %v2479_v22  ;;  %v2495_v33 = vrot.slane %v2479_v22, %v9431_v4  ;;  %7728 = vst.sshfl [vmem:[%s8990_s20 + $0x84] sm:$0x1 pattern:$0x73625140] %v2479_v22  ;;  %3155 = vmatprep.subr.mxu1 %v9889_v39  ;;  %v12418_v58 = vld [vmem:[#allocation25_spill] sm:$0xff]  ;;  %v12419_v54 = vld [vmem:[#allocation27_spill] sm:$0xff] }
 0x572   : > { %3079 = vmatpush1.msra.mxu0 %v10021_v62  ;;  %v2471_v29 = vcombine.high %v2467_v25, %v2467_v25  ;;  %2540 = vst [vmem:[%s8990_s20 + $0x34] sm:$0x1] %v2470_v46  ;;  %2543 = vst [vmem:[%s8990_s20 + $0x64] sm:$0x1] %v2469_v36  ;;  %3156 = vmatpush1.msra.mxu1 %v10023_v1  ;;  %v12420_v48 = vld [vmem:[#allocation30_spill] sm:$0xff]  ;;  %v12421_v47 = vld [vmem:[#allocation31_spill] sm:$0xff] }
 0x573   : > { %3080 = vmatprep.subr.mxu0 %v10027_v2  ;;  %v2488_v40 = vcombine.high %v2486_v61, %v2486_v61  ;;  %v2502_v44 = vrot.slane %v2486_v61, %v9431_v4  ;;  %v2509_v37 = vrot.slane %v2487_v21, %v9431_v4  ;;  %v2517_v52 = vcombine.high %v2495_v33, %v2495_v33  ;;  %v12422_v43 = vld [vmem:[#allocation32_spill] sm:$0xff]  ;;  %v12423_v27 = vld [vmem:[#allocation33_spill] sm:$0xff]  ;;  %v12424_v22 = vld [vmem:[#allocation34_spill] sm:$0xff] }
 0x574   : > { %7729 = vst.sshfl [vmem:[%s8990_s20 + $0x94] sm:$0x1 pattern:$0x73625140] %v2487_v21  ;;  %3157 = vmatprep.subr.mxu1 %v10029_v60  ;;  %2544 = vst [vmem:[%s8990_s20 + $0x74] sm:$0x1] %v2471_v29  ;;  %3081 = vmatpush1.msra.mxu0 %v10033_v14 }
 0x575   : > { %7730 = vst.sshfl [vmem:[%s8990_s20 + $0xc4] sm:$0x1 pattern:$0x73625140] %v2486_v61  ;;  %3158 = vmatpush1.msra.mxu1 %v10035_v5  ;;  %v2516_v39 = vrot.slane %v2488_v40, %v9431_v4  ;;  %v2518_v59 = vcombine.high %v2502_v44, %v2502_v44  ;;  %v2519_v34 = vcombine.high %v2509_v37, %v2509_v37  ;;  %2547 = vst [vmem:[%s8990_s20 + $0xa4] sm:$0x1] %v2517_v52 }
 0x576   : > { %7731 = vst.sshfl [vmem:[%s8990_s20 + $0xd4] sm:$0x1 pattern:$0x73625140] %v2488_v40  ;;  %3082 = vmatprep.subr.mxu0 %v10039_v7  ;;  %3159 = vmatprep.subr.mxu1 %v10041_v8  ;;  %v12425_v25 = vld [vmem:[#allocation35_spill] sm:$0xff]  ;;  %v12426_v36 = vld [vmem:[#allocation36_spill] sm:$0xff] }
 0x577   : > { %3083 = vmatpush1.msra.mxu0 %v10045_v9  ;;  %3160 = vmatpush1.msra.mxu1 %v10047_v10  ;;  %v2520_v42 = vcombine.high %v2516_v39, %v2516_v39  ;;  %2548 = vst [vmem:[%s8990_s20 + $0xb4] sm:$0x1] %v2519_v34  ;;  %2551 = vst [vmem:[%s8990_s20 + $0xe4] sm:$0x1] %v2518_v59  ;;  %v12427_v46 = vld [vmem:[#allocation37_spill] sm:$0xff]  ;;  %v12428_v61 = vld [vmem:[#allocation38_spill] sm:$0xff] }
 0x578   : > { %3084 = vmatprep.subr.mxu0 %v10051_v3  ;;  %3161 = vmatprep.subr.mxu1 %v10053_v13  ;;  %v12429_v21 = vld [vmem:[#allocation39_spill] sm:$0xff]  ;;  %v12430_v33 = vld [vmem:[#allocation40_spill] sm:$0xff]  ;;  %v12431_v29 = vld [vmem:[#allocation41_spill] sm:$0xff] }
 0x579   : > { %3085 = vmatpush1.msra.mxu0 %v10057_v15  ;;  %3162 = vmatpush1.msra.mxu1 %v10059_v16  ;;  %2552 = vst [vmem:[%s8990_s20 + $0xf4] sm:$0x1] %v2520_v42  ;;  %v12432_v40 = vld [vmem:[#allocation42_spill] sm:$0xff]  ;;  %v12433_v44 = vld [vmem:[#allocation43_spill] sm:$0xff]  ;;  %v12434_v37 = vld [vmem:[#allocation44_spill] sm:$0xff] }
 0x57a   : > { %3086 = vmatprep.subr.mxu0 %v10063_v19  ;;  %3163 = vmatprep.subr.mxu1 %v10065_v30  ;;  %v12435_v52 = vld [vmem:[#allocation45_spill] sm:$0xff]  ;;  %v7732_v39 = vld [vmem:[%s8979_s19 + $0x140] sm:$0xff]  ;;  %v7733_v34 = vld [vmem:[%s8979_s19 + $0x148] sm:$0xff] }
 0x57b   : > { %3087 = vmatpush1.msra.mxu0 %v10069_v20  ;;  %3164 = vmatpush1.msra.mxu1 %v10071_v28 }
 0x57c   : > { %3088 = vmatprep.subr.mxu0 %v10075_v57  ;;  %3165 = vmatprep.subr.mxu1 %v10077_v6 }
 0x57d   : > { %3089 = vmatpush1.msra.mxu0 %v10081_v18  ;;  %3166 = vmatpush1.msra.mxu1 %v10083_v32 }
 0x57e   : > { %3090 = vmatprep.subr.mxu0 %v10087_v38  ;;  %3167 = vmatprep.subr.mxu1 %v10089_v35 }
 0x57f   : > { %3091 = vmatpush1.msra.mxu0 %v10093_v11  ;;  %3168 = vmatpush1.msra.mxu1 %v10095_v41 }
 0x580   : > { %3092 = vmatprep.subr.mxu0 %v10099_v55  ;;  %3169 = vmatprep.subr.mxu1 %v10101_v31 }
 0x581   : > { %3093 = vmatpush1.msra.mxu0 %v12410_v45  ;;  %3170 = vmatpush1.msra.mxu1 %v12411_v56 }
 0x582   : > { %3094 = vmatprep.subr.mxu0 %v12412_v53  ;;  %3171 = vmatprep.subr.mxu1 %v12413_v26 }
 0x583   : > { %3095 = vmatpush1.msra.mxu0 %v12414_v17  ;;  %3172 = vmatpush1.msra.mxu1 %v12415_v23 }
 0x584   : > { %3096 = vmatprep.subr.mxu0 %v12416_v50  ;;  %3173 = vmatprep.subr.mxu1 %v12417_v24 }
 0x585   : > { %3097 = vmatpush1.msra.mxu0 %v12418_v58  ;;  %3174 = vmatpush1.msra.mxu1 %v12419_v54 }
 0x586   : > { %3098 = vmatprep.subr.mxu0 %v12420_v48  ;;  %3175 = vmatprep.subr.mxu1 %v12421_v47  ;;  %v7734_v47 = vld [vmem:[%s8979_s19 + $0x150] sm:$0xff] }
 0x587   : > { %3099 = vmatpush1.msra.mxu0 %v12422_v43  ;;  %3176 = vmatpush1.msra.mxu1 %v12423_v27 }
 0x588   : > { %3100 = vmatprep.subr.mxu0 %v12424_v22  ;;  %3177 = vmatprep.subr.mxu1 %v12425_v25 }
 0x589   : > { %3101 = vmatpush1.msra.mxu0 %v12426_v36  ;;  %3178 = vmatpush1.msra.mxu1 %v12427_v46 }
 0x58a   : > { %3102 = vmatprep.subr.mxu0 %v12428_v61  ;;  %3179 = vmatprep.subr.mxu1 %v12429_v21  ;;  %v7736_v21 = vld [vmem:[%s8979_s19 + $0x160] sm:$0xff] }
 0x58b   : > { %3103 = vmatpush1.msra.mxu0 %v12430_v33  ;;  %3180 = vmatpush1.msra.mxu1 %v12431_v29 }
 0x58c   : > { %3104 = vmatprep.subr.mxu0 %v12432_v40  ;;  %3181 = vmatprep.subr.mxu1 %v12433_v44  ;;  %v7737_v44 = vld [vmem:[%s8979_s19 + $0x168] sm:$0xff] }
 0x58d   : > { %3105 = vmatpush1.msra.mxu0 %v12434_v37  ;;  %3138 = vmatprep.mubr.f32.mxu0 %v12303_v63 }
 0x58e   : > { %3182 = vmatpush1.msra.mxu1 %v12435_v52  ;;  %3215 = vmatprep.mubr.f32.mxu1 %v12303_v63 }
 0x629   : > { %v2697_v59 = vpop.f32.mrf.mxu0  ;;  %v2774_v33 = vpop.f32.mrf.mxu1 }
 0x62a   : > { %v2785_v42 = vadd.f32 %v7732_v39, %v2697_v59  ;;  %v7735_v39 = vld [vmem:[%s8979_s19 + $0x158] sm:$0xff] }
 0x62b   : > { %v2699_v29 = vpop.f32.mrf.mxu0  ;;  %v2776_v36 = vpop.f32.mrf.mxu1 }
 0x62c   : > { %v7740_v40 = vmul.f32 -1.442695, %v2785_v42  ;;  %v2786_v61 = vadd.f32 %v7733_v34, %v2699_v29  ;;  %v2788_v42 = vadd.f32 %v7735_v39, %v2776_v36  ;;  %v7739_v29 = vld [vmem:[%s8979_s19 + $0x178] sm:$0xff] }
 0x62e   : > { %v2703_v46 = vpop.f32.mrf.mxu0  ;;  %8252 = vpow2.f32 %v7740_v40  ;;  %v7742_v37 = vmul.f32 -1.442695, %v2786_v61  ;;  %v7744_v48 = vmul.f32 -1.442695, %v2788_v42  ;;  %v2787_v61 = vadd.f32 %v7734_v47, %v2774_v33 }
 0x62f   : > { %v2789_v52 = vadd.f32 %v7736_v21, %v2703_v46  ;;  %v2780_v59 = vpop.f32.mrf.mxu1  ;;  %v7738_v46 = vld [vmem:[%s8979_s19 + $0x170] sm:$0xff] }
 0x630   : > { %v2705_v25 = vpop.f32.mrf.mxu0  ;;  %8254 = vpow2.f32 %v7742_v37 }
 0x631   : > { %v7741_v22 = vmul.f32 -1.442695, %v2789_v52  ;;  %v2790_v27 = vadd.f32 %v7737_v44, %v2705_v25  ;;  %v2782_v34 = vpop.f32.mrf.mxu1 }
 0x632   : > { %v2792_v40 = vadd.f32 %v7739_v29, %v2782_v34 }
 0x633   : > { %8256 = vpow2.f32 %v7741_v22  ;;  %v7743_v43 = vmul.f32 -1.442695, %v2790_v27  ;;  %v2791_v22 = vadd.f32 %v7738_v46, %v2780_v59  ;;  %v2848_v59 = vpop.permute.xlu0 %2847 }
 0x634   : > { %v7745_v37 = vmul.f32 -1.442695, %v2792_v40  ;;  %vm2852_vm10 = vcmp.eq.s32.totalorder %v2848_v59, 1 }
 0x635   : > { %8258 = vpow2.f32 %v7743_v43 }
 0x636   : > { %8260 = vpow2.f32 %v7744_v48 }
 0x63b   : > { %v8253_v54 = vpop.eup %8252 }
 0x63c   : > { %v2799_v58 = vadd.f32 1.0, %v8253_v54 }
 0x63d   : > { %v8255_v21 = vpop.eup %8254 }
 0x63e   : > { %8262 = vrcp.f32 %v2799_v58  ;;  %v2811_v25 = vadd.f32 1.0, %v8255_v21 }
 0x63f   : > { %8264 = vtanh.f32 %v2787_v61 }
 0x640   : > { %v8257_v44 = vpop.eup %8256  ;;  %8266 = vrcp.f32 %v2811_v25 }
 0x641   : > { %v2800_v43 = vadd.f32 1.0, %v8257_v44  ;;  %8268 = vpow2.f32 %v7745_v37  ;;  %v2851_v44 = vpop.permute.xlu1 %2850 }
 0x642   : > { %v8259_v27 = vpop.eup %8258  ;;  %vm2853_vm11 = vcmp.eq.s32.totalorder %v2851_v44, 1 }
 0x643   : > { %8270 = vrcp.f32 %v2800_v43  ;;  %v2812_v36 = vadd.f32 1.0, %v8259_v27  ;;  %v8261_v52 = vpop.eup %8260 }
 0x644   : > { %8272 = vtanh.f32 %v2791_v22  ;;  %v2825_v39 = vadd.f32 1.0, %v8261_v52 }
 0x645   : > { %8274 = vrcp.f32 %v2812_v36 }
 0x646   : > { %8276 = vrcp.f32 %v2825_v39 }
 0x64b   : > { %v8263_v47 = vpop.eup %8262 }
 0x64c   : > { %v8265_v54 = vpop.eup %8264 }
 0x64d   : > { %v8267_v33 = vpop.eup %8266  ;;  %v2833_v42 = vmul.f32 %v8265_v54, %v8263_v47 }
 0x64e   : > { %v8269_v48 = vpop.eup %8268  ;;  %v2831_v58 = vmul.f32 %v8267_v33, %v10196_v49 }
 0x64f   : > { %v2826_v46 = vadd.f32 1.0, %v8269_v48 }
 0x650   : > { %v8271_v29 = vpop.eup %8270  ;;  %v2835_v40 = vadd.f32 %v2833_v42, %v2831_v58 }
 0x651   : > { %v8273_v34 = vpop.eup %8272 }
 0x652   : > { %v8275_v61 = vpop.eup %8274  ;;  %8278 = vtanh.f32 %v2835_v40  ;;  %v10322_v21 = vsel %vm2852_vm10, %v2835_v40, %v10196_v49  ;;  %v2834_v37 = vmul.f32 %v8273_v34, %v8271_v29 }
 0x653   : > { %v2832_v25 = vmul.f32 %v8275_v61, %v10201_v0  ;;  %8280 = vrcp.f32 %v2826_v46  ;;  %v8277_v27 = vpop.eup %8276 }
 0x655   : > { %v2836_v22 = vadd.f32 %v2834_v37, %v2832_v25 }
 0x657   : > { %8282 = vtanh.f32 %v2836_v22  ;;  %v10327_v43 = vsel %vm2853_vm11, %v2836_v22, %v10201_v0 }
 0x65f   : > { %v8279_v36 = vpop.eup %8278 }
 0x660   : > { %v2839_v52 = vmul.f32 %v8279_v36, %v8277_v27  ;;  %v8281_v47 = vpop.eup %8280 }
 0x662   : > { %v10331_v49 = vsel %vm2852_vm10, %v2839_v52, %v10205_v12  ;;  %v2862_v54 = vsel %vm2852_vm10, %v2839_v52, 0.0 }
 0x663   : > { %v2866_v39 = vcombine.high %v2862_v54, %v2862_v54  ;;  %v2873_v48 = vrot.slane %v2862_v54, %v9431_v4  ;;  %3139 = vmatmul.mubr.f32.vlgmr.msra.gmra.mxu0 %v10331_v49  ;;  %3216 = vmatmul.mubr.f32.vlgmr.msra.gmra.mxu1 %v10331_v49 }
 0x664   : > { %v8283_v33 = vpop.eup %8282  ;;  %3144 = vmatprep.mubr.f32.mxu0 %v12303_v63  ;;  %3221 = vmatprep.mubr.f32.mxu1 %v12303_v63 }
 0x665   : > { %v2840_v0 = vmul.f32 %v8283_v33, %v8281_v47  ;;  %v2880_v12 = vrot.slane %v2866_v39, %v9431_v4  ;;  %v2881_v42 = vcombine.high %v2873_v48, %v2873_v48  ;;  %v2889_v58 = vrot.slane %v2873_v48, %v9431_v4  ;;  %7746 = vst.sshfl [vmem:[%s8990_s20 + $0x5] sm:$0x1 pattern:$0x73625140] %v2873_v48 }
 0x667   : > { %v10344_v29 = vsel %vm2853_vm11, %v2840_v0, %v10220_v51  ;;  %v2863_v34 = vsel %vm2853_vm11, %v2840_v0, 0.0  ;;  %v2882_v59 = vcombine.high %v2880_v12, %v2880_v12  ;;  %v2896_v40 = vrot.slane %v2880_v12, %v9431_v4  ;;  %7747 = vst.sshfl [vmem:[%s8990_s20 + $0x15] sm:$0x1 pattern:$0x73625140] %v2881_v42 }
 0x668   : > { %v2903_v61 = vrot.slane %v2881_v42, %v9431_v4  ;;  %v2911_v46 = vcombine.high %v2889_v58, %v2889_v58  ;;  %7748 = vst.sshfl [vmem:[%s8990_s20 + $0x45] sm:$0x1 pattern:$0x73625140] %v2880_v12  ;;  %3145 = vmatmul.mubr.f32.gmra.mxu0 %v10344_v29  ;;  %v2915_v37 = vcombine.high %v2863_v34, %v2863_v34 }
 0x669   : > { %v2922_v51 = vrot.slane %v2863_v34, %v9431_v4  ;;  %3222 = vmatmul.mubr.f32.gmra.mxu1 %v10344_v29  ;;  %3581 = vmatprep.mubr.f32.mxu0 %v12303_v63  ;;  %v2910_v25 = vrot.slane %v2882_v59, %v9431_v4  ;;  %v2912_v44 = vcombine.high %v2896_v40, %v2896_v40  ;;  %v10375_v34 = vld [vmem:[#allocation9 + $0x1e8] sm:$0xff]  ;;  %v10381_v40 = vld [vmem:[#allocation9 + $0x1e0] sm:$0xff] }
 0x66a   : > { %v2913_v22 = vcombine.high %v2903_v61, %v2903_v61  ;;  %2982 = vst [vmem:[%s8990_s20 + $0x25] sm:$0x1] %v2911_v46  ;;  %7749 = vst.sshfl [vmem:[%s8990_s20 + $0x55] sm:$0x1 pattern:$0x73625140] %v2882_v59  ;;  %3658 = vmatprep.mubr.f32.mxu1 %v12303_v63  ;;  %v2929_v27 = vrot.slane %v2915_v37, %v9431_v4  ;;  %3517 = vmatprep.subr.mxu0 %v10375_v34 }
 0x66b   : > { %v2930_v36 = vcombine.high %v2922_v51, %v2922_v51  ;;  %v2938_v52 = vrot.slane %v2922_v51, %v9431_v4  ;;  %7750 = vst.sshfl [vmem:[%s8990_s20 + $0x85] sm:$0x1 pattern:$0x73625140] %v2922_v51  ;;  %v2914_v47 = vcombine.high %v2910_v25, %v2910_v25  ;;  %2986 = vst [vmem:[%s8990_s20 + $0x65] sm:$0x1] %v2912_v44  ;;  %3518 = vmatpush1.msra.mxu0 %v10381_v40 }
 0x66c   : > { %2983 = vst [vmem:[%s8990_s20 + $0x35] sm:$0x1] %v2913_v22  ;;  %v2931_v54 = vcombine.high %v2929_v27, %v2929_v27  ;;  %v2945_v33 = vrot.slane %v2929_v27, %v9431_v4  ;;  %7752 = vst.sshfl [vmem:[%s8990_s20 + $0xc5] sm:$0x1 pattern:$0x73625140] %v2929_v27 }
 0x66d   : > { %v2952_v39 = vrot.slane %v2930_v36, %v9431_v4  ;;  %v2960_v48 = vcombine.high %v2938_v52, %v2938_v52  ;;  %7751 = vst.sshfl [vmem:[%s8990_s20 + $0x95] sm:$0x1 pattern:$0x73625140] %v2930_v36  ;;  %2987 = vst [vmem:[%s8990_s20 + $0x75] sm:$0x1] %v2914_v47 }
 0x66e   : > { %v2959_v0 = vrot.slane %v2931_v54, %v9431_v4  ;;  %v2961_v12 = vcombine.high %v2945_v33, %v2945_v33  ;;  %7753 = vst.sshfl [vmem:[%s8990_s20 + $0xd5] sm:$0x1 pattern:$0x73625140] %v2931_v54  ;;  %v10377_v59 = vld [vmem:[#allocation9 + $0x1f8] sm:$0xff]  ;;  %v10383_v61 = vld [vmem:[#allocation9 + $0x1f0] sm:$0xff] }
 0x66f   : > { %v2962_v42 = vcombine.high %v2952_v39, %v2952_v39  ;;  %2990 = vst [vmem:[%s8990_s20 + $0xa5] sm:$0x1] %v2960_v48  ;;  %3594 = vmatprep.subr.mxu1 %v10377_v59  ;;  %v10387_v46 = vld [vmem:[#allocation9 + $0x1c8] sm:$0xff]  ;;  %v10389_v37 = vld [vmem:[#allocation9 + $0x1d8] sm:$0xff]  ;;  %v10393_v51 = vld [vmem:[#allocation9 + $0x1c0] sm:$0xff] }
 0x670   : > { %v2963_v58 = vcombine.high %v2959_v0, %v2959_v0  ;;  %2994 = vst [vmem:[%s8990_s20 + $0xe5] sm:$0x1] %v2961_v12  ;;  %3595 = vmatpush1.msra.mxu1 %v10383_v61  ;;  %3519 = vmatprep.subr.mxu0 %v10387_v46  ;;  %v10395_v25 = vld [vmem:[#allocation9 + $0x1d0] sm:$0xff]  ;;  %v10399_v44 = vld [vmem:[#allocation9 + $0x1a8] sm:$0xff]  ;;  %v10401_v22 = vld [vmem:[#allocation9 + $0x1b8] sm:$0xff] }
 0x671   : > { %2991 = vst [vmem:[%s8990_s20 + $0xb5] sm:$0x1] %v2962_v42  ;;  %3596 = vmatprep.subr.mxu1 %v10389_v37  ;;  %3520 = vmatpush1.msra.mxu0 %v10393_v51  ;;  %v7761_v47 = vld [vmem:[%s8979_s19 + $0x1b8] sm:$0xff]  ;;  %v7756_v33 = vld [vmem:[%s8979_s19 + $0x190] sm:$0xff] }
 0x672   : > { %2995 = vst [vmem:[%s8990_s20 + $0xf5] sm:$0x1] %v2963_v58  ;;  %3597 = vmatpush1.msra.mxu1 %v10395_v25  ;;  %3521 = vmatprep.subr.mxu0 %v10399_v44  ;;  %v7760_v58 = vld [vmem:[%s8979_s19 + $0x1b0] sm:$0xff] }
 0x673   : > { %3598 = vmatprep.subr.mxu1 %v10401_v22  ;;  %3522 = vmatpush1.msra.mxu0 %v10021_v62  ;;  %v12436_v62 = vld [vmem:[#allocation25_spill] sm:$0xff] }
 0x674   : > { %3599 = vmatpush1.msra.mxu1 %v10023_v1  ;;  %3523 = vmatprep.subr.mxu0 %v10027_v2  ;;  %v12437_v1 = vld [vmem:[#allocation27_spill] sm:$0xff]  ;;  %v12438_v2 = vld [vmem:[#allocation30_spill] sm:$0xff] }
 0x675   : > { %3600 = vmatprep.subr.mxu1 %v10029_v60  ;;  %3524 = vmatpush1.msra.mxu0 %v10033_v14  ;;  %v12439_v60 = vld [vmem:[#allocation31_spill] sm:$0xff]  ;;  %v12440_v14 = vld [vmem:[#allocation32_spill] sm:$0xff] }
 0x676   : > { %3601 = vmatpush1.msra.mxu1 %v10035_v5  ;;  %3525 = vmatprep.subr.mxu0 %v10039_v7  ;;  %v12441_v5 = vld [vmem:[#allocation33_spill] sm:$0xff]  ;;  %v12442_v7 = vld [vmem:[#allocation34_spill] sm:$0xff] }
 0x677   : > { %3602 = vmatprep.subr.mxu1 %v10041_v8  ;;  %3526 = vmatpush1.msra.mxu0 %v10045_v9  ;;  %v12443_v8 = vld [vmem:[#allocation35_spill] sm:$0xff]  ;;  %v12444_v9 = vld [vmem:[#allocation36_spill] sm:$0xff] }
 0x678   : > { %3603 = vmatpush1.msra.mxu1 %v10047_v10  ;;  %3527 = vmatprep.subr.mxu0 %v10051_v3  ;;  %v12445_v10 = vld [vmem:[#allocation37_spill] sm:$0xff]  ;;  %v12446_v3 = vld [vmem:[#allocation38_spill] sm:$0xff] }
 0x679   : > { %3604 = vmatprep.subr.mxu1 %v10053_v13  ;;  %3528 = vmatpush1.msra.mxu0 %v10057_v15  ;;  %v12447_v13 = vld [vmem:[#allocation39_spill] sm:$0xff]  ;;  %v12448_v15 = vld [vmem:[#allocation40_spill] sm:$0xff] }
 0x67a   : > { %3605 = vmatpush1.msra.mxu1 %v10059_v16  ;;  %3529 = vmatprep.subr.mxu0 %v10063_v19  ;;  %v12449_v16 = vld [vmem:[#allocation41_spill] sm:$0xff]  ;;  %v12450_v19 = vld [vmem:[#allocation42_spill] sm:$0xff] }
 0x67b   : > { %3606 = vmatprep.subr.mxu1 %v10065_v30  ;;  %3530 = vmatpush1.msra.mxu0 %v10069_v20  ;;  %v12451_v30 = vld [vmem:[#allocation43_spill] sm:$0xff]  ;;  %v12452_v20 = vld [vmem:[#allocation44_spill] sm:$0xff] }
 0x67c   : > { %3607 = vmatpush1.msra.mxu1 %v10071_v28  ;;  %3531 = vmatprep.subr.mxu0 %v10075_v57  ;;  %v12453_v28 = vld [vmem:[#allocation45_spill] sm:$0xff]  ;;  %v7754_v57 = vld [vmem:[%s8979_s19 + $0x180] sm:$0xff] }
 0x67d   : > { %3608 = vmatprep.subr.mxu1 %v10077_v6  ;;  %3532 = vmatpush1.msra.mxu0 %v10081_v18  ;;  %v7755_v18 = vld [vmem:[%s8979_s19 + $0x188] sm:$0xff] }
 0x67e   : > { %3609 = vmatpush1.msra.mxu1 %v10083_v32  ;;  %3533 = vmatprep.subr.mxu0 %v10087_v38 }
 0x67f   : > { %3610 = vmatprep.subr.mxu1 %v10089_v35  ;;  %3534 = vmatpush1.msra.mxu0 %v10093_v11  ;;  %v7758_v11 = vld [vmem:[%s8979_s19 + $0x1a0] sm:$0xff] }
 0x680   : > { %3611 = vmatpush1.msra.mxu1 %v10095_v41  ;;  %3535 = vmatprep.subr.mxu0 %v10099_v55 }
 0x681   : > { %3612 = vmatprep.subr.mxu1 %v10101_v31  ;;  %3536 = vmatpush1.msra.mxu0 %v12410_v45  ;;  %v7759_v45 = vld [vmem:[%s8979_s19 + $0x1a8] sm:$0xff] }
 0x682   : > { %3613 = vmatpush1.msra.mxu1 %v12411_v56  ;;  %3537 = vmatprep.subr.mxu0 %v12412_v53 }
 0x683   : > { %3614 = vmatprep.subr.mxu1 %v12413_v26  ;;  %3538 = vmatpush1.msra.mxu0 %v12414_v17 }
 0x684   : > { %3615 = vmatpush1.msra.mxu1 %v12415_v23  ;;  %3539 = vmatprep.subr.mxu0 %v12416_v50 }
 0x685   : > { %3616 = vmatprep.subr.mxu1 %v12417_v24  ;;  %3540 = vmatpush1.msra.mxu0 %v12436_v62  ;;  %v7757_v24 = vld [vmem:[%s8979_s19 + $0x198] sm:$0xff] }
 0x686   : > { %3617 = vmatpush1.msra.mxu1 %v12437_v1  ;;  %3541 = vmatprep.subr.mxu0 %v12438_v2 }
 0x687   : > { %3618 = vmatprep.subr.mxu1 %v12439_v60  ;;  %3542 = vmatpush1.msra.mxu0 %v12440_v14 }
 0x688   : > { %3619 = vmatpush1.msra.mxu1 %v12441_v5  ;;  %3543 = vmatprep.subr.mxu0 %v12442_v7 }
 0x689   : > { %3620 = vmatprep.subr.mxu1 %v12443_v8  ;;  %3544 = vmatpush1.msra.mxu0 %v12444_v9 }
 0x68a   : > { %3621 = vmatpush1.msra.mxu1 %v12445_v10  ;;  %3545 = vmatprep.subr.mxu0 %v12446_v3 }
 0x68b   : > { %3622 = vmatprep.subr.mxu1 %v12447_v13  ;;  %3546 = vmatpush1.msra.mxu0 %v12448_v15 }
 0x68c   : > { %3623 = vmatpush1.msra.mxu1 %v12449_v16  ;;  %3547 = vmatprep.subr.mxu0 %v12450_v19 }
 0x68d   : > { %3624 = vmatprep.subr.mxu1 %v12451_v30  ;;  %3548 = vmatpush1.msra.mxu0 %v12452_v20 }
 0x68e   : > { %3625 = vmatpush1.msra.mxu1 %v12453_v28  ;;  %3960 = vmatprep.subr.mxu0 %v10375_v34 }
 0x68f   : > { %4037 = vmatprep.subr.mxu1 %v10377_v59 }
 0x723   : > { %v3140_v6 = vpop.f32.mrf.mxu0  ;;  %v3217_v38 = vpop.f32.mrf.mxu1 }
 0x724   : > { %v3228_v32 = vadd.f32 %v7754_v57, %v3140_v6  ;;  %v3230_v12 = vadd.f32 %v7756_v33, %v3217_v38  ;;  %v3291_v57 = vpop.permute.xlu0 %3290 }
 0x725   : > { %v3142_v35 = vpop.f32.mrf.mxu0  ;;  %v3219_v53 = vpop.f32.mrf.mxu1  ;;  %vm3295_vm12 = vcmp.eq.s32.totalorder %v3291_v57, 1  ;;  %v10551_v57 = vld [vmem:[#allocation9 + $0x168] sm:$0xff] }
 0x726   : > { %v7762_v41 = vmul.f32 -1.442695, %v3228_v32  ;;  %v3229_v55 = vadd.f32 %v7755_v18, %v3142_v35  ;;  %v3231_v52 = vadd.f32 %v7757_v24, %v3219_v53 }
 0x728   : > { %v3146_v31 = vpop.f32.mrf.mxu0  ;;  %8284 = vpow2.f32 %v7762_v41  ;;  %v7764_v56 = vmul.f32 -1.442695, %v3229_v55  ;;  %v7766_v39 = vmul.f32 -1.442695, %v3231_v52  ;;  %v3294_v41 = vpop.permute.xlu1 %3293 }
 0x729   : > { %v3232_v26 = vadd.f32 %v7758_v11, %v3146_v31  ;;  %v3223_v27 = vpop.f32.mrf.mxu1  ;;  %vm3296_vm13 = vcmp.eq.s32.totalorder %v3294_v41, 1  ;;  %v10569_v41 = vld [vmem:[#allocation9 + $0x140] sm:$0xff] }
 0x72a   : > { %v3148_v17 = vpop.f32.mrf.mxu0  ;;  %8286 = vpow2.f32 %v7764_v56  ;;  %v3234_v14 = vadd.f32 %v7760_v58, %v3223_v27 }
 0x72b   : > { %v7763_v23 = vmul.f32 -1.442695, %v3232_v26  ;;  %v3233_v50 = vadd.f32 %v7759_v45, %v3148_v17  ;;  %v3225_v54 = vpop.f32.mrf.mxu1 }
 0x72c   : > { %v3235_v48 = vadd.f32 %v7761_v47, %v3225_v54 }
 0x72d   : > { %8288 = vpow2.f32 %v7763_v23  ;;  %v7765_v36 = vmul.f32 -1.442695, %v3233_v50 }
 0x72e   : > { %v7767_v1 = vmul.f32 -1.442695, %v3235_v48 }
 0x72f   : > { %8290 = vpow2.f32 %v7765_v36 }
 0x730   : > { %8292 = vpow2.f32 %v7766_v39 }
 0x735   : > { %v8285_v0 = vpop.eup %8284 }
 0x736   : > { %v3242_v42 = vadd.f32 1.0, %v8285_v0 }
 0x737   : > { %v8287_v62 = vpop.eup %8286 }
 0x738   : > { %8294 = vrcp.f32 %v3242_v42  ;;  %v3254_v2 = vadd.f32 1.0, %v8287_v62 }
 0x739   : > { %8296 = vtanh.f32 %v3230_v12 }
 0x73a   : > { %v8289_v60 = vpop.eup %8288  ;;  %8298 = vrcp.f32 %v3254_v2 }
 0x73b   : > { %v3243_v5 = vadd.f32 1.0, %v8289_v60  ;;  %8300 = vpow2.f32 %v7767_v1 }
 0x73c   : > { %v8291_v7 = vpop.eup %8290 }
 0x73d   : > { %8302 = vrcp.f32 %v3243_v5  ;;  %v3255_v8 = vadd.f32 1.0, %v8291_v7  ;;  %v8293_v9 = vpop.eup %8292 }
 0x73e   : > { %8304 = vtanh.f32 %v3234_v14  ;;  %v3268_v15 = vadd.f32 1.0, %v8293_v9 }
 0x73f   : > { %8306 = vrcp.f32 %v3255_v8 }
 0x740   : > { %8308 = vrcp.f32 %v3268_v15  ;;  %v10533_v15 = vld [vmem:[#allocation9 + $0x1a0] sm:$0xff] }
 0x745   : > { %v8295_v10 = vpop.eup %8294 }
 0x746   : > { %v8297_v3 = vpop.eup %8296 }
 0x747   : > { %v8299_v13 = vpop.eup %8298  ;;  %v3276_v19 = vmul.f32 %v8297_v3, %v8295_v10 }
 0x748   : > { %v8301_v16 = vpop.eup %8300  ;;  %v3274_v30 = vmul.f32 %v8299_v13, %v10322_v21 }
 0x749   : > { %v3269_v32 = vadd.f32 1.0, %v8301_v16  ;;  %v10535_v16 = vld [vmem:[#allocation9 + $0x1b0] sm:$0xff] }
 0x74a   : > { %v8303_v20 = vpop.eup %8302  ;;  %v3278_v6 = vadd.f32 %v3276_v19, %v3274_v30  ;;  %v10539_v19 = vld [vmem:[#allocation9 + $0x188] sm:$0xff]  ;;  %v10541_v30 = vld [vmem:[#allocation9 + $0x198] sm:$0xff] }
 0x74b   : > { %v8305_v28 = vpop.eup %8304 }
 0x74c   : > { %v8307_v18 = vpop.eup %8306  ;;  %8310 = vtanh.f32 %v3278_v6  ;;  %v10472_v38 = vsel %vm3295_vm12, %v3278_v6, %v10322_v21  ;;  %v3277_v35 = vmul.f32 %v8305_v28, %v8303_v20  ;;  %v10545_v20 = vld [vmem:[#allocation9 + $0x180] sm:$0xff]  ;;  %v10547_v28 = vld [vmem:[#allocation9 + $0x190] sm:$0xff]  ;;  %v10553_v6 = vld [vmem:[#allocation9 + $0x178] sm:$0xff] }
 0x74d   : > { %v3275_v11 = vmul.f32 %v8307_v18, %v10327_v43  ;;  %8312 = vrcp.f32 %v3269_v32  ;;  %v8309_v45 = vpop.eup %8308  ;;  %v10557_v18 = vld [vmem:[#allocation9 + $0x160] sm:$0xff]  ;;  %v10559_v32 = vld [vmem:[#allocation9 + $0x170] sm:$0xff] }
 0x74f   : > { %v3279_v55 = vadd.f32 %v3277_v35, %v3275_v11  ;;  %v10563_v35 = vld [vmem:[#allocation9 + $0x148] sm:$0xff]  ;;  %v10565_v11 = vld [vmem:[#allocation9 + $0x158] sm:$0xff] }
 0x751   : > { %8314 = vtanh.f32 %v3279_v55  ;;  %v10477_v31 = vsel %vm3296_vm13, %v3279_v55, %v10327_v43  ;;  %v10571_v55 = vld [vmem:[#allocation9 + $0x150] sm:$0xff] }
 0x759   : > { %v8311_v56 = vpop.eup %8310 }
 0x75a   : > { %v3282_v53 = vmul.f32 %v8311_v56, %v8309_v45  ;;  %v8313_v26 = vpop.eup %8312  ;;  %v10575_v45 = vld [vmem:[#allocation9 + $0x128] sm:$0xff]  ;;  %v10577_v56 = vld [vmem:[#allocation9 + $0x138] sm:$0xff] }
 0x75c   : > { %v10481_v21 = vsel %vm3295_vm12, %v3282_v53, %v10331_v49  ;;  %v3305_v17 = vsel %vm3295_vm12, %v3282_v53, 0.0  ;;  %v10581_v53 = vld [vmem:[#allocation9 + $0x120] sm:$0xff] }
 0x75d   : > { %v3309_v50 = vcombine.high %v3305_v17, %v3305_v17  ;;  %v3316_v24 = vrot.slane %v3305_v17, %v9431_v4  ;;  %3582 = vmatmul.mubr.f32.vlgmr.msra.gmra.mxu0 %v10481_v21  ;;  %3659 = vmatmul.mubr.f32.vlgmr.msra.gmra.mxu1 %v10481_v21  ;;  %v10587_v17 = vld [vmem:[#allocation9 + $0x108] sm:$0xff] }
 0x75e   : > { %v8315_v23 = vpop.eup %8314  ;;  %3587 = vmatprep.mubr.f32.mxu0 %v12303_v63  ;;  %3664 = vmatprep.mubr.f32.mxu1 %v12303_v63 }
 0x75f   : > { %v3283_v43 = vmul.f32 %v8315_v23, %v8313_v26  ;;  %v3323_v49 = vrot.slane %v3309_v50, %v9431_v4  ;;  %v3324_v27 = vcombine.high %v3316_v24, %v3316_v24  ;;  %v3332_v36 = vrot.slane %v3316_v24, %v9431_v4  ;;  %7768 = vst.sshfl [vmem:[%s8990_s20 + $0x6] sm:$0x1 pattern:$0x73625140] %v3316_v24  ;;  %v10583_v26 = vld [vmem:[#allocation9 + $0x130] sm:$0xff]  ;;  %v10589_v23 = vld [vmem:[#allocation9 + $0x118] sm:$0xff] }
 0x760   : > { %3961 = vmatpush1.msra.mxu0 %v10381_v40  ;;  %4038 = vmatpush1.msra.mxu1 %v10383_v61  ;;  %v10593_v50 = vld [vmem:[#allocation9 + $0x100] sm:$0xff]  ;;  %v10595_v24 = vld [vmem:[#allocation9 + $0x110] sm:$0xff] }
 0x761   : > { %v10496_v52 = vsel %vm3296_vm13, %v3283_v43, %v10344_v29  ;;  %v3306_v47 = vsel %vm3296_vm13, %v3283_v43, 0.0  ;;  %3962 = vmatprep.subr.mxu0 %v10387_v46  ;;  %4039 = vmatprep.subr.mxu1 %v10389_v37  ;;  %v3325_v54 = vcombine.high %v3323_v49, %v3323_v49  ;;  %v3339_v33 = vrot.slane %v3323_v49, %v9431_v4  ;;  %v10599_v43 = vld [vmem:[#allocation9 + $0xe8] sm:$0xff] }
 0x762   : > { %v3346_v39 = vrot.slane %v3324_v27, %v9431_v4  ;;  %v3354_v48 = vcombine.high %v3332_v36, %v3332_v36  ;;  %7769 = vst.sshfl [vmem:[%s8990_s20 + $0x16] sm:$0x1 pattern:$0x73625140] %v3324_v27  ;;  %3588 = vmatmul.mubr.f32.gmra.mxu0 %v10496_v52  ;;  %v3358_v29 = vcombine.high %v3306_v47, %v3306_v47  ;;  %v10605_v27 = vld [vmem:[#allocation9 + $0xe0] sm:$0xff]  ;;  %v10607_v36 = vld [vmem:[#allocation9 + $0xf0] sm:$0xff] }
 0x763   : > { %7770 = vst.sshfl [vmem:[%s8990_s20 + $0x46] sm:$0x1 pattern:$0x73625140] %v3323_v49  ;;  %v3365_v0 = vrot.slane %v3306_v47, %v9431_v4  ;;  %3665 = vmatmul.mubr.f32.gmra.mxu1 %v10496_v52  ;;  %3963 = vmatpush1.msra.mxu0 %v10393_v51  ;;  %v3353_v12 = vrot.slane %v3325_v54, %v9431_v4  ;;  %v10601_v49 = vld [vmem:[#allocation9 + $0xf8] sm:$0xff]  ;;  %v10611_v47 = vld [vmem:[#allocation9 + $0xc8] sm:$0xff] }
 0x764   : > { %v3355_v42 = vcombine.high %v3339_v33, %v3339_v33  ;;  %v3356_v58 = vcombine.high %v3346_v39, %v3346_v39  ;;  %3425 = vst [vmem:[%s8990_s20 + $0x26] sm:$0x1] %v3354_v48  ;;  %7771 = vst.sshfl [vmem:[%s8990_s20 + $0x56] sm:$0x1 pattern:$0x73625140] %v3325_v54  ;;  %4040 = vmatpush1.msra.mxu1 %v10395_v25  ;;  %3964 = vmatprep.subr.mxu0 %v10399_v44 }
 0x765   : > { %v3372_v62 = vrot.slane %v3358_v29, %v9431_v4  ;;  %v3373_v1 = vcombine.high %v3365_v0, %v3365_v0  ;;  %v3381_v2 = vrot.slane %v3365_v0, %v9431_v4  ;;  %7772 = vst.sshfl [vmem:[%s8990_s20 + $0x86] sm:$0x1 pattern:$0x73625140] %v3365_v0  ;;  %4041 = vmatprep.subr.mxu1 %v10401_v22  ;;  %v10613_v54 = vld [vmem:[#allocation9 + $0xd8] sm:$0xff]  ;;  %v10617_v33 = vld [vmem:[#allocation9 + $0xc0] sm:$0xff] }
 0x766   : > { %4024 = vmatprep.mubr.f32.mxu0 %v12303_v63  ;;  %v3357_v60 = vcombine.high %v3353_v12, %v3353_v12  ;;  %3426 = vst [vmem:[%s8990_s20 + $0x36] sm:$0x1] %v3356_v58  ;;  %3429 = vst [vmem:[%s8990_s20 + $0x66] sm:$0x1] %v3355_v42  ;;  %4101 = vmatprep.mubr.f32.mxu1 %v12303_v63  ;;  %v10619_v39 = vld [vmem:[#allocation9 + $0xd0] sm:$0xff]  ;;  %v10623_v48 = vld [vmem:[#allocation9 + $0xa8] sm:$0xff] }
 0x767   : > { %v3374_v14 = vcombine.high %v3372_v62, %v3372_v62  ;;  %v3388_v5 = vrot.slane %v3372_v62, %v9431_v4  ;;  %v3395_v7 = vrot.slane %v3373_v1, %v9431_v4  ;;  %v3403_v8 = vcombine.high %v3381_v2, %v3381_v2  ;;  %7773 = vst.sshfl [vmem:[%s8990_s20 + $0x96] sm:$0x1 pattern:$0x73625140] %v3373_v1  ;;  %v10625_v29 = vld [vmem:[#allocation9 + $0xb8] sm:$0xff]  ;;  %v10629_v0 = vld [vmem:[#allocation9 + $0xa0] sm:$0xff] }
 0x768   : > { %7774 = vst.sshfl [vmem:[%s8990_s20 + $0xc6] sm:$0x1 pattern:$0x73625140] %v3372_v62  ;;  %3430 = vst [vmem:[%s8990_s20 + $0x76] sm:$0x1] %v3357_v60  ;;  %3965 = vmatpush1.msra.mxu0 %v10533_v15  ;;  %4042 = vmatpush1.msra.mxu1 %v10535_v16 }
 0x769   : > { %v3402_v9 = vrot.slane %v3374_v14, %v9431_v4  ;;  %v3404_v10 = vcombine.high %v3388_v5, %v3388_v5  ;;  %v3405_v3 = vcombine.high %v3395_v7, %v3395_v7  ;;  %3433 = vst [vmem:[%s8990_s20 + $0xa6] sm:$0x1] %v3403_v8  ;;  %7775 = vst.sshfl [vmem:[%s8990_s20 + $0xd6] sm:$0x1 pattern:$0x73625140] %v3374_v14  ;;  %3966 = vmatprep.subr.mxu0 %v10539_v19 }
 0x76a   : > { %4043 = vmatprep.subr.mxu1 %v10541_v30  ;;  %3967 = vmatpush1.msra.mxu0 %v10545_v20  ;;  %12454 = vst [vmem:[#allocation20_spill] sm:$0xff] %v10617_v33  ;;  %12455 = vst [vmem:[#allocation26_spill] sm:$0xff] %v10619_v39  ;;  %v10631_v12 = vld [vmem:[#allocation9 + $0xb0] sm:$0xff]  ;;  %v10635_v42 = vld [vmem:[#allocation9 + $0x88] sm:$0xff] }
 0x76b   : > { %v3406_v13 = vcombine.high %v3402_v9, %v3402_v9  ;;  %3434 = vst [vmem:[%s8990_s20 + $0xb6] sm:$0x1] %v3405_v3  ;;  %3437 = vst [vmem:[%s8990_s20 + $0xe6] sm:$0x1] %v3404_v10  ;;  %4044 = vmatpush1.msra.mxu1 %v10547_v28  ;;  %3968 = vmatprep.subr.mxu0 %v10551_v57  ;;  %v10637_v58 = vld [vmem:[#allocation9 + $0x98] sm:$0xff]  ;;  %v10641_v62 = vld [vmem:[#allocation9 + $0x80] sm:$0xff] }
 0x76c   : > { %4045 = vmatprep.subr.mxu1 %v10553_v6  ;;  %3969 = vmatpush1.msra.mxu0 %v10557_v18  ;;  %12456 = vst [vmem:[#allocation21_spill] sm:$0xff] %v10623_v48  ;;  %12457 = vst [vmem:[#allocation28_spill] sm:$0xff] %v10625_v29  ;;  %v10643_v1 = vld [vmem:[#allocation9 + $0x90] sm:$0xff]  ;;  %v10647_v2 = vld [vmem:[#allocation9 + $0x68] sm:$0xff] }
 0x76d   : > { %3438 = vst [vmem:[%s8990_s20 + $0xf6] sm:$0x1] %v3406_v13  ;;  %4046 = vmatpush1.msra.mxu1 %v10559_v32  ;;  %3970 = vmatprep.subr.mxu0 %v10563_v35  ;;  %12458 = vst [vmem:[#allocation22_spill] sm:$0xff] %v10629_v0  ;;  %v10649_v60 = vld [vmem:[#allocation9 + $0x78] sm:$0xff]  ;;  %v10653_v14 = vld [vmem:[#allocation9 + $0x60] sm:$0xff] }
 0x76e   : > { %4047 = vmatprep.subr.mxu1 %v10565_v11  ;;  %3971 = vmatpush1.msra.mxu0 %v10569_v41  ;;  %12459 = vst [vmem:[#allocation29_spill] sm:$0xff] %v10631_v12  ;;  %12460 = vst [vmem:[#allocation23_spill] sm:$0xff] %v10635_v42  ;;  %v10655_v5 = vld [vmem:[#allocation9 + $0x70] sm:$0xff]  ;;  %v10659_v7 = vld [vmem:[#allocation9 + $0x48] sm:$0xff] }
 0x76f   : > { %4048 = vmatpush1.msra.mxu1 %v10571_v55  ;;  %3972 = vmatprep.subr.mxu0 %v10575_v45  ;;  %12461 = vst [vmem:[#allocation24_spill] sm:$0xff] %v10637_v58  ;;  %12462 = vst [vmem:[#allocation25_spill] sm:$0xff] %v10641_v62  ;;  %v10661_v8 = vld [vmem:[#allocation9 + $0x58] sm:$0xff]  ;;  %v10665_v9 = vld [vmem:[#allocation9 + $0x40] sm:$0xff] }
 0x770   : > { %4049 = vmatprep.subr.mxu1 %v10577_v56  ;;  %3973 = vmatpush1.msra.mxu0 %v10581_v53  ;;  %12463 = vst [vmem:[#allocation27_spill] sm:$0xff] %v10643_v1  ;;  %12464 = vst [vmem:[#allocation30_spill] sm:$0xff] %v10647_v2  ;;  %v10667_v10 = vld [vmem:[#allocation9 + $0x50] sm:$0xff]  ;;  %v10671_v3 = vld [vmem:[#allocation9 + $0x28] sm:$0xff] }
 0x771   : > { %4050 = vmatpush1.msra.mxu1 %v10583_v26  ;;  %3974 = vmatprep.subr.mxu0 %v10587_v17  ;;  %12465 = vst [vmem:[#allocation31_spill] sm:$0xff] %v10649_v60  ;;  %12466 = vst [vmem:[#allocation32_spill] sm:$0xff] %v10653_v14  ;;  %v10673_v13 = vld [vmem:[#allocation9 + $0x38] sm:$0xff] }
 0x772   : > { %4051 = vmatprep.subr.mxu1 %v10589_v23  ;;  %3975 = vmatpush1.msra.mxu0 %v10593_v50  ;;  %12467 = vst [vmem:[#allocation33_spill] sm:$0xff] %v10655_v5  ;;  %12468 = vst [vmem:[#allocation34_spill] sm:$0xff] %v10659_v7 }
 0x773   : > { %4052 = vmatpush1.msra.mxu1 %v10595_v24  ;;  %3976 = vmatprep.subr.mxu0 %v10599_v43  ;;  %12469 = vst [vmem:[#allocation35_spill] sm:$0xff] %v10661_v8  ;;  %12470 = vst [vmem:[#allocation36_spill] sm:$0xff] %v10665_v9 }
 0x774   : > { %4053 = vmatprep.subr.mxu1 %v10601_v49  ;;  %3977 = vmatpush1.msra.mxu0 %v10605_v27  ;;  %12471 = vst [vmem:[#allocation37_spill] sm:$0xff] %v10667_v10  ;;  %12472 = vst [vmem:[#allocation38_spill] sm:$0xff] %v10671_v3 }
 0x775   : > { %4054 = vmatpush1.msra.mxu1 %v10607_v36  ;;  %3978 = vmatprep.subr.mxu0 %v10611_v47  ;;  %12473 = vst [vmem:[#allocation39_spill] sm:$0xff] %v10673_v13 }
 0x776   : > { %4055 = vmatprep.subr.mxu1 %v10613_v54  ;;  %3979 = vmatpush1.msra.mxu0 %v10617_v33 }
 0x777   : > { %4056 = vmatpush1.msra.mxu1 %v10619_v39  ;;  %3980 = vmatprep.subr.mxu0 %v10623_v48 }
 0x778   : > { %4057 = vmatprep.subr.mxu1 %v10625_v29  ;;  %3981 = vmatpush1.msra.mxu0 %v10629_v0  ;;  %v7778_v29 = vld [vmem:[%s8979_s19 + $0x1d0] sm:$0xff] }
 0x779   : > { %4058 = vmatpush1.msra.mxu1 %v10631_v12  ;;  %3982 = vmatprep.subr.mxu0 %v10635_v42 }
 0x77a   : > { %4059 = vmatprep.subr.mxu1 %v10637_v58  ;;  %3983 = vmatpush1.msra.mxu0 %v10641_v62  ;;  %v7781_v58 = vld [vmem:[%s8979_s19 + $0x1e8] sm:$0xff] }
 0x77b   : > { %4060 = vmatpush1.msra.mxu1 %v10643_v1  ;;  %3984 = vmatprep.subr.mxu0 %v10647_v2 }
 0x77c   : > { %4061 = vmatprep.subr.mxu1 %v10649_v60  ;;  %3985 = vmatpush1.msra.mxu0 %v10653_v14  ;;  %v7780_v60 = vld [vmem:[%s8979_s19 + $0x1e0] sm:$0xff] }
 0x77d   : > { %4062 = vmatpush1.msra.mxu1 %v10655_v5  ;;  %3986 = vmatprep.subr.mxu0 %v10659_v7  ;;  %v10677_v7 = vld [vmem:[#allocation9 + $0x20] sm:$0xff]  ;;  %v7777_v5 = vld [vmem:[%s8979_s19 + $0x1c8] sm:$0xff] }
 0x77e   : > { %4063 = vmatprep.subr.mxu1 %v10661_v8  ;;  %3987 = vmatpush1.msra.mxu0 %v10665_v9  ;;  %12474 = vst [vmem:[#allocation40_spill] sm:$0xff] %v10677_v7  ;;  %v10679_v8 = vld [vmem:[#allocation9 + $0x30] sm:$0xff]  ;;  %v10683_v9 = vld [vmem:[#allocation9 + $0x8] sm:$0xff] }
 0x77f   : > { %4064 = vmatpush1.msra.mxu1 %v10667_v10  ;;  %3988 = vmatprep.subr.mxu0 %v10671_v3  ;;  %12475 = vst [vmem:[#allocation41_spill] sm:$0xff] %v10679_v8  ;;  %12476 = vst [vmem:[#allocation42_spill] sm:$0xff] %v10683_v9  ;;  %v10685_v10 = vld [vmem:[#allocation9 + $0x18] sm:$0xff]  ;;  %v10689_v3 = vld [vmem:[#allocation9] sm:$0xff] }
 0x780   : > { %4065 = vmatprep.subr.mxu1 %v10673_v13  ;;  %3989 = vmatpush1.msra.mxu0 %v10677_v7  ;;  %12477 = vst [vmem:[#allocation43_spill] sm:$0xff] %v10685_v10  ;;  %12478 = vst [vmem:[#allocation44_spill] sm:$0xff] %v10689_v3  ;;  %v10691_v13 = vld [vmem:[#allocation9 + $0x10] sm:$0xff] }
 0x781   : > { %4066 = vmatpush1.msra.mxu1 %v10679_v8  ;;  %3990 = vmatprep.subr.mxu0 %v10683_v9  ;;  %12479 = vst [vmem:[#allocation45_spill] sm:$0xff] %v10691_v13  ;;  %v7776_v8 = vld [vmem:[%s8979_s19 + $0x1c0] sm:$0xff] }
 0x782   : > { %4067 = vmatprep.subr.mxu1 %v10685_v10  ;;  %3991 = vmatpush1.msra.mxu0 %v10689_v3 }
 0x783   : > { %4068 = vmatpush1.msra.mxu1 %v10691_v13  ;;  %4403 = vmatprep.subr.mxu0 %v10375_v34 }
 0x784   : > { %4480 = vmatprep.subr.mxu1 %v10377_v59 }
 0x81d   : > { %v3583_v7 = vpop.f32.mrf.mxu0  ;;  %v3660_v9 = vpop.f32.mrf.mxu1 }
 0x81e   : > { %v3671_v14 = vadd.f32 %v7776_v8, %v3583_v7  ;;  %v7779_v7 = vld [vmem:[%s8979_s19 + $0x1d8] sm:$0xff] }
 0x81f   : > { %v3585_v10 = vpop.f32.mrf.mxu0  ;;  %v3662_v3 = vpop.f32.mrf.mxu1 }
 0x820   : > { %v7784_v2 = vmul.f32 -1.442695, %v3671_v14  ;;  %v3672_v1 = vadd.f32 %v7777_v5, %v3585_v10  ;;  %v3674_v14 = vadd.f32 %v7779_v7, %v3662_v3  ;;  %v7783_v5 = vld [vmem:[%s8979_s19 + $0x1f8] sm:$0xff] }
 0x822   : > { %v3589_v62 = vpop.f32.mrf.mxu0  ;;  %8316 = vpow2.f32 %v7784_v2  ;;  %v7786_v13 = vmul.f32 -1.442695, %v3672_v1  ;;  %v7788_v48 = vmul.f32 -1.442695, %v3674_v14  ;;  %v3673_v1 = vadd.f32 %v7778_v29, %v3660_v9 }
 0x823   : > { %v3675_v34 = vadd.f32 %v7780_v60, %v3589_v62  ;;  %v3666_v8 = vpop.f32.mrf.mxu1  ;;  %v7782_v62 = vld [vmem:[%s8979_s19 + $0x1f0] sm:$0xff] }
 0x824   : > { %v3591_v42 = vpop.f32.mrf.mxu0  ;;  %8318 = vpow2.f32 %v7786_v13 }
 0x825   : > { %v7785_v59 = vmul.f32 -1.442695, %v3675_v34  ;;  %v3676_v12 = vadd.f32 %v7781_v58, %v3591_v42  ;;  %v3668_v10 = vpop.f32.mrf.mxu1  ;;  %v3677_v34 = vadd.f32 %v7782_v62, %v3666_v8  ;;  %v3734_v8 = vpop.permute.xlu0 %3733 }
 0x826   : > { %v3678_v2 = vadd.f32 %v7783_v5, %v3668_v10  ;;  %vm3738_vm14 = vcmp.eq.s32.totalorder %v3734_v8, 1 }
 0x827   : > { %8320 = vpow2.f32 %v7785_v59  ;;  %v7787_v0 = vmul.f32 -1.442695, %v3676_v12 }
 0x828   : > { %v7789_v13 = vmul.f32 -1.442695, %v3678_v2 }
 0x829   : > { %8322 = vpow2.f32 %v7787_v0 }
 0x82a   : > { %8324 = vpow2.f32 %v7788_v48 }
 0x82f   : > { %v8317_v39 = vpop.eup %8316 }
 0x830   : > { %v3685_v33 = vadd.f32 1.0, %v8317_v39 }
 0x831   : > { %v8319_v60 = vpop.eup %8318 }
 0x832   : > { %8326 = vrcp.f32 %v3685_v33  ;;  %v3697_v42 = vadd.f32 1.0, %v8319_v60 }
 0x833   : > { %8328 = vtanh.f32 %v3673_v1 }
 0x834   : > { %v8321_v58 = vpop.eup %8320  ;;  %8330 = vrcp.f32 %v3697_v42 }
 0x835   : > { %v3686_v0 = vadd.f32 1.0, %v8321_v58  ;;  %8332 = vpow2.f32 %v7789_v13  ;;  %v3737_v58 = vpop.permute.xlu1 %3736 }
 0x836   : > { %v8323_v12 = vpop.eup %8322  ;;  %vm3739_vm15 = vcmp.eq.s32.totalorder %v3737_v58, 1 }
 0x837   : > { %8334 = vrcp.f32 %v3686_v0  ;;  %v3698_v3 = vadd.f32 1.0, %v8323_v12  ;;  %v8325_v59 = vpop.eup %8324 }
 0x838   : > { %8336 = vtanh.f32 %v3677_v34  ;;  %v3711_v7 = vadd.f32 1.0, %v8325_v59 }
 0x839   : > { %8338 = vrcp.f32 %v3698_v3 }
 0x83a   : > { %8340 = vrcp.f32 %v3711_v7 }
 0x83f   : > { %v8327_v29 = vpop.eup %8326 }
 0x840   : > { %v8329_v39 = vpop.eup %8328 }
 0x841   : > { %v8331_v9 = vpop.eup %8330  ;;  %v3719_v14 = vmul.f32 %v8329_v39, %v8327_v29 }
 0x842   : > { %v8333_v48 = vpop.eup %8332  ;;  %v3717_v33 = vmul.f32 %v8331_v9, %v10472_v38 }
 0x843   : > { %v3712_v62 = vadd.f32 1.0, %v8333_v48 }
 0x844   : > { %v8335_v5 = vpop.eup %8334  ;;  %v3721_v2 = vadd.f32 %v3719_v14, %v3717_v33 }
 0x845   : > { %v8337_v10 = vpop.eup %8336 }
 0x846   : > { %v8339_v1 = vpop.eup %8338  ;;  %8342 = vtanh.f32 %v3721_v2  ;;  %v10708_v60 = vsel %vm3738_vm14, %v3721_v2, %v10472_v38  ;;  %v3720_v13 = vmul.f32 %v8337_v10, %v8335_v5 }
 0x847   : > { %v3718_v42 = vmul.f32 %v8339_v1, %v10477_v31  ;;  %8344 = vrcp.f32 %v3712_v62  ;;  %v8341_v12 = vpop.eup %8340 }
 0x849   : > { %v3722_v34 = vadd.f32 %v3720_v13, %v3718_v42 }
 0x84b   : > { %8346 = vtanh.f32 %v3722_v34  ;;  %v10713_v0 = vsel %vm3739_vm15, %v3722_v34, %v10477_v31 }
 0x853   : > { %v8343_v3 = vpop.eup %8342 }
 0x854   : > { %v3725_v59 = vmul.f32 %v8343_v3, %v8341_v12  ;;  %v8345_v29 = vpop.eup %8344 }
 0x856   : > { %v10717_v38 = vsel %vm3738_vm14, %v3725_v59, %v10481_v21  ;;  %v3748_v39 = vsel %vm3738_vm14, %v3725_v59, 0.0 }
 0x857   : > { %v3752_v7 = vcombine.high %v3748_v39, %v3748_v39  ;;  %v3759_v48 = vrot.slane %v3748_v39, %v9431_v4  ;;  %4025 = vmatmul.mubr.f32.vlgmr.msra.gmra.mxu0 %v10717_v38  ;;  %4102 = vmatmul.mubr.f32.vlgmr.msra.gmra.mxu1 %v10717_v38  ;;  %v12480_v39 = vld [vmem:[#allocation20_spill] sm:$0xff] }
 0x858   : > { %v8347_v9 = vpop.eup %8346  ;;  %4030 = vmatprep.mubr.f32.mxu0 %v12303_v63  ;;  %4107 = vmatprep.mubr.f32.mxu1 %v12303_v63 }
 0x859   : > { %v3726_v31 = vmul.f32 %v8347_v9, %v8345_v29  ;;  %v3766_v21 = vrot.slane %v3752_v7, %v9431_v4  ;;  %v3767_v14 = vcombine.high %v3759_v48, %v3759_v48  ;;  %v3775_v33 = vrot.slane %v3759_v48, %v9431_v4  ;;  %7790 = vst.sshfl [vmem:[%s8990_s20 + $0x7] sm:$0x1 pattern:$0x73625140] %v3759_v48  ;;  %v12481_v9 = vld [vmem:[#allocation26_spill] sm:$0xff]  ;;  %v12482_v7 = vld [vmem:[#allocation21_spill] sm:$0xff] }
 0x85a   : > { %4404 = vmatpush1.msra.mxu0 %v10381_v40  ;;  %4481 = vmatpush1.msra.mxu1 %v10383_v61  ;;  %v12483_v48 = vld [vmem:[#allocation28_spill] sm:$0xff] }
 0x85b   : > { %v10732_v5 = vsel %vm3739_vm15, %v3726_v31, %v10496_v52  ;;  %v3749_v10 = vsel %vm3739_vm15, %v3726_v31, 0.0  ;;  %4405 = vmatprep.subr.mxu0 %v10387_v46  ;;  %4482 = vmatprep.subr.mxu1 %v10389_v37  ;;  %v3768_v8 = vcombine.high %v3766_v21, %v3766_v21  ;;  %v3782_v2 = vrot.slane %v3766_v21, %v9431_v4  ;;  %v12484_v31 = vld [vmem:[#allocation22_spill] sm:$0xff] }
 0x85c   : > { %v3789_v1 = vrot.slane %v3767_v14, %v9431_v4  ;;  %v3797_v40 = vcombine.high %v3775_v33, %v3775_v33  ;;  %7791 = vst.sshfl [vmem:[%s8990_s20 + $0x17] sm:$0x1 pattern:$0x73625140] %v3767_v14  ;;  %4031 = vmatmul.mubr.f32.gmra.mxu0 %v10732_v5  ;;  %v3801_v61 = vcombine.high %v3749_v10, %v3749_v10  ;;  %v12486_v14 = vld [vmem:[#allocation23_spill] sm:$0xff]  ;;  %v12487_v33 = vld [vmem:[#allocation24_spill] sm:$0xff] }
 0x85d   : > { %7792 = vst.sshfl [vmem:[%s8990_s20 + $0x47] sm:$0x1 pattern:$0x73625140] %v3766_v21  ;;  %v3808_v52 = vrot.slane %v3749_v10, %v9431_v4  ;;  %4108 = vmatmul.mubr.f32.gmra.mxu1 %v10732_v5  ;;  %4406 = vmatpush1.msra.mxu0 %v10393_v51  ;;  %v3796_v46 = vrot.slane %v3768_v8, %v9431_v4  ;;  %v12485_v21 = vld [vmem:[#allocation29_spill] sm:$0xff] }
 0x85e   : > { %v3798_v37 = vcombine.high %v3782_v2, %v3782_v2  ;;  %v3799_v62 = vcombine.high %v3789_v1, %v3789_v1  ;;  %3868 = vst [vmem:[%s8990_s20 + $0x27] sm:$0x1] %v3797_v40  ;;  %7793 = vst.sshfl [vmem:[%s8990_s20 + $0x57] sm:$0x1 pattern:$0x73625140] %v3768_v8  ;;  %4483 = vmatpush1.msra.mxu1 %v10395_v25  ;;  %4407 = vmatprep.subr.mxu0 %v10399_v44 }
 0x85f   : > { %v3815_v13 = vrot.slane %v3801_v61, %v9431_v4  ;;  %v3816_v42 = vcombine.high %v3808_v52, %v3808_v52  ;;  %v3824_v58 = vrot.slane %v3808_v52, %v9431_v4  ;;  %7794 = vst.sshfl [vmem:[%s8990_s20 + $0x87] sm:$0x1 pattern:$0x73625140] %v3808_v52  ;;  %4484 = vmatprep.subr.mxu1 %v10401_v22  ;;  %v12488_v10 = vld [vmem:[#allocation25_spill] sm:$0xff]  ;;  %v12489_v8 = vld [vmem:[#allocation27_spill] sm:$0xff] }
 0x860   : > { %4408 = vmatpush1.msra.mxu0 %v10533_v15  ;;  %v3800_v51 = vcombine.high %v3796_v46, %v3796_v46  ;;  %3869 = vst [vmem:[%s8990_s20 + $0x37] sm:$0x1] %v3799_v62  ;;  %3872 = vst [vmem:[%s8990_s20 + $0x67] sm:$0x1] %v3798_v37  ;;  %4485 = vmatpush1.msra.mxu1 %v10535_v16  ;;  %v12490_v2 = vld [vmem:[#allocation30_spill] sm:$0xff]  ;;  %v12491_v1 = vld [vmem:[#allocation31_spill] sm:$0xff] }
 0x861   : > { %4409 = vmatprep.subr.mxu0 %v10539_v19  ;;  %v3817_v25 = vcombine.high %v3815_v13, %v3815_v13  ;;  %v3831_v44 = vrot.slane %v3815_v13, %v9431_v4  ;;  %v3838_v34 = vrot.slane %v3816_v42, %v9431_v4  ;;  %v3846_v12 = vcombine.high %v3824_v58, %v3824_v58  ;;  %v12492_v40 = vld [vmem:[#allocation32_spill] sm:$0xff]  ;;  %v12493_v61 = vld [vmem:[#allocation33_spill] sm:$0xff]  ;;  %v12494_v52 = vld [vmem:[#allocation34_spill] sm:$0xff] }
 0x862   : > { %7795 = vst.sshfl [vmem:[%s8990_s20 + $0x97] sm:$0x1 pattern:$0x73625140] %v3816_v42  ;;  %4486 = vmatprep.subr.mxu1 %v10541_v30  ;;  %3873 = vst [vmem:[%s8990_s20 + $0x77] sm:$0x1] %v3800_v51  ;;  %4410 = vmatpush1.msra.mxu0 %v10545_v20 }
 0x863   : > { %7796 = vst.sshfl [vmem:[%s8990_s20 + $0xc7] sm:$0x1 pattern:$0x73625140] %v3815_v13  ;;  %4487 = vmatpush1.msra.mxu1 %v10547_v28  ;;  %v3845_v22 = vrot.slane %v3817_v25, %v9431_v4  ;;  %v3847_v3 = vcombine.high %v3831_v44, %v3831_v44  ;;  %v3848_v59 = vcombine.high %v3838_v34, %v3838_v34  ;;  %3876 = vst [vmem:[%s8990_s20 + $0xa7] sm:$0x1] %v3846_v12 }
 0x864   : > { %7797 = vst.sshfl [vmem:[%s8990_s20 + $0xd7] sm:$0x1 pattern:$0x73625140] %v3817_v25  ;;  %4411 = vmatprep.subr.mxu0 %v10551_v57  ;;  %4488 = vmatprep.subr.mxu1 %v10553_v6  ;;  %v12495_v46 = vld [vmem:[#allocation35_spill] sm:$0xff]  ;;  %v12496_v37 = vld [vmem:[#allocation36_spill] sm:$0xff] }
 0x865   : > { %4412 = vmatpush1.msra.mxu0 %v10557_v18  ;;  %4489 = vmatpush1.msra.mxu1 %v10559_v32  ;;  %v3849_v29 = vcombine.high %v3845_v22, %v3845_v22  ;;  %3877 = vst [vmem:[%s8990_s20 + $0xb7] sm:$0x1] %v3848_v59  ;;  %3880 = vst [vmem:[%s8990_s20 + $0xe7] sm:$0x1] %v3847_v3  ;;  %v12497_v62 = vld [vmem:[#allocation37_spill] sm:$0xff]  ;;  %v12498_v13 = vld [vmem:[#allocation38_spill] sm:$0xff] }
 0x866   : > { %4413 = vmatprep.subr.mxu0 %v10563_v35  ;;  %4490 = vmatprep.subr.mxu1 %v10565_v11  ;;  %v12499_v42 = vld [vmem:[#allocation39_spill] sm:$0xff]  ;;  %v12500_v58 = vld [vmem:[#allocation40_spill] sm:$0xff]  ;;  %v12501_v51 = vld [vmem:[#allocation41_spill] sm:$0xff] }
 0x867   : > { %4414 = vmatpush1.msra.mxu0 %v10569_v41  ;;  %4491 = vmatpush1.msra.mxu1 %v10571_v55  ;;  %3881 = vst [vmem:[%s8990_s20 + $0xf7] sm:$0x1] %v3849_v29  ;;  %v12502_v25 = vld [vmem:[#allocation42_spill] sm:$0xff]  ;;  %v12503_v44 = vld [vmem:[#allocation43_spill] sm:$0xff]  ;;  %v12504_v34 = vld [vmem:[#allocation44_spill] sm:$0xff] }
 0x868   : > { %4415 = vmatprep.subr.mxu0 %v10575_v45  ;;  %4492 = vmatprep.subr.mxu1 %v10577_v56  ;;  %v12505_v12 = vld [vmem:[#allocation45_spill] sm:$0xff]  ;;  %v7798_v22 = vld [vmem:[%s8979_s19 + $0x200] sm:$0xff]  ;;  %v7799_v59 = vld [vmem:[%s8979_s19 + $0x208] sm:$0xff] }
 0x869   : > { %4416 = vmatpush1.msra.mxu0 %v10581_v53  ;;  %4493 = vmatpush1.msra.mxu1 %v10583_v26 }
 0x86a   : > { %4417 = vmatprep.subr.mxu0 %v10587_v17  ;;  %4494 = vmatprep.subr.mxu1 %v10589_v23 }
 0x86b   : > { %4418 = vmatpush1.msra.mxu0 %v10593_v50  ;;  %4495 = vmatpush1.msra.mxu1 %v10595_v24 }
 0x86c   : > { %4419 = vmatprep.subr.mxu0 %v10599_v43  ;;  %4496 = vmatprep.subr.mxu1 %v10601_v49 }
 0x86d   : > { %4420 = vmatpush1.msra.mxu0 %v10605_v27  ;;  %4497 = vmatpush1.msra.mxu1 %v10607_v36 }
 0x86e   : > { %4421 = vmatprep.subr.mxu0 %v10611_v47  ;;  %4498 = vmatprep.subr.mxu1 %v10613_v54 }
 0x86f   : > { %4422 = vmatpush1.msra.mxu0 %v12480_v39  ;;  %4499 = vmatpush1.msra.mxu1 %v12481_v9 }
 0x870   : > { %4423 = vmatprep.subr.mxu0 %v12482_v7  ;;  %4500 = vmatprep.subr.mxu1 %v12483_v48 }
 0x871   : > { %4424 = vmatpush1.msra.mxu0 %v12484_v31  ;;  %4501 = vmatpush1.msra.mxu1 %v12485_v21 }
 0x872   : > { %4425 = vmatprep.subr.mxu0 %v12486_v14  ;;  %4502 = vmatprep.subr.mxu1 %v12487_v33 }
 0x873   : > { %4426 = vmatpush1.msra.mxu0 %v12488_v10  ;;  %4503 = vmatpush1.msra.mxu1 %v12489_v8 }
 0x874   : > { %4427 = vmatprep.subr.mxu0 %v12490_v2  ;;  %4504 = vmatprep.subr.mxu1 %v12491_v1  ;;  %v7800_v1 = vld [vmem:[%s8979_s19 + $0x210] sm:$0xff] }
 0x875   : > { %4428 = vmatpush1.msra.mxu0 %v12492_v40  ;;  %4505 = vmatpush1.msra.mxu1 %v12493_v61 }
 0x876   : > { %4429 = vmatprep.subr.mxu0 %v12494_v52  ;;  %4506 = vmatprep.subr.mxu1 %v12495_v46 }
 0x877   : > { %4430 = vmatpush1.msra.mxu0 %v12496_v37  ;;  %4507 = vmatpush1.msra.mxu1 %v12497_v62 }
 0x878   : > { %4431 = vmatprep.subr.mxu0 %v12498_v13  ;;  %4508 = vmatprep.subr.mxu1 %v12499_v42  ;;  %v7802_v42 = vld [vmem:[%s8979_s19 + $0x220] sm:$0xff] }
 0x879   : > { %4432 = vmatpush1.msra.mxu0 %v12500_v58  ;;  %4509 = vmatpush1.msra.mxu1 %v12501_v51 }
 0x87a   : > { %4433 = vmatprep.subr.mxu0 %v12502_v25  ;;  %4510 = vmatprep.subr.mxu1 %v12503_v44  ;;  %v7803_v44 = vld [vmem:[%s8979_s19 + $0x228] sm:$0xff] }
 0x87b   : > { %4434 = vmatpush1.msra.mxu0 %v12504_v34  ;;  %4467 = vmatprep.mubr.f32.mxu0 %v12303_v63 }
 0x87c   : > { %4511 = vmatpush1.msra.mxu1 %v12505_v12  ;;  %4544 = vmatprep.mubr.f32.mxu1 %v12303_v63 }
 0x917   : > { %v4026_v3 = vpop.f32.mrf.mxu0  ;;  %v4103_v58 = vpop.f32.mrf.mxu1 }
 0x918   : > { %v4114_v29 = vadd.f32 %v7798_v22, %v4026_v3  ;;  %v7801_v22 = vld [vmem:[%s8979_s19 + $0x218] sm:$0xff] }
 0x919   : > { %v4028_v51 = vpop.f32.mrf.mxu0  ;;  %v4105_v37 = vpop.f32.mrf.mxu1 }
 0x91a   : > { %v7806_v25 = vmul.f32 -1.442695, %v4114_v29  ;;  %v4115_v13 = vadd.f32 %v7799_v59, %v4028_v51  ;;  %v4117_v29 = vadd.f32 %v7801_v22, %v4105_v37  ;;  %v7805_v51 = vld [vmem:[%s8979_s19 + $0x238] sm:$0xff] }
 0x91c   : > { %v4032_v62 = vpop.f32.mrf.mxu0  ;;  %8348 = vpow2.f32 %v7806_v25  ;;  %v7808_v34 = vmul.f32 -1.442695, %v4115_v13  ;;  %v7810_v2 = vmul.f32 -1.442695, %v4117_v29  ;;  %v4116_v13 = vadd.f32 %v7800_v1, %v4103_v58 }
 0x91d   : > { %v4118_v12 = vadd.f32 %v7802_v42, %v4032_v62  ;;  %v4109_v3 = vpop.f32.mrf.mxu1  ;;  %v7804_v62 = vld [vmem:[%s8979_s19 + $0x230] sm:$0xff] }
 0x91e   : > { %v4034_v46 = vpop.f32.mrf.mxu0  ;;  %8350 = vpow2.f32 %v7808_v34 }
 0x91f   : > { %v7807_v52 = vmul.f32 -1.442695, %v4118_v12  ;;  %v4119_v61 = vadd.f32 %v7803_v44, %v4034_v46  ;;  %v4111_v59 = vpop.f32.mrf.mxu1 }
 0x920   : > { %v4121_v25 = vadd.f32 %v7805_v51, %v4111_v59 }
 0x921   : > { %8352 = vpow2.f32 %v7807_v52  ;;  %v7809_v40 = vmul.f32 -1.442695, %v4119_v61  ;;  %v4120_v52 = vadd.f32 %v7804_v62, %v4109_v3  ;;  %v4177_v3 = vpop.permute.xlu0 %4176 }
 0x922   : > { %v7811_v34 = vmul.f32 -1.442695, %v4121_v25  ;;  %vm4181_vm0 = vcmp.eq.s32.totalorder %v4177_v3, 1 }
 0x923   : > { %8354 = vpow2.f32 %v7809_v40 }
 0x924   : > { %8356 = vpow2.f32 %v7810_v2 }
 0x929   : > { %v8349_v8 = vpop.eup %8348 }
 0x92a   : > { %v4128_v10 = vadd.f32 1.0, %v8349_v8 }
 0x92b   : > { %v8351_v42 = vpop.eup %8350 }
 0x92c   : > { %8358 = vrcp.f32 %v4128_v10  ;;  %v4140_v46 = vadd.f32 1.0, %v8351_v42 }
 0x92d   : > { %8360 = vtanh.f32 %v4116_v13 }
 0x92e   : > { %v8353_v44 = vpop.eup %8352  ;;  %8362 = vrcp.f32 %v4140_v46 }
 0x92f   : > { %v4129_v40 = vadd.f32 1.0, %v8353_v44  ;;  %8364 = vpow2.f32 %v7811_v34  ;;  %v4180_v44 = vpop.permute.xlu1 %4179 }
 0x930   : > { %v8355_v61 = vpop.eup %8354  ;;  %vm4182_vm1 = vcmp.eq.s32.totalorder %v4180_v44, 1 }
 0x931   : > { %8366 = vrcp.f32 %v4129_v40  ;;  %v4141_v37 = vadd.f32 1.0, %v8355_v61  ;;  %v8357_v12 = vpop.eup %8356 }
 0x932   : > { %8368 = vtanh.f32 %v4120_v52  ;;  %v4154_v22 = vadd.f32 1.0, %v8357_v12 }
 0x933   : > { %8370 = vrcp.f32 %v4141_v37 }
 0x934   : > { %8372 = vrcp.f32 %v4154_v22 }
 0x939   : > { %v8359_v1 = vpop.eup %8358 }
 0x93a   : > { %v8361_v8 = vpop.eup %8360 }
 0x93b   : > { %v8363_v58 = vpop.eup %8362  ;;  %v4162_v29 = vmul.f32 %v8361_v8, %v8359_v1 }
 0x93c   : > { %v8365_v2 = vpop.eup %8364  ;;  %v4160_v10 = vmul.f32 %v8363_v58, %v10708_v60 }
 0x93d   : > { %v4155_v62 = vadd.f32 1.0, %v8365_v2 }
 0x93e   : > { %v8367_v51 = vpop.eup %8366  ;;  %v4164_v25 = vadd.f32 %v4162_v29, %v4160_v10 }
 0x93f   : > { %v8369_v59 = vpop.eup %8368 }
 0x940   : > { %v8371_v13 = vpop.eup %8370  ;;  %8374 = vtanh.f32 %v4164_v25  ;;  %v10834_v42 = vsel %vm4181_vm0, %v4164_v25, %v10708_v60  ;;  %v4163_v34 = vmul.f32 %v8369_v59, %v8367_v51 }
 0x941   : > { %v4161_v46 = vmul.f32 %v8371_v13, %v10713_v0  ;;  %8376 = vrcp.f32 %v4155_v62  ;;  %v8373_v61 = vpop.eup %8372 }
 0x943   : > { %v4165_v52 = vadd.f32 %v4163_v34, %v4161_v46 }
 0x945   : > { %8378 = vtanh.f32 %v4165_v52  ;;  %v10839_v40 = vsel %vm4182_vm1, %v4165_v52, %v10713_v0 }
 0x94d   : > { %v8375_v37 = vpop.eup %8374 }
 0x94e   : > { %v4168_v12 = vmul.f32 %v8375_v37, %v8373_v61  ;;  %v8377_v1 = vpop.eup %8376 }
 0x950   : > { %v10843_v60 = vsel %vm4181_vm0, %v4168_v12, %v10717_v38  ;;  %v4191_v8 = vsel %vm4181_vm0, %v4168_v12, 0.0 }
 0x951   : > { %v4195_v22 = vcombine.high %v4191_v8, %v4191_v8  ;;  %v4202_v2 = vrot.slane %v4191_v8, %v9431_v4  ;;  %4468 = vmatmul.mubr.f32.vlgmr.msra.gmra.mxu0 %v10843_v60  ;;  %4545 = vmatmul.mubr.f32.vlgmr.msra.gmra.mxu1 %v10843_v60 }
 0x952   : > { %v8379_v58 = vpop.eup %8378  ;;  %4473 = vmatprep.mubr.f32.mxu0 %v12303_v63  ;;  %4550 = vmatprep.mubr.f32.mxu1 %v12303_v63 }
 0x953   : > { %v4169_v0 = vmul.f32 %v8379_v58, %v8377_v1  ;;  %v4209_v38 = vrot.slane %v4195_v22, %v9431_v4  ;;  %v4210_v29 = vcombine.high %v4202_v2, %v4202_v2  ;;  %v4218_v10 = vrot.slane %v4202_v2, %v9431_v4  ;;  %7812 = vst.sshfl [vmem:[%s8990_s20 + $0x8] sm:$0x1 pattern:$0x73625140] %v4202_v2 }
 0x955   : > { %v10856_v51 = vsel %vm4182_vm1, %v4169_v0, %v10732_v5  ;;  %v4192_v59 = vsel %vm4182_vm1, %v4169_v0, 0.0  ;;  %v4211_v3 = vcombine.high %v4209_v38, %v4209_v38  ;;  %v4225_v25 = vrot.slane %v4209_v38, %v9431_v4  ;;  %7813 = vst.sshfl [vmem:[%s8990_s20 + $0x18] sm:$0x1 pattern:$0x73625140] %v4210_v29 }
 0x956   : > { %v4232_v13 = vrot.slane %v4210_v29, %v9431_v4  ;;  %v4240_v62 = vcombine.high %v4218_v10, %v4218_v10  ;;  %7814 = vst.sshfl [vmem:[%s8990_s20 + $0x48] sm:$0x1 pattern:$0x73625140] %v4209_v38  ;;  %4474 = vmatmul.mubr.f32.gmra.mxu0 %v10856_v51  ;;  %v4244_v34 = vcombine.high %v4192_v59, %v4192_v59 }
 0x957   : > { %v4251_v5 = vrot.slane %v4192_v59, %v9431_v4  ;;  %4551 = vmatmul.mubr.f32.gmra.mxu1 %v10856_v51  ;;  %4910 = vmatprep.mubr.f32.mxu0 %v12303_v63  ;;  %v4239_v46 = vrot.slane %v4211_v3, %v9431_v4  ;;  %v4241_v44 = vcombine.high %v4225_v25, %v4225_v25  ;;  %v10887_v59 = vld [vmem:[#allocation9 + $0x1e8] sm:$0xff]  ;;  %v10893_v25 = vld [vmem:[#allocation9 + $0x1e0] sm:$0xff] }
 0x958   : > { %v4242_v52 = vcombine.high %v4232_v13, %v4232_v13  ;;  %4311 = vst [vmem:[%s8990_s20 + $0x28] sm:$0x1] %v4240_v62  ;;  %7815 = vst.sshfl [vmem:[%s8990_s20 + $0x58] sm:$0x1 pattern:$0x73625140] %v4211_v3  ;;  %4987 = vmatprep.mubr.f32.mxu1 %v12303_v63  ;;  %v4258_v61 = vrot.slane %v4244_v34, %v9431_v4  ;;  %4846 = vmatprep.subr.mxu0 %v10887_v59 }
 0x959   : > { %v4259_v37 = vcombine.high %v4251_v5, %v4251_v5  ;;  %v4267_v12 = vrot.slane %v4251_v5, %v9431_v4  ;;  %7816 = vst.sshfl [vmem:[%s8990_s20 + $0x88] sm:$0x1 pattern:$0x73625140] %v4251_v5  ;;  %v4243_v1 = vcombine.high %v4239_v46, %v4239_v46  ;;  %4315 = vst [vmem:[%s8990_s20 + $0x68] sm:$0x1] %v4241_v44  ;;  %4847 = vmatpush1.msra.mxu0 %v10893_v25 }
 0x95a   : > { %4312 = vst [vmem:[%s8990_s20 + $0x38] sm:$0x1] %v4242_v52  ;;  %v4260_v8 = vcombine.high %v4258_v61, %v4258_v61  ;;  %v4274_v58 = vrot.slane %v4258_v61, %v9431_v4  ;;  %7818 = vst.sshfl [vmem:[%s8990_s20 + $0xc8] sm:$0x1 pattern:$0x73625140] %v4258_v61 }
 0x95b   : > { %v4281_v22 = vrot.slane %v4259_v37, %v9431_v4  ;;  %v4289_v2 = vcombine.high %v4267_v12, %v4267_v12  ;;  %7817 = vst.sshfl [vmem:[%s8990_s20 + $0x98] sm:$0x1 pattern:$0x73625140] %v4259_v37  ;;  %4316 = vst [vmem:[%s8990_s20 + $0x78] sm:$0x1] %v4243_v1 }
 0x95c   : > { %v4288_v0 = vrot.slane %v4260_v8, %v9431_v4  ;;  %v4290_v38 = vcombine.high %v4274_v58, %v4274_v58  ;;  %7819 = vst.sshfl [vmem:[%s8990_s20 + $0xd8] sm:$0x1 pattern:$0x73625140] %v4260_v8  ;;  %v10889_v3 = vld [vmem:[#allocation9 + $0x1f8] sm:$0xff]  ;;  %v10895_v13 = vld [vmem:[#allocation9 + $0x1f0] sm:$0xff] }
 0x95d   : > { %v4291_v29 = vcombine.high %v4281_v22, %v4281_v22  ;;  %4319 = vst [vmem:[%s8990_s20 + $0xa8] sm:$0x1] %v4289_v2  ;;  %4923 = vmatprep.subr.mxu1 %v10889_v3  ;;  %v10899_v62 = vld [vmem:[#allocation9 + $0x1c8] sm:$0xff]  ;;  %v10901_v34 = vld [vmem:[#allocation9 + $0x1d8] sm:$0xff]  ;;  %v10905_v5 = vld [vmem:[#allocation9 + $0x1c0] sm:$0xff] }
 0x95e   : > { %v4292_v10 = vcombine.high %v4288_v0, %v4288_v0  ;;  %4323 = vst [vmem:[%s8990_s20 + $0xe8] sm:$0x1] %v4290_v38  ;;  %4924 = vmatpush1.msra.mxu1 %v10895_v13  ;;  %4848 = vmatprep.subr.mxu0 %v10899_v62  ;;  %v10907_v46 = vld [vmem:[#allocation9 + $0x1d0] sm:$0xff]  ;;  %v10911_v44 = vld [vmem:[#allocation9 + $0x1a8] sm:$0xff]  ;;  %v10913_v52 = vld [vmem:[#allocation9 + $0x1b8] sm:$0xff] }
 0x95f   : > { %4320 = vst [vmem:[%s8990_s20 + $0xb8] sm:$0x1] %v4291_v29  ;;  %4925 = vmatprep.subr.mxu1 %v10901_v34  ;;  %4849 = vmatpush1.msra.mxu0 %v10905_v5  ;;  %v7827_v1 = vld [vmem:[%s8979_s19 + $0x278] sm:$0xff]  ;;  %v7822_v58 = vld [vmem:[%s8979_s19 + $0x250] sm:$0xff] }
 0x960   : > { %4324 = vst [vmem:[%s8990_s20 + $0xf8] sm:$0x1] %v4292_v10  ;;  %4926 = vmatpush1.msra.mxu1 %v10907_v46  ;;  %4850 = vmatprep.subr.mxu0 %v10911_v44  ;;  %v7826_v10 = vld [vmem:[%s8979_s19 + $0x270] sm:$0xff] }
 0x961   : > { %4927 = vmatprep.subr.mxu1 %v10913_v52  ;;  %4851 = vmatpush1.msra.mxu0 %v10533_v15  ;;  %v12506_v15 = vld [vmem:[#allocation25_spill] sm:$0xff] }
 0x962   : > { %4928 = vmatpush1.msra.mxu1 %v10535_v16  ;;  %4852 = vmatprep.subr.mxu0 %v10539_v19  ;;  %v12507_v16 = vld [vmem:[#allocation27_spill] sm:$0xff]  ;;  %v12508_v19 = vld [vmem:[#allocation30_spill] sm:$0xff] }
 0x963   : > { %4929 = vmatprep.subr.mxu1 %v10541_v30  ;;  %4853 = vmatpush1.msra.mxu0 %v10545_v20  ;;  %v12509_v30 = vld [vmem:[#allocation31_spill] sm:$0xff]  ;;  %v12510_v20 = vld [vmem:[#allocation32_spill] sm:$0xff] }
 0x964   : > { %4930 = vmatpush1.msra.mxu1 %v10547_v28  ;;  %4854 = vmatprep.subr.mxu0 %v10551_v57  ;;  %v12511_v28 = vld [vmem:[#allocation33_spill] sm:$0xff]  ;;  %v12512_v57 = vld [vmem:[#allocation34_spill] sm:$0xff] }
 0x965   : > { %4931 = vmatprep.subr.mxu1 %v10553_v6  ;;  %4855 = vmatpush1.msra.mxu0 %v10557_v18  ;;  %v12513_v6 = vld [vmem:[#allocation35_spill] sm:$0xff]  ;;  %v12514_v18 = vld [vmem:[#allocation36_spill] sm:$0xff] }
 0x966   : > { %4932 = vmatpush1.msra.mxu1 %v10559_v32  ;;  %4856 = vmatprep.subr.mxu0 %v10563_v35  ;;  %v12515_v32 = vld [vmem:[#allocation37_spill] sm:$0xff]  ;;  %v12516_v35 = vld [vmem:[#allocation38_spill] sm:$0xff] }
 0x967   : > { %4933 = vmatprep.subr.mxu1 %v10565_v11  ;;  %4857 = vmatpush1.msra.mxu0 %v10569_v41  ;;  %v12517_v11 = vld [vmem:[#allocation39_spill] sm:$0xff]  ;;  %v12518_v41 = vld [vmem:[#allocation40_spill] sm:$0xff] }
 0x968   : > { %4934 = vmatpush1.msra.mxu1 %v10571_v55  ;;  %4858 = vmatprep.subr.mxu0 %v10575_v45  ;;  %v12519_v55 = vld [vmem:[#allocation41_spill] sm:$0xff]  ;;  %v12520_v45 = vld [vmem:[#allocation42_spill] sm:$0xff] }
 0x969   : > { %4935 = vmatprep.subr.mxu1 %v10577_v56  ;;  %4859 = vmatpush1.msra.mxu0 %v10581_v53  ;;  %v12521_v56 = vld [vmem:[#allocation43_spill] sm:$0xff]  ;;  %v12522_v53 = vld [vmem:[#allocation44_spill] sm:$0xff] }
 0x96a   : > { %4936 = vmatpush1.msra.mxu1 %v10583_v26  ;;  %4860 = vmatprep.subr.mxu0 %v10587_v17  ;;  %v12523_v26 = vld [vmem:[#allocation45_spill] sm:$0xff]  ;;  %v7820_v17 = vld [vmem:[%s8979_s19 + $0x240] sm:$0xff] }
 0x96b   : > { %4937 = vmatprep.subr.mxu1 %v10589_v23  ;;  %4861 = vmatpush1.msra.mxu0 %v10593_v50  ;;  %v7821_v50 = vld [vmem:[%s8979_s19 + $0x248] sm:$0xff] }
 0x96c   : > { %4938 = vmatpush1.msra.mxu1 %v10595_v24  ;;  %4862 = vmatprep.subr.mxu0 %v10599_v43 }
 0x96d   : > { %4939 = vmatprep.subr.mxu1 %v10601_v49  ;;  %4863 = vmatpush1.msra.mxu0 %v10605_v27  ;;  %v7824_v27 = vld [vmem:[%s8979_s19 + $0x260] sm:$0xff] }
 0x96e   : > { %4940 = vmatpush1.msra.mxu1 %v10607_v36  ;;  %4864 = vmatprep.subr.mxu0 %v10611_v47 }
 0x96f   : > { %4941 = vmatprep.subr.mxu1 %v10613_v54  ;;  %4865 = vmatpush1.msra.mxu0 %v12480_v39  ;;  %v7825_v39 = vld [vmem:[%s8979_s19 + $0x268] sm:$0xff] }
 0x970   : > { %4942 = vmatpush1.msra.mxu1 %v12481_v9  ;;  %4866 = vmatprep.subr.mxu0 %v12482_v7 }
 0x971   : > { %4943 = vmatprep.subr.mxu1 %v12483_v48  ;;  %4867 = vmatpush1.msra.mxu0 %v12484_v31 }
 0x972   : > { %4944 = vmatpush1.msra.mxu1 %v12485_v21  ;;  %4868 = vmatprep.subr.mxu0 %v12486_v14 }
 0x973   : > { %4945 = vmatprep.subr.mxu1 %v12487_v33  ;;  %4869 = vmatpush1.msra.mxu0 %v12506_v15  ;;  %v7823_v33 = vld [vmem:[%s8979_s19 + $0x258] sm:$0xff] }
 0x974   : > { %4946 = vmatpush1.msra.mxu1 %v12507_v16  ;;  %4870 = vmatprep.subr.mxu0 %v12508_v19 }
 0x975   : > { %4947 = vmatprep.subr.mxu1 %v12509_v30  ;;  %4871 = vmatpush1.msra.mxu0 %v12510_v20 }
 0x976   : > { %4948 = vmatpush1.msra.mxu1 %v12511_v28  ;;  %4872 = vmatprep.subr.mxu0 %v12512_v57 }
 0x977   : > { %4949 = vmatprep.subr.mxu1 %v12513_v6  ;;  %4873 = vmatpush1.msra.mxu0 %v12514_v18 }
 0x978   : > { %4950 = vmatpush1.msra.mxu1 %v12515_v32  ;;  %4874 = vmatprep.subr.mxu0 %v12516_v35 }
 0x979   : > { %4951 = vmatprep.subr.mxu1 %v12517_v11  ;;  %4875 = vmatpush1.msra.mxu0 %v12518_v41 }
 0x97a   : > { %4952 = vmatpush1.msra.mxu1 %v12519_v55  ;;  %4876 = vmatprep.subr.mxu0 %v12520_v45 }
 0x97b   : > { %4953 = vmatprep.subr.mxu1 %v12521_v56  ;;  %4877 = vmatpush1.msra.mxu0 %v12522_v53 }
 0x97c   : > { %4954 = vmatpush1.msra.mxu1 %v12523_v26  ;;  %5289 = vmatprep.subr.mxu0 %v10887_v59 }
 0x97d   : > { %5366 = vmatprep.subr.mxu1 %v10889_v3 }
 0xa11   : > { %v4469_v23 = vpop.f32.mrf.mxu0  ;;  %v4546_v43 = vpop.f32.mrf.mxu1 }
 0xa12   : > { %v4557_v24 = vadd.f32 %v7820_v17, %v4469_v23  ;;  %v4559_v38 = vadd.f32 %v7822_v58, %v4546_v43  ;;  %v4620_v17 = vpop.permute.xlu0 %4619 }
 0xa13   : > { %v4471_v49 = vpop.f32.mrf.mxu0  ;;  %v4548_v7 = vpop.f32.mrf.mxu1  ;;  %vm4624_vm2 = vcmp.eq.s32.totalorder %v4620_v17, 1  ;;  %v11063_v17 = vld [vmem:[#allocation9 + $0x168] sm:$0xff] }
 0xa14   : > { %v7828_v36 = vmul.f32 -1.442695, %v4557_v24  ;;  %v4558_v47 = vadd.f32 %v7821_v50, %v4471_v49  ;;  %v4560_v12 = vadd.f32 %v7823_v33, %v4548_v7 }
 0xa16   : > { %v4475_v54 = vpop.f32.mrf.mxu0  ;;  %8380 = vpow2.f32 %v7828_v36  ;;  %v7830_v9 = vmul.f32 -1.442695, %v4558_v47  ;;  %v7832_v22 = vmul.f32 -1.442695, %v4560_v12  ;;  %v4623_v36 = vpop.permute.xlu1 %4622 }
 0xa17   : > { %v4561_v48 = vadd.f32 %v7824_v27, %v4475_v54  ;;  %v4552_v61 = vpop.f32.mrf.mxu1  ;;  %vm4625_vm3 = vcmp.eq.s32.totalorder %v4623_v36, 1  ;;  %v11081_v36 = vld [vmem:[#allocation9 + $0x140] sm:$0xff] }
 0xa18   : > { %v4477_v31 = vpop.f32.mrf.mxu0  ;;  %8382 = vpow2.f32 %v7830_v9  ;;  %v4563_v20 = vadd.f32 %v7826_v10, %v4552_v61 }
 0xa19   : > { %v7829_v21 = vmul.f32 -1.442695, %v4561_v48  ;;  %v4562_v14 = vadd.f32 %v7825_v39, %v4477_v31  ;;  %v4554_v8 = vpop.f32.mrf.mxu1 }
 0xa1a   : > { %v4564_v2 = vadd.f32 %v7827_v1, %v4554_v8 }
 0xa1b   : > { %8384 = vpow2.f32 %v7829_v21  ;;  %v7831_v37 = vmul.f32 -1.442695, %v4562_v14 }
 0xa1c   : > { %v7833_v16 = vmul.f32 -1.442695, %v4564_v2 }
 0xa1d   : > { %8386 = vpow2.f32 %v7831_v37 }
 0xa1e   : > { %8388 = vpow2.f32 %v7832_v22 }
 0xa23   : > { %v8381_v0 = vpop.eup %8380 }
 0xa24   : > { %v4571_v29 = vadd.f32 1.0, %v8381_v0 }
 0xa25   : > { %v8383_v15 = vpop.eup %8382 }
 0xa26   : > { %8390 = vrcp.f32 %v4571_v29  ;;  %v4583_v19 = vadd.f32 1.0, %v8383_v15 }
 0xa27   : > { %8392 = vtanh.f32 %v4559_v38 }
 0xa28   : > { %v8385_v30 = vpop.eup %8384  ;;  %8394 = vrcp.f32 %v4583_v19 }
 0xa29   : > { %v4572_v28 = vadd.f32 1.0, %v8385_v30  ;;  %8396 = vpow2.f32 %v7833_v16 }
 0xa2a   : > { %v8387_v57 = vpop.eup %8386 }
 0xa2b   : > { %8398 = vrcp.f32 %v4572_v28  ;;  %v4584_v6 = vadd.f32 1.0, %v8387_v57  ;;  %v8389_v18 = vpop.eup %8388 }
 0xa2c   : > { %8400 = vtanh.f32 %v4563_v20  ;;  %v4597_v41 = vadd.f32 1.0, %v8389_v18 }
 0xa2d   : > { %8402 = vrcp.f32 %v4584_v6 }
 0xa2e   : > { %8404 = vrcp.f32 %v4597_v41  ;;  %v11045_v41 = vld [vmem:[#allocation9 + $0x1a0] sm:$0xff] }
 0xa33   : > { %v8391_v32 = vpop.eup %8390 }
 0xa34   : > { %v8393_v35 = vpop.eup %8392 }
 0xa35   : > { %v8395_v11 = vpop.eup %8394  ;;  %v4605_v45 = vmul.f32 %v8393_v35, %v8391_v32 }
 0xa36   : > { %v8397_v55 = vpop.eup %8396  ;;  %v4603_v56 = vmul.f32 %v8395_v11, %v10834_v42 }
 0xa37   : > { %v4598_v24 = vadd.f32 1.0, %v8397_v55  ;;  %v11047_v55 = vld [vmem:[#allocation9 + $0x1b0] sm:$0xff] }
 0xa38   : > { %v8399_v53 = vpop.eup %8398  ;;  %v4607_v23 = vadd.f32 %v4605_v45, %v4603_v56  ;;  %v11051_v45 = vld [vmem:[#allocation9 + $0x188] sm:$0xff]  ;;  %v11053_v56 = vld [vmem:[#allocation9 + $0x198] sm:$0xff] }
 0xa39   : > { %v8401_v26 = vpop.eup %8400 }
 0xa3a   : > { %v8403_v50 = vpop.eup %8402  ;;  %8406 = vtanh.f32 %v4607_v23  ;;  %v10984_v43 = vsel %vm4624_vm2, %v4607_v23, %v10834_v42  ;;  %v4606_v49 = vmul.f32 %v8401_v26, %v8399_v53  ;;  %v11057_v53 = vld [vmem:[#allocation9 + $0x180] sm:$0xff]  ;;  %v11059_v26 = vld [vmem:[#allocation9 + $0x190] sm:$0xff]  ;;  %v11065_v23 = vld [vmem:[#allocation9 + $0x178] sm:$0xff] }
 0xa3b   : > { %v4604_v27 = vmul.f32 %v8403_v50, %v10839_v40  ;;  %8408 = vrcp.f32 %v4598_v24  ;;  %v8405_v39 = vpop.eup %8404  ;;  %v11069_v50 = vld [vmem:[#allocation9 + $0x160] sm:$0xff]  ;;  %v11071_v24 = vld [vmem:[#allocation9 + $0x170] sm:$0xff] }
 0xa3d   : > { %v4608_v47 = vadd.f32 %v4606_v49, %v4604_v27  ;;  %v11075_v49 = vld [vmem:[#allocation9 + $0x148] sm:$0xff]  ;;  %v11077_v27 = vld [vmem:[#allocation9 + $0x158] sm:$0xff] }
 0xa3f   : > { %8410 = vtanh.f32 %v4608_v47  ;;  %v10989_v54 = vsel %vm4625_vm3, %v4608_v47, %v10839_v40  ;;  %v11083_v47 = vld [vmem:[#allocation9 + $0x150] sm:$0xff] }
 0xa47   : > { %v8407_v9 = vpop.eup %8406 }
 0xa48   : > { %v4611_v7 = vmul.f32 %v8407_v9, %v8405_v39  ;;  %v8409_v48 = vpop.eup %8408  ;;  %v11087_v39 = vld [vmem:[#allocation9 + $0x128] sm:$0xff]  ;;  %v11089_v9 = vld [vmem:[#allocation9 + $0x138] sm:$0xff] }
 0xa4a   : > { %v10993_v42 = vsel %vm4624_vm2, %v4611_v7, %v10843_v60  ;;  %v4634_v31 = vsel %vm4624_vm2, %v4611_v7, 0.0  ;;  %v11093_v7 = vld [vmem:[#allocation9 + $0x120] sm:$0xff] }
 0xa4b   : > { %v4638_v14 = vcombine.high %v4634_v31, %v4634_v31  ;;  %v4645_v33 = vrot.slane %v4634_v31, %v9431_v4  ;;  %4911 = vmatmul.mubr.f32.vlgmr.msra.gmra.mxu0 %v10993_v42  ;;  %4988 = vmatmul.mubr.f32.vlgmr.msra.gmra.mxu1 %v10993_v42  ;;  %v11099_v31 = vld [vmem:[#allocation9 + $0x108] sm:$0xff] }
 0xa4c   : > { %v8411_v21 = vpop.eup %8410  ;;  %4916 = vmatprep.mubr.f32.mxu0 %v12303_v63  ;;  %4993 = vmatprep.mubr.f32.mxu1 %v12303_v63 }
 0xa4d   : > { %v4612_v40 = vmul.f32 %v8411_v21, %v8409_v48  ;;  %v4652_v60 = vrot.slane %v4638_v14, %v9431_v4  ;;  %v4653_v61 = vcombine.high %v4645_v33, %v4645_v33  ;;  %v4661_v37 = vrot.slane %v4645_v33, %v9431_v4  ;;  %7834 = vst.sshfl [vmem:[%s8990_s20 + $0x9] sm:$0x1 pattern:$0x73625140] %v4645_v33  ;;  %v11095_v48 = vld [vmem:[#allocation9 + $0x130] sm:$0xff]  ;;  %v11101_v21 = vld [vmem:[#allocation9 + $0x118] sm:$0xff] }
 0xa4e   : > { %5290 = vmatpush1.msra.mxu0 %v10893_v25  ;;  %5367 = vmatpush1.msra.mxu1 %v10895_v13  ;;  %v11105_v14 = vld [vmem:[#allocation9 + $0x100] sm:$0xff]  ;;  %v11107_v33 = vld [vmem:[#allocation9 + $0x110] sm:$0xff] }
 0xa4f   : > { %v11008_v12 = vsel %vm4625_vm3, %v4612_v40, %v10856_v51  ;;  %v4635_v1 = vsel %vm4625_vm3, %v4612_v40, 0.0  ;;  %5291 = vmatprep.subr.mxu0 %v10899_v62  ;;  %5368 = vmatprep.subr.mxu1 %v10901_v34  ;;  %v4654_v8 = vcombine.high %v4652_v60, %v4652_v60  ;;  %v4668_v58 = vrot.slane %v4652_v60, %v9431_v4  ;;  %v11111_v40 = vld [vmem:[#allocation9 + $0xe8] sm:$0xff] }
 0xa50   : > { %v4675_v22 = vrot.slane %v4653_v61, %v9431_v4  ;;  %v4683_v2 = vcombine.high %v4661_v37, %v4661_v37  ;;  %7835 = vst.sshfl [vmem:[%s8990_s20 + $0x19] sm:$0x1 pattern:$0x73625140] %v4653_v61  ;;  %4917 = vmatmul.mubr.f32.gmra.mxu0 %v11008_v12  ;;  %v4687_v51 = vcombine.high %v4635_v1, %v4635_v1  ;;  %v11117_v61 = vld [vmem:[#allocation9 + $0xe0] sm:$0xff]  ;;  %v11119_v37 = vld [vmem:[#allocation9 + $0xf0] sm:$0xff] }
 0xa51   : > { %7836 = vst.sshfl [vmem:[%s8990_s20 + $0x49] sm:$0x1 pattern:$0x73625140] %v4652_v60  ;;  %v4694_v0 = vrot.slane %v4635_v1, %v9431_v4  ;;  %4994 = vmatmul.mubr.f32.gmra.mxu1 %v11008_v12  ;;  %5292 = vmatpush1.msra.mxu0 %v10905_v5  ;;  %v4682_v38 = vrot.slane %v4654_v8, %v9431_v4  ;;  %v11113_v60 = vld [vmem:[#allocation9 + $0xf8] sm:$0xff]  ;;  %v11123_v1 = vld [vmem:[#allocation9 + $0xc8] sm:$0xff] }
 0xa52   : > { %v4684_v29 = vcombine.high %v4668_v58, %v4668_v58  ;;  %v4685_v10 = vcombine.high %v4675_v22, %v4675_v22  ;;  %4754 = vst [vmem:[%s8990_s20 + $0x29] sm:$0x1] %v4683_v2  ;;  %7837 = vst.sshfl [vmem:[%s8990_s20 + $0x59] sm:$0x1 pattern:$0x73625140] %v4654_v8  ;;  %5369 = vmatpush1.msra.mxu1 %v10907_v46  ;;  %5293 = vmatprep.subr.mxu0 %v10911_v44 }
 0xa53   : > { %v4701_v15 = vrot.slane %v4687_v51, %v9431_v4  ;;  %v4702_v16 = vcombine.high %v4694_v0, %v4694_v0  ;;  %v4710_v19 = vrot.slane %v4694_v0, %v9431_v4  ;;  %7838 = vst.sshfl [vmem:[%s8990_s20 + $0x89] sm:$0x1 pattern:$0x73625140] %v4694_v0  ;;  %5370 = vmatprep.subr.mxu1 %v10913_v52  ;;  %v11125_v8 = vld [vmem:[#allocation9 + $0xd8] sm:$0xff]  ;;  %v11129_v58 = vld [vmem:[#allocation9 + $0xc0] sm:$0xff] }
 0xa54   : > { %5353 = vmatprep.mubr.f32.mxu0 %v12303_v63  ;;  %v4686_v30 = vcombine.high %v4682_v38, %v4682_v38  ;;  %4755 = vst [vmem:[%s8990_s20 + $0x39] sm:$0x1] %v4685_v10  ;;  %4758 = vst [vmem:[%s8990_s20 + $0x69] sm:$0x1] %v4684_v29  ;;  %5430 = vmatprep.mubr.f32.mxu1 %v12303_v63  ;;  %v11131_v22 = vld [vmem:[#allocation9 + $0xd0] sm:$0xff]  ;;  %v11135_v2 = vld [vmem:[#allocation9 + $0xa8] sm:$0xff] }
 0xa55   : > { %v4703_v20 = vcombine.high %v4701_v15, %v4701_v15  ;;  %v4717_v28 = vrot.slane %v4701_v15, %v9431_v4  ;;  %v4724_v57 = vrot.slane %v4702_v16, %v9431_v4  ;;  %v4732_v6 = vcombine.high %v4710_v19, %v4710_v19  ;;  %7839 = vst.sshfl [vmem:[%s8990_s20 + $0x99] sm:$0x1 pattern:$0x73625140] %v4702_v16  ;;  %v11137_v51 = vld [vmem:[#allocation9 + $0xb8] sm:$0xff]  ;;  %v11141_v0 = vld [vmem:[#allocation9 + $0xa0] sm:$0xff] }
 0xa56   : > { %7840 = vst.sshfl [vmem:[%s8990_s20 + $0xc9] sm:$0x1 pattern:$0x73625140] %v4701_v15  ;;  %4759 = vst [vmem:[%s8990_s20 + $0x79] sm:$0x1] %v4686_v30  ;;  %5294 = vmatpush1.msra.mxu0 %v11045_v41  ;;  %5371 = vmatpush1.msra.mxu1 %v11047_v55 }
 0xa57   : > { %v4731_v18 = vrot.slane %v4703_v20, %v9431_v4  ;;  %v4733_v32 = vcombine.high %v4717_v28, %v4717_v28  ;;  %v4734_v35 = vcombine.high %v4724_v57, %v4724_v57  ;;  %4762 = vst [vmem:[%s8990_s20 + $0xa9] sm:$0x1] %v4732_v6  ;;  %7841 = vst.sshfl [vmem:[%s8990_s20 + $0xd9] sm:$0x1 pattern:$0x73625140] %v4703_v20  ;;  %5295 = vmatprep.subr.mxu0 %v11051_v45 }
 0xa58   : > { %5372 = vmatprep.subr.mxu1 %v11053_v56  ;;  %5296 = vmatpush1.msra.mxu0 %v11057_v53  ;;  %12524 = vst [vmem:[#allocation20_spill] sm:$0xff] %v11129_v58  ;;  %12525 = vst [vmem:[#allocation26_spill] sm:$0xff] %v11131_v22  ;;  %v11143_v38 = vld [vmem:[#allocation9 + $0xb0] sm:$0xff]  ;;  %v11147_v29 = vld [vmem:[#allocation9 + $0x88] sm:$0xff] }
 0xa59   : > { %v4735_v11 = vcombine.high %v4731_v18, %v4731_v18  ;;  %4763 = vst [vmem:[%s8990_s20 + $0xb9] sm:$0x1] %v4734_v35  ;;  %4766 = vst [vmem:[%s8990_s20 + $0xe9] sm:$0x1] %v4733_v32  ;;  %5373 = vmatpush1.msra.mxu1 %v11059_v26  ;;  %5297 = vmatprep.subr.mxu0 %v11063_v17  ;;  %v11149_v10 = vld [vmem:[#allocation9 + $0x98] sm:$0xff]  ;;  %v11153_v15 = vld [vmem:[#allocation9 + $0x80] sm:$0xff] }
 0xa5a   : > { %5374 = vmatprep.subr.mxu1 %v11065_v23  ;;  %5298 = vmatpush1.msra.mxu0 %v11069_v50  ;;  %12526 = vst [vmem:[#allocation21_spill] sm:$0xff] %v11135_v2  ;;  %12527 = vst [vmem:[#allocation28_spill] sm:$0xff] %v11137_v51  ;;  %v11155_v16 = vld [vmem:[#allocation9 + $0x90] sm:$0xff]  ;;  %v11159_v19 = vld [vmem:[#allocation9 + $0x68] sm:$0xff] }
 0xa5b   : > { %4767 = vst [vmem:[%s8990_s20 + $0xf9] sm:$0x1] %v4735_v11  ;;  %5375 = vmatpush1.msra.mxu1 %v11071_v24  ;;  %5299 = vmatprep.subr.mxu0 %v11075_v49  ;;  %12528 = vst [vmem:[#allocation22_spill] sm:$0xff] %v11141_v0  ;;  %v11161_v30 = vld [vmem:[#allocation9 + $0x78] sm:$0xff]  ;;  %v11165_v20 = vld [vmem:[#allocation9 + $0x60] sm:$0xff] }
 0xa5c   : > { %5376 = vmatprep.subr.mxu1 %v11077_v27  ;;  %5300 = vmatpush1.msra.mxu0 %v11081_v36  ;;  %12529 = vst [vmem:[#allocation29_spill] sm:$0xff] %v11143_v38  ;;  %12530 = vst [vmem:[#allocation23_spill] sm:$0xff] %v11147_v29  ;;  %v11167_v28 = vld [vmem:[#allocation9 + $0x70] sm:$0xff]  ;;  %v11171_v57 = vld [vmem:[#allocation9 + $0x48] sm:$0xff] }
 0xa5d   : > { %5377 = vmatpush1.msra.mxu1 %v11083_v47  ;;  %5301 = vmatprep.subr.mxu0 %v11087_v39  ;;  %12531 = vst [vmem:[#allocation24_spill] sm:$0xff] %v11149_v10  ;;  %12532 = vst [vmem:[#allocation25_spill] sm:$0xff] %v11153_v15  ;;  %v11173_v6 = vld [vmem:[#allocation9 + $0x58] sm:$0xff]  ;;  %v11177_v18 = vld [vmem:[#allocation9 + $0x40] sm:$0xff] }
 0xa5e   : > { %5378 = vmatprep.subr.mxu1 %v11089_v9  ;;  %5302 = vmatpush1.msra.mxu0 %v11093_v7  ;;  %12533 = vst [vmem:[#allocation27_spill] sm:$0xff] %v11155_v16  ;;  %12534 = vst [vmem:[#allocation30_spill] sm:$0xff] %v11159_v19  ;;  %v11179_v32 = vld [vmem:[#allocation9 + $0x50] sm:$0xff]  ;;  %v11183_v35 = vld [vmem:[#allocation9 + $0x28] sm:$0xff] }
 0xa5f   : > { %5379 = vmatpush1.msra.mxu1 %v11095_v48  ;;  %5303 = vmatprep.subr.mxu0 %v11099_v31  ;;  %12535 = vst [vmem:[#allocation31_spill] sm:$0xff] %v11161_v30  ;;  %12536 = vst [vmem:[#allocation32_spill] sm:$0xff] %v11165_v20  ;;  %v11185_v11 = vld [vmem:[#allocation9 + $0x38] sm:$0xff] }
 0xa60   : > { %5380 = vmatprep.subr.mxu1 %v11101_v21  ;;  %5304 = vmatpush1.msra.mxu0 %v11105_v14  ;;  %12537 = vst [vmem:[#allocation33_spill] sm:$0xff] %v11167_v28  ;;  %12538 = vst [vmem:[#allocation34_spill] sm:$0xff] %v11171_v57 }
 0xa61   : > { %5381 = vmatpush1.msra.mxu1 %v11107_v33  ;;  %5305 = vmatprep.subr.mxu0 %v11111_v40  ;;  %12539 = vst [vmem:[#allocation35_spill] sm:$0xff] %v11173_v6  ;;  %12540 = vst [vmem:[#allocation36_spill] sm:$0xff] %v11177_v18 }
 0xa62   : > { %5382 = vmatprep.subr.mxu1 %v11113_v60  ;;  %5306 = vmatpush1.msra.mxu0 %v11117_v61  ;;  %12541 = vst [vmem:[#allocation37_spill] sm:$0xff] %v11179_v32  ;;  %12542 = vst [vmem:[#allocation38_spill] sm:$0xff] %v11183_v35 }
 0xa63   : > { %5383 = vmatpush1.msra.mxu1 %v11119_v37  ;;  %5307 = vmatprep.subr.mxu0 %v11123_v1  ;;  %12543 = vst [vmem:[#allocation39_spill] sm:$0xff] %v11185_v11 }
 0xa64   : > { %5384 = vmatprep.subr.mxu1 %v11125_v8  ;;  %5308 = vmatpush1.msra.mxu0 %v11129_v58 }
 0xa65   : > { %5385 = vmatpush1.msra.mxu1 %v11131_v22  ;;  %5309 = vmatprep.subr.mxu0 %v11135_v2 }
 0xa66   : > { %5386 = vmatprep.subr.mxu1 %v11137_v51  ;;  %5310 = vmatpush1.msra.mxu0 %v11141_v0  ;;  %v7844_v51 = vld [vmem:[%s8979_s19 + $0x290] sm:$0xff] }
 0xa67   : > { %5387 = vmatpush1.msra.mxu1 %v11143_v38  ;;  %5311 = vmatprep.subr.mxu0 %v11147_v29 }
 0xa68   : > { %5388 = vmatprep.subr.mxu1 %v11149_v10  ;;  %5312 = vmatpush1.msra.mxu0 %v11153_v15  ;;  %v7847_v10 = vld [vmem:[%s8979_s19 + $0x2a8] sm:$0xff] }
 0xa69   : > { %5389 = vmatpush1.msra.mxu1 %v11155_v16  ;;  %5313 = vmatprep.subr.mxu0 %v11159_v19 }
 0xa6a   : > { %5390 = vmatprep.subr.mxu1 %v11161_v30  ;;  %5314 = vmatpush1.msra.mxu0 %v11165_v20  ;;  %v7846_v30 = vld [vmem:[%s8979_s19 + $0x2a0] sm:$0xff] }
 0xa6b   : > { %5391 = vmatpush1.msra.mxu1 %v11167_v28  ;;  %5315 = vmatprep.subr.mxu0 %v11171_v57  ;;  %v11189_v57 = vld [vmem:[#allocation9 + $0x20] sm:$0xff]  ;;  %v7843_v28 = vld [vmem:[%s8979_s19 + $0x288] sm:$0xff] }
 0xa6c   : > { %5392 = vmatprep.subr.mxu1 %v11173_v6  ;;  %5316 = vmatpush1.msra.mxu0 %v11177_v18  ;;  %12544 = vst [vmem:[#allocation40_spill] sm:$0xff] %v11189_v57  ;;  %v11191_v6 = vld [vmem:[#allocation9 + $0x30] sm:$0xff]  ;;  %v11195_v18 = vld [vmem:[#allocation9 + $0x8] sm:$0xff] }
 0xa6d   : > { %5393 = vmatpush1.msra.mxu1 %v11179_v32  ;;  %5317 = vmatprep.subr.mxu0 %v11183_v35  ;;  %12545 = vst [vmem:[#allocation41_spill] sm:$0xff] %v11191_v6  ;;  %12546 = vst [vmem:[#allocation42_spill] sm:$0xff] %v11195_v18  ;;  %v11197_v32 = vld [vmem:[#allocation9 + $0x18] sm:$0xff]  ;;  %v11201_v35 = vld [vmem:[#allocation9] sm:$0xff] }
 0xa6e   : > { %5394 = vmatprep.subr.mxu1 %v11185_v11  ;;  %5318 = vmatpush1.msra.mxu0 %v11189_v57  ;;  %12547 = vst [vmem:[#allocation43_spill] sm:$0xff] %v11197_v32  ;;  %12548 = vst [vmem:[#allocation44_spill] sm:$0xff] %v11201_v35  ;;  %v11203_v11 = vld [vmem:[#allocation9 + $0x10] sm:$0xff] }
 0xa6f   : > { %5395 = vmatpush1.msra.mxu1 %v11191_v6  ;;  %5319 = vmatprep.subr.mxu0 %v11195_v18  ;;  %12549 = vst [vmem:[#allocation45_spill] sm:$0xff] %v11203_v11  ;;  %v7842_v6 = vld [vmem:[%s8979_s19 + $0x280] sm:$0xff] }
 0xa70   : > { %5396 = vmatprep.subr.mxu1 %v11197_v32  ;;  %5320 = vmatpush1.msra.mxu0 %v11201_v35 }
 0xa71   : > { %5397 = vmatpush1.msra.mxu1 %v11203_v11  ;;  %5732 = vmatprep.subr.mxu0 %v10887_v59 }
 0xa72   : > { %5809 = vmatprep.subr.mxu1 %v10889_v3 }
 0xb0b   : > { %v4912_v57 = vpop.f32.mrf.mxu0  ;;  %v4989_v18 = vpop.f32.mrf.mxu1 }
 0xb0c   : > { %v5000_v20 = vadd.f32 %v7842_v6, %v4912_v57  ;;  %v7845_v57 = vld [vmem:[%s8979_s19 + $0x298] sm:$0xff] }
 0xb0d   : > { %v4914_v32 = vpop.f32.mrf.mxu0  ;;  %v4991_v35 = vpop.f32.mrf.mxu1 }
 0xb0e   : > { %v7850_v19 = vmul.f32 -1.442695, %v5000_v20  ;;  %v5001_v16 = vadd.f32 %v7843_v28, %v4914_v32  ;;  %v5003_v20 = vadd.f32 %v7845_v57, %v4991_v35  ;;  %v7849_v28 = vld [vmem:[%s8979_s19 + $0x2b8] sm:$0xff] }
 0xb10   : > { %v4918_v15 = vpop.f32.mrf.mxu0  ;;  %8412 = vpow2.f32 %v7850_v19  ;;  %v7852_v11 = vmul.f32 -1.442695, %v5001_v16  ;;  %v7854_v2 = vmul.f32 -1.442695, %v5003_v20  ;;  %v5002_v16 = vadd.f32 %v7844_v51, %v4989_v18 }
 0xb11   : > { %v5004_v59 = vadd.f32 %v7846_v30, %v4918_v15  ;;  %v4995_v6 = vpop.f32.mrf.mxu1  ;;  %v7848_v15 = vld [vmem:[%s8979_s19 + $0x2b0] sm:$0xff] }
 0xb12   : > { %v4920_v29 = vpop.f32.mrf.mxu0  ;;  %8414 = vpow2.f32 %v7852_v11 }
 0xb13   : > { %v7851_v3 = vmul.f32 -1.442695, %v5004_v59  ;;  %v5005_v38 = vadd.f32 %v7847_v10, %v4920_v29  ;;  %v4997_v32 = vpop.f32.mrf.mxu1  ;;  %v5006_v59 = vadd.f32 %v7848_v15, %v4995_v6  ;;  %v5063_v6 = vpop.permute.xlu0 %5062 }
 0xb14   : > { %v5007_v19 = vadd.f32 %v7849_v28, %v4997_v32  ;;  %vm5067_vm4 = vcmp.eq.s32.totalorder %v5063_v6, 1 }
 0xb15   : > { %8416 = vpow2.f32 %v7851_v3  ;;  %v7853_v0 = vmul.f32 -1.442695, %v5005_v38 }
 0xb16   : > { %v7855_v11 = vmul.f32 -1.442695, %v5007_v19 }
 0xb17   : > { %8418 = vpow2.f32 %v7853_v0 }
 0xb18   : > { %8420 = vpow2.f32 %v7854_v2 }
 0xb1d   : > { %v8413_v22 = vpop.eup %8412 }
 0xb1e   : > { %v5014_v58 = vadd.f32 1.0, %v8413_v22 }
 0xb1f   : > { %v8415_v30 = vpop.eup %8414 }
 0xb20   : > { %8422 = vrcp.f32 %v5014_v58  ;;  %v5026_v29 = vadd.f32 1.0, %v8415_v30 }
 0xb21   : > { %8424 = vtanh.f32 %v5002_v16 }
 0xb22   : > { %v8417_v10 = vpop.eup %8416  ;;  %8426 = vrcp.f32 %v5026_v29 }
 0xb23   : > { %v5015_v0 = vadd.f32 1.0, %v8417_v10  ;;  %8428 = vpow2.f32 %v7855_v11  ;;  %v5066_v10 = vpop.permute.xlu1 %5065 }
 0xb24   : > { %v8419_v38 = vpop.eup %8418  ;;  %vm5068_vm5 = vcmp.eq.s32.totalorder %v5066_v10, 1 }
 0xb25   : > { %8430 = vrcp.f32 %v5015_v0  ;;  %v5027_v35 = vadd.f32 1.0, %v8419_v38  ;;  %v8421_v3 = vpop.eup %8420 }
 0xb26   : > { %8432 = vtanh.f32 %v5006_v59  ;;  %v5040_v57 = vadd.f32 1.0, %v8421_v3 }
 0xb27   : > { %8434 = vrcp.f32 %v5027_v35 }
 0xb28   : > { %8436 = vrcp.f32 %v5040_v57 }
 0xb2d   : > { %v8423_v51 = vpop.eup %8422 }
 0xb2e   : > { %v8425_v22 = vpop.eup %8424 }
 0xb2f   : > { %v8427_v18 = vpop.eup %8426  ;;  %v5048_v20 = vmul.f32 %v8425_v22, %v8423_v51 }
 0xb30   : > { %v8429_v2 = vpop.eup %8428  ;;  %v5046_v58 = vmul.f32 %v8427_v18, %v10984_v43 }
 0xb31   : > { %v5041_v15 = vadd.f32 1.0, %v8429_v2 }
 0xb32   : > { %v8431_v28 = vpop.eup %8430  ;;  %v5050_v19 = vadd.f32 %v5048_v20, %v5046_v58 }
 0xb33   : > { %v8433_v32 = vpop.eup %8432 }
 0xb34   : > { %v8435_v16 = vpop.eup %8434  ;;  %8438 = vtanh.f32 %v5050_v19  ;;  %v11220_v30 = vsel %vm5067_vm4, %v5050_v19, %v10984_v43  ;;  %v5049_v11 = vmul.f32 %v8433_v32, %v8431_v28 }
 0xb35   : > { %v5047_v29 = vmul.f32 %v8435_v16, %v10989_v54  ;;  %8440 = vrcp.f32 %v5041_v15  ;;  %v8437_v38 = vpop.eup %8436 }
 0xb37   : > { %v5051_v59 = vadd.f32 %v5049_v11, %v5047_v29 }
 0xb39   : > { %8442 = vtanh.f32 %v5051_v59  ;;  %v11225_v0 = vsel %vm5068_vm5, %v5051_v59, %v10989_v54 }
 0xb41   : > { %v8439_v35 = vpop.eup %8438 }
 0xb42   : > { %v5054_v3 = vmul.f32 %v8439_v35, %v8437_v38  ;;  %v8441_v51 = vpop.eup %8440 }
 0xb44   : > { %v11229_v43 = vsel %vm5067_vm4, %v5054_v3, %v10993_v42  ;;  %v5077_v22 = vsel %vm5067_vm4, %v5054_v3, 0.0 }
 0xb45   : > { %v5081_v57 = vcombine.high %v5077_v22, %v5077_v22  ;;  %v5088_v2 = vrot.slane %v5077_v22, %v9431_v4  ;;  %5354 = vmatmul.mubr.f32.vlgmr.msra.gmra.mxu0 %v11229_v43  ;;  %5431 = vmatmul.mubr.f32.vlgmr.msra.gmra.mxu1 %v11229_v43  ;;  %v12550_v22 = vld [vmem:[#allocation20_spill] sm:$0xff] }
 0xb46   : > { %v8443_v18 = vpop.eup %8442  ;;  %5359 = vmatprep.mubr.f32.mxu0 %v12303_v63  ;;  %5436 = vmatprep.mubr.f32.mxu1 %v12303_v63 }
 0xb47   : > { %v5055_v54 = vmul.f32 %v8443_v18, %v8441_v51  ;;  %v5095_v42 = vrot.slane %v5081_v57, %v9431_v4  ;;  %v5096_v20 = vcombine.high %v5088_v2, %v5088_v2  ;;  %v5104_v58 = vrot.slane %v5088_v2, %v9431_v4  ;;  %7856 = vst.sshfl [vmem:[%s8990_s20 + $0xa] sm:$0x1 pattern:$0x73625140] %v5088_v2  ;;  %v12551_v18 = vld [vmem:[#allocation26_spill] sm:$0xff]  ;;  %v12552_v57 = vld [vmem:[#allocation21_spill] sm:$0xff] }
 0xb48   : > { %5733 = vmatpush1.msra.mxu0 %v10893_v25  ;;  %5810 = vmatpush1.msra.mxu1 %v10895_v13  ;;  %v12553_v2 = vld [vmem:[#allocation28_spill] sm:$0xff] }
 0xb49   : > { %v11244_v28 = vsel %vm5068_vm5, %v5055_v54, %v11008_v12  ;;  %v5078_v32 = vsel %vm5068_vm5, %v5055_v54, 0.0  ;;  %5734 = vmatprep.subr.mxu0 %v10899_v62  ;;  %5811 = vmatprep.subr.mxu1 %v10901_v34  ;;  %v5097_v6 = vcombine.high %v5095_v42, %v5095_v42  ;;  %v5111_v19 = vrot.slane %v5095_v42, %v9431_v4  ;;  %v12554_v54 = vld [vmem:[#allocation22_spill] sm:$0xff] }
 0xb4a   : > { %v5118_v16 = vrot.slane %v5096_v20, %v9431_v4  ;;  %v5126_v25 = vcombine.high %v5104_v58, %v5104_v58  ;;  %7857 = vst.sshfl [vmem:[%s8990_s20 + $0x1a] sm:$0x1 pattern:$0x73625140] %v5096_v20  ;;  %5360 = vmatmul.mubr.f32.gmra.mxu0 %v11244_v28  ;;  %v5130_v13 = vcombine.high %v5078_v32, %v5078_v32  ;;  %v12556_v20 = vld [vmem:[#allocation23_spill] sm:$0xff]  ;;  %v12557_v58 = vld [vmem:[#allocation24_spill] sm:$0xff] }
 0xb4b   : > { %7858 = vst.sshfl [vmem:[%s8990_s20 + $0x4a] sm:$0x1 pattern:$0x73625140] %v5095_v42  ;;  %v5137_v12 = vrot.slane %v5078_v32, %v9431_v4  ;;  %5437 = vmatmul.mubr.f32.gmra.mxu1 %v11244_v28  ;;  %5735 = vmatpush1.msra.mxu0 %v10905_v5  ;;  %v5125_v62 = vrot.slane %v5097_v6, %v9431_v4  ;;  %v12555_v42 = vld [vmem:[#allocation29_spill] sm:$0xff] }
 0xb4c   : > { %v5127_v34 = vcombine.high %v5111_v19, %v5111_v19  ;;  %v5128_v15 = vcombine.high %v5118_v16, %v5118_v16  ;;  %5197 = vst [vmem:[%s8990_s20 + $0x2a] sm:$0x1] %v5126_v25  ;;  %7859 = vst.sshfl [vmem:[%s8990_s20 + $0x5a] sm:$0x1 pattern:$0x73625140] %v5097_v6  ;;  %5812 = vmatpush1.msra.mxu1 %v10907_v46  ;;  %5736 = vmatprep.subr.mxu0 %v10911_v44 }
 0xb4d   : > { %v5144_v11 = vrot.slane %v5130_v13, %v9431_v4  ;;  %v5145_v29 = vcombine.high %v5137_v12, %v5137_v12  ;;  %v5153_v10 = vrot.slane %v5137_v12, %v9431_v4  ;;  %7860 = vst.sshfl [vmem:[%s8990_s20 + $0x8a] sm:$0x1 pattern:$0x73625140] %v5137_v12  ;;  %5813 = vmatprep.subr.mxu1 %v10913_v52  ;;  %v12558_v32 = vld [vmem:[#allocation25_spill] sm:$0xff]  ;;  %v12559_v6 = vld [vmem:[#allocation27_spill] sm:$0xff] }
 0xb4e   : > { %5737 = vmatpush1.msra.mxu0 %v11045_v41  ;;  %v5129_v5 = vcombine.high %v5125_v62, %v5125_v62  ;;  %5198 = vst [vmem:[%s8990_s20 + $0x3a] sm:$0x1] %v5128_v15  ;;  %5201 = vst [vmem:[%s8990_s20 + $0x6a] sm:$0x1] %v5127_v34  ;;  %5814 = vmatpush1.msra.mxu1 %v11047_v55  ;;  %v12560_v19 = vld [vmem:[#allocation30_spill] sm:$0xff]  ;;  %v12561_v16 = vld [vmem:[#allocation31_spill] sm:$0xff] }
 0xb4f   : > { %5738 = vmatprep.subr.mxu0 %v11051_v45  ;;  %v5146_v46 = vcombine.high %v5144_v11, %v5144_v11  ;;  %v5160_v44 = vrot.slane %v5144_v11, %v9431_v4  ;;  %v5167_v59 = vrot.slane %v5145_v29, %v9431_v4  ;;  %v5175_v38 = vcombine.high %v5153_v10, %v5153_v10  ;;  %v12562_v25 = vld [vmem:[#allocation32_spill] sm:$0xff]  ;;  %v12563_v13 = vld [vmem:[#allocation33_spill] sm:$0xff]  ;;  %v12564_v12 = vld [vmem:[#allocation34_spill] sm:$0xff] }
 0xb50   : > { %7861 = vst.sshfl [vmem:[%s8990_s20 + $0x9a] sm:$0x1 pattern:$0x73625140] %v5145_v29  ;;  %5815 = vmatprep.subr.mxu1 %v11053_v56  ;;  %5202 = vst [vmem:[%s8990_s20 + $0x7a] sm:$0x1] %v5129_v5  ;;  %5739 = vmatpush1.msra.mxu0 %v11057_v53 }
 0xb51   : > { %7862 = vst.sshfl [vmem:[%s8990_s20 + $0xca] sm:$0x1 pattern:$0x73625140] %v5144_v11  ;;  %5816 = vmatpush1.msra.mxu1 %v11059_v26  ;;  %v5174_v52 = vrot.slane %v5146_v46, %v9431_v4  ;;  %v5176_v35 = vcombine.high %v5160_v44, %v5160_v44  ;;  %v5177_v3 = vcombine.high %v5167_v59, %v5167_v59  ;;  %5205 = vst [vmem:[%s8990_s20 + $0xaa] sm:$0x1] %v5175_v38 }
 0xb52   : > { %7863 = vst.sshfl [vmem:[%s8990_s20 + $0xda] sm:$0x1 pattern:$0x73625140] %v5146_v46  ;;  %5740 = vmatprep.subr.mxu0 %v11063_v17  ;;  %5817 = vmatprep.subr.mxu1 %v11065_v23  ;;  %v12565_v62 = vld [vmem:[#allocation35_spill] sm:$0xff]  ;;  %v12566_v34 = vld [vmem:[#allocation36_spill] sm:$0xff] }
 0xb53   : > { %5741 = vmatpush1.msra.mxu0 %v11069_v50  ;;  %5818 = vmatpush1.msra.mxu1 %v11071_v24  ;;  %v5178_v51 = vcombine.high %v5174_v52, %v5174_v52  ;;  %5206 = vst [vmem:[%s8990_s20 + $0xba] sm:$0x1] %v5177_v3  ;;  %5209 = vst [vmem:[%s8990_s20 + $0xea] sm:$0x1] %v5176_v35  ;;  %v12567_v15 = vld [vmem:[#allocation37_spill] sm:$0xff]  ;;  %v12568_v11 = vld [vmem:[#allocation38_spill] sm:$0xff] }
 0xb54   : > { %5742 = vmatprep.subr.mxu0 %v11075_v49  ;;  %5819 = vmatprep.subr.mxu1 %v11077_v27  ;;  %v12569_v29 = vld [vmem:[#allocation39_spill] sm:$0xff]  ;;  %v12570_v10 = vld [vmem:[#allocation40_spill] sm:$0xff]  ;;  %v12571_v5 = vld [vmem:[#allocation41_spill] sm:$0xff] }
 0xb55   : > { %5743 = vmatpush1.msra.mxu0 %v11081_v36  ;;  %5820 = vmatpush1.msra.mxu1 %v11083_v47  ;;  %5210 = vst [vmem:[%s8990_s20 + $0xfa] sm:$0x1] %v5178_v51  ;;  %v12572_v46 = vld [vmem:[#allocation42_spill] sm:$0xff]  ;;  %v12573_v44 = vld [vmem:[#allocation43_spill] sm:$0xff]  ;;  %v12574_v59 = vld [vmem:[#allocation44_spill] sm:$0xff] }
 0xb56   : > { %5744 = vmatprep.subr.mxu0 %v11087_v39  ;;  %5821 = vmatprep.subr.mxu1 %v11089_v9  ;;  %v12575_v38 = vld [vmem:[#allocation45_spill] sm:$0xff]  ;;  %v7864_v52 = vld [vmem:[%s8979_s19 + $0x2c0] sm:$0xff]  ;;  %v7865_v3 = vld [vmem:[%s8979_s19 + $0x2c8] sm:$0xff] }
 0xb57   : > { %5745 = vmatpush1.msra.mxu0 %v11093_v7  ;;  %5822 = vmatpush1.msra.mxu1 %v11095_v48 }
 0xb58   : > { %5746 = vmatprep.subr.mxu0 %v11099_v31  ;;  %5823 = vmatprep.subr.mxu1 %v11101_v21 }
 0xb59   : > { %5747 = vmatpush1.msra.mxu0 %v11105_v14  ;;  %5824 = vmatpush1.msra.mxu1 %v11107_v33 }
 0xb5a   : > { %5748 = vmatprep.subr.mxu0 %v11111_v40  ;;  %5825 = vmatprep.subr.mxu1 %v11113_v60 }
 0xb5b   : > { %5749 = vmatpush1.msra.mxu0 %v11117_v61  ;;  %5826 = vmatpush1.msra.mxu1 %v11119_v37 }
 0xb5c   : > { %5750 = vmatprep.subr.mxu0 %v11123_v1  ;;  %5827 = vmatprep.subr.mxu1 %v11125_v8 }
 0xb5d   : > { %5751 = vmatpush1.msra.mxu0 %v12550_v22  ;;  %5828 = vmatpush1.msra.mxu1 %v12551_v18 }
 0xb5e   : > { %5752 = vmatprep.subr.mxu0 %v12552_v57  ;;  %5829 = vmatprep.subr.mxu1 %v12553_v2 }
 0xb5f   : > { %5753 = vmatpush1.msra.mxu0 %v12554_v54  ;;  %5830 = vmatpush1.msra.mxu1 %v12555_v42 }
 0xb60   : > { %5754 = vmatprep.subr.mxu0 %v12556_v20  ;;  %5831 = vmatprep.subr.mxu1 %v12557_v58 }
 0xb61   : > { %5755 = vmatpush1.msra.mxu0 %v12558_v32  ;;  %5832 = vmatpush1.msra.mxu1 %v12559_v6 }
 0xb62   : > { %5756 = vmatprep.subr.mxu0 %v12560_v19  ;;  %5833 = vmatprep.subr.mxu1 %v12561_v16  ;;  %v7866_v16 = vld [vmem:[%s8979_s19 + $0x2d0] sm:$0xff] }
 0xb63   : > { %5757 = vmatpush1.msra.mxu0 %v12562_v25  ;;  %5834 = vmatpush1.msra.mxu1 %v12563_v13 }
 0xb64   : > { %5758 = vmatprep.subr.mxu0 %v12564_v12  ;;  %5835 = vmatprep.subr.mxu1 %v12565_v62 }
 0xb65   : > { %5759 = vmatpush1.msra.mxu0 %v12566_v34  ;;  %5836 = vmatpush1.msra.mxu1 %v12567_v15 }
 0xb66   : > { %5760 = vmatprep.subr.mxu0 %v12568_v11  ;;  %5837 = vmatprep.subr.mxu1 %v12569_v29  ;;  %v7868_v29 = vld [vmem:[%s8979_s19 + $0x2e0] sm:$0xff] }
 0xb67   : > { %5761 = vmatpush1.msra.mxu0 %v12570_v10  ;;  %5838 = vmatpush1.msra.mxu1 %v12571_v5 }
 0xb68   : > { %5762 = vmatprep.subr.mxu0 %v12572_v46  ;;  %5839 = vmatprep.subr.mxu1 %v12573_v44  ;;  %v7869_v44 = vld [vmem:[%s8979_s19 + $0x2e8] sm:$0xff] }
 0xb69   : > { %5763 = vmatpush1.msra.mxu0 %v12574_v59  ;;  %5796 = vmatprep.mubr.f32.mxu0 %v12303_v63 }
 0xb6a   : > { %5840 = vmatpush1.msra.mxu1 %v12575_v38  ;;  %5873 = vmatprep.mubr.f32.mxu1 %v12303_v63 }
 0xc05   : > { %v5355_v35 = vpop.f32.mrf.mxu0  ;;  %v5432_v10 = vpop.f32.mrf.mxu1 }
 0xc06   : > { %v5443_v51 = vadd.f32 %v7864_v52, %v5355_v35  ;;  %v7867_v52 = vld [vmem:[%s8979_s19 + $0x2d8] sm:$0xff] }
 0xc07   : > { %v5357_v5 = vpop.f32.mrf.mxu0  ;;  %v5434_v34 = vpop.f32.mrf.mxu1 }
 0xc08   : > { %v7872_v46 = vmul.f32 -1.442695, %v5443_v51  ;;  %v5444_v11 = vadd.f32 %v7865_v3, %v5357_v5  ;;  %v5446_v51 = vadd.f32 %v7867_v52, %v5434_v34  ;;  %v7871_v5 = vld [vmem:[%s8979_s19 + $0x2f8] sm:$0xff] }
 0xc0a   : > { %v5361_v15 = vpop.f32.mrf.mxu0  ;;  %8444 = vpow2.f32 %v7872_v46  ;;  %v7874_v59 = vmul.f32 -1.442695, %v5444_v11  ;;  %v7876_v19 = vmul.f32 -1.442695, %v5446_v51  ;;  %v5445_v11 = vadd.f32 %v7866_v16, %v5432_v10 }
 0xc0b   : > { %v5447_v38 = vadd.f32 %v7868_v29, %v5361_v15  ;;  %v5438_v35 = vpop.f32.mrf.mxu1  ;;  %v7870_v15 = vld [vmem:[%s8979_s19 + $0x2f0] sm:$0xff] }
 0xc0c   : > { %v5363_v62 = vpop.f32.mrf.mxu0  ;;  %8446 = vpow2.f32 %v7874_v59 }
 0xc0d   : > { %v7873_v12 = vmul.f32 -1.442695, %v5447_v38  ;;  %v5448_v13 = vadd.f32 %v7869_v44, %v5363_v62  ;;  %v5440_v3 = vpop.f32.mrf.mxu1 }
 0xc0e   : > { %v5450_v46 = vadd.f32 %v7871_v5, %v5440_v3 }
 0xc0f   : > { %8448 = vpow2.f32 %v7873_v12  ;;  %v7875_v25 = vmul.f32 -1.442695, %v5448_v13  ;;  %v5449_v12 = vadd.f32 %v7870_v15, %v5438_v35  ;;  %v5506_v35 = vpop.permute.xlu0 %5505 }
 0xc10   : > { %v7877_v59 = vmul.f32 -1.442695, %v5450_v46  ;;  %vm5510_vm6 = vcmp.eq.s32.totalorder %v5506_v35, 1 }
 0xc11   : > { %8450 = vpow2.f32 %v7875_v25 }
 0xc12   : > { %8452 = vpow2.f32 %v7876_v19 }
 0xc17   : > { %v8445_v6 = vpop.eup %8444 }
 0xc18   : > { %v5457_v32 = vadd.f32 1.0, %v8445_v6 }
 0xc19   : > { %v8447_v29 = vpop.eup %8446 }
 0xc1a   : > { %8454 = vrcp.f32 %v5457_v32  ;;  %v5469_v62 = vadd.f32 1.0, %v8447_v29 }
 0xc1b   : > { %8456 = vtanh.f32 %v5445_v11 }
 0xc1c   : > { %v8449_v44 = vpop.eup %8448  ;;  %8458 = vrcp.f32 %v5469_v62 }
 0xc1d   : > { %v5458_v25 = vadd.f32 1.0, %v8449_v44  ;;  %8460 = vpow2.f32 %v7877_v59  ;;  %v5509_v44 = vpop.permute.xlu1 %5508 }
 0xc1e   : > { %v8451_v13 = vpop.eup %8450  ;;  %vm5511_vm7 = vcmp.eq.s32.totalorder %v5509_v44, 1 }
 0xc1f   : > { %8462 = vrcp.f32 %v5458_v25  ;;  %v5470_v34 = vadd.f32 1.0, %v8451_v13  ;;  %v8453_v38 = vpop.eup %8452 }
 0xc20   : > { %8464 = vtanh.f32 %v5449_v12  ;;  %v5483_v52 = vadd.f32 1.0, %v8453_v38 }
 0xc21   : > { %8466 = vrcp.f32 %v5470_v34 }
 0xc22   : > { %8468 = vrcp.f32 %v5483_v52 }
 0xc27   : > { %v8455_v16 = vpop.eup %8454 }
 0xc28   : > { %v8457_v6 = vpop.eup %8456 }
 0xc29   : > { %v8459_v10 = vpop.eup %8458  ;;  %v5491_v51 = vmul.f32 %v8457_v6, %v8455_v16 }
 0xc2a   : > { %v8461_v19 = vpop.eup %8460  ;;  %v5489_v32 = vmul.f32 %v8459_v10, %v11220_v30 }
 0xc2b   : > { %v5484_v15 = vadd.f32 1.0, %v8461_v19 }
 0xc2c   : > { %v8463_v5 = vpop.eup %8462  ;;  %v5493_v46 = vadd.f32 %v5491_v51, %v5489_v32 }
 0xc2d   : > { %v8465_v3 = vpop.eup %8464 }
 0xc2e   : > { %v8467_v11 = vpop.eup %8466  ;;  %8470 = vtanh.f32 %v5493_v46  ;;  %v11346_v29 = vsel %vm5510_vm6, %v5493_v46, %v11220_v30  ;;  %v5492_v59 = vmul.f32 %v8465_v3, %v8463_v5 }
 0xc2f   : > { %v5490_v62 = vmul.f32 %v8467_v11, %v11225_v0  ;;  %8472 = vrcp.f32 %v5484_v15  ;;  %v8469_v13 = vpop.eup %8468 }
 0xc31   : > { %v5494_v12 = vadd.f32 %v5492_v59, %v5490_v62 }
 0xc33   : > { %8474 = vtanh.f32 %v5494_v12  ;;  %v11351_v25 = vsel %vm5511_vm7, %v5494_v12, %v11225_v0 }
 0xc3b   : > { %v8471_v34 = vpop.eup %8470 }
 0xc3c   : > { %v5497_v38 = vmul.f32 %v8471_v34, %v8469_v13  ;;  %v8473_v16 = vpop.eup %8472 }
 0xc3e   : > { %v11355_v30 = vsel %vm5510_vm6, %v5497_v38, %v11229_v43  ;;  %v5520_v6 = vsel %vm5510_vm6, %v5497_v38, 0.0 }
 0xc3f   : > { %v5524_v52 = vcombine.high %v5520_v6, %v5520_v6  ;;  %v5531_v19 = vrot.slane %v5520_v6, %v9431_v4  ;;  %5797 = vmatmul.mubr.f32.vlgmr.msra.gmra.mxu0 %v11355_v30  ;;  %5874 = vmatmul.mubr.f32.vlgmr.msra.gmra.mxu1 %v11355_v30 }
 0xc40   : > { %v8475_v10 = vpop.eup %8474  ;;  %5802 = vmatprep.mubr.f32.mxu0 %v12303_v63  ;;  %5879 = vmatprep.mubr.f32.mxu1 %v12303_v63 }
 0xc41   : > { %v5498_v0 = vmul.f32 %v8475_v10, %v8473_v16  ;;  %v5538_v43 = vrot.slane %v5524_v52, %v9431_v4  ;;  %v5539_v51 = vcombine.high %v5531_v19, %v5531_v19  ;;  %v5547_v32 = vrot.slane %v5531_v19, %v9431_v4  ;;  %7878 = vst.sshfl [vmem:[%s8990_s20 + $0xb] sm:$0x1 pattern:$0x73625140] %v5531_v19 }
 0xc43   : > { %v11368_v5 = vsel %vm5511_vm7, %v5498_v0, %v11244_v28  ;;  %v5521_v3 = vsel %vm5511_vm7, %v5498_v0, 0.0  ;;  %v5540_v35 = vcombine.high %v5538_v43, %v5538_v43  ;;  %v5554_v46 = vrot.slane %v5538_v43, %v9431_v4  ;;  %7879 = vst.sshfl [vmem:[%s8990_s20 + $0x1b] sm:$0x1 pattern:$0x73625140] %v5539_v51 }
 0xc44   : > { %v5561_v11 = vrot.slane %v5539_v51, %v9431_v4  ;;  %v5569_v15 = vcombine.high %v5547_v32, %v5547_v32  ;;  %7880 = vst.sshfl [vmem:[%s8990_s20 + $0x4b] sm:$0x1 pattern:$0x73625140] %v5538_v43  ;;  %5803 = vmatmul.mubr.f32.gmra.mxu0 %v11368_v5  ;;  %v5573_v59 = vcombine.high %v5521_v3, %v5521_v3 }
 0xc45   : > { %v5580_v28 = vrot.slane %v5521_v3, %v9431_v4  ;;  %5880 = vmatmul.mubr.f32.gmra.mxu1 %v11368_v5  ;;  %6239 = vmatprep.mubr.f32.mxu0 %v12303_v63  ;;  %v5568_v62 = vrot.slane %v5540_v35, %v9431_v4  ;;  %v5570_v44 = vcombine.high %v5554_v46, %v5554_v46  ;;  %v11399_v3 = vld [vmem:[#allocation9 + $0x1e8] sm:$0xff]  ;;  %v11405_v46 = vld [vmem:[#allocation9 + $0x1e0] sm:$0xff] }
 0xc46   : > { %v5571_v12 = vcombine.high %v5561_v11, %v5561_v11  ;;  %5640 = vst [vmem:[%s8990_s20 + $0x2b] sm:$0x1] %v5569_v15  ;;  %7881 = vst.sshfl [vmem:[%s8990_s20 + $0x5b] sm:$0x1 pattern:$0x73625140] %v5540_v35  ;;  %6316 = vmatprep.mubr.f32.mxu1 %v12303_v63  ;;  %v5587_v13 = vrot.slane %v5573_v59, %v9431_v4  ;;  %6175 = vmatprep.subr.mxu0 %v11399_v3 }
 0xc47   : > { %v5588_v34 = vcombine.high %v5580_v28, %v5580_v28  ;;  %v5596_v38 = vrot.slane %v5580_v28, %v9431_v4  ;;  %7882 = vst.sshfl [vmem:[%s8990_s20 + $0x8b] sm:$0x1 pattern:$0x73625140] %v5580_v28  ;;  %v5572_v16 = vcombine.high %v5568_v62, %v5568_v62  ;;  %5644 = vst [vmem:[%s8990_s20 + $0x6b] sm:$0x1] %v5570_v44  ;;  %6176 = vmatpush1.msra.mxu0 %v11405_v46 }
 0xc48   : > { %5641 = vst [vmem:[%s8990_s20 + $0x3b] sm:$0x1] %v5571_v12  ;;  %v5589_v6 = vcombine.high %v5587_v13, %v5587_v13  ;;  %v5603_v10 = vrot.slane %v5587_v13, %v9431_v4  ;;  %7884 = vst.sshfl [vmem:[%s8990_s20 + $0xcb] sm:$0x1 pattern:$0x73625140] %v5587_v13 }
 0xc49   : > { %v5610_v52 = vrot.slane %v5588_v34, %v9431_v4  ;;  %v5618_v19 = vcombine.high %v5596_v38, %v5596_v38  ;;  %7883 = vst.sshfl [vmem:[%s8990_s20 + $0x9b] sm:$0x1 pattern:$0x73625140] %v5588_v34  ;;  %5645 = vst [vmem:[%s8990_s20 + $0x7b] sm:$0x1] %v5572_v16 }
 0xc4a   : > { %v5617_v0 = vrot.slane %v5589_v6, %v9431_v4  ;;  %v5619_v43 = vcombine.high %v5603_v10, %v5603_v10  ;;  %7885 = vst.sshfl [vmem:[%s8990_s20 + $0xdb] sm:$0x1 pattern:$0x73625140] %v5589_v6  ;;  %v11401_v35 = vld [vmem:[#allocation9 + $0x1f8] sm:$0xff]  ;;  %v11407_v11 = vld [vmem:[#allocation9 + $0x1f0] sm:$0xff] }
 0xc4b   : > { %v5620_v51 = vcombine.high %v5610_v52, %v5610_v52  ;;  %5648 = vst [vmem:[%s8990_s20 + $0xab] sm:$0x1] %v5618_v19  ;;  %6252 = vmatprep.subr.mxu1 %v11401_v35  ;;  %v11411_v15 = vld [vmem:[#allocation9 + $0x1c8] sm:$0xff]  ;;  %v11413_v59 = vld [vmem:[#allocation9 + $0x1d8] sm:$0xff]  ;;  %v11417_v28 = vld [vmem:[#allocation9 + $0x1c0] sm:$0xff] }
 0xc4c   : > { %v5621_v32 = vcombine.high %v5617_v0, %v5617_v0  ;;  %5652 = vst [vmem:[%s8990_s20 + $0xeb] sm:$0x1] %v5619_v43  ;;  %6253 = vmatpush1.msra.mxu1 %v11407_v11  ;;  %6177 = vmatprep.subr.mxu0 %v11411_v15  ;;  %v11419_v62 = vld [vmem:[#allocation9 + $0x1d0] sm:$0xff]  ;;  %v11423_v44 = vld [vmem:[#allocation9 + $0x1a8] sm:$0xff]  ;;  %v11425_v12 = vld [vmem:[#allocation9 + $0x1b8] sm:$0xff] }
 0xc4d   : > { %5649 = vst [vmem:[%s8990_s20 + $0xbb] sm:$0x1] %v5620_v51  ;;  %6254 = vmatprep.subr.mxu1 %v11413_v59  ;;  %6178 = vmatpush1.msra.mxu0 %v11417_v28  ;;  %v7893_v16 = vld [vmem:[%s8979_s19 + $0x338] sm:$0xff]  ;;  %v7888_v10 = vld [vmem:[%s8979_s19 + $0x310] sm:$0xff] }
 0xc4e   : > { %5653 = vst [vmem:[%s8990_s20 + $0xfb] sm:$0x1] %v5621_v32  ;;  %6255 = vmatpush1.msra.mxu1 %v11419_v62  ;;  %6179 = vmatprep.subr.mxu0 %v11423_v44  ;;  %v7892_v32 = vld [vmem:[%s8979_s19 + $0x330] sm:$0xff] }
 0xc4f   : > { %6256 = vmatprep.subr.mxu1 %v11425_v12  ;;  %6180 = vmatpush1.msra.mxu0 %v11045_v41  ;;  %v12576_v41 = vld [vmem:[#allocation25_spill] sm:$0xff] }
 0xc50   : > { %6257 = vmatpush1.msra.mxu1 %v11047_v55  ;;  %6181 = vmatprep.subr.mxu0 %v11051_v45  ;;  %v12577_v55 = vld [vmem:[#allocation27_spill] sm:$0xff]  ;;  %v12578_v45 = vld [vmem:[#allocation30_spill] sm:$0xff] }
 0xc51   : > { %6258 = vmatprep.subr.mxu1 %v11053_v56  ;;  %6182 = vmatpush1.msra.mxu0 %v11057_v53  ;;  %v12579_v56 = vld [vmem:[#allocation31_spill] sm:$0xff]  ;;  %v12580_v53 = vld [vmem:[#allocation32_spill] sm:$0xff] }
 0xc52   : > { %6259 = vmatpush1.msra.mxu1 %v11059_v26  ;;  %6183 = vmatprep.subr.mxu0 %v11063_v17  ;;  %v12581_v26 = vld [vmem:[#allocation33_spill] sm:$0xff]  ;;  %v12582_v17 = vld [vmem:[#allocation34_spill] sm:$0xff] }
 0xc53   : > { %6260 = vmatprep.subr.mxu1 %v11065_v23  ;;  %6184 = vmatpush1.msra.mxu0 %v11069_v50  ;;  %v12583_v23 = vld [vmem:[#allocation35_spill] sm:$0xff]  ;;  %v12584_v50 = vld [vmem:[#allocation36_spill] sm:$0xff] }
 0xc54   : > { %6261 = vmatpush1.msra.mxu1 %v11071_v24  ;;  %6185 = vmatprep.subr.mxu0 %v11075_v49  ;;  %v12585_v24 = vld [vmem:[#allocation37_spill] sm:$0xff]  ;;  %v12586_v49 = vld [vmem:[#allocation38_spill] sm:$0xff] }
 0xc55   : > { %6262 = vmatprep.subr.mxu1 %v11077_v27  ;;  %6186 = vmatpush1.msra.mxu0 %v11081_v36  ;;  %v12587_v27 = vld [vmem:[#allocation39_spill] sm:$0xff]  ;;  %v12588_v36 = vld [vmem:[#allocation40_spill] sm:$0xff] }
 0xc56   : > { %6263 = vmatpush1.msra.mxu1 %v11083_v47  ;;  %6187 = vmatprep.subr.mxu0 %v11087_v39  ;;  %v12589_v47 = vld [vmem:[#allocation41_spill] sm:$0xff]  ;;  %v12590_v39 = vld [vmem:[#allocation42_spill] sm:$0xff] }
 0xc57   : > { %6264 = vmatprep.subr.mxu1 %v11089_v9  ;;  %6188 = vmatpush1.msra.mxu0 %v11093_v7  ;;  %v12591_v9 = vld [vmem:[#allocation43_spill] sm:$0xff]  ;;  %v12592_v7 = vld [vmem:[#allocation44_spill] sm:$0xff] }
 0xc58   : > { %6265 = vmatpush1.msra.mxu1 %v11095_v48  ;;  %6189 = vmatprep.subr.mxu0 %v11099_v31  ;;  %v12593_v48 = vld [vmem:[#allocation45_spill] sm:$0xff]  ;;  %v7886_v31 = vld [vmem:[%s8979_s19 + $0x300] sm:$0xff] }
 0xc59   : > { %6266 = vmatprep.subr.mxu1 %v11101_v21  ;;  %6190 = vmatpush1.msra.mxu0 %v11105_v14  ;;  %v7887_v14 = vld [vmem:[%s8979_s19 + $0x308] sm:$0xff] }
 0xc5a   : > { %6267 = vmatpush1.msra.mxu1 %v11107_v33  ;;  %6191 = vmatprep.subr.mxu0 %v11111_v40 }
 0xc5b   : > { %6268 = vmatprep.subr.mxu1 %v11113_v60  ;;  %6192 = vmatpush1.msra.mxu0 %v11117_v61  ;;  %v7890_v61 = vld [vmem:[%s8979_s19 + $0x320] sm:$0xff] }
 0xc5c   : > { %6269 = vmatpush1.msra.mxu1 %v11119_v37  ;;  %6193 = vmatprep.subr.mxu0 %v11123_v1 }
 0xc5d   : > { %6270 = vmatprep.subr.mxu1 %v11125_v8  ;;  %6194 = vmatpush1.msra.mxu0 %v12550_v22  ;;  %v7891_v22 = vld [vmem:[%s8979_s19 + $0x328] sm:$0xff] }
 0xc5e   : > { %6271 = vmatpush1.msra.mxu1 %v12551_v18  ;;  %6195 = vmatprep.subr.mxu0 %v12552_v57 }
 0xc5f   : > { %6272 = vmatprep.subr.mxu1 %v12553_v2  ;;  %6196 = vmatpush1.msra.mxu0 %v12554_v54 }
 0xc60   : > { %6273 = vmatpush1.msra.mxu1 %v12555_v42  ;;  %6197 = vmatprep.subr.mxu0 %v12556_v20 }
 0xc61   : > { %6274 = vmatprep.subr.mxu1 %v12557_v58  ;;  %6198 = vmatpush1.msra.mxu0 %v12576_v41  ;;  %v7889_v58 = vld [vmem:[%s8979_s19 + $0x318] sm:$0xff] }
 0xc62   : > { %6275 = vmatpush1.msra.mxu1 %v12577_v55  ;;  %6199 = vmatprep.subr.mxu0 %v12578_v45 }
 0xc63   : > { %6276 = vmatprep.subr.mxu1 %v12579_v56  ;;  %6200 = vmatpush1.msra.mxu0 %v12580_v53 }
 0xc64   : > { %6277 = vmatpush1.msra.mxu1 %v12581_v26  ;;  %6201 = vmatprep.subr.mxu0 %v12582_v17 }
 0xc65   : > { %6278 = vmatprep.subr.mxu1 %v12583_v23  ;;  %6202 = vmatpush1.msra.mxu0 %v12584_v50 }
 0xc66   : > { %6279 = vmatpush1.msra.mxu1 %v12585_v24  ;;  %6203 = vmatprep.subr.mxu0 %v12586_v49 }
 0xc67   : > { %6280 = vmatprep.subr.mxu1 %v12587_v27  ;;  %6204 = vmatpush1.msra.mxu0 %v12588_v36 }
 0xc68   : > { %6281 = vmatpush1.msra.mxu1 %v12589_v47  ;;  %6205 = vmatprep.subr.mxu0 %v12590_v39 }
 0xc69   : > { %6282 = vmatprep.subr.mxu1 %v12591_v9  ;;  %6206 = vmatpush1.msra.mxu0 %v12592_v7 }
 0xc6a   : > { %6283 = vmatpush1.msra.mxu1 %v12593_v48  ;;  %6618 = vmatprep.subr.mxu0 %v11399_v3 }
 0xc6b   : > { %6695 = vmatprep.subr.mxu1 %v11401_v35 }
 0xcff   : > { %v5798_v21 = vpop.f32.mrf.mxu0  ;;  %v5875_v40 = vpop.f32.mrf.mxu1 }
 0xd00   : > { %v5886_v33 = vadd.f32 %v7886_v31, %v5798_v21  ;;  %v5888_v43 = vadd.f32 %v7888_v10, %v5875_v40  ;;  %v5949_v31 = vpop.permute.xlu0 %5948 }
 0xd01   : > { %v5800_v60 = vpop.f32.mrf.mxu0  ;;  %v5877_v57 = vpop.f32.mrf.mxu1  ;;  %vm5953_vm8 = vcmp.eq.s32.totalorder %v5949_v31, 1  ;;  %v11575_v31 = vld [vmem:[#allocation9 + $0x168] sm:$0xff] }
 0xd02   : > { %v7894_v37 = vmul.f32 -1.442695, %v5886_v33  ;;  %v5887_v1 = vadd.f32 %v7887_v14, %v5800_v60  ;;  %v5889_v38 = vadd.f32 %v7889_v58, %v5877_v57 }
 0xd04   : > { %v5804_v8 = vpop.f32.mrf.mxu0  ;;  %8476 = vpow2.f32 %v7894_v37  ;;  %v7896_v18 = vmul.f32 -1.442695, %v5887_v1  ;;  %v7898_v52 = vmul.f32 -1.442695, %v5889_v38  ;;  %v5952_v37 = vpop.permute.xlu1 %5951 }
 0xd05   : > { %v5890_v2 = vadd.f32 %v7890_v61, %v5804_v8  ;;  %v5881_v13 = vpop.f32.mrf.mxu1  ;;  %vm5954_vm9 = vcmp.eq.s32.totalorder %v5952_v37, 1  ;;  %v11593_v37 = vld [vmem:[#allocation9 + $0x140] sm:$0xff] }
 0xd06   : > { %v5806_v54 = vpop.f32.mrf.mxu0  ;;  %8478 = vpow2.f32 %v7896_v18  ;;  %v5892_v53 = vadd.f32 %v7892_v32, %v5881_v13 }
 0xd07   : > { %v7895_v42 = vmul.f32 -1.442695, %v5890_v2  ;;  %v5891_v20 = vadd.f32 %v7891_v22, %v5806_v54  ;;  %v5883_v6 = vpop.f32.mrf.mxu1 }
 0xd08   : > { %v5893_v19 = vadd.f32 %v7893_v16, %v5883_v6 }
 0xd09   : > { %8480 = vpow2.f32 %v7895_v42  ;;  %v7897_v34 = vmul.f32 -1.442695, %v5891_v20 }
 0xd0a   : > { %v7899_v55 = vmul.f32 -1.442695, %v5893_v19 }
 0xd0b   : > { %8482 = vpow2.f32 %v7897_v34 }
 0xd0c   : > { %8484 = vpow2.f32 %v7898_v52 }
 0xd11   : > { %v8477_v0 = vpop.eup %8476 }
 0xd12   : > { %v5900_v51 = vadd.f32 1.0, %v8477_v0 }
 0xd13   : > { %v8479_v41 = vpop.eup %8478 }
 0xd14   : > { %8486 = vrcp.f32 %v5900_v51  ;;  %v5912_v45 = vadd.f32 1.0, %v8479_v41 }
 0xd15   : > { %8488 = vtanh.f32 %v5888_v43 }
 0xd16   : > { %v8481_v56 = vpop.eup %8480  ;;  %8490 = vrcp.f32 %v5912_v45 }
 0xd17   : > { %v5901_v26 = vadd.f32 1.0, %v8481_v56  ;;  %8492 = vpow2.f32 %v7899_v55 }
 0xd18   : > { %v8483_v17 = vpop.eup %8482 }
 0xd19   : > { %8494 = vrcp.f32 %v5901_v26  ;;  %v5913_v23 = vadd.f32 1.0, %v8483_v17  ;;  %v8485_v50 = vpop.eup %8484 }
 0xd1a   : > { %8496 = vtanh.f32 %v5892_v53  ;;  %v5926_v36 = vadd.f32 1.0, %v8485_v50 }
 0xd1b   : > { %8498 = vrcp.f32 %v5913_v23 }
 0xd1c   : > { %8500 = vrcp.f32 %v5926_v36  ;;  %v11557_v36 = vld [vmem:[#allocation9 + $0x1a0] sm:$0xff] }
 0xd21   : > { %v8487_v24 = vpop.eup %8486 }
 0xd22   : > { %v8489_v49 = vpop.eup %8488 }
 0xd23   : > { %v8491_v27 = vpop.eup %8490  ;;  %v5934_v39 = vmul.f32 %v8489_v49, %v8487_v24 }
 0xd24   : > { %v8493_v47 = vpop.eup %8492  ;;  %v5932_v9 = vmul.f32 %v8491_v27, %v11346_v29 }
 0xd25   : > { %v5927_v33 = vadd.f32 1.0, %v8493_v47  ;;  %v11559_v47 = vld [vmem:[#allocation9 + $0x1b0] sm:$0xff] }
 0xd26   : > { %v8495_v7 = vpop.eup %8494  ;;  %v5936_v21 = vadd.f32 %v5934_v39, %v5932_v9  ;;  %v11563_v39 = vld [vmem:[#allocation9 + $0x188] sm:$0xff]  ;;  %v11565_v9 = vld [vmem:[#allocation9 + $0x198] sm:$0xff] }
 0xd27   : > { %v8497_v48 = vpop.eup %8496 }
 0xd28   : > { %v8499_v14 = vpop.eup %8498  ;;  %8502 = vtanh.f32 %v5936_v21  ;;  %v11496_v40 = vsel %vm5953_vm8, %v5936_v21, %v11346_v29  ;;  %v5935_v60 = vmul.f32 %v8497_v48, %v8495_v7  ;;  %v11569_v7 = vld [vmem:[#allocation9 + $0x180] sm:$0xff]  ;;  %v11571_v48 = vld [vmem:[#allocation9 + $0x190] sm:$0xff]  ;;  %v11577_v21 = vld [vmem:[#allocation9 + $0x178] sm:$0xff] }
 0xd29   : > { %v5933_v61 = vmul.f32 %v8499_v14, %v11351_v25  ;;  %8504 = vrcp.f32 %v5927_v33  ;;  %v8501_v22 = vpop.eup %8500  ;;  %v11581_v14 = vld [vmem:[#allocation9 + $0x160] sm:$0xff]  ;;  %v11583_v33 = vld [vmem:[#allocation9 + $0x170] sm:$0xff] }
 0xd2b   : > { %v5937_v1 = vadd.f32 %v5935_v60, %v5933_v61  ;;  %v11587_v60 = vld [vmem:[#allocation9 + $0x148] sm:$0xff]  ;;  %v11589_v61 = vld [vmem:[#allocation9 + $0x158] sm:$0xff] }
 0xd2d   : > { %8506 = vtanh.f32 %v5937_v1  ;;  %v11501_v8 = vsel %vm5954_vm9, %v5937_v1, %v11351_v25  ;;  %v11595_v1 = vld [vmem:[#allocation9 + $0x150] sm:$0xff] }
 0xd35   : > { %v8503_v18 = vpop.eup %8502 }
 0xd36   : > { %v5940_v57 = vmul.f32 %v8503_v18, %v8501_v22  ;;  %v8505_v2 = vpop.eup %8504  ;;  %v11599_v22 = vld [vmem:[#allocation9 + $0x128] sm:$0xff]  ;;  %v11601_v18 = vld [vmem:[#allocation9 + $0x138] sm:$0xff] }
 0xd38   : > { %v11505_v29 = vsel %vm5953_vm8, %v5940_v57, %v11355_v30  ;;  %v5963_v54 = vsel %vm5953_vm8, %v5940_v57, 0.0  ;;  %v11605_v57 = vld [vmem:[#allocation9 + $0x120] sm:$0xff] }
 0xd39   : > { %v5967_v20 = vcombine.high %v5963_v54, %v5963_v54  ;;  %v5974_v58 = vrot.slane %v5963_v54, %v9431_v4  ;;  %6240 = vmatmul.mubr.f32.vlgmr.msra.gmra.mxu0 %v11505_v29  ;;  %6317 = vmatmul.mubr.f32.vlgmr.msra.gmra.mxu1 %v11505_v29  ;;  %v11611_v54 = vld [vmem:[#allocation9 + $0x108] sm:$0xff] }
 0xd3a   : > { %v8507_v42 = vpop.eup %8506  ;;  %6245 = vmatprep.mubr.f32.mxu0 %v12303_v63  ;;  %6322 = vmatprep.mubr.f32.mxu1 %v12303_v63 }
 0xd3b   : > { %v5941_v25 = vmul.f32 %v8507_v42, %v8505_v2  ;;  %v5981_v30 = vrot.slane %v5967_v20, %v9431_v4  ;;  %v5982_v13 = vcombine.high %v5974_v58, %v5974_v58  ;;  %v5990_v34 = vrot.slane %v5974_v58, %v9431_v4  ;;  %7900 = vst.sshfl [vmem:[%s8990_s20 + $0xc] sm:$0x1 pattern:$0x73625140] %v5974_v58  ;;  %v11607_v2 = vld [vmem:[#allocation9 + $0x130] sm:$0xff]  ;;  %v11613_v42 = vld [vmem:[#allocation9 + $0x118] sm:$0xff] }
 0xd3c   : > { %6619 = vmatpush1.msra.mxu0 %v11405_v46  ;;  %6696 = vmatpush1.msra.mxu1 %v11407_v11  ;;  %v11617_v20 = vld [vmem:[#allocation9 + $0x100] sm:$0xff]  ;;  %v11619_v58 = vld [vmem:[#allocation9 + $0x110] sm:$0xff] }
 0xd3d   : > { %v11520_v38 = vsel %vm5954_vm9, %v5941_v25, %v11368_v5  ;;  %v5964_v16 = vsel %vm5954_vm9, %v5941_v25, 0.0  ;;  %6620 = vmatprep.subr.mxu0 %v11411_v15  ;;  %6697 = vmatprep.subr.mxu1 %v11413_v59  ;;  %v5983_v6 = vcombine.high %v5981_v30, %v5981_v30  ;;  %v5997_v10 = vrot.slane %v5981_v30, %v9431_v4  ;;  %v11623_v25 = vld [vmem:[#allocation9 + $0xe8] sm:$0xff] }
 0xd3e   : > { %v6004_v52 = vrot.slane %v5982_v13, %v9431_v4  ;;  %v6012_v19 = vcombine.high %v5990_v34, %v5990_v34  ;;  %7901 = vst.sshfl [vmem:[%s8990_s20 + $0x1c] sm:$0x1 pattern:$0x73625140] %v5982_v13  ;;  %6246 = vmatmul.mubr.f32.gmra.mxu0 %v11520_v38  ;;  %v6016_v5 = vcombine.high %v5964_v16, %v5964_v16  ;;  %v11629_v13 = vld [vmem:[#allocation9 + $0xe0] sm:$0xff]  ;;  %v11631_v34 = vld [vmem:[#allocation9 + $0xf0] sm:$0xff] }
 0xd3f   : > { %7902 = vst.sshfl [vmem:[%s8990_s20 + $0x4c] sm:$0x1 pattern:$0x73625140] %v5981_v30  ;;  %v6023_v0 = vrot.slane %v5964_v16, %v9431_v4  ;;  %6323 = vmatmul.mubr.f32.gmra.mxu1 %v11520_v38  ;;  %6621 = vmatpush1.msra.mxu0 %v11417_v28  ;;  %v6011_v43 = vrot.slane %v5983_v6, %v9431_v4  ;;  %v11625_v30 = vld [vmem:[#allocation9 + $0xf8] sm:$0xff]  ;;  %v11635_v16 = vld [vmem:[#allocation9 + $0xc8] sm:$0xff] }
 0xd40   : > { %v6013_v51 = vcombine.high %v5997_v10, %v5997_v10  ;;  %v6014_v32 = vcombine.high %v6004_v52, %v6004_v52  ;;  %6083 = vst [vmem:[%s8990_s20 + $0x2c] sm:$0x1] %v6012_v19  ;;  %7903 = vst.sshfl [vmem:[%s8990_s20 + $0x5c] sm:$0x1 pattern:$0x73625140] %v5983_v6  ;;  %6698 = vmatpush1.msra.mxu1 %v11419_v62  ;;  %6622 = vmatprep.subr.mxu0 %v11423_v44 }
 0xd41   : > { %v6030_v41 = vrot.slane %v6016_v5, %v9431_v4  ;;  %v6031_v55 = vcombine.high %v6023_v0, %v6023_v0  ;;  %v6039_v45 = vrot.slane %v6023_v0, %v9431_v4  ;;  %7904 = vst.sshfl [vmem:[%s8990_s20 + $0x8c] sm:$0x1 pattern:$0x73625140] %v6023_v0  ;;  %6699 = vmatprep.subr.mxu1 %v11425_v12  ;;  %v11637_v6 = vld [vmem:[#allocation9 + $0xd8] sm:$0xff]  ;;  %v11641_v10 = vld [vmem:[#allocation9 + $0xc0] sm:$0xff] }
 0xd42   : > { %6682 = vmatprep.mubr.f32.mxu0 %v12303_v63  ;;  %v6015_v56 = vcombine.high %v6011_v43, %v6011_v43  ;;  %6084 = vst [vmem:[%s8990_s20 + $0x3c] sm:$0x1] %v6014_v32  ;;  %6087 = vst [vmem:[%s8990_s20 + $0x6c] sm:$0x1] %v6013_v51  ;;  %6759 = vmatprep.mubr.f32.mxu1 %v12303_v63  ;;  %v11643_v52 = vld [vmem:[#allocation9 + $0xd0] sm:$0xff]  ;;  %v11647_v19 = vld [vmem:[#allocation9 + $0xa8] sm:$0xff] }
 0xd43   : > { %v6032_v53 = vcombine.high %v6030_v41, %v6030_v41  ;;  %v6046_v26 = vrot.slane %v6030_v41, %v9431_v4  ;;  %v6053_v17 = vrot.slane %v6031_v55, %v9431_v4  ;;  %v6061_v23 = vcombine.high %v6039_v45, %v6039_v45  ;;  %7905 = vst.sshfl [vmem:[%s8990_s20 + $0x9c] sm:$0x1 pattern:$0x73625140] %v6031_v55  ;;  %v11649_v5 = vld [vmem:[#allocation9 + $0xb8] sm:$0xff]  ;;  %v11653_v0 = vld [vmem:[#allocation9 + $0xa0] sm:$0xff] }
 0xd44   : > { %7906 = vst.sshfl [vmem:[%s8990_s20 + $0xcc] sm:$0x1 pattern:$0x73625140] %v6030_v41  ;;  %6088 = vst [vmem:[%s8990_s20 + $0x7c] sm:$0x1] %v6015_v56  ;;  %6623 = vmatpush1.msra.mxu0 %v11557_v36  ;;  %6700 = vmatpush1.msra.mxu1 %v11559_v47 }
 0xd45   : > { %v6060_v50 = vrot.slane %v6032_v53, %v9431_v4  ;;  %v6062_v24 = vcombine.high %v6046_v26, %v6046_v26  ;;  %v6063_v49 = vcombine.high %v6053_v17, %v6053_v17  ;;  %6091 = vst [vmem:[%s8990_s20 + $0xac] sm:$0x1] %v6061_v23  ;;  %7907 = vst.sshfl [vmem:[%s8990_s20 + $0xdc] sm:$0x1 pattern:$0x73625140] %v6032_v53  ;;  %6624 = vmatprep.subr.mxu0 %v11563_v39 }
 0xd46   : > { %6701 = vmatprep.subr.mxu1 %v11565_v9  ;;  %6625 = vmatpush1.msra.mxu0 %v11569_v7  ;;  %12594 = vst [vmem:[#allocation20_spill] sm:$0xff] %v11641_v10  ;;  %12595 = vst [vmem:[#allocation26_spill] sm:$0xff] %v11643_v52  ;;  %v11655_v43 = vld [vmem:[#allocation9 + $0xb0] sm:$0xff]  ;;  %v11659_v51 = vld [vmem:[#allocation9 + $0x88] sm:$0xff] }
 0xd47   : > { %v6064_v27 = vcombine.high %v6060_v50, %v6060_v50  ;;  %6092 = vst [vmem:[%s8990_s20 + $0xbc] sm:$0x1] %v6063_v49  ;;  %6095 = vst [vmem:[%s8990_s20 + $0xec] sm:$0x1] %v6062_v24  ;;  %6702 = vmatpush1.msra.mxu1 %v11571_v48  ;;  %6626 = vmatprep.subr.mxu0 %v11575_v31  ;;  %v11661_v32 = vld [vmem:[#allocation9 + $0x98] sm:$0xff]  ;;  %v11665_v41 = vld [vmem:[#allocation9 + $0x80] sm:$0xff] }
 0xd48   : > { %6703 = vmatprep.subr.mxu1 %v11577_v21  ;;  %6627 = vmatpush1.msra.mxu0 %v11581_v14  ;;  %12596 = vst [vmem:[#allocation21_spill] sm:$0xff] %v11647_v19  ;;  %12597 = vst [vmem:[#allocation28_spill] sm:$0xff] %v11649_v5  ;;  %v11667_v55 = vld [vmem:[#allocation9 + $0x90] sm:$0xff]  ;;  %v11671_v45 = vld [vmem:[#allocation9 + $0x68] sm:$0xff] }
 0xd49   : > { %6096 = vst [vmem:[%s8990_s20 + $0xfc] sm:$0x1] %v6064_v27  ;;  %6704 = vmatpush1.msra.mxu1 %v11583_v33  ;;  %6628 = vmatprep.subr.mxu0 %v11587_v60  ;;  %12598 = vst [vmem:[#allocation22_spill] sm:$0xff] %v11653_v0  ;;  %v11673_v56 = vld [vmem:[#allocation9 + $0x78] sm:$0xff]  ;;  %v11677_v53 = vld [vmem:[#allocation9 + $0x60] sm:$0xff] }
 0xd4a   : > { %6705 = vmatprep.subr.mxu1 %v11589_v61  ;;  %6629 = vmatpush1.msra.mxu0 %v11593_v37  ;;  %12599 = vst [vmem:[#allocation29_spill] sm:$0xff] %v11655_v43  ;;  %12600 = vst [vmem:[#allocation23_spill] sm:$0xff] %v11659_v51  ;;  %v11679_v26 = vld [vmem:[#allocation9 + $0x70] sm:$0xff]  ;;  %v11683_v17 = vld [vmem:[#allocation9 + $0x48] sm:$0xff] }
 0xd4b   : > { %6706 = vmatpush1.msra.mxu1 %v11595_v1  ;;  %6630 = vmatprep.subr.mxu0 %v11599_v22  ;;  %12601 = vst [vmem:[#allocation24_spill] sm:$0xff] %v11661_v32  ;;  %12602 = vst [vmem:[#allocation25_spill] sm:$0xff] %v11665_v41  ;;  %v11685_v23 = vld [vmem:[#allocation9 + $0x58] sm:$0xff]  ;;  %v11689_v50 = vld [vmem:[#allocation9 + $0x40] sm:$0xff] }
 0xd4c   : > { %6707 = vmatprep.subr.mxu1 %v11601_v18  ;;  %6631 = vmatpush1.msra.mxu0 %v11605_v57  ;;  %12603 = vst [vmem:[#allocation27_spill] sm:$0xff] %v11667_v55  ;;  %12604 = vst [vmem:[#allocation30_spill] sm:$0xff] %v11671_v45  ;;  %v11691_v24 = vld [vmem:[#allocation9 + $0x50] sm:$0xff]  ;;  %v11695_v49 = vld [vmem:[#allocation9 + $0x28] sm:$0xff] }
 0xd4d   : > { %6708 = vmatpush1.msra.mxu1 %v11607_v2  ;;  %6632 = vmatprep.subr.mxu0 %v11611_v54  ;;  %12605 = vst [vmem:[#allocation31_spill] sm:$0xff] %v11673_v56  ;;  %12606 = vst [vmem:[#allocation32_spill] sm:$0xff] %v11677_v53  ;;  %v11697_v27 = vld [vmem:[#allocation9 + $0x38] sm:$0xff] }
 0xd4e   : > { %6709 = vmatprep.subr.mxu1 %v11613_v42  ;;  %6633 = vmatpush1.msra.mxu0 %v11617_v20  ;;  %12607 = vst [vmem:[#allocation33_spill] sm:$0xff] %v11679_v26  ;;  %12608 = vst [vmem:[#allocation34_spill] sm:$0xff] %v11683_v17 }
 0xd4f   : > { %6710 = vmatpush1.msra.mxu1 %v11619_v58  ;;  %6634 = vmatprep.subr.mxu0 %v11623_v25  ;;  %12609 = vst [vmem:[#allocation35_spill] sm:$0xff] %v11685_v23  ;;  %12610 = vst [vmem:[#allocation36_spill] sm:$0xff] %v11689_v50 }
 0xd50   : > { %6711 = vmatprep.subr.mxu1 %v11625_v30  ;;  %6635 = vmatpush1.msra.mxu0 %v11629_v13  ;;  %12611 = vst [vmem:[#allocation37_spill] sm:$0xff] %v11691_v24  ;;  %12612 = vst [vmem:[#allocation38_spill] sm:$0xff] %v11695_v49 }
 0xd51   : > { %6712 = vmatpush1.msra.mxu1 %v11631_v34  ;;  %6636 = vmatprep.subr.mxu0 %v11635_v16  ;;  %12613 = vst [vmem:[#allocation39_spill] sm:$0xff] %v11697_v27 }
 0xd52   : > { %6713 = vmatprep.subr.mxu1 %v11637_v6  ;;  %6637 = vmatpush1.msra.mxu0 %v11641_v10 }
 0xd53   : > { %6714 = vmatpush1.msra.mxu1 %v11643_v52  ;;  %6638 = vmatprep.subr.mxu0 %v11647_v19 }
 0xd54   : > { %6715 = vmatprep.subr.mxu1 %v11649_v5  ;;  %6639 = vmatpush1.msra.mxu0 %v11653_v0  ;;  %v7910_v5 = vld [vmem:[%s8979_s19 + $0x350] sm:$0xff] }
 0xd55   : > { %6716 = vmatpush1.msra.mxu1 %v11655_v43  ;;  %6640 = vmatprep.subr.mxu0 %v11659_v51 }
 0xd56   : > { %6717 = vmatprep.subr.mxu1 %v11661_v32  ;;  %6641 = vmatpush1.msra.mxu0 %v11665_v41  ;;  %v7913_v32 = vld [vmem:[%s8979_s19 + $0x368] sm:$0xff] }
 0xd57   : > { %6718 = vmatpush1.msra.mxu1 %v11667_v55  ;;  %6642 = vmatprep.subr.mxu0 %v11671_v45 }
 0xd58   : > { %6719 = vmatprep.subr.mxu1 %v11673_v56  ;;  %6643 = vmatpush1.msra.mxu0 %v11677_v53  ;;  %v7912_v56 = vld [vmem:[%s8979_s19 + $0x360] sm:$0xff] }
 0xd59   : > { %6720 = vmatpush1.msra.mxu1 %v11679_v26  ;;  %6644 = vmatprep.subr.mxu0 %v11683_v17  ;;  %v11701_v17 = vld [vmem:[#allocation9 + $0x20] sm:$0xff]  ;;  %v7909_v26 = vld [vmem:[%s8979_s19 + $0x348] sm:$0xff] }
 0xd5a   : > { %6721 = vmatprep.subr.mxu1 %v11685_v23  ;;  %6645 = vmatpush1.msra.mxu0 %v11689_v50  ;;  %12614 = vst [vmem:[#allocation40_spill] sm:$0xff] %v11701_v17  ;;  %v11703_v23 = vld [vmem:[#allocation9 + $0x30] sm:$0xff]  ;;  %v11707_v50 = vld [vmem:[#allocation9 + $0x8] sm:$0xff] }
 0xd5b   : > { %6722 = vmatpush1.msra.mxu1 %v11691_v24  ;;  %6646 = vmatprep.subr.mxu0 %v11695_v49  ;;  %12615 = vst [vmem:[#allocation41_spill] sm:$0xff] %v11703_v23  ;;  %12616 = vst [vmem:[#allocation42_spill] sm:$0xff] %v11707_v50  ;;  %v11709_v24 = vld [vmem:[#allocation9 + $0x18] sm:$0xff]  ;;  %v11713_v49 = vld [vmem:[#allocation9] sm:$0xff] }
 0xd5c   : > { %6723 = vmatprep.subr.mxu1 %v11697_v27  ;;  %6647 = vmatpush1.msra.mxu0 %v11701_v17  ;;  %12617 = vst [vmem:[#allocation43_spill] sm:$0xff] %v11709_v24  ;;  %12618 = vst [vmem:[#allocation44_spill] sm:$0xff] %v11713_v49  ;;  %v11715_v27 = vld [vmem:[#allocation9 + $0x10] sm:$0xff] }
 0xd5d   : > { %6724 = vmatpush1.msra.mxu1 %v11703_v23  ;;  %6648 = vmatprep.subr.mxu0 %v11707_v50  ;;  %12619 = vst [vmem:[#allocation45_spill] sm:$0xff] %v11715_v27  ;;  %v7908_v23 = vld [vmem:[%s8979_s19 + $0x340] sm:$0xff] }
 0xd5e   : > { %6725 = vmatprep.subr.mxu1 %v11709_v24  ;;  %6649 = vmatpush1.msra.mxu0 %v11713_v49 }
 0xd5f   : > { %6726 = vmatpush1.msra.mxu1 %v11715_v27  ;;  %7061 = vmatprep.subr.mxu0 %v11399_v3 }
 0xd60   : > { %7138 = vmatprep.subr.mxu1 %v11401_v35 }
 0xdf9   : > { %v6241_v17 = vpop.f32.mrf.mxu0  ;;  %v6318_v50 = vpop.f32.mrf.mxu1 }
 0xdfa   : > { %v6329_v53 = vadd.f32 %v7908_v23, %v6241_v17  ;;  %v7911_v17 = vld [vmem:[%s8979_s19 + $0x358] sm:$0xff] }
 0xdfb   : > { %v6243_v24 = vpop.f32.mrf.mxu0  ;;  %v6320_v49 = vpop.f32.mrf.mxu1 }
 0xdfc   : > { %v7916_v45 = vmul.f32 -1.442695, %v6329_v53  ;;  %v6330_v55 = vadd.f32 %v7909_v26, %v6243_v24  ;;  %v6332_v53 = vadd.f32 %v7911_v17, %v6320_v49  ;;  %v7915_v26 = vld [vmem:[%s8979_s19 + $0x378] sm:$0xff] }
 0xdfe   : > { %v6247_v41 = vpop.f32.mrf.mxu0  ;;  %8508 = vpow2.f32 %v7916_v45  ;;  %v7918_v27 = vmul.f32 -1.442695, %v6330_v55  ;;  %v7920_v19 = vmul.f32 -1.442695, %v6332_v53  ;;  %v6331_v55 = vadd.f32 %v7910_v5, %v6318_v50 }
 0xdff   : > { %v6333_v3 = vadd.f32 %v7912_v56, %v6247_v41  ;;  %v6324_v23 = vpop.f32.mrf.mxu1  ;;  %v7914_v41 = vld [vmem:[%s8979_s19 + $0x370] sm:$0xff] }
 0xe00   : > { %v6249_v51 = vpop.f32.mrf.mxu0  ;;  %8510 = vpow2.f32 %v7918_v27 }
 0xe01   : > { %v7917_v35 = vmul.f32 -1.442695, %v6333_v3  ;;  %v6334_v43 = vadd.f32 %v7913_v32, %v6249_v51  ;;  %v6326_v24 = vpop.f32.mrf.mxu1  ;;  %v6335_v3 = vadd.f32 %v7914_v41, %v6324_v23  ;;  %v6392_v23 = vpop.permute.xlu0 %6391 }
 0xe02   : > { %v6336_v45 = vadd.f32 %v7915_v26, %v6326_v24  ;;  %vm6396_vm10 = vcmp.eq.s32.totalorder %v6392_v23, 1 }
 0xe03   : > { %8512 = vpow2.f32 %v7917_v35  ;;  %v7919_v0 = vmul.f32 -1.442695, %v6334_v43 }
 0xe04   : > { %v7921_v27 = vmul.f32 -1.442695, %v6336_v45 }
 0xe05   : > { %8514 = vpow2.f32 %v7919_v0 }
 0xe06   : > { %8516 = vpow2.f32 %v7920_v19 }
 0xe0b   : > { %v8509_v52 = vpop.eup %8508 }
 0xe0c   : > { %v6343_v10 = vadd.f32 1.0, %v8509_v52 }
 0xe0d   : > { %v8511_v56 = vpop.eup %8510 }
 0xe0e   : > { %8518 = vrcp.f32 %v6343_v10  ;;  %v6355_v51 = vadd.f32 1.0, %v8511_v56 }
 0xe0f   : > { %8520 = vtanh.f32 %v6331_v55 }
 0xe10   : > { %v8513_v32 = vpop.eup %8512  ;;  %8522 = vrcp.f32 %v6355_v51 }
 0xe11   : > { %v6344_v0 = vadd.f32 1.0, %v8513_v32  ;;  %8524 = vpow2.f32 %v7921_v27  ;;  %v6395_v32 = vpop.permute.xlu1 %6394 }
 0xe12   : > { %v8515_v43 = vpop.eup %8514  ;;  %vm6397_vm11 = vcmp.eq.s32.totalorder %v6395_v32, 1 }
 0xe13   : > { %8526 = vrcp.f32 %v6344_v0  ;;  %v6356_v49 = vadd.f32 1.0, %v8515_v43  ;;  %v8517_v35 = vpop.eup %8516 }
 0xe14   : > { %8528 = vtanh.f32 %v6335_v3  ;;  %v6369_v17 = vadd.f32 1.0, %v8517_v35 }
 0xe15   : > { %8530 = vrcp.f32 %v6356_v49 }
 0xe16   : > { %8532 = vrcp.f32 %v6369_v17 }
 0xe1b   : > { %v8519_v5 = vpop.eup %8518 }
 0xe1c   : > { %v8521_v52 = vpop.eup %8520 }
 0xe1d   : > { %v8523_v50 = vpop.eup %8522  ;;  %v6377_v53 = vmul.f32 %v8521_v52, %v8519_v5 }
 0xe1e   : > { %v8525_v19 = vpop.eup %8524  ;;  %v6375_v10 = vmul.f32 %v8523_v50, %v11496_v40 }
 0xe1f   : > { %v6370_v41 = vadd.f32 1.0, %v8525_v19 }
 0xe20   : > { %v8527_v26 = vpop.eup %8526  ;;  %v6379_v45 = vadd.f32 %v6377_v53, %v6375_v10 }
 0xe21   : > { %v8529_v24 = vpop.eup %8528 }
 0xe22   : > { %v8531_v55 = vpop.eup %8530  ;;  %8534 = vtanh.f32 %v6379_v45  ;;  %v11732_v56 = vsel %vm6396_vm10, %v6379_v45, %v11496_v40  ;;  %v6378_v27 = vmul.f32 %v8529_v24, %v8527_v26 }
 0xe23   : > { %v6376_v51 = vmul.f32 %v8531_v55, %v11501_v8  ;;  %8536 = vrcp.f32 %v6370_v41  ;;  %v8533_v43 = vpop.eup %8532 }
 0xe25   : > { %v6380_v3 = vadd.f32 %v6378_v27, %v6376_v51 }
 0xe27   : > { %8538 = vtanh.f32 %v6380_v3  ;;  %v11737_v0 = vsel %vm6397_vm11, %v6380_v3, %v11501_v8 }
 0xe2f   : > { %v8535_v49 = vpop.eup %8534 }
 0xe30   : > { %v6383_v35 = vmul.f32 %v8535_v49, %v8533_v43  ;;  %v8537_v5 = vpop.eup %8536  ;;  %v12645_v49 = vld [vmem:[#allocation45_spill] sm:$0xff] }
 0xe32   : > { %v11741_v40 = vsel %vm6396_vm10, %v6383_v35, %v11505_v29  ;;  %v6406_v52 = vsel %vm6396_vm10, %v6383_v35, 0.0  ;;  %v7930_v35 = vld [vmem:[%s8979_s19 + $0x380] sm:$0xff] }
 0xe33   : > { %v6410_v17 = vcombine.high %v6406_v52, %v6406_v52  ;;  %v6417_v19 = vrot.slane %v6406_v52, %v9431_v4  ;;  %6683 = vmatmul.mubr.f32.vlgmr.msra.gmra.mxu0 %v11741_v40  ;;  %6760 = vmatmul.mubr.f32.vlgmr.msra.gmra.mxu1 %v11741_v40  ;;  %v7931_v52 = vld [vmem:[%s8979_s19 + $0x388] sm:$0xff] }
 0xe34   : > { %v8539_v50 = vpop.eup %8538  ;;  %6688 = vmatprep.mubr.f32.mxu0 %v12303_v63  ;;  %6765 = vmatprep.mubr.f32.mxu1 %v12303_v63 }
 0xe35   : > { %v6384_v8 = vmul.f32 %v8539_v50, %v8537_v5  ;;  %v6424_v29 = vrot.slane %v6410_v17, %v9431_v4  ;;  %v6425_v53 = vcombine.high %v6417_v19, %v6417_v19  ;;  %v6433_v10 = vrot.slane %v6417_v19, %v9431_v4  ;;  %7922 = vst.sshfl [vmem:[%s8990_s20 + $0xd] sm:$0x1 pattern:$0x73625140] %v6417_v19 }
 0xe36   : > { %7062 = vmatpush1.msra.mxu0 %v11405_v46  ;;  %7139 = vmatpush1.msra.mxu1 %v11407_v11 }
 0xe37   : > { %v11756_v26 = vsel %vm6397_vm11, %v6384_v8, %v11520_v38  ;;  %v6407_v24 = vsel %vm6397_vm11, %v6384_v8, 0.0  ;;  %7063 = vmatprep.subr.mxu0 %v11411_v15  ;;  %7140 = vmatprep.subr.mxu1 %v11413_v59  ;;  %v6426_v23 = vcombine.high %v6424_v29, %v6424_v29  ;;  %v6440_v45 = vrot.slane %v6424_v29, %v9431_v4  ;;  %v7934_v8 = vld [vmem:[%s8979_s19 + $0x3a0] sm:$0xff] }
 0xe38   : > { %v6447_v55 = vrot.slane %v6425_v53, %v9431_v4  ;;  %v6455_v46 = vcombine.high %v6433_v10, %v6433_v10  ;;  %7923 = vst.sshfl [vmem:[%s8990_s20 + $0x1d] sm:$0x1 pattern:$0x73625140] %v6425_v53  ;;  %6689 = vmatmul.mubr.f32.gmra.mxu0 %v11756_v26  ;;  %v6459_v11 = vcombine.high %v6407_v24, %v6407_v24 }
 0xe39   : > { %7924 = vst.sshfl [vmem:[%s8990_s20 + $0x4d] sm:$0x1 pattern:$0x73625140] %v6424_v29  ;;  %v6466_v38 = vrot.slane %v6407_v24, %v9431_v4  ;;  %6766 = vmatmul.mubr.f32.gmra.mxu1 %v11756_v26  ;;  %7064 = vmatpush1.msra.mxu0 %v11417_v28  ;;  %v6454_v15 = vrot.slane %v6426_v23, %v9431_v4  ;;  %v7935_v24 = vld [vmem:[%s8979_s19 + $0x3a8] sm:$0xff] }
 0xe3a   : > { %v6456_v59 = vcombine.high %v6440_v45, %v6440_v45  ;;  %v6457_v41 = vcombine.high %v6447_v55, %v6447_v55  ;;  %6526 = vst [vmem:[%s8990_s20 + $0x2d] sm:$0x1] %v6455_v46  ;;  %7925 = vst.sshfl [vmem:[%s8990_s20 + $0x5d] sm:$0x1 pattern:$0x73625140] %v6426_v23  ;;  %7141 = vmatpush1.msra.mxu1 %v11419_v62  ;;  %7065 = vmatprep.subr.mxu0 %v11423_v44 }
 0xe3b   : > { %v6473_v27 = vrot.slane %v6459_v11, %v9431_v4  ;;  %v6474_v51 = vcombine.high %v6466_v38, %v6466_v38  ;;  %v6482_v32 = vrot.slane %v6466_v38, %v9431_v4  ;;  %7926 = vst.sshfl [vmem:[%s8990_s20 + $0x8d] sm:$0x1 pattern:$0x73625140] %v6466_v38  ;;  %7142 = vmatprep.subr.mxu1 %v11425_v12 }
 0xe3c   : > { %7066 = vmatpush1.msra.mxu0 %v11557_v36  ;;  %v6458_v28 = vcombine.high %v6454_v15, %v6454_v15  ;;  %6527 = vst [vmem:[%s8990_s20 + $0x3d] sm:$0x1] %v6457_v41  ;;  %6530 = vst [vmem:[%s8990_s20 + $0x6d] sm:$0x1] %v6456_v59  ;;  %7143 = vmatpush1.msra.mxu1 %v11559_v47  ;;  %v7933_v15 = vld [vmem:[%s8979_s19 + $0x398] sm:$0xff] }
 0xe3d   : > { %7067 = vmatprep.subr.mxu0 %v11563_v39  ;;  %v6475_v62 = vcombine.high %v6473_v27, %v6473_v27  ;;  %v6489_v44 = vrot.slane %v6473_v27, %v9431_v4  ;;  %v6496_v3 = vrot.slane %v6474_v51, %v9431_v4  ;;  %v6504_v43 = vcombine.high %v6482_v32, %v6482_v32 }
 0xe3e   : > { %7927 = vst.sshfl [vmem:[%s8990_s20 + $0x9d] sm:$0x1 pattern:$0x73625140] %v6474_v51  ;;  %7144 = vmatprep.subr.mxu1 %v11565_v9  ;;  %6531 = vst [vmem:[%s8990_s20 + $0x7d] sm:$0x1] %v6458_v28  ;;  %7068 = vmatpush1.msra.mxu0 %v11569_v7 }
 0xe3f   : > { %7928 = vst.sshfl [vmem:[%s8990_s20 + $0xcd] sm:$0x1 pattern:$0x73625140] %v6473_v27  ;;  %7145 = vmatpush1.msra.mxu1 %v11571_v48  ;;  %v6503_v12 = vrot.slane %v6475_v62, %v9431_v4  ;;  %v6505_v36 = vcombine.high %v6489_v44, %v6489_v44  ;;  %v6506_v47 = vcombine.high %v6496_v3, %v6496_v3  ;;  %6534 = vst [vmem:[%s8990_s20 + $0xad] sm:$0x1] %v6504_v43 }
 0xe40   : > { %7929 = vst.sshfl [vmem:[%s8990_s20 + $0xdd] sm:$0x1 pattern:$0x73625140] %v6475_v62  ;;  %7069 = vmatprep.subr.mxu0 %v11575_v31  ;;  %7146 = vmatprep.subr.mxu1 %v11577_v21  ;;  %v12620_v9 = vld [vmem:[#allocation20_spill] sm:$0xff]  ;;  %v12621_v7 = vld [vmem:[#allocation26_spill] sm:$0xff] }
 0xe41   : > { %7070 = vmatpush1.msra.mxu0 %v11581_v14  ;;  %7147 = vmatpush1.msra.mxu1 %v11583_v33  ;;  %v6507_v39 = vcombine.high %v6503_v12, %v6503_v12  ;;  %6535 = vst [vmem:[%s8990_s20 + $0xbd] sm:$0x1] %v6506_v47  ;;  %6538 = vst [vmem:[%s8990_s20 + $0xed] sm:$0x1] %v6505_v36  ;;  %v12622_v48 = vld [vmem:[#allocation21_spill] sm:$0xff]  ;;  %v12623_v31 = vld [vmem:[#allocation28_spill] sm:$0xff] }
 0xe42   : > { %7071 = vmatprep.subr.mxu0 %v11587_v60  ;;  %7148 = vmatprep.subr.mxu1 %v11589_v61  ;;  %v12624_v21 = vld [vmem:[#allocation22_spill] sm:$0xff]  ;;  %v12625_v14 = vld [vmem:[#allocation29_spill] sm:$0xff]  ;;  %v12626_v33 = vld [vmem:[#allocation23_spill] sm:$0xff] }
 0xe43   : > { %7072 = vmatpush1.msra.mxu0 %v11593_v37  ;;  %7149 = vmatpush1.msra.mxu1 %v11595_v1  ;;  %6539 = vst [vmem:[%s8990_s20 + $0xfd] sm:$0x1] %v6507_v39  ;;  %v12627_v60 = vld [vmem:[#allocation24_spill] sm:$0xff]  ;;  %v12628_v61 = vld [vmem:[#allocation25_spill] sm:$0xff]  ;;  %v12629_v37 = vld [vmem:[#allocation27_spill] sm:$0xff] }
 0xe44   : > { %7073 = vmatprep.subr.mxu0 %v11599_v22  ;;  %7150 = vmatprep.subr.mxu1 %v11601_v18  ;;  %v12630_v1 = vld [vmem:[#allocation30_spill] sm:$0xff]  ;;  %v12631_v22 = vld [vmem:[#allocation31_spill] sm:$0xff]  ;;  %v12632_v18 = vld [vmem:[#allocation32_spill] sm:$0xff] }
 0xe45   : > { %7074 = vmatpush1.msra.mxu0 %v11605_v57  ;;  %7151 = vmatpush1.msra.mxu1 %v11607_v2  ;;  %v12633_v57 = vld [vmem:[#allocation33_spill] sm:$0xff]  ;;  %v12634_v2 = vld [vmem:[#allocation34_spill] sm:$0xff]  ;;  %v7932_v28 = vld [vmem:[%s8979_s19 + $0x390] sm:$0xff] }
 0xe46   : > { %7075 = vmatprep.subr.mxu0 %v11611_v54  ;;  %7152 = vmatprep.subr.mxu1 %v11613_v42  ;;  %v12635_v54 = vld [vmem:[#allocation35_spill] sm:$0xff]  ;;  %v12636_v42 = vld [vmem:[#allocation36_spill] sm:$0xff]  ;;  %v7937_v51 = vld [vmem:[%s8979_s19 + $0x3b8] sm:$0xff] }
 0xe47   : > { %7076 = vmatpush1.msra.mxu0 %v11617_v20  ;;  %7153 = vmatpush1.msra.mxu1 %v11619_v58  ;;  %v12637_v20 = vld [vmem:[#allocation37_spill] sm:$0xff]  ;;  %v12638_v58 = vld [vmem:[#allocation38_spill] sm:$0xff]  ;;  %v7936_v36 = vld [vmem:[%s8979_s19 + $0x3b0] sm:$0xff] }
 0xe48   : > { %7077 = vmatprep.subr.mxu0 %v11623_v25  ;;  %7154 = vmatprep.subr.mxu1 %v11625_v30  ;;  %v12639_v25 = vld [vmem:[#allocation39_spill] sm:$0xff]  ;;  %v12640_v30 = vld [vmem:[#allocation40_spill] sm:$0xff] }
 0xe49   : > { %7078 = vmatpush1.msra.mxu0 %v11629_v13  ;;  %7155 = vmatpush1.msra.mxu1 %v11631_v34  ;;  %v12641_v13 = vld [vmem:[#allocation41_spill] sm:$0xff]  ;;  %v12642_v34 = vld [vmem:[#allocation42_spill] sm:$0xff] }
 0xe4a   : > { %7079 = vmatprep.subr.mxu0 %v11635_v16  ;;  %7156 = vmatprep.subr.mxu1 %v11637_v6  ;;  %v12643_v16 = vld [vmem:[#allocation43_spill] sm:$0xff]  ;;  %v12644_v6 = vld [vmem:[#allocation44_spill] sm:$0xff] }
 0xe4b   : > { %7080 = vmatpush1.msra.mxu0 %v12620_v9  ;;  %7157 = vmatpush1.msra.mxu1 %v12621_v7 }
 0xe4c   : > { %7081 = vmatprep.subr.mxu0 %v12622_v48  ;;  %7158 = vmatprep.subr.mxu1 %v12623_v31 }
 0xe4d   : > { %7082 = vmatpush1.msra.mxu0 %v12624_v21  ;;  %7159 = vmatpush1.msra.mxu1 %v12625_v14 }
 0xe4e   : > { %7083 = vmatprep.subr.mxu0 %v12626_v33  ;;  %7160 = vmatprep.subr.mxu1 %v12627_v60 }
 0xe4f   : > { %7084 = vmatpush1.msra.mxu0 %v12628_v61  ;;  %7161 = vmatpush1.msra.mxu1 %v12629_v37 }
 0xe50   : > { %7085 = vmatprep.subr.mxu0 %v12630_v1  ;;  %7162 = vmatprep.subr.mxu1 %v12631_v22 }
 0xe51   : > { %7086 = vmatpush1.msra.mxu0 %v12632_v18  ;;  %7163 = vmatpush1.msra.mxu1 %v12633_v57 }
 0xe52   : > { %7087 = vmatprep.subr.mxu0 %v12634_v2  ;;  %7164 = vmatprep.subr.mxu1 %v12635_v54 }
 0xe53   : > { %7088 = vmatpush1.msra.mxu0 %v12636_v42  ;;  %7165 = vmatpush1.msra.mxu1 %v12637_v20  ;;  %v6835_v42 = vpop.permute.xlu0 %6834 }
 0xe54   : > { %7089 = vmatprep.subr.mxu0 %v12638_v58  ;;  %7166 = vmatprep.subr.mxu1 %v12639_v25  ;;  %vm6839_vm12 = vcmp.eq.s32.totalorder %v6835_v42, 1  ;;  %v7955_v42 = vld [vmem:[%s8979_s19 + $0x3d8] sm:$0xff] }
 0xe55   : > { %7090 = vmatpush1.msra.mxu0 %v12640_v30  ;;  %7167 = vmatpush1.msra.mxu1 %v12641_v13 }
 0xe56   : > { %7091 = vmatprep.subr.mxu0 %v12642_v34  ;;  %7168 = vmatprep.subr.mxu1 %v12643_v16  ;;  %v6838_v16 = vpop.permute.xlu1 %6837 }
 0xe57   : > { %7092 = vmatpush1.msra.mxu0 %v12644_v6  ;;  %7125 = vmatprep.mubr.f32.mxu0 %v12303_v63  ;;  %vm6840_vm13 = vcmp.eq.s32.totalorder %v6838_v16, 1  ;;  %v7954_v16 = vld [vmem:[%s8979_s19 + $0x3d0] sm:$0xff] }
 0xe58   : > { %7169 = vmatpush1.msra.mxu1 %v12645_v49  ;;  %7202 = vmatprep.mubr.f32.mxu1 %v12303_v63 }
 0xef3   : > { %v6684_v5 = vpop.f32.mrf.mxu0  ;;  %v6761_v17 = vpop.f32.mrf.mxu1 }
 0xef4   : > { %v6772_v50 = vadd.f32 %v7930_v35, %v6684_v5  ;;  %v6774_v43 = vadd.f32 %v7932_v28, %v6761_v17 }
 0xef5   : > { %v6686_v19 = vpop.f32.mrf.mxu0  ;;  %v6763_v45 = vpop.f32.mrf.mxu1 }
 0xef6   : > { %v7938_v29 = vmul.f32 -1.442695, %v6772_v50  ;;  %v6773_v53 = vadd.f32 %v7931_v52, %v6686_v19  ;;  %v6775_v27 = vadd.f32 %v7933_v15, %v6763_v45 }
 0xef8   : > { %v6690_v10 = vpop.f32.mrf.mxu0  ;;  %8540 = vpow2.f32 %v7938_v29  ;;  %v7940_v23 = vmul.f32 -1.442695, %v6773_v53  ;;  %v7942_v62 = vmul.f32 -1.442695, %v6775_v27 }
 0xef9   : > { %v6776_v55 = vadd.f32 %v7934_v8, %v6690_v10  ;;  %v6767_v59 = vpop.f32.mrf.mxu1 }
 0xefa   : > { %v6692_v46 = vpop.f32.mrf.mxu0  ;;  %8542 = vpow2.f32 %v7940_v23  ;;  %v6778_v48 = vadd.f32 %v7936_v36, %v6767_v59 }
 0xefb   : > { %v7939_v11 = vmul.f32 -1.442695, %v6776_v55  ;;  %v6777_v38 = vadd.f32 %v7935_v24, %v6692_v46  ;;  %v6769_v32 = vpop.f32.mrf.mxu1 }
 0xefc   : > { %v6779_v44 = vadd.f32 %v7937_v51, %v6769_v32 }
 0xefd   : > { %8544 = vpow2.f32 %v7939_v11  ;;  %v7941_v41 = vmul.f32 -1.442695, %v6777_v38 }
 0xefe   : > { %v7943_v39 = vmul.f32 -1.442695, %v6779_v44 }
 0xeff   : > { %8546 = vpow2.f32 %v7941_v41 }
 0xf00   : > { %8548 = vpow2.f32 %v7942_v62 }
 0xf05   : > { %v8541_v3 = vpop.eup %8540 }
 0xf06   : > { %v6786_v12 = vadd.f32 1.0, %v8541_v3 }
 0xf07   : > { %v8543_v47 = vpop.eup %8542 }
 0xf08   : > { %8550 = vrcp.f32 %v6786_v12  ;;  %v6798_v9 = vadd.f32 1.0, %v8543_v47 }
 0xf09   : > { %8552 = vtanh.f32 %v6774_v43 }
 0xf0a   : > { %v8545_v7 = vpop.eup %8544  ;;  %8554 = vrcp.f32 %v6798_v9 }
 0xf0b   : > { %v6787_v31 = vadd.f32 1.0, %v8545_v7  ;;  %8556 = vpow2.f32 %v7943_v39  ;;  %v7952_v39 = vld [vmem:[%s8979_s19 + $0x3c0] sm:$0xff]  ;;  %v7953_v7 = vld [vmem:[%s8979_s19 + $0x3c8] sm:$0xff] }
 0xf0c   : > { %v8547_v21 = vpop.eup %8546 }
 0xf0d   : > { %8558 = vrcp.f32 %v6787_v31  ;;  %v6799_v14 = vadd.f32 1.0, %v8547_v21  ;;  %v8549_v33 = vpop.eup %8548 }
 0xf0e   : > { %8560 = vtanh.f32 %v6778_v48  ;;  %v6812_v1 = vadd.f32 1.0, %v8549_v33 }
 0xf0f   : > { %8562 = vrcp.f32 %v6799_v14  ;;  %v7956_v14 = vld [vmem:[%s8979_s19 + $0x3e0] sm:$0xff] }
 0xf10   : > { %8564 = vrcp.f32 %v6812_v1 }
 0xf15   : > { %v8551_v60 = vpop.eup %8550 }
 0xf16   : > { %v8553_v61 = vpop.eup %8552 }
 0xf17   : > { %v8555_v37 = vpop.eup %8554  ;;  %v6820_v18 = vmul.f32 %v8553_v61, %v8551_v60 }
 0xf18   : > { %v8557_v22 = vpop.eup %8556  ;;  %v6818_v57 = vmul.f32 %v8555_v37, %v11732_v56  ;;  %v7957_v37 = vld [vmem:[%s8979_s19 + $0x3e8] sm:$0xff] }
 0xf19   : > { %v6813_v25 = vadd.f32 1.0, %v8557_v22 }
 0xf1a   : > { %v8559_v2 = vpop.eup %8558  ;;  %v6822_v20 = vadd.f32 %v6820_v18, %v6818_v57 }
 0xf1b   : > { %v8561_v54 = vpop.eup %8560 }
 0xf1c   : > { %v8563_v58 = vpop.eup %8562  ;;  %8566 = vtanh.f32 %v6822_v20  ;;  %v11858_v30 = vsel %vm6839_vm12, %v6822_v20, %v11732_v56  ;;  %v6821_v13 = vmul.f32 %v8561_v54, %v8559_v2 }
 0xf1d   : > { %v6819_v34 = vmul.f32 %v8563_v58, %v11737_v0  ;;  %8568 = vrcp.f32 %v6813_v25  ;;  %v8565_v35 = vpop.eup %8564 }
 0xf1f   : > { %v6823_v6 = vadd.f32 %v6821_v13, %v6819_v34  ;;  %v7959_v13 = vld [vmem:[%s8979_s19 + $0x3f8] sm:$0xff] }
 0xf21   : > { %8570 = vtanh.f32 %v6823_v6  ;;  %v11863_v49 = vsel %vm6840_vm13, %v6823_v6, %v11737_v0 }
 0xf29   : > { %v8567_v5 = vpop.eup %8566 }
 0xf2a   : > { %v6826_v52 = vmul.f32 %v8567_v5, %v8565_v35  ;;  %v8569_v50 = vpop.eup %8568 }
 0xf2c   : > { %v11867_v56 = vsel %vm6839_vm12, %v6826_v52, %v11741_v40  ;;  %v6849_v17 = vsel %vm6839_vm12, %v6826_v52, 0.0 }
 0xf2d   : > { %v6853_v8 = vcombine.high %v6849_v17, %v6849_v17  ;;  %v6860_v29 = vrot.slane %v6849_v17, %v9431_v4  ;;  %7126 = vmatmul.mubr.f32.vlgmr.msra.gmra.mxu0 %v11867_v56  ;;  %7203 = vmatmul.mubr.f32.vlgmr.msra.gmra.mxu1 %v11867_v56  ;;  %v7958_v17 = vld [vmem:[%s8979_s19 + $0x3f0] sm:$0xff] }
 0xf2e   : > { %v8571_v19 = vpop.eup %8570  ;;  %7131 = vmatprep.mubr.f32.mxu0 %v12303_v63  ;;  %7208 = vmatprep.mubr.f32.mxu1 %v12303_v63 }
 0xf2f   : > { %v6827_v0 = vmul.f32 %v8571_v19, %v8569_v50  ;;  %v6867_v40 = vrot.slane %v6853_v8, %v9431_v4  ;;  %v6868_v53 = vcombine.high %v6860_v29, %v6860_v29  ;;  %v6876_v10 = vrot.slane %v6860_v29, %v9431_v4  ;;  %7944 = vst.sshfl [vmem:[%s8990_s20 + $0xe] sm:$0x1 pattern:$0x73625140] %v6860_v29 }
 0xf31   : > { %v11880_v24 = vsel %vm6840_vm13, %v6827_v0, %v11756_v26  ;;  %v6850_v23 = vsel %vm6840_vm13, %v6827_v0, 0.0  ;;  %v6869_v45 = vcombine.high %v6867_v40, %v6867_v40  ;;  %v6883_v55 = vrot.slane %v6867_v40, %v9431_v4  ;;  %7945 = vst.sshfl [vmem:[%s8990_s20 + $0x1e] sm:$0x1 pattern:$0x73625140] %v6868_v53 }
 0xf32   : > { %v6890_v46 = vrot.slane %v6868_v53, %v9431_v4  ;;  %v6898_v63 = vcombine.high %v6876_v10, %v6876_v10  ;;  %7946 = vst.sshfl [vmem:[%s8990_s20 + $0x4e] sm:$0x1 pattern:$0x73625140] %v6867_v40  ;;  %7132 = vmatmul.mubr.f32.gmra.mxu0 %v11880_v24  ;;  %v6902_v11 = vcombine.high %v6850_v23, %v6850_v23 }
 0xf33   : > { %v6909_v26 = vrot.slane %v6850_v23, %v9431_v4  ;;  %7209 = vmatmul.mubr.f32.gmra.mxu1 %v11880_v24  ;;  %v6897_v38 = vrot.slane %v6869_v45, %v9431_v4  ;;  %v6899_v15 = vcombine.high %v6883_v55, %v6883_v55  ;;  %7947 = vst.sshfl [vmem:[%s8990_s20 + $0x5e] sm:$0x1 pattern:$0x73625140] %v6869_v45 }
 0xf34   : > { %v6900_v59 = vcombine.high %v6890_v46, %v6890_v46  ;;  %6969 = vst [vmem:[%s8990_s20 + $0x2e] sm:$0x1] %v6898_v63  ;;  %v6916_v41 = vrot.slane %v6902_v11, %v9431_v4 }
 0xf35   : > { %v6917_v27 = vcombine.high %v6909_v26, %v6909_v26  ;;  %v6925_v51 = vrot.slane %v6909_v26, %v9431_v4  ;;  %7948 = vst.sshfl [vmem:[%s8990_s20 + $0x8e] sm:$0x1 pattern:$0x73625140] %v6909_v26  ;;  %v6901_v32 = vcombine.high %v6897_v38, %v6897_v38  ;;  %6973 = vst [vmem:[%s8990_s20 + $0x6e] sm:$0x1] %v6899_v15  ;;  %v7278_v38 = vpop.permute.xlu0 %7277 }
 0xf36   : > { %6970 = vst [vmem:[%s8990_s20 + $0x3e] sm:$0x1] %v6900_v59  ;;  %v6918_v28 = vcombine.high %v6916_v41, %v6916_v41  ;;  %v6932_v62 = vrot.slane %v6916_v41, %v9431_v4  ;;  %7950 = vst.sshfl [vmem:[%s8990_s20 + $0xce] sm:$0x1 pattern:$0x73625140] %v6916_v41 }
 0xf37   : > { %v6939_v44 = vrot.slane %v6917_v27, %v9431_v4  ;;  %v6947_v3 = vcombine.high %v6925_v51, %v6925_v51  ;;  %7949 = vst.sshfl [vmem:[%s8990_s20 + $0x9e] sm:$0x1 pattern:$0x73625140] %v6917_v27  ;;  %6974 = vst [vmem:[%s8990_s20 + $0x7e] sm:$0x1] %v6901_v32 }
 0xf38   : > { %v6946_v43 = vrot.slane %v6918_v28, %v9431_v4  ;;  %v6948_v12 = vcombine.high %v6932_v62, %v6932_v62  ;;  %7951 = vst.sshfl [vmem:[%s8990_s20 + $0xde] sm:$0x1 pattern:$0x73625140] %v6918_v28  ;;  %vm7282_vm14 = vcmp.eq.s32.totalorder %v7278_v38, 1  ;;  %v7281_v62 = vpop.permute.xlu1 %7280 }
 0xf39   : > { %v6949_v36 = vcombine.high %v6939_v44, %v6939_v44  ;;  %6977 = vst [vmem:[%s8990_s20 + $0xae] sm:$0x1] %v6947_v3  ;;  %vm7283_vm15 = vcmp.eq.s32.totalorder %v7281_v62, 1 }
 0xf3a   : > { %v6950_v47 = vcombine.high %v6946_v43, %v6946_v43  ;;  %6981 = vst [vmem:[%s8990_s20 + $0xee] sm:$0x1] %v6948_v12 }
 0xf3b   : > { %6978 = vst [vmem:[%s8990_s20 + $0xbe] sm:$0x1] %v6949_v36 }
 0xf3c   : > { %6982 = vst [vmem:[%s8990_s20 + $0xfe] sm:$0x1] %v6950_v47 }
 0xfed   : > { %v7127_v9 = vpop.f32.mrf.mxu0  ;;  %v7204_v31 = vpop.f32.mrf.mxu1 }
 0xfee   : > { %v7215_v48 = vadd.f32 %v7952_v39, %v7127_v9  ;;  %v7217_v52 = vadd.f32 %v7954_v16, %v7204_v31 }
 0xfef   : > { %v7129_v21 = vpop.f32.mrf.mxu0  ;;  %v7206_v22 = vpop.f32.mrf.mxu1 }
 0xff0   : > { %v7960_v33 = vmul.f32 -1.442695, %v7215_v48  ;;  %v7216_v60 = vadd.f32 %v7953_v7, %v7129_v21  ;;  %v7218_v25 = vadd.f32 %v7955_v42, %v7206_v22 }
 0xff2   : > { %v7133_v61 = vpop.f32.mrf.mxu0  ;;  %8572 = vpow2.f32 %v7960_v33  ;;  %v7962_v1 = vmul.f32 -1.442695, %v7216_v60  ;;  %v7964_v6 = vmul.f32 -1.442695, %v7218_v25 }
 0xff3   : > { %v7219_v18 = vadd.f32 %v7956_v14, %v7133_v61  ;;  %v7210_v20 = vpop.f32.mrf.mxu1 }
 0xff4   : > { %v7135_v57 = vpop.f32.mrf.mxu0  ;;  %8574 = vpow2.f32 %v7962_v1  ;;  %v7221_v40 = vadd.f32 %v7958_v17, %v7210_v20 }
 0xff5   : > { %v7961_v2 = vmul.f32 -1.442695, %v7219_v18  ;;  %v7220_v54 = vadd.f32 %v7957_v37, %v7135_v57  ;;  %v7212_v34 = vpop.f32.mrf.mxu1 }
 0xff6   : > { %v7222_v35 = vadd.f32 %v7959_v13, %v7212_v34 }
 0xff7   : > { %8576 = vpow2.f32 %v7961_v2  ;;  %v7963_v58 = vmul.f32 -1.442695, %v7220_v54 }
 0xff8   : > { %v7965_v8 = vmul.f32 -1.442695, %v7222_v35 }
 0xff9   : > { %8578 = vpow2.f32 %v7963_v58 }
 0xffa   : > { %8580 = vpow2.f32 %v7964_v6 }
 0xfff   : > { %v8573_v5 = vpop.eup %8572 }
0x1000   : > { %v7229_v50 = vadd.f32 1.0, %v8573_v5 }
0x1001   : > { %v8575_v19 = vpop.eup %8574 }
0x1002   : > { %8582 = vrcp.f32 %v7229_v50  ;;  %v7241_v29 = vadd.f32 1.0, %v8575_v19 }
0x1003   : > { %8584 = vtanh.f32 %v7217_v52 }
0x1004   : > { %v8577_v0 = vpop.eup %8576  ;;  %8586 = vrcp.f32 %v7241_v29 }
0x1005   : > { %v7230_v53 = vadd.f32 1.0, %v8577_v0  ;;  %8588 = vpow2.f32 %v7965_v8 }
0x1006   : > { %v8579_v10 = vpop.eup %8578 }
0x1007   : > { %8590 = vrcp.f32 %v7230_v53  ;;  %v7242_v23 = vadd.f32 1.0, %v8579_v10  ;;  %v8581_v45 = vpop.eup %8580 }
0x1008   : > { %8592 = vtanh.f32 %v7221_v40  ;;  %v7255_v11 = vadd.f32 1.0, %v8581_v45 }
0x1009   : > { %8594 = vrcp.f32 %v7242_v23 }
0x100a   : > { %8596 = vrcp.f32 %v7255_v11 }
0x100f   : > { %v8583_v55 = vpop.eup %8582 }
0x1010   : > { %v8585_v46 = vpop.eup %8584 }
0x1011   : > { %v8587_v63 = vpop.eup %8586  ;;  %v7263_v15 = vmul.f32 %v8585_v46, %v8583_v55 }
0x1012   : > { %v8589_v26 = vpop.eup %8588  ;;  %v7261_v59 = vmul.f32 %v8587_v63, %v11858_v30 }
0x1013   : > { %v7256_v28 = vadd.f32 1.0, %v8589_v26 }
0x1014   : > { %v8591_v41 = vpop.eup %8590  ;;  %v7265_v51 = vadd.f32 %v7263_v15, %v7261_v59 }
0x1015   : > { %v8593_v27 = vpop.eup %8592 }
0x1016   : > { %v8595_v32 = vpop.eup %8594  ;;  %8598 = vtanh.f32 %v7265_v51  ;;  %v7288_v44 = vsel %vm7282_vm14, %v7265_v51, %v11858_v30  ;;  %v7264_v3 = vmul.f32 %v8593_v27, %v8591_v41 }
0x1017   : > { %v7262_v43 = vmul.f32 %v8595_v32, %v11863_v49  ;;  %7290 = vst [vmem:[#allocation3 + $0x8] sm:$0xff] %v7288_v44  ;;  %8600 = vrcp.f32 %v7256_v28  ;;  %v8597_v47 = vpop.eup %8596 }
0x1019   : > { %v7266_v12 = vadd.f32 %v7264_v3, %v7262_v43 }
0x101b   : > { %8602 = vtanh.f32 %v7266_v12  ;;  %v7289_v36 = vsel %vm7283_vm15, %v7266_v12, %v11863_v49 }
0x101c   : > { %7291 = vst [vmem:[#allocation3] sm:$0xff] %v7289_v36 }
0x1023   : > { %v8599_v39 = vpop.eup %8598 }
0x1024   : > { %v7269_v9 = vmul.f32 %v8599_v39, %v8597_v47  ;;  %v8601_v7 = vpop.eup %8600 }
0x1026   : > { %v7284_v30 = vsel %vm7282_vm14, %v7269_v9, %v11867_v56  ;;  %v7292_v48 = vsel %vm7282_vm14, %v7269_v9, 0.0 }
0x1027   : > { %7286 = vst [vmem:[#allocation2] sm:$0xff] %v7284_v30  ;;  %v7296_v21 = vcombine.high %v7292_v48, %v7292_v48  ;;  %v7303_v14 = vrot.slane %v7292_v48, %v9431_v4 }
0x1028   : > { %v8603_v31 = vpop.eup %8602 }
0x1029   : > { %v7270_v33 = vmul.f32 %v8603_v31, %v8601_v7  ;;  %v7310_v49 = vrot.slane %v7296_v21, %v9431_v4  ;;  %v7311_v60 = vcombine.high %v7303_v14, %v7303_v14  ;;  %v7319_v61 = vrot.slane %v7303_v14, %v9431_v4  ;;  %7966 = vst.sshfl [vmem:[%s8990_s20 + $0xf] sm:$0x1 pattern:$0x73625140] %v7303_v14 }
0x102b   : > { %v7285_v56 = vsel %vm7283_vm15, %v7270_v33, %v11880_v24  ;;  %v7293_v37 = vsel %vm7283_vm15, %v7270_v33, 0.0  ;;  %v7312_v1 = vcombine.high %v7310_v49, %v7310_v49  ;;  %v7326_v22 = vrot.slane %v7310_v49, %v9431_v4  ;;  %7967 = vst.sshfl [vmem:[%s8990_s20 + $0x1f] sm:$0x1 pattern:$0x73625140] %v7311_v60 }
0x102c   : > { %v7333_v18 = vrot.slane %v7311_v60, %v9431_v4  ;;  %v7341_v57 = vcombine.high %v7319_v61, %v7319_v61  ;;  %7968 = vst.sshfl [vmem:[%s8990_s20 + $0x4f] sm:$0x1 pattern:$0x73625140] %v7310_v49  ;;  %7287 = vst [vmem:[#allocation2 + $0x8] sm:$0xff] %v7285_v56  ;;  %v7345_v2 = vcombine.high %v7293_v37, %v7293_v37 }
0x102d   : > { %v7352_v54 = vrot.slane %v7293_v37, %v9431_v4  ;;  %v7340_v42 = vrot.slane %v7312_v1, %v9431_v4  ;;  %v7342_v24 = vcombine.high %v7326_v22, %v7326_v22  ;;  %7969 = vst.sshfl [vmem:[%s8990_s20 + $0x5f] sm:$0x1 pattern:$0x73625140] %v7312_v1 }
0x102e   : > { %v7343_v20 = vcombine.high %v7333_v18, %v7333_v18  ;;  %7412 = vst [vmem:[%s8990_s20 + $0x2f] sm:$0x1] %v7341_v57  ;;  %v7359_v58 = vrot.slane %v7345_v2, %v9431_v4 }
0x102f   : > { %v7360_v25 = vcombine.high %v7352_v54, %v7352_v54  ;;  %v7368_v13 = vrot.slane %v7352_v54, %v9431_v4  ;;  %7970 = vst.sshfl [vmem:[%s8990_s20 + $0x8f] sm:$0x1 pattern:$0x73625140] %v7352_v54  ;;  %v7344_v34 = vcombine.high %v7340_v42, %v7340_v42  ;;  %7416 = vst [vmem:[%s8990_s20 + $0x6f] sm:$0x1] %v7342_v24 }
0x1030   : > { %7413 = vst [vmem:[%s8990_s20 + $0x3f] sm:$0x1] %v7343_v20  ;;  %v7361_v16 = vcombine.high %v7359_v58, %v7359_v58  ;;  %v7375_v6 = vrot.slane %v7359_v58, %v9431_v4  ;;  %7972 = vst.sshfl [vmem:[%s8990_s20 + $0xcf] sm:$0x1 pattern:$0x73625140] %v7359_v58 }
0x1031   : > { %v7382_v35 = vrot.slane %v7360_v25, %v9431_v4  ;;  %v7390_v5 = vcombine.high %v7368_v13, %v7368_v13  ;;  %7971 = vst.sshfl [vmem:[%s8990_s20 + $0x9f] sm:$0x1 pattern:$0x73625140] %v7360_v25  ;;  %7417 = vst [vmem:[%s8990_s20 + $0x7f] sm:$0x1] %v7344_v34 }
0x1032   : > { %v7389_v52 = vrot.slane %v7361_v16, %v9431_v4  ;;  %v7391_v50 = vcombine.high %v7375_v6, %v7375_v6  ;;  %7973 = vst.sshfl [vmem:[%s8990_s20 + $0xdf] sm:$0x1 pattern:$0x73625140] %v7361_v16  ;;  %7429 = sbr.rel (%p7974_p8) target bundleno = 4154 (0x103a), region = 60 }
0x1033   : > { %v7392_v17 = vcombine.high %v7382_v35, %v7382_v35  ;;  %7420 = vst [vmem:[%s8990_s20 + $0xaf] sm:$0x1] %v7390_v5 }
0x1034   : > { %v7393_v19 = vcombine.high %v7389_v52, %v7389_v52  ;;  %7424 = vst [vmem:[%s8990_s20 + $0xef] sm:$0x1] %v7391_v50 }
0x1035   : > { %7421 = vst [vmem:[%s8990_s20 + $0xbf] sm:$0x1] %v7392_v17 }
0x1036   : > { %7425 = vst [vmem:[%s8990_s20 + $0xff] sm:$0x1] %v7393_v19 }
0x1037   : > { %v7430_v8 = vld [vmem:[#allocation2] sm:$0xff]  ;;  %v7431_v29 = vld [vmem:[#allocation2 + $0x8] sm:$0xff]  ;;  %v7434_v0 = vld [vmem:[#allocation3 + $0x8] sm:$0xff] }
0x1038   : > { %7432 = vst [vmem:[#allocation11] sm:$0xff] %v7430_v8  ;;  %7433 = vst [vmem:[#allocation11 + $0x8] sm:$0xff] %v7431_v29  ;;  %v7435_v40 = vld [vmem:[#allocation3] sm:$0xff] }
0x1039   : > { %7436 = vst [vmem:[#allocation13] sm:$0xff] %v7434_v0  ;;  %7437 = vst [vmem:[#allocation13 + $0x8] sm:$0xff] %v7435_v40 }
0x103a PF: > { %s7439_s19 = scalar_lea.sflag [#allocation6], %s8975_s22 }
0x103b   : > { %s7986_s23 = sshll.u32 %s8862_s28, 8  ;;  %s7462_s11 = sshll.u32 %s8990_s20, 4  ;;  %s7463_s11 = int_to_ptr.vmem [resolvable:$true] %s7462_s11 }
0x103c   : > { %s7451_s16 = scalar_lea.hbm %s12019_s5, %s7986_s23  ;;  %s8790_s14 = smov 256  }
0x103d   : > { %p12646_p1 = scmp.ne.s32.totalorder %s12283_s12, 0  ;;  %s8791_s22 = smov 512  }
0x103e   : > { %s8792_s21 = smov 2   ;;  %s8793_s18 = smov 128  }
0x103f   : > { %7997 = sst [smem:[#allocation15]] (%p12646_p1), %s8790_s14  ;;  %s8794_s20 = smov 8  }
0x1040   : > { %7998 = sst [smem:[#allocation15 + $0x1]] (%p12646_p1), %s8791_s22  ;;  %s8795_s2 = smov 131072  }
0x1041   : > { %7999 = sst [smem:[#allocation15 + $0x2]] (%p12646_p1), %s8792_s21  ;;  %s8796_s17 = smov 0  }
0x1042   : > { %8000 = sst [smem:[#allocation15 + $0x3]] (%p12646_p1), %s8793_s18  ;;  %s8797_s9 = smov [#allocation11]  }
0x1043   : > { %8001 = sst [smem:[#allocation15 + $0x4]] (%p12646_p1), %s8793_s18  ;;  %s7488_s29 = sshll.u32 %s8797_s9, 4  ;;  %s7489_s29 = int_to_ptr.vmem [resolvable:$true] %s7488_s29 }
0x1044   : > { %8002 = sst [smem:[#allocation15 + $0x5]] (%p12646_p1), %s8794_s20  ;;  %s8684_s23 = scalar_lea.vmem %s7489_s29, 256 }
0x1045   : > { %8003 = dma.general (%p12646_p1), %s7463_s11, 4096, %s7451_s16, %s7439_s19, %s8795_s2, [#allocation15], %s8796_s17, 0  }
0x1046   : > { %p8685_p2 = scmp.ne.s32.totalorder %s7489_s29, %s8684_s23  ;;  %p12647_p6 = scmp.eq.s32.totalorder %s8862_s28, 1 }
0x1047   : > { %p8691_p10 = scmp.lt.s32.totalorder %s7489_s29, %s7489_s29  ;;  %p8692_p0 = scmp.lt.s32.totalorder %s8684_s23, %s8684_s23 }
0x1048   : > { %p8686_p13 = pnand %p8685_p2, %p12647_p6 }
0x1049   : > { %p8693_p11 = por %p8692_p0, %p8691_p10 }
0x104a   : > { %p8687_p5 = pneg %p8686_p13 }
0x104c   : > { %p8694_p3 = pnand %p8693_p11, %p8687_p5 }
0x104e   : > { %8697 = shalt.err (!%p8694_p3)
}
0x104f   : > { %s8798_s13 = smov 128   ;;  %s8799_s30 = smov 8  }
0x1050   : > { %p12648_p4 = pmov %p12647_p6  ;;  %s8800_s11 = smov [#allocation13]  }
0x1051   : > { %s7501_s16 = sshll.u32 %s8800_s11, 4  ;;  %s7502_s16 = int_to_ptr.vmem [resolvable:$true] %s7501_s16 }
0x1052   : > { %8005 = dma.vmem_to_hbm [thread:$0]  (%p12648_p4), %s7489_s29, 256, %s12020_s6, [#allocation12], %s8798_s13, %s8798_s13, %s8799_s30  }
0x1053   : > { %s8708_s14 = scalar_lea.vmem %s7502_s16, 256  ;;  %p12649_p7 = pmov %p12648_p4 }
0x1054   : > { %p8709_p9 = scmp.ne.s32.totalorder %s7502_s16, %s8708_s14  ;;  %p8715_p1 = scmp.lt.s32.totalorder %s7502_s16, %s7502_s16 }
0x1055   : > { %p8716_p2 = scmp.lt.s32.totalorder %s8708_s14, %s8708_s14 }
0x1056   : > { %p8710_p12 = pnand %p8709_p9, %p12649_p7 }
0x1057   : > { %p8717_p6 = por %p8716_p2, %p8715_p1 }
0x1058   : > { %p8711_p8 = pneg %p8710_p12 }
0x105a   : > { %p8718_p13 = pnand %p8717_p6, %p8711_p8 }
0x105c   : > { %8721 = shalt.err (!%p8718_p13)
}
0x105d   : > { %p12650_p5 = pmov %p12648_p4  ;;  %p12651_p10 = pmov %p12648_p4 }
0x105f   : > { %8007 = dma.vmem_to_hbm [thread:$0]  (%p12650_p5), %s7502_s16, 256, %s12021_s7, [#allocation12], %s8798_s13, %s8798_s13, %s8799_s30  }
0x1060   : > { %8757 = dma.done.wait (%p12651_p10), [#allocation12], 512   ;;  %p12652_p0 = pmov %p12648_p4 }
0x1062   : > { %8759 = vsyncadd (%p12652_p0), [#allocation12], 4294966784 }
0x1063 PF: > { %s7524_s18 = sand.u32 1, %s8766_s24   ;;  %p12653_p11 = scmp.ne.s32.totalorder %s12278_s8, 0 }
0x1064   : > { %p12654_p3 = scmp.ge.s32.totalorder %s8778_s27, 2  ;;  %s7525_s20 = scalar_lea.sflag [#allocation6], %s7524_s18 }
0x1066   : > { %p8025_p4 = pnand %p12654_p3, %p12653_p11 }
0x1068   : > { %p8026_p9 = pneg %p8025_p4 }
0x106a   : > { %8761 = dma.done.wait (%p8026_p9), %s7525_s20, 4096  }
0x106b   : > { %8763 = vsyncadd (%p8026_p9), %s7525_s20, 4294963200  ;;  %p23_p7 = scmp.ge.s32.totalorder %s8917_s10, 4   ;;  %s12655_s24 = smov %s8770_s25 }
0x106c   : > { %s12656_s25 = smov %s8774_s26  ;;  %s12657_s26 = smov %s8926_s15 }
0x106d   : > { %s12658_s27 = smov %s8917_s10  ;;  %25 = sbr.rel (!%p23_p7) target bundleno = 9 (0x9), region = 137 }
0x1072   :  { %7530 = vsyncpa [#allocation5], 1 }
0x1073   :  { %7532 = vsyncpa [#allocation5 + $0x1], 1 }
0x1074   :  { %7533 = vsyncpa [#allocation8], 1 }
0x1075   :  { %7534 = vsyncpa [#allocation6], 1 }
0x1076   :  { %7536 = vsyncpa [#allocation6 + $0x1], 1 }
0x1077   :  { %7537 = vsyncpa [#allocation12], 1 }

</bundles_post_ra>
